<compile_context>
chip_gen: v5e
topology: v5e:2x2
jax: 0.10.0
libtpu: 0.0.40
codegen_flags: <defaults>
</compile_context>

<pallas_src>
import functools
import math

import jax
import jax.numpy as jnp
from jax import lax
from jax.experimental import pallas as pl
from jax.experimental.pallas import tpu as pltpu


# ----------------------------------------------------------------------------
# Fused kernel
# ----------------------------------------------------------------------------
def _layer_norm(x, g, b):
    """torch nn.LayerNorm over the last dim (eps = 1e-5, biased variance)."""
    mu = jnp.mean(x, axis=-1, keepdims=True)
    xc = x - mu
    var = jnp.mean(xc * xc, axis=-1, keepdims=True)
    return xc * lax.rsqrt(var + 1e-5) * g + b


def _obj_branch_kernel(x_ref, maskb_ref, valid_ref, name_ref, pe_ref,
                       enc1_w_ref, enc1_b_ref, enc2_w_ref, enc2_b_ref,
                       wq_ref, wk_ref, wv_ref, bq_ref, bk_ref, bv_ref,
                       wo_ref, bo_ref, ln1_g_ref, ln1_b_ref,
                       ff1_w_ref, ff1_b_ref, ff2_w_ref, ff2_b_ref,
                       ln2_g_ref, ln2_b_ref,
                       head_w_ref, head_b_ref,
                       map_wp_ref, map_we_ref, map_b_ref,
                       out_ref, *, obj_num, seq_len, nhead, n_layers):
    """Whole OBJBranch forward for ONE batch element (obj_num sequences)."""
    f32 = jnp.float32
    T = seq_len
    hd = wq_ref.shape[-1]
    scale = 1.0 / math.sqrt(hd)

    # ---- encoder MLP (Linear -> LeakyReLU -> Linear -> LeakyReLU) + pos-enc
    h = jnp.dot(x_ref[...], enc1_w_ref[...],
                preferred_element_type=f32) + enc1_b_ref[...]
    h = jnp.where(h >= 0.0, h, 0.01 * h)
    h = jnp.dot(h, enc2_w_ref[...],
                preferred_element_type=f32) + enc2_b_ref[...]
    h = jnp.where(h >= 0.0, h, 0.01 * h)
    h = h + pe_ref[...]                                   # [obj_num*T, N]

    maskb = maskb_ref[...]                                # [obj_num, 1, T]

    # ---- 3 x TransformerEncoderLayer (post-norm, nhead=2, relu FFN) --------
    for l in range(n_layers):                             # static unroll (3)
        wq_l, wk_l, wv_l = wq_ref[l], wk_ref[l], wv_ref[l]   # [H, N, hd]
        bq_l, bk_l, bv_l = bq_ref[l], bk_ref[l], bv_ref[l]   # [H, 1, hd]
        wo_l = wo_ref[l]                                     # [H, hd, N]

        attn = bo_ref[l]                                     # [1, N] (broadcasts)
        for hh in range(nhead):                              # head split in weights
            q = (jnp.dot(h, wq_l[hh], preferred_element_type=f32)
                 + bq_l[hh]) * scale                         # [obj*T, hd]
            k = jnp.dot(h, wk_l[hh], preferred_element_type=f32) + bk_l[hh]
            v = jnp.dot(h, wv_l[hh], preferred_element_type=f32) + bv_l[hh]
            ctx_parts = []
            for o in range(obj_num):                         # independent sequences
                qo = q[o * T:(o + 1) * T, :]                 # sublane-aligned slices
                ko = k[o * T:(o + 1) * T, :]
                vo = v[o * T:(o + 1) * T, :]
                # scores = qo @ ko.T  (dot_general, contracting last dims)
                s = lax.dot_general(qo, ko, (((1,), (1,)), ((), ())),
                                    preferred_element_type=f32)   # [T, T]
                s = s + maskb[o]                                  # key-padding bias
                s = s - jnp.max(s, axis=-1, keepdims=True)
                p = jnp.exp(s)
                p = p / jnp.sum(p, axis=-1, keepdims=True)
                ctx_parts.append(jnp.dot(p, vo, preferred_element_type=f32))
            ctx = jnp.concatenate(ctx_parts, axis=0)             # [obj*T, hd]
            attn = attn + jnp.dot(ctx, wo_l[hh], preferred_element_type=f32)

        h = _layer_norm(h + attn, ln1_g_ref[l], ln1_b_ref[l])

        # FFN: the [obj*T, 2048] hidden never leaves VMEM.
        ff = jnp.dot(h, ff1_w_ref[l], preferred_element_type=f32) + ff1_b_ref[l]
        ff = jnp.maximum(ff, 0.0)
        ff = jnp.dot(ff, ff2_w_ref[l], preferred_element_type=f32) + ff2_b_ref[l]
        h = _layer_norm(h + ff, ln2_g_ref[l], ln2_b_ref[l])

    # ---- object-name embedding head ----------------------------------------
    emb = jnp.dot(name_ref[0], head_w_ref[...],
                  preferred_element_type=f32) + head_b_ref[...]   # [obj_num, N]

    # ---- masked mean pooling + concat + mapping (decomposed per object) ----
    out = map_b_ref[...]                                          # [1, 1024]
    for o in range(obj_num):
        ho = h[o * T:(o + 1) * T, :]                              # [T, N]
        vo = valid_ref[o]                                         # [T, 1]
        pooled_o = (jnp.sum(ho * vo, axis=0, keepdims=True) /
                    jnp.sum(vo, axis=0, keepdims=True))           # [1, N]
        out = out + jnp.dot(pooled_o, map_wp_ref[o], preferred_element_type=f32)
        out = out + jnp.dot(emb[o:o + 1, :], map_we_ref[o],
                            preferred_element_type=f32)
    out_ref[0] = out.astype(out_ref.dtype)


# ----------------------------------------------------------------------------
# Host-side glue
# ----------------------------------------------------------------------------
PACK_ORDER = ("enc1_w", "enc1_b", "enc2_w", "enc2_b",
              "wq", "wk", "wv", "bq", "bk", "bv", "wo", "bo",
              "ln1_g", "ln1_b", "ff1_w", "ff1_b", "ff2_w", "ff2_b",
              "ln2_g", "ln2_b", "head_w", "head_b",
              "map_wp", "map_we", "map_b")


def positional_encoding(seq_len, d_model, max_len=300):
    position = jnp.arange(max_len, dtype=jnp.float32)[:, None]
    div_term = jnp.exp(jnp.arange(0, d_model, 2, dtype=jnp.float32) *
                       (-math.log(10000.0) / d_model))
    pe = jnp.zeros((max_len, d_model), jnp.float32)
    pe = pe.at[:, 0::2].set(jnp.sin(position * div_term))
    pe = pe.at[:, 1::2].set(jnp.cos(position * div_term))
    return pe[:seq_len]


def pack_params(params, *, obj_num, neuron_num, nhead=2):
    """One-time repacking: stack layers, fold the head split into the attention
    weights, split the mapping weight into per-(object, pooled/emb) blocks."""
    N = neuron_num
    H = nhead
    hd = N // H
    layers = params["layers"]

    def stack(fn):
        return jnp.stack([fn(lp) for lp in layers], axis=0)

    out_dim = params["map_b"].shape[0]
    map_w4 = params["map_w"].reshape(obj_num, 2, N, out_dim)
    return {
        "enc1_w": params["enc1_w"], "enc1_b": params["enc1_b"].reshape(1, -1),
        "enc2_w": params["enc2_w"], "enc2_b": params["enc2_b"].reshape(1, -1),
        "wq": stack(lambda lp: lp["wq"].reshape(N, H, hd).transpose(1, 0, 2)),
        "wk": stack(lambda lp: lp["wk"].reshape(N, H, hd).transpose(1, 0, 2)),
        "wv": stack(lambda lp: lp["wv"].reshape(N, H, hd).transpose(1, 0, 2)),
        "bq": stack(lambda lp: lp["bq"].reshape(H, 1, hd)),
        "bk": stack(lambda lp: lp["bk"].reshape(H, 1, hd)),
        "bv": stack(lambda lp: lp["bv"].reshape(H, 1, hd)),
        "wo": stack(lambda lp: lp["wo"].reshape(H, hd, N)),
        "bo": stack(lambda lp: lp["bo"].reshape(1, N)),
        "ln1_g": stack(lambda lp: lp["ln1_g"].reshape(1, N)),
        "ln1_b": stack(lambda lp: lp["ln1_b"].reshape(1, N)),
        "ff1_w": stack(lambda lp: lp["ff1_w"]),
        "ff1_b": stack(lambda lp: lp["ff1_b"].reshape(1, -1)),
        "ff2_w": stack(lambda lp: lp["ff2_w"]),
        "ff2_b": stack(lambda lp: lp["ff2_b"].reshape(1, N)),
        "ln2_g": stack(lambda lp: lp["ln2_g"].reshape(1, N)),
        "ln2_b": stack(lambda lp: lp["ln2_b"].reshape(1, N)),
        "head_w": params["head_w"], "head_b": params["head_b"].reshape(1, -1),
        "map_wp": map_w4[:, 0], "map_we": map_w4[:, 1],
        "map_b": params["map_b"].reshape(1, -1),
    }


def obj_branch_forward(packed, obj_loc, obj_mask, obj_name,
                       *, obj_num, obj_dim, neuron_num, nhead=2):
    B, T = obj_mask.shape
    S = B * obj_num
    N = neuron_num
    R = obj_num * T               # rows handled per grid step (one batch element)
    n_layers = packed["wq"].shape[0]
    out_dim = packed["map_b"].shape[-1]
    name_dim = obj_name.shape[-1]

    # permute(0,2,1,3), slice to obj_dim, flatten to [S*T, obj_dim]  (row=(b,o,t)).
    x = jnp.transpose(obj_loc, (0, 2, 1, 3))[:, :, :, :obj_dim]
    x = x.reshape(S * T, obj_dim).astype(jnp.float32)

    # torch: obj_mask.repeat(obj_num, 1) -> rows in (object, batch) order while the
    # embeddings are in (batch, object) order; reproduced verbatim.
    mask_tiled = jnp.tile(obj_mask, (obj_num, 1))                       # [S, T] bool
    mask_bias = jnp.where(mask_tiled, -1e9, 0.0).astype(jnp.float32).reshape(S, 1, T)
    valid = (~mask_tiled).astype(jnp.float32).reshape(S, T, 1)
    pe = jnp.tile(positional_encoding(T, N), (obj_num, 1))              # [R, N]

    def full_spec(a):
        nd = a.ndim
        return pl.BlockSpec(a.shape, lambda b: (0,) * nd)

    weights = [packed[k] for k in PACK_ORDER]
    in_specs = [
        pl.BlockSpec((R, obj_dim), lambda b: (b, 0)),                   # x
        pl.BlockSpec((obj_num, 1, T), lambda b: (b, 0, 0)),             # mask bias
        pl.BlockSpec((obj_num, T, 1), lambda b: (b, 0, 0)),             # valid
        pl.BlockSpec((1, obj_num, name_dim), lambda b: (b, 0, 0)),      # obj_name
        full_spec(pe),
    ] + [full_spec(a) for a in weights]

    out = pl.pallas_call(
        functools.partial(_obj_branch_kernel, obj_num=obj_num, seq_len=T,
                          nhead=nhead, n_layers=n_layers),
        out_shape=jax.ShapeDtypeStruct((B, 1, out_dim), jnp.float32),
        grid=(B,),
        in_specs=in_specs,
        out_specs=pl.BlockSpec((1, 1, out_dim), lambda b: (b, 0, 0)),
        compiler_params=pltpu.CompilerParams(
            dimension_semantics=("parallel",)),
    )(x, mask_bias, valid, obj_name, pe, *weights)
    return out.reshape(B, out_dim)


# ----------------------------------------------------------------------------
# Deterministic synthetic parameter init (shapes from OBJBranch.__init__)
# ----------------------------------------------------------------------------
def init_params(obj_dim, N, obj_num, d_ff=2048, name_dim=300, n_layers=3):
    key = jax.random.PRNGKey(42)
    ctr = [0]

    def nxt():
        ctr[0] += 1
        return jax.random.fold_in(key, ctr[0])

    def W(i, o):
        return jax.random.normal(nxt(), (i, o), jnp.float32) / math.sqrt(i)

    def Bv(o):
        return 0.01 * jax.random.normal(nxt(), (o,), jnp.float32)

    params = {
        "enc1_w": W(obj_dim, N // 2), "enc1_b": Bv(N // 2),
        "enc2_w": W(N // 2, N), "enc2_b": Bv(N),
        "head_w": W(name_dim, N), "head_b": Bv(N),
        "map_w": W(obj_num * N * 2, 1024), "map_b": Bv(1024),
        "layers": [],
    }
    for _ in range(n_layers):
        params["layers"].append({
            "wq": W(N, N), "bq": Bv(N),
            "wk": W(N, N), "bk": Bv(N),
            "wv": W(N, N), "bv": Bv(N),
            "wo": W(N, N), "bo": Bv(N),
            "ln1_g": jnp.ones((N,), jnp.float32), "ln1_b": jnp.zeros((N,), jnp.float32),
            "ff1_w": W(N, 2048), "ff1_b": Bv(2048),
            "ff2_w": W(2048, N), "ff2_b": Bv(N),
            "ln2_g": jnp.ones((N,), jnp.float32), "ln2_b": jnp.zeros((N,), jnp.float32),
        })
    return params


# ----------------------------------------------------------------------------
if __name__ == "__main__":
    B, T = 2, 8                 # batch, RFID sequence length (obj_num*T multiple of 8)
    OBJ_NUM, OBJ_DIM = 2, 4     # params.obj_num, params.obj_dim
    N = 32                      # params.obj_branch_size
    LOC_DIM = 6                 # raw obj_loc feature dim (sliced to OBJ_DIM)

    key = jax.random.PRNGKey(0)
    k1, k2, k3 = jax.random.split(key, 3)
    obj_loc = jax.random.normal(k1, (B, T, OBJ_NUM, LOC_DIM), jnp.float32)
    obj_mask = jax.random.uniform(k2, (B, T)) < 0.3     # True = padded timestep
    obj_mask = obj_mask.at[:, 0].set(False)             # keep >=1 valid timestep/row
    obj_name = jax.random.normal(k3, (B, OBJ_NUM, 300), jnp.float32)

    params = init_params(OBJ_DIM, N, OBJ_NUM)
    packed = pack_params(params, obj_num=OBJ_NUM, neuron_num=N, nhead=2)

    fwd = jax.jit(functools.partial(obj_branch_forward,
                                    obj_num=OBJ_NUM, obj_dim=OBJ_DIM,
                                    neuron_num=N))
    out = fwd(packed, obj_loc, obj_mask, obj_name)
    jax.block_until_ready(out)
    assert out.shape == (B, 1024) and out.dtype == jnp.float32
    print("KERNEL_OK")
</pallas_src>

<mosaic_0001>
module attributes {stable_mosaic.version = 11 : i64} {
  func.func @_obj_branch_kernel(%arg0: i32, %arg1: memref<16x4xf32, #tpu.memory_space<vmem>>, %arg2: memref<2x1x8xf32, #tpu.memory_space<vmem>>, %arg3: memref<2x8x1xf32, #tpu.memory_space<vmem>>, %arg4: memref<1x2x300xf32, #tpu.memory_space<vmem>>, %arg5: memref<16x32xf32, #tpu.memory_space<vmem>>, %arg6: memref<4x16xf32, #tpu.memory_space<vmem>>, %arg7: memref<1x16xf32, #tpu.memory_space<vmem>>, %arg8: memref<16x32xf32, #tpu.memory_space<vmem>>, %arg9: memref<1x32xf32, #tpu.memory_space<vmem>>, %arg10: memref<3x2x32x16xf32, #tpu.memory_space<vmem>>, %arg11: memref<3x2x32x16xf32, #tpu.memory_space<vmem>>, %arg12: memref<3x2x32x16xf32, #tpu.memory_space<vmem>>, %arg13: memref<3x2x1x16xf32, #tpu.memory_space<vmem>>, %arg14: memref<3x2x1x16xf32, #tpu.memory_space<vmem>>, %arg15: memref<3x2x1x16xf32, #tpu.memory_space<vmem>>, %arg16: memref<3x2x16x32xf32, #tpu.memory_space<vmem>>, %arg17: memref<3x1x32xf32, #tpu.memory_space<vmem>>, %arg18: memref<3x1x32xf32, #tpu.memory_space<vmem>>, %arg19: memref<3x1x32xf32, #tpu.memory_space<vmem>>, %arg20: memref<3x32x2048xf32, #tpu.memory_space<vmem>>, %arg21: memref<3x1x2048xf32, #tpu.memory_space<vmem>>, %arg22: memref<3x2048x32xf32, #tpu.memory_space<vmem>>, %arg23: memref<3x1x32xf32, #tpu.memory_space<vmem>>, %arg24: memref<3x1x32xf32, #tpu.memory_space<vmem>>, %arg25: memref<3x1x32xf32, #tpu.memory_space<vmem>>, %arg26: memref<300x32xf32, #tpu.memory_space<vmem>>, %arg27: memref<1x32xf32, #tpu.memory_space<vmem>>, %arg28: memref<2x32x1024xf32, #tpu.memory_space<vmem>>, %arg29: memref<2x32x1024xf32, #tpu.memory_space<vmem>>, %arg30: memref<1x1024xf32, #tpu.memory_space<vmem>>, %arg31: memref<1x1x1024xf32, #tpu.memory_space<vmem>>) attributes {dimension_semantics = [#tpu.dimension_semantics<parallel>], iteration_bounds = array<i64: 2>, scalar_prefetch = 0 : i64, scratch_operands = 0 : i64, tpu.core_type = #tpu.core_type<tc>, window_params = [{transform_indices = @transform_0, window_bounds = array<i64: 16, 4>}, {transform_indices = @transform_1, window_bounds = array<i64: 2, 1, 8>}, {transform_indices = @transform_2, window_bounds = array<i64: 2, 8, 1>}, {transform_indices = @transform_3, window_bounds = array<i64: 1, 2, 300>}, {pipeline_mode = #tpu.pipeline_mode<synchronous>, transform_indices = @transform_4, window_bounds = array<i64: 16, 32>}, {pipeline_mode = #tpu.pipeline_mode<synchronous>, transform_indices = @transform_5, window_bounds = array<i64: 4, 16>}, {pipeline_mode = #tpu.pipeline_mode<synchronous>, transform_indices = @transform_6, window_bounds = array<i64: 1, 16>}, {pipeline_mode = #tpu.pipeline_mode<synchronous>, transform_indices = @transform_7, window_bounds = array<i64: 16, 32>}, {pipeline_mode = #tpu.pipeline_mode<synchronous>, transform_indices = @transform_8, window_bounds = array<i64: 1, 32>}, {pipeline_mode = #tpu.pipeline_mode<synchronous>, transform_indices = @transform_9, window_bounds = array<i64: 3, 2, 32, 16>}, {pipeline_mode = #tpu.pipeline_mode<synchronous>, transform_indices = @transform_10, window_bounds = array<i64: 3, 2, 32, 16>}, {pipeline_mode = #tpu.pipeline_mode<synchronous>, transform_indices = @transform_11, window_bounds = array<i64: 3, 2, 32, 16>}, {pipeline_mode = #tpu.pipeline_mode<synchronous>, transform_indices = @transform_12, window_bounds = array<i64: 3, 2, 1, 16>}, {pipeline_mode = #tpu.pipeline_mode<synchronous>, transform_indices = @transform_13, window_bounds = array<i64: 3, 2, 1, 16>}, {pipeline_mode = #tpu.pipeline_mode<synchronous>, transform_indices = @transform_14, window_bounds = array<i64: 3, 2, 1, 16>}, {pipeline_mode = #tpu.pipeline_mode<synchronous>, transform_indices = @transform_15, window_bounds = array<i64: 3, 2, 16, 32>}, {pipeline_mode = #tpu.pipeline_mode<synchronous>, transform_indices = @transform_16, window_bounds = array<i64: 3, 1, 32>}, {pipeline_mode = #tpu.pipeline_mode<synchronous>, transform_indices = @transform_17, window_bounds = array<i64: 3, 1, 32>}, {pipeline_mode = #tpu.pipeline_mode<synchronous>, transform_indices = @transform_18, window_bounds = array<i64: 3, 1, 32>}, {pipeline_mode = #tpu.pipeline_mode<synchronous>, transform_indices = @transform_19, window_bounds = array<i64: 3, 32, 2048>}, {pipeline_mode = #tpu.pipeline_mode<synchronous>, transform_indices = @transform_20, window_bounds = array<i64: 3, 1, 2048>}, {pipeline_mode = #tpu.pipeline_mode<synchronous>, transform_indices = @transform_21, window_bounds = array<i64: 3, 2048, 32>}, {pipeline_mode = #tpu.pipeline_mode<synchronous>, transform_indices = @transform_22, window_bounds = array<i64: 3, 1, 32>}, {pipeline_mode = #tpu.pipeline_mode<synchronous>, transform_indices = @transform_23, window_bounds = array<i64: 3, 1, 32>}, {pipeline_mode = #tpu.pipeline_mode<synchronous>, transform_indices = @transform_24, window_bounds = array<i64: 3, 1, 32>}, {pipeline_mode = #tpu.pipeline_mode<synchronous>, transform_indices = @transform_25, window_bounds = array<i64: 300, 32>}, {pipeline_mode = #tpu.pipeline_mode<synchronous>, transform_indices = @transform_26, window_bounds = array<i64: 1, 32>}, {pipeline_mode = #tpu.pipeline_mode<synchronous>, transform_indices = @transform_27, window_bounds = array<i64: 2, 32, 1024>}, {pipeline_mode = #tpu.pipeline_mode<synchronous>, transform_indices = @transform_28, window_bounds = array<i64: 2, 32, 1024>}, {pipeline_mode = #tpu.pipeline_mode<synchronous>, transform_indices = @transform_29, window_bounds = array<i64: 1, 1024>}, {transform_indices = @transform_30, window_bounds = array<i64: 1, 1, 1024>}]} {
    %c0 = arith.constant 0 : index
    %c0_0 = arith.constant 0 : index
    %0 = vector.load %arg1[%c0, %c0_0] : memref<16x4xf32, #tpu.memory_space<vmem>>, vector<16x4xf32>
    %c0_1 = arith.constant 0 : index
    %c0_2 = arith.constant 0 : index
    %1 = vector.load %arg6[%c0_1, %c0_2] : memref<4x16xf32, #tpu.memory_space<vmem>>, vector<4x16xf32>
    %cst = arith.constant dense<0.000000e+00> : vector<16x16xf32>
    %2 = tpu.matmul %0, %1, %cst {dimension_numbers = #tpu.dot_dimension_numbers<[1], [0], [0], [1], [0, 0, 1, 1], [], []>} : vector<16x4xf32>, vector<4x16xf32>, vector<16x16xf32> -> vector<16x16xf32>
    %c0_3 = arith.constant 0 : index
    %c0_4 = arith.constant 0 : index
    %3 = vector.load %arg7[%c0_3, %c0_4] : memref<1x16xf32, #tpu.memory_space<vmem>>, vector<1x16xf32>
    %4 = vector.broadcast %3 : vector<1x16xf32> to vector<16x16xf32>
    %5 = arith.addf %2, %4 : vector<16x16xf32>
    %cst_5 = arith.constant 0.000000e+00 : f32
    %6 = vector.broadcast %cst_5 : f32 to vector<16x16xf32>
    %7 = arith.cmpf oge, %5, %6 : vector<16x16xf32>
    %cst_6 = arith.constant 0.00999999977 : f32
    %8 = vector.broadcast %cst_6 : f32 to vector<16x16xf32>
    %9 = arith.mulf %8, %5 : vector<16x16xf32>
    %10 = arith.select %7, %5, %9 : vector<16x16xi1>, vector<16x16xf32>
    %c0_7 = arith.constant 0 : index
    %c0_8 = arith.constant 0 : index
    %11 = vector.load %arg8[%c0_7, %c0_8] : memref<16x32xf32, #tpu.memory_space<vmem>>, vector<16x32xf32>
    %cst_9 = arith.constant dense<0.000000e+00> : vector<16x32xf32>
    %12 = tpu.matmul %10, %11, %cst_9 {dimension_numbers = #tpu.dot_dimension_numbers<[1], [0], [0], [1], [0, 0, 1, 1], [], []>} : vector<16x16xf32>, vector<16x32xf32>, vector<16x32xf32> -> vector<16x32xf32>
    %c0_10 = arith.constant 0 : index
    %c0_11 = arith.constant 0 : index
    %13 = vector.load %arg9[%c0_10, %c0_11] : memref<1x32xf32, #tpu.memory_space<vmem>>, vector<1x32xf32>
    %14 = vector.broadcast %13 : vector<1x32xf32> to vector<16x32xf32>
    %15 = arith.addf %12, %14 : vector<16x32xf32>
    %cst_12 = arith.constant 0.000000e+00 : f32
    %16 = vector.broadcast %cst_12 : f32 to vector<16x32xf32>
    %17 = arith.cmpf oge, %15, %16 : vector<16x32xf32>
    %cst_13 = arith.constant 0.00999999977 : f32
    %18 = vector.broadcast %cst_13 : f32 to vector<16x32xf32>
    %19 = arith.mulf %18, %15 : vector<16x32xf32>
    %20 = arith.select %17, %15, %19 : vector<16x32xi1>, vector<16x32xf32>
    %c0_14 = arith.constant 0 : index
    %c0_15 = arith.constant 0 : index
    %21 = vector.load %arg5[%c0_14, %c0_15] : memref<16x32xf32, #tpu.memory_space<vmem>>, vector<16x32xf32>
    %22 = arith.addf %20, %21 : vector<16x32xf32>
    %c0_16 = arith.constant 0 : index
    %c0_17 = arith.constant 0 : index
    %c0_18 = arith.constant 0 : index
    %23 = vector.load %arg2[%c0_16, %c0_17, %c0_18] : memref<2x1x8xf32, #tpu.memory_space<vmem>>, vector<2x1x8xf32>
    %c0_19 = arith.constant 0 : index
    %c0_20 = arith.constant 0 : index
    %c0_21 = arith.constant 0 : index
    %c0_22 = arith.constant 0 : index
    %24 = vector.load %arg10[%c0_19, %c0_20, %c0_21, %c0_22] : memref<3x2x32x16xf32, #tpu.memory_space<vmem>>, vector<1x2x32x16xf32>
    %25 = vector.shape_cast %24 : vector<1x2x32x16xf32> to vector<2x32x16xf32>
    %c0_23 = arith.constant 0 : index
    %c0_24 = arith.constant 0 : index
    %c0_25 = arith.constant 0 : index
    %c0_26 = arith.constant 0 : index
    %26 = vector.load %arg11[%c0_23, %c0_24, %c0_25, %c0_26] : memref<3x2x32x16xf32, #tpu.memory_space<vmem>>, vector<1x2x32x16xf32>
    %27 = vector.shape_cast %26 : vector<1x2x32x16xf32> to vector<2x32x16xf32>
    %c0_27 = arith.constant 0 : index
    %c0_28 = arith.constant 0 : index
    %c0_29 = arith.constant 0 : index
    %c0_30 = arith.constant 0 : index
    %28 = vector.load %arg12[%c0_27, %c0_28, %c0_29, %c0_30] : memref<3x2x32x16xf32, #tpu.memory_space<vmem>>, vector<1x2x32x16xf32>
    %29 = vector.shape_cast %28 : vector<1x2x32x16xf32> to vector<2x32x16xf32>
    %c0_31 = arith.constant 0 : index
    %c0_32 = arith.constant 0 : index
    %c0_33 = arith.constant 0 : index
    %c0_34 = arith.constant 0 : index
    %30 = vector.load %arg13[%c0_31, %c0_32, %c0_33, %c0_34] : memref<3x2x1x16xf32, #tpu.memory_space<vmem>>, vector<1x2x1x16xf32>
    %31 = vector.shape_cast %30 : vector<1x2x1x16xf32> to vector<2x1x16xf32>
    %c0_35 = arith.constant 0 : index
    %c0_36 = arith.constant 0 : index
    %c0_37 = arith.constant 0 : index
    %c0_38 = arith.constant 0 : index
    %32 = vector.load %arg14[%c0_35, %c0_36, %c0_37, %c0_38] : memref<3x2x1x16xf32, #tpu.memory_space<vmem>>, vector<1x2x1x16xf32>
    %33 = vector.shape_cast %32 : vector<1x2x1x16xf32> to vector<2x1x16xf32>
    %c0_39 = arith.constant 0 : index
    %c0_40 = arith.constant 0 : index
    %c0_41 = arith.constant 0 : index
    %c0_42 = arith.constant 0 : index
    %34 = vector.load %arg15[%c0_39, %c0_40, %c0_41, %c0_42] : memref<3x2x1x16xf32, #tpu.memory_space<vmem>>, vector<1x2x1x16xf32>
    %35 = vector.shape_cast %34 : vector<1x2x1x16xf32> to vector<2x1x16xf32>
    %c0_43 = arith.constant 0 : index
    %c0_44 = arith.constant 0 : index
    %c0_45 = arith.constant 0 : index
    %c0_46 = arith.constant 0 : index
    %36 = vector.load %arg16[%c0_43, %c0_44, %c0_45, %c0_46] : memref<3x2x16x32xf32, #tpu.memory_space<vmem>>, vector<1x2x16x32xf32>
    %37 = vector.shape_cast %36 : vector<1x2x16x32xf32> to vector<2x16x32xf32>
    %c0_47 = arith.constant 0 : index
    %c0_48 = arith.constant 0 : index
    %c0_49 = arith.constant 0 : index
    %38 = vector.load %arg17[%c0_47, %c0_48, %c0_49] : memref<3x1x32xf32, #tpu.memory_space<vmem>>, vector<1x1x32xf32>
    %39 = vector.shape_cast %38 : vector<1x1x32xf32> to vector<1x32xf32>
    %40 = vector.extract_strided_slice %25 {offsets = [0, 0, 0], sizes = [1, 32, 16], strides = [1, 1, 1]} : vector<2x32x16xf32> to vector<1x32x16xf32>
    %41 = vector.shape_cast %40 : vector<1x32x16xf32> to vector<32x16xf32>
    %cst_50 = arith.constant dense<0.000000e+00> : vector<16x16xf32>
    %42 = tpu.matmul %22, %41, %cst_50 {dimension_numbers = #tpu.dot_dimension_numbers<[1], [0], [0], [1], [0, 0, 1, 1], [], []>} : vector<16x32xf32>, vector<32x16xf32>, vector<16x16xf32> -> vector<16x16xf32>
    %43 = vector.extract_strided_slice %31 {offsets = [0, 0, 0], sizes = [1, 1, 16], strides = [1, 1, 1]} : vector<2x1x16xf32> to vector<1x1x16xf32>
    %44 = vector.shape_cast %43 : vector<1x1x16xf32> to vector<1x16xf32>
    %45 = vector.broadcast %44 : vector<1x16xf32> to vector<16x16xf32>
    %46 = arith.addf %42, %45 : vector<16x16xf32>
    %cst_51 = arith.constant 2.500000e-01 : f32
    %47 = vector.broadcast %cst_51 : f32 to vector<16x16xf32>
    %48 = arith.mulf %46, %47 : vector<16x16xf32>
    %49 = vector.extract_strided_slice %27 {offsets = [0, 0, 0], sizes = [1, 32, 16], strides = [1, 1, 1]} : vector<2x32x16xf32> to vector<1x32x16xf32>
    %50 = vector.shape_cast %49 : vector<1x32x16xf32> to vector<32x16xf32>
    %cst_52 = arith.constant dense<0.000000e+00> : vector<16x16xf32>
    %51 = tpu.matmul %22, %50, %cst_52 {dimension_numbers = #tpu.dot_dimension_numbers<[1], [0], [0], [1], [0, 0, 1, 1], [], []>} : vector<16x32xf32>, vector<32x16xf32>, vector<16x16xf32> -> vector<16x16xf32>
    %52 = vector.extract_strided_slice %33 {offsets = [0, 0, 0], sizes = [1, 1, 16], strides = [1, 1, 1]} : vector<2x1x16xf32> to vector<1x1x16xf32>
    %53 = vector.shape_cast %52 : vector<1x1x16xf32> to vector<1x16xf32>
    %54 = vector.broadcast %53 : vector<1x16xf32> to vector<16x16xf32>
    %55 = arith.addf %51, %54 : vector<16x16xf32>
    %56 = vector.extract_strided_slice %29 {offsets = [0, 0, 0], sizes = [1, 32, 16], strides = [1, 1, 1]} : vector<2x32x16xf32> to vector<1x32x16xf32>
    %57 = vector.shape_cast %56 : vector<1x32x16xf32> to vector<32x16xf32>
    %cst_53 = arith.constant dense<0.000000e+00> : vector<16x16xf32>
    %58 = tpu.matmul %22, %57, %cst_53 {dimension_numbers = #tpu.dot_dimension_numbers<[1], [0], [0], [1], [0, 0, 1, 1], [], []>} : vector<16x32xf32>, vector<32x16xf32>, vector<16x16xf32> -> vector<16x16xf32>
    %59 = vector.extract_strided_slice %35 {offsets = [0, 0, 0], sizes = [1, 1, 16], strides = [1, 1, 1]} : vector<2x1x16xf32> to vector<1x1x16xf32>
    %60 = vector.shape_cast %59 : vector<1x1x16xf32> to vector<1x16xf32>
    %61 = vector.broadcast %60 : vector<1x16xf32> to vector<16x16xf32>
    %62 = arith.addf %58, %61 : vector<16x16xf32>
    %63 = vector.extract_strided_slice %48 {offsets = [0, 0], sizes = [8, 16], strides = [1, 1]} : vector<16x16xf32> to vector<8x16xf32>
    %64 = vector.extract_strided_slice %55 {offsets = [0, 0], sizes = [8, 16], strides = [1, 1]} : vector<16x16xf32> to vector<8x16xf32>
    %65 = vector.extract_strided_slice %62 {offsets = [0, 0], sizes = [8, 16], strides = [1, 1]} : vector<16x16xf32> to vector<8x16xf32>
    %cst_54 = arith.constant dense<0.000000e+00> : vector<8x8xf32>
    %66 = tpu.matmul %63, %64, %cst_54 {dimension_numbers = #tpu.dot_dimension_numbers<[1], [1], [0], [0], [0, 0, 1, 0], [], []>} : vector<8x16xf32>, vector<8x16xf32>, vector<8x8xf32> -> vector<8x8xf32>
    %67 = vector.extract_strided_slice %23 {offsets = [0, 0, 0], sizes = [1, 1, 8], strides = [1, 1, 1]} : vector<2x1x8xf32> to vector<1x1x8xf32>
    %68 = vector.shape_cast %67 : vector<1x1x8xf32> to vector<1x8xf32>
    %69 = vector.broadcast %68 : vector<1x8xf32> to vector<8x8xf32>
    %70 = arith.addf %66, %69 : vector<8x8xf32>
    %cst_55 = arith.constant dense<0xFF800000> : vector<8xf32>
    %71 = vector.multi_reduction <maximumf>, %70, %cst_55 [1] : vector<8x8xf32> to vector<8xf32>
    %72 = vector.shape_cast %71 : vector<8xf32> to vector<8x1xf32>
    %73 = vector.broadcast %72 : vector<8x1xf32> to vector<8x8xf32>
    %74 = arith.subf %70, %73 : vector<8x8xf32>
    %75 = math.exp %74 : vector<8x8xf32>
    %cst_56 = arith.constant dense<0.000000e+00> : vector<8xf32>
    %76 = vector.multi_reduction <add>, %75, %cst_56 [1] : vector<8x8xf32> to vector<8xf32>
    %77 = vector.shape_cast %76 : vector<8xf32> to vector<8x1xf32>
    %78 = vector.broadcast %77 : vector<8x1xf32> to vector<8x8xf32>
    %79 = arith.divf %75, %78 : vector<8x8xf32>
    %cst_57 = arith.constant dense<0.000000e+00> : vector<8x16xf32>
    %80 = tpu.matmul %79, %65, %cst_57 {dimension_numbers = #tpu.dot_dimension_numbers<[1], [0], [0], [1], [0, 0, 1, 1], [], []>} : vector<8x8xf32>, vector<8x16xf32>, vector<8x16xf32> -> vector<8x16xf32>
    %81 = vector.extract_strided_slice %48 {offsets = [8, 0], sizes = [8, 16], strides = [1, 1]} : vector<16x16xf32> to vector<8x16xf32>
    %82 = vector.extract_strided_slice %55 {offsets = [8, 0], sizes = [8, 16], strides = [1, 1]} : vector<16x16xf32> to vector<8x16xf32>
    %83 = vector.extract_strided_slice %62 {offsets = [8, 0], sizes = [8, 16], strides = [1, 1]} : vector<16x16xf32> to vector<8x16xf32>
    %cst_58 = arith.constant dense<0.000000e+00> : vector<8x8xf32>
    %84 = tpu.matmul %81, %82, %cst_58 {dimension_numbers = #tpu.dot_dimension_numbers<[1], [1], [0], [0], [0, 0, 1, 0], [], []>} : vector<8x16xf32>, vector<8x16xf32>, vector<8x8xf32> -> vector<8x8xf32>
    %85 = vector.extract_strided_slice %23 {offsets = [1, 0, 0], sizes = [1, 1, 8], strides = [1, 1, 1]} : vector<2x1x8xf32> to vector<1x1x8xf32>
    %86 = vector.shape_cast %85 : vector<1x1x8xf32> to vector<1x8xf32>
    %87 = vector.broadcast %86 : vector<1x8xf32> to vector<8x8xf32>
    %88 = arith.addf %84, %87 : vector<8x8xf32>
    %cst_59 = arith.constant dense<0xFF800000> : vector<8xf32>
    %89 = vector.multi_reduction <maximumf>, %88, %cst_59 [1] : vector<8x8xf32> to vector<8xf32>
    %90 = vector.shape_cast %89 : vector<8xf32> to vector<8x1xf32>
    %91 = vector.broadcast %90 : vector<8x1xf32> to vector<8x8xf32>
    %92 = arith.subf %88, %91 : vector<8x8xf32>
    %93 = math.exp %92 : vector<8x8xf32>
    %cst_60 = arith.constant dense<0.000000e+00> : vector<8xf32>
    %94 = vector.multi_reduction <add>, %93, %cst_60 [1] : vector<8x8xf32> to vector<8xf32>
    %95 = vector.shape_cast %94 : vector<8xf32> to vector<8x1xf32>
    %96 = vector.broadcast %95 : vector<8x1xf32> to vector<8x8xf32>
    %97 = arith.divf %93, %96 : vector<8x8xf32>
    %cst_61 = arith.constant dense<0.000000e+00> : vector<8x16xf32>
    %98 = tpu.matmul %97, %83, %cst_61 {dimension_numbers = #tpu.dot_dimension_numbers<[1], [0], [0], [1], [0, 0, 1, 1], [], []>} : vector<8x8xf32>, vector<8x16xf32>, vector<8x16xf32> -> vector<8x16xf32>
    %99 = tpu.concatenate %80, %98 in 0 : vector<8x16xf32>, vector<8x16xf32> -> vector<16x16xf32>
    %100 = vector.extract_strided_slice %37 {offsets = [0, 0, 0], sizes = [1, 16, 32], strides = [1, 1, 1]} : vector<2x16x32xf32> to vector<1x16x32xf32>
    %101 = vector.shape_cast %100 : vector<1x16x32xf32> to vector<16x32xf32>
    %cst_62 = arith.constant dense<0.000000e+00> : vector<16x32xf32>
    %102 = tpu.matmul %99, %101, %cst_62 {dimension_numbers = #tpu.dot_dimension_numbers<[1], [0], [0], [1], [0, 0, 1, 1], [], []>} : vector<16x16xf32>, vector<16x32xf32>, vector<16x32xf32> -> vector<16x32xf32>
    %103 = vector.broadcast %39 : vector<1x32xf32> to vector<16x32xf32>
    %104 = arith.addf %103, %102 : vector<16x32xf32>
    %105 = vector.extract_strided_slice %25 {offsets = [1, 0, 0], sizes = [1, 32, 16], strides = [1, 1, 1]} : vector<2x32x16xf32> to vector<1x32x16xf32>
    %106 = vector.shape_cast %105 : vector<1x32x16xf32> to vector<32x16xf32>
    %cst_63 = arith.constant dense<0.000000e+00> : vector<16x16xf32>
    %107 = tpu.matmul %22, %106, %cst_63 {dimension_numbers = #tpu.dot_dimension_numbers<[1], [0], [0], [1], [0, 0, 1, 1], [], []>} : vector<16x32xf32>, vector<32x16xf32>, vector<16x16xf32> -> vector<16x16xf32>
    %108 = vector.extract_strided_slice %31 {offsets = [1, 0, 0], sizes = [1, 1, 16], strides = [1, 1, 1]} : vector<2x1x16xf32> to vector<1x1x16xf32>
    %109 = vector.shape_cast %108 : vector<1x1x16xf32> to vector<1x16xf32>
    %110 = vector.broadcast %109 : vector<1x16xf32> to vector<16x16xf32>
    %111 = arith.addf %107, %110 : vector<16x16xf32>
    %cst_64 = arith.constant 2.500000e-01 : f32
    %112 = vector.broadcast %cst_64 : f32 to vector<16x16xf32>
    %113 = arith.mulf %111, %112 : vector<16x16xf32>
    %114 = vector.extract_strided_slice %27 {offsets = [1, 0, 0], sizes = [1, 32, 16], strides = [1, 1, 1]} : vector<2x32x16xf32> to vector<1x32x16xf32>
    %115 = vector.shape_cast %114 : vector<1x32x16xf32> to vector<32x16xf32>
    %cst_65 = arith.constant dense<0.000000e+00> : vector<16x16xf32>
    %116 = tpu.matmul %22, %115, %cst_65 {dimension_numbers = #tpu.dot_dimension_numbers<[1], [0], [0], [1], [0, 0, 1, 1], [], []>} : vector<16x32xf32>, vector<32x16xf32>, vector<16x16xf32> -> vector<16x16xf32>
    %117 = vector.extract_strided_slice %33 {offsets = [1, 0, 0], sizes = [1, 1, 16], strides = [1, 1, 1]} : vector<2x1x16xf32> to vector<1x1x16xf32>
    %118 = vector.shape_cast %117 : vector<1x1x16xf32> to vector<1x16xf32>
    %119 = vector.broadcast %118 : vector<1x16xf32> to vector<16x16xf32>
    %120 = arith.addf %116, %119 : vector<16x16xf32>
    %121 = vector.extract_strided_slice %29 {offsets = [1, 0, 0], sizes = [1, 32, 16], strides = [1, 1, 1]} : vector<2x32x16xf32> to vector<1x32x16xf32>
    %122 = vector.shape_cast %121 : vector<1x32x16xf32> to vector<32x16xf32>
    %cst_66 = arith.constant dense<0.000000e+00> : vector<16x16xf32>
    %123 = tpu.matmul %22, %122, %cst_66 {dimension_numbers = #tpu.dot_dimension_numbers<[1], [0], [0], [1], [0, 0, 1, 1], [], []>} : vector<16x32xf32>, vector<32x16xf32>, vector<16x16xf32> -> vector<16x16xf32>
    %124 = vector.extract_strided_slice %35 {offsets = [1, 0, 0], sizes = [1, 1, 16], strides = [1, 1, 1]} : vector<2x1x16xf32> to vector<1x1x16xf32>
    %125 = vector.shape_cast %124 : vector<1x1x16xf32> to vector<1x16xf32>
    %126 = vector.broadcast %125 : vector<1x16xf32> to vector<16x16xf32>
    %127 = arith.addf %123, %126 : vector<16x16xf32>
    %128 = vector.extract_strided_slice %113 {offsets = [0, 0], sizes = [8, 16], strides = [1, 1]} : vector<16x16xf32> to vector<8x16xf32>
    %129 = vector.extract_strided_slice %120 {offsets = [0, 0], sizes = [8, 16], strides = [1, 1]} : vector<16x16xf32> to vector<8x16xf32>
    %130 = vector.extract_strided_slice %127 {offsets = [0, 0], sizes = [8, 16], strides = [1, 1]} : vector<16x16xf32> to vector<8x16xf32>
    %cst_67 = arith.constant dense<0.000000e+00> : vector<8x8xf32>
    %131 = tpu.matmul %128, %129, %cst_67 {dimension_numbers = #tpu.dot_dimension_numbers<[1], [1], [0], [0], [0, 0, 1, 0], [], []>} : vector<8x16xf32>, vector<8x16xf32>, vector<8x8xf32> -> vector<8x8xf32>
    %132 = vector.extract_strided_slice %23 {offsets = [0, 0, 0], sizes = [1, 1, 8], strides = [1, 1, 1]} : vector<2x1x8xf32> to vector<1x1x8xf32>
    %133 = vector.shape_cast %132 : vector<1x1x8xf32> to vector<1x8xf32>
    %134 = vector.broadcast %133 : vector<1x8xf32> to vector<8x8xf32>
    %135 = arith.addf %131, %134 : vector<8x8xf32>
    %cst_68 = arith.constant dense<0xFF800000> : vector<8xf32>
    %136 = vector.multi_reduction <maximumf>, %135, %cst_68 [1] : vector<8x8xf32> to vector<8xf32>
    %137 = vector.shape_cast %136 : vector<8xf32> to vector<8x1xf32>
    %138 = vector.broadcast %137 : vector<8x1xf32> to vector<8x8xf32>
    %139 = arith.subf %135, %138 : vector<8x8xf32>
    %140 = math.exp %139 : vector<8x8xf32>
    %cst_69 = arith.constant dense<0.000000e+00> : vector<8xf32>
    %141 = vector.multi_reduction <add>, %140, %cst_69 [1] : vector<8x8xf32> to vector<8xf32>
    %142 = vector.shape_cast %141 : vector<8xf32> to vector<8x1xf32>
    %143 = vector.broadcast %142 : vector<8x1xf32> to vector<8x8xf32>
    %144 = arith.divf %140, %143 : vector<8x8xf32>
    %cst_70 = arith.constant dense<0.000000e+00> : vector<8x16xf32>
    %145 = tpu.matmul %144, %130, %cst_70 {dimension_numbers = #tpu.dot_dimension_numbers<[1], [0], [0], [1], [0, 0, 1, 1], [], []>} : vector<8x8xf32>, vector<8x16xf32>, vector<8x16xf32> -> vector<8x16xf32>
    %146 = vector.extract_strided_slice %113 {offsets = [8, 0], sizes = [8, 16], strides = [1, 1]} : vector<16x16xf32> to vector<8x16xf32>
    %147 = vector.extract_strided_slice %120 {offsets = [8, 0], sizes = [8, 16], strides = [1, 1]} : vector<16x16xf32> to vector<8x16xf32>
    %148 = vector.extract_strided_slice %127 {offsets = [8, 0], sizes = [8, 16], strides = [1, 1]} : vector<16x16xf32> to vector<8x16xf32>
    %cst_71 = arith.constant dense<0.000000e+00> : vector<8x8xf32>
    %149 = tpu.matmul %146, %147, %cst_71 {dimension_numbers = #tpu.dot_dimension_numbers<[1], [1], [0], [0], [0, 0, 1, 0], [], []>} : vector<8x16xf32>, vector<8x16xf32>, vector<8x8xf32> -> vector<8x8xf32>
    %150 = vector.extract_strided_slice %23 {offsets = [1, 0, 0], sizes = [1, 1, 8], strides = [1, 1, 1]} : vector<2x1x8xf32> to vector<1x1x8xf32>
    %151 = vector.shape_cast %150 : vector<1x1x8xf32> to vector<1x8xf32>
    %152 = vector.broadcast %151 : vector<1x8xf32> to vector<8x8xf32>
    %153 = arith.addf %149, %152 : vector<8x8xf32>
    %cst_72 = arith.constant dense<0xFF800000> : vector<8xf32>
    %154 = vector.multi_reduction <maximumf>, %153, %cst_72 [1] : vector<8x8xf32> to vector<8xf32>
    %155 = vector.shape_cast %154 : vector<8xf32> to vector<8x1xf32>
    %156 = vector.broadcast %155 : vector<8x1xf32> to vector<8x8xf32>
    %157 = arith.subf %153, %156 : vector<8x8xf32>
    %158 = math.exp %157 : vector<8x8xf32>
    %cst_73 = arith.constant dense<0.000000e+00> : vector<8xf32>
    %159 = vector.multi_reduction <add>, %158, %cst_73 [1] : vector<8x8xf32> to vector<8xf32>
    %160 = vector.shape_cast %159 : vector<8xf32> to vector<8x1xf32>
    %161 = vector.broadcast %160 : vector<8x1xf32> to vector<8x8xf32>
    %162 = arith.divf %158, %161 : vector<8x8xf32>
    %cst_74 = arith.constant dense<0.000000e+00> : vector<8x16xf32>
    %163 = tpu.matmul %162, %148, %cst_74 {dimension_numbers = #tpu.dot_dimension_numbers<[1], [0], [0], [1], [0, 0, 1, 1], [], []>} : vector<8x8xf32>, vector<8x16xf32>, vector<8x16xf32> -> vector<8x16xf32>
    %164 = tpu.concatenate %145, %163 in 0 : vector<8x16xf32>, vector<8x16xf32> -> vector<16x16xf32>
    %165 = vector.extract_strided_slice %37 {offsets = [1, 0, 0], sizes = [1, 16, 32], strides = [1, 1, 1]} : vector<2x16x32xf32> to vector<1x16x32xf32>
    %166 = vector.shape_cast %165 : vector<1x16x32xf32> to vector<16x32xf32>
    %cst_75 = arith.constant dense<0.000000e+00> : vector<16x32xf32>
    %167 = tpu.matmul %164, %166, %cst_75 {dimension_numbers = #tpu.dot_dimension_numbers<[1], [0], [0], [1], [0, 0, 1, 1], [], []>} : vector<16x16xf32>, vector<16x32xf32>, vector<16x32xf32> -> vector<16x32xf32>
    %168 = arith.addf %104, %167 : vector<16x32xf32>
    %169 = arith.addf %22, %168 : vector<16x32xf32>
    %c0_76 = arith.constant 0 : index
    %c0_77 = arith.constant 0 : index
    %c0_78 = arith.constant 0 : index
    %170 = vector.load %arg18[%c0_76, %c0_77, %c0_78] : memref<3x1x32xf32, #tpu.memory_space<vmem>>, vector<1x1x32xf32>
    %171 = vector.shape_cast %170 : vector<1x1x32xf32> to vector<1x32xf32>
    %c0_79 = arith.constant 0 : index
    %c0_80 = arith.constant 0 : index
    %c0_81 = arith.constant 0 : index
    %172 = vector.load %arg19[%c0_79, %c0_80, %c0_81] : memref<3x1x32xf32, #tpu.memory_space<vmem>>, vector<1x1x32xf32>
    %173 = vector.shape_cast %172 : vector<1x1x32xf32> to vector<1x32xf32>
    %cst_82 = arith.constant dense<0.000000e+00> : vector<16xf32>
    %174 = vector.multi_reduction <add>, %169, %cst_82 [1] : vector<16x32xf32> to vector<16xf32>
    %175 = vector.shape_cast %174 : vector<16xf32> to vector<16x1xf32>
    %cst_83 = arith.constant 3.200000e+01 : f32
    %176 = vector.broadcast %cst_83 : f32 to vector<16x1xf32>
    %177 = arith.divf %175, %176 : vector<16x1xf32>
    %178 = vector.broadcast %177 : vector<16x1xf32> to vector<16x32xf32>
    %179 = arith.subf %169, %178 : vector<16x32xf32>
    %180 = arith.mulf %179, %179 : vector<16x32xf32>
    %cst_84 = arith.constant dense<0.000000e+00> : vector<16xf32>
    %181 = vector.multi_reduction <add>, %180, %cst_84 [1] : vector<16x32xf32> to vector<16xf32>
    %182 = vector.shape_cast %181 : vector<16xf32> to vector<16x1xf32>
    %cst_85 = arith.constant 3.200000e+01 : f32
    %183 = vector.broadcast %cst_85 : f32 to vector<16x1xf32>
    %184 = arith.divf %182, %183 : vector<16x1xf32>
    %cst_86 = arith.constant 9.99999974E-6 : f32
    %185 = vector.broadcast %cst_86 : f32 to vector<16x1xf32>
    %186 = arith.addf %184, %185 : vector<16x1xf32>
    %187 = math.rsqrt %186 : vector<16x1xf32>
    %188 = vector.broadcast %187 : vector<16x1xf32> to vector<16x32xf32>
    %189 = arith.mulf %179, %188 : vector<16x32xf32>
    %190 = vector.broadcast %171 : vector<1x32xf32> to vector<16x32xf32>
    %191 = arith.mulf %189, %190 : vector<16x32xf32>
    %192 = vector.broadcast %173 : vector<1x32xf32> to vector<16x32xf32>
    %193 = arith.addf %191, %192 : vector<16x32xf32>
    %c0_87 = arith.constant 0 : index
    %c0_88 = arith.constant 0 : index
    %c0_89 = arith.constant 0 : index
    %194 = vector.load %arg20[%c0_87, %c0_88, %c0_89] : memref<3x32x2048xf32, #tpu.memory_space<vmem>>, vector<1x32x2048xf32>
    %195 = vector.shape_cast %194 : vector<1x32x2048xf32> to vector<32x2048xf32>
    %cst_90 = arith.constant dense<0.000000e+00> : vector<16x2048xf32>
    %196 = tpu.matmul %193, %195, %cst_90 {dimension_numbers = #tpu.dot_dimension_numbers<[1], [0], [0], [1], [0, 0, 1, 1], [], []>} : vector<16x32xf32>, vector<32x2048xf32>, vector<16x2048xf32> -> vector<16x2048xf32>
    %c0_91 = arith.constant 0 : index
    %c0_92 = arith.constant 0 : index
    %c0_93 = arith.constant 0 : index
    %197 = vector.load %arg21[%c0_91, %c0_92, %c0_93] : memref<3x1x2048xf32, #tpu.memory_space<vmem>>, vector<1x1x2048xf32>
    %198 = vector.shape_cast %197 : vector<1x1x2048xf32> to vector<1x2048xf32>
    %199 = vector.broadcast %198 : vector<1x2048xf32> to vector<16x2048xf32>
    %200 = arith.addf %196, %199 : vector<16x2048xf32>
    %cst_94 = arith.constant 0.000000e+00 : f32
    %201 = vector.broadcast %cst_94 : f32 to vector<16x2048xf32>
    %202 = arith.maximumf %200, %201 : vector<16x2048xf32>
    %c0_95 = arith.constant 0 : index
    %c0_96 = arith.constant 0 : index
    %c0_97 = arith.constant 0 : index
    %203 = vector.load %arg22[%c0_95, %c0_96, %c0_97] : memref<3x2048x32xf32, #tpu.memory_space<vmem>>, vector<1x2048x32xf32>
    %204 = vector.shape_cast %203 : vector<1x2048x32xf32> to vector<2048x32xf32>
    %cst_98 = arith.constant dense<0.000000e+00> : vector<16x32xf32>
    %205 = tpu.matmul %202, %204, %cst_98 {dimension_numbers = #tpu.dot_dimension_numbers<[1], [0], [0], [1], [0, 0, 1, 1], [], []>} : vector<16x2048xf32>, vector<2048x32xf32>, vector<16x32xf32> -> vector<16x32xf32>
    %c0_99 = arith.constant 0 : index
    %c0_100 = arith.constant 0 : index
    %c0_101 = arith.constant 0 : index
    %206 = vector.load %arg23[%c0_99, %c0_100, %c0_101] : memref<3x1x32xf32, #tpu.memory_space<vmem>>, vector<1x1x32xf32>
    %207 = vector.shape_cast %206 : vector<1x1x32xf32> to vector<1x32xf32>
    %208 = vector.broadcast %207 : vector<1x32xf32> to vector<16x32xf32>
    %209 = arith.addf %205, %208 : vector<16x32xf32>
    %210 = arith.addf %193, %209 : vector<16x32xf32>
    %c0_102 = arith.constant 0 : index
    %c0_103 = arith.constant 0 : index
    %c0_104 = arith.constant 0 : index
    %211 = vector.load %arg24[%c0_102, %c0_103, %c0_104] : memref<3x1x32xf32, #tpu.memory_space<vmem>>, vector<1x1x32xf32>
    %212 = vector.shape_cast %211 : vector<1x1x32xf32> to vector<1x32xf32>
    %c0_105 = arith.constant 0 : index
    %c0_106 = arith.constant 0 : index
    %c0_107 = arith.constant 0 : index
    %213 = vector.load %arg25[%c0_105, %c0_106, %c0_107] : memref<3x1x32xf32, #tpu.memory_space<vmem>>, vector<1x1x32xf32>
    %214 = vector.shape_cast %213 : vector<1x1x32xf32> to vector<1x32xf32>
    %cst_108 = arith.constant dense<0.000000e+00> : vector<16xf32>
    %215 = vector.multi_reduction <add>, %210, %cst_108 [1] : vector<16x32xf32> to vector<16xf32>
    %216 = vector.shape_cast %215 : vector<16xf32> to vector<16x1xf32>
    %cst_109 = arith.constant 3.200000e+01 : f32
    %217 = vector.broadcast %cst_109 : f32 to vector<16x1xf32>
    %218 = arith.divf %216, %217 : vector<16x1xf32>
    %219 = vector.broadcast %218 : vector<16x1xf32> to vector<16x32xf32>
    %220 = arith.subf %210, %219 : vector<16x32xf32>
    %221 = arith.mulf %220, %220 : vector<16x32xf32>
    %cst_110 = arith.constant dense<0.000000e+00> : vector<16xf32>
    %222 = vector.multi_reduction <add>, %221, %cst_110 [1] : vector<16x32xf32> to vector<16xf32>
    %223 = vector.shape_cast %222 : vector<16xf32> to vector<16x1xf32>
    %cst_111 = arith.constant 3.200000e+01 : f32
    %224 = vector.broadcast %cst_111 : f32 to vector<16x1xf32>
    %225 = arith.divf %223, %224 : vector<16x1xf32>
    %cst_112 = arith.constant 9.99999974E-6 : f32
    %226 = vector.broadcast %cst_112 : f32 to vector<16x1xf32>
    %227 = arith.addf %225, %226 : vector<16x1xf32>
    %228 = math.rsqrt %227 : vector<16x1xf32>
    %229 = vector.broadcast %228 : vector<16x1xf32> to vector<16x32xf32>
    %230 = arith.mulf %220, %229 : vector<16x32xf32>
    %231 = vector.broadcast %212 : vector<1x32xf32> to vector<16x32xf32>
    %232 = arith.mulf %230, %231 : vector<16x32xf32>
    %233 = vector.broadcast %214 : vector<1x32xf32> to vector<16x32xf32>
    %234 = arith.addf %232, %233 : vector<16x32xf32>
    %c1 = arith.constant 1 : index
    %c0_113 = arith.constant 0 : index
    %c0_114 = arith.constant 0 : index
    %c0_115 = arith.constant 0 : index
    %235 = vector.load %arg10[%c1, %c0_113, %c0_114, %c0_115] : memref<3x2x32x16xf32, #tpu.memory_space<vmem>>, vector<1x2x32x16xf32>
    %236 = vector.shape_cast %235 : vector<1x2x32x16xf32> to vector<2x32x16xf32>
    %c1_116 = arith.constant 1 : index
    %c0_117 = arith.constant 0 : index
    %c0_118 = arith.constant 0 : index
    %c0_119 = arith.constant 0 : index
    %237 = vector.load %arg11[%c1_116, %c0_117, %c0_118, %c0_119] : memref<3x2x32x16xf32, #tpu.memory_space<vmem>>, vector<1x2x32x16xf32>
    %238 = vector.shape_cast %237 : vector<1x2x32x16xf32> to vector<2x32x16xf32>
    %c1_120 = arith.constant 1 : index
    %c0_121 = arith.constant 0 : index
    %c0_122 = arith.constant 0 : index
    %c0_123 = arith.constant 0 : index
    %239 = vector.load %arg12[%c1_120, %c0_121, %c0_122, %c0_123] : memref<3x2x32x16xf32, #tpu.memory_space<vmem>>, vector<1x2x32x16xf32>
    %240 = vector.shape_cast %239 : vector<1x2x32x16xf32> to vector<2x32x16xf32>
    %c1_124 = arith.constant 1 : index
    %c0_125 = arith.constant 0 : index
    %c0_126 = arith.constant 0 : index
    %c0_127 = arith.constant 0 : index
    %241 = vector.load %arg13[%c1_124, %c0_125, %c0_126, %c0_127] : memref<3x2x1x16xf32, #tpu.memory_space<vmem>>, vector<1x2x1x16xf32>
    %242 = vector.shape_cast %241 : vector<1x2x1x16xf32> to vector<2x1x16xf32>
    %c1_128 = arith.constant 1 : index
    %c0_129 = arith.constant 0 : index
    %c0_130 = arith.constant 0 : index
    %c0_131 = arith.constant 0 : index
    %243 = vector.load %arg14[%c1_128, %c0_129, %c0_130, %c0_131] : memref<3x2x1x16xf32, #tpu.memory_space<vmem>>, vector<1x2x1x16xf32>
    %244 = vector.shape_cast %243 : vector<1x2x1x16xf32> to vector<2x1x16xf32>
    %c1_132 = arith.constant 1 : index
    %c0_133 = arith.constant 0 : index
    %c0_134 = arith.constant 0 : index
    %c0_135 = arith.constant 0 : index
    %245 = vector.load %arg15[%c1_132, %c0_133, %c0_134, %c0_135] : memref<3x2x1x16xf32, #tpu.memory_space<vmem>>, vector<1x2x1x16xf32>
    %246 = vector.shape_cast %245 : vector<1x2x1x16xf32> to vector<2x1x16xf32>
    %c1_136 = arith.constant 1 : index
    %c0_137 = arith.constant 0 : index
    %c0_138 = arith.constant 0 : index
    %c0_139 = arith.constant 0 : index
    %247 = vector.load %arg16[%c1_136, %c0_137, %c0_138, %c0_139] : memref<3x2x16x32xf32, #tpu.memory_space<vmem>>, vector<1x2x16x32xf32>
    %248 = vector.shape_cast %247 : vector<1x2x16x32xf32> to vector<2x16x32xf32>
    %c1_140 = arith.constant 1 : index
    %c0_141 = arith.constant 0 : index
    %c0_142 = arith.constant 0 : index
    %249 = vector.load %arg17[%c1_140, %c0_141, %c0_142] : memref<3x1x32xf32, #tpu.memory_space<vmem>>, vector<1x1x32xf32>
    %250 = vector.shape_cast %249 : vector<1x1x32xf32> to vector<1x32xf32>
    %251 = vector.extract_strided_slice %236 {offsets = [0, 0, 0], sizes = [1, 32, 16], strides = [1, 1, 1]} : vector<2x32x16xf32> to vector<1x32x16xf32>
    %252 = vector.shape_cast %251 : vector<1x32x16xf32> to vector<32x16xf32>
    %cst_143 = arith.constant dense<0.000000e+00> : vector<16x16xf32>
    %253 = tpu.matmul %234, %252, %cst_143 {dimension_numbers = #tpu.dot_dimension_numbers<[1], [0], [0], [1], [0, 0, 1, 1], [], []>} : vector<16x32xf32>, vector<32x16xf32>, vector<16x16xf32> -> vector<16x16xf32>
    %254 = vector.extract_strided_slice %242 {offsets = [0, 0, 0], sizes = [1, 1, 16], strides = [1, 1, 1]} : vector<2x1x16xf32> to vector<1x1x16xf32>
    %255 = vector.shape_cast %254 : vector<1x1x16xf32> to vector<1x16xf32>
    %256 = vector.broadcast %255 : vector<1x16xf32> to vector<16x16xf32>
    %257 = arith.addf %253, %256 : vector<16x16xf32>
    %cst_144 = arith.constant 2.500000e-01 : f32
    %258 = vector.broadcast %cst_144 : f32 to vector<16x16xf32>
    %259 = arith.mulf %257, %258 : vector<16x16xf32>
    %260 = vector.extract_strided_slice %238 {offsets = [0, 0, 0], sizes = [1, 32, 16], strides = [1, 1, 1]} : vector<2x32x16xf32> to vector<1x32x16xf32>
    %261 = vector.shape_cast %260 : vector<1x32x16xf32> to vector<32x16xf32>
    %cst_145 = arith.constant dense<0.000000e+00> : vector<16x16xf32>
    %262 = tpu.matmul %234, %261, %cst_145 {dimension_numbers = #tpu.dot_dimension_numbers<[1], [0], [0], [1], [0, 0, 1, 1], [], []>} : vector<16x32xf32>, vector<32x16xf32>, vector<16x16xf32> -> vector<16x16xf32>
    %263 = vector.extract_strided_slice %244 {offsets = [0, 0, 0], sizes = [1, 1, 16], strides = [1, 1, 1]} : vector<2x1x16xf32> to vector<1x1x16xf32>
    %264 = vector.shape_cast %263 : vector<1x1x16xf32> to vector<1x16xf32>
    %265 = vector.broadcast %264 : vector<1x16xf32> to vector<16x16xf32>
    %266 = arith.addf %262, %265 : vector<16x16xf32>
    %267 = vector.extract_strided_slice %240 {offsets = [0, 0, 0], sizes = [1, 32, 16], strides = [1, 1, 1]} : vector<2x32x16xf32> to vector<1x32x16xf32>
    %268 = vector.shape_cast %267 : vector<1x32x16xf32> to vector<32x16xf32>
    %cst_146 = arith.constant dense<0.000000e+00> : vector<16x16xf32>
    %269 = tpu.matmul %234, %268, %cst_146 {dimension_numbers = #tpu.dot_dimension_numbers<[1], [0], [0], [1], [0, 0, 1, 1], [], []>} : vector<16x32xf32>, vector<32x16xf32>, vector<16x16xf32> -> vector<16x16xf32>
    %270 = vector.extract_strided_slice %246 {offsets = [0, 0, 0], sizes = [1, 1, 16], strides = [1, 1, 1]} : vector<2x1x16xf32> to vector<1x1x16xf32>
    %271 = vector.shape_cast %270 : vector<1x1x16xf32> to vector<1x16xf32>
    %272 = vector.broadcast %271 : vector<1x16xf32> to vector<16x16xf32>
    %273 = arith.addf %269, %272 : vector<16x16xf32>
    %274 = vector.extract_strided_slice %259 {offsets = [0, 0], sizes = [8, 16], strides = [1, 1]} : vector<16x16xf32> to vector<8x16xf32>
    %275 = vector.extract_strided_slice %266 {offsets = [0, 0], sizes = [8, 16], strides = [1, 1]} : vector<16x16xf32> to vector<8x16xf32>
    %276 = vector.extract_strided_slice %273 {offsets = [0, 0], sizes = [8, 16], strides = [1, 1]} : vector<16x16xf32> to vector<8x16xf32>
    %cst_147 = arith.constant dense<0.000000e+00> : vector<8x8xf32>
    %277 = tpu.matmul %274, %275, %cst_147 {dimension_numbers = #tpu.dot_dimension_numbers<[1], [1], [0], [0], [0, 0, 1, 0], [], []>} : vector<8x16xf32>, vector<8x16xf32>, vector<8x8xf32> -> vector<8x8xf32>
    %278 = vector.extract_strided_slice %23 {offsets = [0, 0, 0], sizes = [1, 1, 8], strides = [1, 1, 1]} : vector<2x1x8xf32> to vector<1x1x8xf32>
    %279 = vector.shape_cast %278 : vector<1x1x8xf32> to vector<1x8xf32>
    %280 = vector.broadcast %279 : vector<1x8xf32> to vector<8x8xf32>
    %281 = arith.addf %277, %280 : vector<8x8xf32>
    %cst_148 = arith.constant dense<0xFF800000> : vector<8xf32>
    %282 = vector.multi_reduction <maximumf>, %281, %cst_148 [1] : vector<8x8xf32> to vector<8xf32>
    %283 = vector.shape_cast %282 : vector<8xf32> to vector<8x1xf32>
    %284 = vector.broadcast %283 : vector<8x1xf32> to vector<8x8xf32>
    %285 = arith.subf %281, %284 : vector<8x8xf32>
    %286 = math.exp %285 : vector<8x8xf32>
    %cst_149 = arith.constant dense<0.000000e+00> : vector<8xf32>
    %287 = vector.multi_reduction <add>, %286, %cst_149 [1] : vector<8x8xf32> to vector<8xf32>
    %288 = vector.shape_cast %287 : vector<8xf32> to vector<8x1xf32>
    %289 = vector.broadcast %288 : vector<8x1xf32> to vector<8x8xf32>
    %290 = arith.divf %286, %289 : vector<8x8xf32>
    %cst_150 = arith.constant dense<0.000000e+00> : vector<8x16xf32>
    %291 = tpu.matmul %290, %276, %cst_150 {dimension_numbers = #tpu.dot_dimension_numbers<[1], [0], [0], [1], [0, 0, 1, 1], [], []>} : vector<8x8xf32>, vector<8x16xf32>, vector<8x16xf32> -> vector<8x16xf32>
    %292 = vector.extract_strided_slice %259 {offsets = [8, 0], sizes = [8, 16], strides = [1, 1]} : vector<16x16xf32> to vector<8x16xf32>
    %293 = vector.extract_strided_slice %266 {offsets = [8, 0], sizes = [8, 16], strides = [1, 1]} : vector<16x16xf32> to vector<8x16xf32>
    %294 = vector.extract_strided_slice %273 {offsets = [8, 0], sizes = [8, 16], strides = [1, 1]} : vector<16x16xf32> to vector<8x16xf32>
    %cst_151 = arith.constant dense<0.000000e+00> : vector<8x8xf32>
    %295 = tpu.matmul %292, %293, %cst_151 {dimension_numbers = #tpu.dot_dimension_numbers<[1], [1], [0], [0], [0, 0, 1, 0], [], []>} : vector<8x16xf32>, vector<8x16xf32>, vector<8x8xf32> -> vector<8x8xf32>
    %296 = vector.extract_strided_slice %23 {offsets = [1, 0, 0], sizes = [1, 1, 8], strides = [1, 1, 1]} : vector<2x1x8xf32> to vector<1x1x8xf32>
    %297 = vector.shape_cast %296 : vector<1x1x8xf32> to vector<1x8xf32>
    %298 = vector.broadcast %297 : vector<1x8xf32> to vector<8x8xf32>
    %299 = arith.addf %295, %298 : vector<8x8xf32>
    %cst_152 = arith.constant dense<0xFF800000> : vector<8xf32>
    %300 = vector.multi_reduction <maximumf>, %299, %cst_152 [1] : vector<8x8xf32> to vector<8xf32>
    %301 = vector.shape_cast %300 : vector<8xf32> to vector<8x1xf32>
    %302 = vector.broadcast %301 : vector<8x1xf32> to vector<8x8xf32>
    %303 = arith.subf %299, %302 : vector<8x8xf32>
    %304 = math.exp %303 : vector<8x8xf32>
    %cst_153 = arith.constant dense<0.000000e+00> : vector<8xf32>
    %305 = vector.multi_reduction <add>, %304, %cst_153 [1] : vector<8x8xf32> to vector<8xf32>
    %306 = vector.shape_cast %305 : vector<8xf32> to vector<8x1xf32>
    %307 = vector.broadcast %306 : vector<8x1xf32> to vector<8x8xf32>
    %308 = arith.divf %304, %307 : vector<8x8xf32>
    %cst_154 = arith.constant dense<0.000000e+00> : vector<8x16xf32>
    %309 = tpu.matmul %308, %294, %cst_154 {dimension_numbers = #tpu.dot_dimension_numbers<[1], [0], [0], [1], [0, 0, 1, 1], [], []>} : vector<8x8xf32>, vector<8x16xf32>, vector<8x16xf32> -> vector<8x16xf32>
    %310 = tpu.concatenate %291, %309 in 0 : vector<8x16xf32>, vector<8x16xf32> -> vector<16x16xf32>
    %311 = vector.extract_strided_slice %248 {offsets = [0, 0, 0], sizes = [1, 16, 32], strides = [1, 1, 1]} : vector<2x16x32xf32> to vector<1x16x32xf32>
    %312 = vector.shape_cast %311 : vector<1x16x32xf32> to vector<16x32xf32>
    %cst_155 = arith.constant dense<0.000000e+00> : vector<16x32xf32>
    %313 = tpu.matmul %310, %312, %cst_155 {dimension_numbers = #tpu.dot_dimension_numbers<[1], [0], [0], [1], [0, 0, 1, 1], [], []>} : vector<16x16xf32>, vector<16x32xf32>, vector<16x32xf32> -> vector<16x32xf32>
    %314 = vector.broadcast %250 : vector<1x32xf32> to vector<16x32xf32>
    %315 = arith.addf %314, %313 : vector<16x32xf32>
    %316 = vector.extract_strided_slice %236 {offsets = [1, 0, 0], sizes = [1, 32, 16], strides = [1, 1, 1]} : vector<2x32x16xf32> to vector<1x32x16xf32>
    %317 = vector.shape_cast %316 : vector<1x32x16xf32> to vector<32x16xf32>
    %cst_156 = arith.constant dense<0.000000e+00> : vector<16x16xf32>
    %318 = tpu.matmul %234, %317, %cst_156 {dimension_numbers = #tpu.dot_dimension_numbers<[1], [0], [0], [1], [0, 0, 1, 1], [], []>} : vector<16x32xf32>, vector<32x16xf32>, vector<16x16xf32> -> vector<16x16xf32>
    %319 = vector.extract_strided_slice %242 {offsets = [1, 0, 0], sizes = [1, 1, 16], strides = [1, 1, 1]} : vector<2x1x16xf32> to vector<1x1x16xf32>
    %320 = vector.shape_cast %319 : vector<1x1x16xf32> to vector<1x16xf32>
    %321 = vector.broadcast %320 : vector<1x16xf32> to vector<16x16xf32>
    %322 = arith.addf %318, %321 : vector<16x16xf32>
    %cst_157 = arith.constant 2.500000e-01 : f32
    %323 = vector.broadcast %cst_157 : f32 to vector<16x16xf32>
    %324 = arith.mulf %322, %323 : vector<16x16xf32>
    %325 = vector.extract_strided_slice %238 {offsets = [1, 0, 0], sizes = [1, 32, 16], strides = [1, 1, 1]} : vector<2x32x16xf32> to vector<1x32x16xf32>
    %326 = vector.shape_cast %325 : vector<1x32x16xf32> to vector<32x16xf32>
    %cst_158 = arith.constant dense<0.000000e+00> : vector<16x16xf32>
    %327 = tpu.matmul %234, %326, %cst_158 {dimension_numbers = #tpu.dot_dimension_numbers<[1], [0], [0], [1], [0, 0, 1, 1], [], []>} : vector<16x32xf32>, vector<32x16xf32>, vector<16x16xf32> -> vector<16x16xf32>
    %328 = vector.extract_strided_slice %244 {offsets = [1, 0, 0], sizes = [1, 1, 16], strides = [1, 1, 1]} : vector<2x1x16xf32> to vector<1x1x16xf32>
    %329 = vector.shape_cast %328 : vector<1x1x16xf32> to vector<1x16xf32>
    %330 = vector.broadcast %329 : vector<1x16xf32> to vector<16x16xf32>
    %331 = arith.addf %327, %330 : vector<16x16xf32>
    %332 = vector.extract_strided_slice %240 {offsets = [1, 0, 0], sizes = [1, 32, 16], strides = [1, 1, 1]} : vector<2x32x16xf32> to vector<1x32x16xf32>
    %333 = vector.shape_cast %332 : vector<1x32x16xf32> to vector<32x16xf32>
    %cst_159 = arith.constant dense<0.000000e+00> : vector<16x16xf32>
    %334 = tpu.matmul %234, %333, %cst_159 {dimension_numbers = #tpu.dot_dimension_numbers<[1], [0], [0], [1], [0, 0, 1, 1], [], []>} : vector<16x32xf32>, vector<32x16xf32>, vector<16x16xf32> -> vector<16x16xf32>
    %335 = vector.extract_strided_slice %246 {offsets = [1, 0, 0], sizes = [1, 1, 16], strides = [1, 1, 1]} : vector<2x1x16xf32> to vector<1x1x16xf32>
    %336 = vector.shape_cast %335 : vector<1x1x16xf32> to vector<1x16xf32>
    %337 = vector.broadcast %336 : vector<1x16xf32> to vector<16x16xf32>
    %338 = arith.addf %334, %337 : vector<16x16xf32>
    %339 = vector.extract_strided_slice %324 {offsets = [0, 0], sizes = [8, 16], strides = [1, 1]} : vector<16x16xf32> to vector<8x16xf32>
    %340 = vector.extract_strided_slice %331 {offsets = [0, 0], sizes = [8, 16], strides = [1, 1]} : vector<16x16xf32> to vector<8x16xf32>
    %341 = vector.extract_strided_slice %338 {offsets = [0, 0], sizes = [8, 16], strides = [1, 1]} : vector<16x16xf32> to vector<8x16xf32>
    %cst_160 = arith.constant dense<0.000000e+00> : vector<8x8xf32>
    %342 = tpu.matmul %339, %340, %cst_160 {dimension_numbers = #tpu.dot_dimension_numbers<[1], [1], [0], [0], [0, 0, 1, 0], [], []>} : vector<8x16xf32>, vector<8x16xf32>, vector<8x8xf32> -> vector<8x8xf32>
    %343 = vector.extract_strided_slice %23 {offsets = [0, 0, 0], sizes = [1, 1, 8], strides = [1, 1, 1]} : vector<2x1x8xf32> to vector<1x1x8xf32>
    %344 = vector.shape_cast %343 : vector<1x1x8xf32> to vector<1x8xf32>
    %345 = vector.broadcast %344 : vector<1x8xf32> to vector<8x8xf32>
    %346 = arith.addf %342, %345 : vector<8x8xf32>
    %cst_161 = arith.constant dense<0xFF800000> : vector<8xf32>
    %347 = vector.multi_reduction <maximumf>, %346, %cst_161 [1] : vector<8x8xf32> to vector<8xf32>
    %348 = vector.shape_cast %347 : vector<8xf32> to vector<8x1xf32>
    %349 = vector.broadcast %348 : vector<8x1xf32> to vector<8x8xf32>
    %350 = arith.subf %346, %349 : vector<8x8xf32>
    %351 = math.exp %350 : vector<8x8xf32>
    %cst_162 = arith.constant dense<0.000000e+00> : vector<8xf32>
    %352 = vector.multi_reduction <add>, %351, %cst_162 [1] : vector<8x8xf32> to vector<8xf32>
    %353 = vector.shape_cast %352 : vector<8xf32> to vector<8x1xf32>
    %354 = vector.broadcast %353 : vector<8x1xf32> to vector<8x8xf32>
    %355 = arith.divf %351, %354 : vector<8x8xf32>
    %cst_163 = arith.constant dense<0.000000e+00> : vector<8x16xf32>
    %356 = tpu.matmul %355, %341, %cst_163 {dimension_numbers = #tpu.dot_dimension_numbers<[1], [0], [0], [1], [0, 0, 1, 1], [], []>} : vector<8x8xf32>, vector<8x16xf32>, vector<8x16xf32> -> vector<8x16xf32>
    %357 = vector.extract_strided_slice %324 {offsets = [8, 0], sizes = [8, 16], strides = [1, 1]} : vector<16x16xf32> to vector<8x16xf32>
    %358 = vector.extract_strided_slice %331 {offsets = [8, 0], sizes = [8, 16], strides = [1, 1]} : vector<16x16xf32> to vector<8x16xf32>
    %359 = vector.extract_strided_slice %338 {offsets = [8, 0], sizes = [8, 16], strides = [1, 1]} : vector<16x16xf32> to vector<8x16xf32>
    %cst_164 = arith.constant dense<0.000000e+00> : vector<8x8xf32>
    %360 = tpu.matmul %357, %358, %cst_164 {dimension_numbers = #tpu.dot_dimension_numbers<[1], [1], [0], [0], [0, 0, 1, 0], [], []>} : vector<8x16xf32>, vector<8x16xf32>, vector<8x8xf32> -> vector<8x8xf32>
    %361 = vector.extract_strided_slice %23 {offsets = [1, 0, 0], sizes = [1, 1, 8], strides = [1, 1, 1]} : vector<2x1x8xf32> to vector<1x1x8xf32>
    %362 = vector.shape_cast %361 : vector<1x1x8xf32> to vector<1x8xf32>
    %363 = vector.broadcast %362 : vector<1x8xf32> to vector<8x8xf32>
    %364 = arith.addf %360, %363 : vector<8x8xf32>
    %cst_165 = arith.constant dense<0xFF800000> : vector<8xf32>
    %365 = vector.multi_reduction <maximumf>, %364, %cst_165 [1] : vector<8x8xf32> to vector<8xf32>
    %366 = vector.shape_cast %365 : vector<8xf32> to vector<8x1xf32>
    %367 = vector.broadcast %366 : vector<8x1xf32> to vector<8x8xf32>
    %368 = arith.subf %364, %367 : vector<8x8xf32>
    %369 = math.exp %368 : vector<8x8xf32>
    %cst_166 = arith.constant dense<0.000000e+00> : vector<8xf32>
    %370 = vector.multi_reduction <add>, %369, %cst_166 [1] : vector<8x8xf32> to vector<8xf32>
    %371 = vector.shape_cast %370 : vector<8xf32> to vector<8x1xf32>
    %372 = vector.broadcast %371 : vector<8x1xf32> to vector<8x8xf32>
    %373 = arith.divf %369, %372 : vector<8x8xf32>
    %cst_167 = arith.constant dense<0.000000e+00> : vector<8x16xf32>
    %374 = tpu.matmul %373, %359, %cst_167 {dimension_numbers = #tpu.dot_dimension_numbers<[1], [0], [0], [1], [0, 0, 1, 1], [], []>} : vector<8x8xf32>, vector<8x16xf32>, vector<8x16xf32> -> vector<8x16xf32>
    %375 = tpu.concatenate %356, %374 in 0 : vector<8x16xf32>, vector<8x16xf32> -> vector<16x16xf32>
    %376 = vector.extract_strided_slice %248 {offsets = [1, 0, 0], sizes = [1, 16, 32], strides = [1, 1, 1]} : vector<2x16x32xf32> to vector<1x16x32xf32>
    %377 = vector.shape_cast %376 : vector<1x16x32xf32> to vector<16x32xf32>
    %cst_168 = arith.constant dense<0.000000e+00> : vector<16x32xf32>
    %378 = tpu.matmul %375, %377, %cst_168 {dimension_numbers = #tpu.dot_dimension_numbers<[1], [0], [0], [1], [0, 0, 1, 1], [], []>} : vector<16x16xf32>, vector<16x32xf32>, vector<16x32xf32> -> vector<16x32xf32>
    %379 = arith.addf %315, %378 : vector<16x32xf32>
    %380 = arith.addf %234, %379 : vector<16x32xf32>
    %c1_169 = arith.constant 1 : index
    %c0_170 = arith.constant 0 : index
    %c0_171 = arith.constant 0 : index
    %381 = vector.load %arg18[%c1_169, %c0_170, %c0_171] : memref<3x1x32xf32, #tpu.memory_space<vmem>>, vector<1x1x32xf32>
    %382 = vector.shape_cast %381 : vector<1x1x32xf32> to vector<1x32xf32>
    %c1_172 = arith.constant 1 : index
    %c0_173 = arith.constant 0 : index
    %c0_174 = arith.constant 0 : index
    %383 = vector.load %arg19[%c1_172, %c0_173, %c0_174] : memref<3x1x32xf32, #tpu.memory_space<vmem>>, vector<1x1x32xf32>
    %384 = vector.shape_cast %383 : vector<1x1x32xf32> to vector<1x32xf32>
    %cst_175 = arith.constant dense<0.000000e+00> : vector<16xf32>
    %385 = vector.multi_reduction <add>, %380, %cst_175 [1] : vector<16x32xf32> to vector<16xf32>
    %386 = vector.shape_cast %385 : vector<16xf32> to vector<16x1xf32>
    %cst_176 = arith.constant 3.200000e+01 : f32
    %387 = vector.broadcast %cst_176 : f32 to vector<16x1xf32>
    %388 = arith.divf %386, %387 : vector<16x1xf32>
    %389 = vector.broadcast %388 : vector<16x1xf32> to vector<16x32xf32>
    %390 = arith.subf %380, %389 : vector<16x32xf32>
    %391 = arith.mulf %390, %390 : vector<16x32xf32>
    %cst_177 = arith.constant dense<0.000000e+00> : vector<16xf32>
    %392 = vector.multi_reduction <add>, %391, %cst_177 [1] : vector<16x32xf32> to vector<16xf32>
    %393 = vector.shape_cast %392 : vector<16xf32> to vector<16x1xf32>
    %cst_178 = arith.constant 3.200000e+01 : f32
    %394 = vector.broadcast %cst_178 : f32 to vector<16x1xf32>
    %395 = arith.divf %393, %394 : vector<16x1xf32>
    %cst_179 = arith.constant 9.99999974E-6 : f32
    %396 = vector.broadcast %cst_179 : f32 to vector<16x1xf32>
    %397 = arith.addf %395, %396 : vector<16x1xf32>
    %398 = math.rsqrt %397 : vector<16x1xf32>
    %399 = vector.broadcast %398 : vector<16x1xf32> to vector<16x32xf32>
    %400 = arith.mulf %390, %399 : vector<16x32xf32>
    %401 = vector.broadcast %382 : vector<1x32xf32> to vector<16x32xf32>
    %402 = arith.mulf %400, %401 : vector<16x32xf32>
    %403 = vector.broadcast %384 : vector<1x32xf32> to vector<16x32xf32>
    %404 = arith.addf %402, %403 : vector<16x32xf32>
    %c1_180 = arith.constant 1 : index
    %c0_181 = arith.constant 0 : index
    %c0_182 = arith.constant 0 : index
    %405 = vector.load %arg20[%c1_180, %c0_181, %c0_182] : memref<3x32x2048xf32, #tpu.memory_space<vmem>>, vector<1x32x2048xf32>
    %406 = vector.shape_cast %405 : vector<1x32x2048xf32> to vector<32x2048xf32>
    %cst_183 = arith.constant dense<0.000000e+00> : vector<16x2048xf32>
    %407 = tpu.matmul %404, %406, %cst_183 {dimension_numbers = #tpu.dot_dimension_numbers<[1], [0], [0], [1], [0, 0, 1, 1], [], []>} : vector<16x32xf32>, vector<32x2048xf32>, vector<16x2048xf32> -> vector<16x2048xf32>
    %c1_184 = arith.constant 1 : index
    %c0_185 = arith.constant 0 : index
    %c0_186 = arith.constant 0 : index
    %408 = vector.load %arg21[%c1_184, %c0_185, %c0_186] : memref<3x1x2048xf32, #tpu.memory_space<vmem>>, vector<1x1x2048xf32>
    %409 = vector.shape_cast %408 : vector<1x1x2048xf32> to vector<1x2048xf32>
    %410 = vector.broadcast %409 : vector<1x2048xf32> to vector<16x2048xf32>
    %411 = arith.addf %407, %410 : vector<16x2048xf32>
    %cst_187 = arith.constant 0.000000e+00 : f32
    %412 = vector.broadcast %cst_187 : f32 to vector<16x2048xf32>
    %413 = arith.maximumf %411, %412 : vector<16x2048xf32>
    %c1_188 = arith.constant 1 : index
    %c0_189 = arith.constant 0 : index
    %c0_190 = arith.constant 0 : index
    %414 = vector.load %arg22[%c1_188, %c0_189, %c0_190] : memref<3x2048x32xf32, #tpu.memory_space<vmem>>, vector<1x2048x32xf32>
    %415 = vector.shape_cast %414 : vector<1x2048x32xf32> to vector<2048x32xf32>
    %cst_191 = arith.constant dense<0.000000e+00> : vector<16x32xf32>
    %416 = tpu.matmul %413, %415, %cst_191 {dimension_numbers = #tpu.dot_dimension_numbers<[1], [0], [0], [1], [0, 0, 1, 1], [], []>} : vector<16x2048xf32>, vector<2048x32xf32>, vector<16x32xf32> -> vector<16x32xf32>
    %c1_192 = arith.constant 1 : index
    %c0_193 = arith.constant 0 : index
    %c0_194 = arith.constant 0 : index
    %417 = vector.load %arg23[%c1_192, %c0_193, %c0_194] : memref<3x1x32xf32, #tpu.memory_space<vmem>>, vector<1x1x32xf32>
    %418 = vector.shape_cast %417 : vector<1x1x32xf32> to vector<1x32xf32>
    %419 = vector.broadcast %418 : vector<1x32xf32> to vector<16x32xf32>
    %420 = arith.addf %416, %419 : vector<16x32xf32>
    %421 = arith.addf %404, %420 : vector<16x32xf32>
    %c1_195 = arith.constant 1 : index
    %c0_196 = arith.constant 0 : index
    %c0_197 = arith.constant 0 : index
    %422 = vector.load %arg24[%c1_195, %c0_196, %c0_197] : memref<3x1x32xf32, #tpu.memory_space<vmem>>, vector<1x1x32xf32>
    %423 = vector.shape_cast %422 : vector<1x1x32xf32> to vector<1x32xf32>
    %c1_198 = arith.constant 1 : index
    %c0_199 = arith.constant 0 : index
    %c0_200 = arith.constant 0 : index
    %424 = vector.load %arg25[%c1_198, %c0_199, %c0_200] : memref<3x1x32xf32, #tpu.memory_space<vmem>>, vector<1x1x32xf32>
    %425 = vector.shape_cast %424 : vector<1x1x32xf32> to vector<1x32xf32>
    %cst_201 = arith.constant dense<0.000000e+00> : vector<16xf32>
    %426 = vector.multi_reduction <add>, %421, %cst_201 [1] : vector<16x32xf32> to vector<16xf32>
    %427 = vector.shape_cast %426 : vector<16xf32> to vector<16x1xf32>
    %cst_202 = arith.constant 3.200000e+01 : f32
    %428 = vector.broadcast %cst_202 : f32 to vector<16x1xf32>
    %429 = arith.divf %427, %428 : vector<16x1xf32>
    %430 = vector.broadcast %429 : vector<16x1xf32> to vector<16x32xf32>
    %431 = arith.subf %421, %430 : vector<16x32xf32>
    %432 = arith.mulf %431, %431 : vector<16x32xf32>
    %cst_203 = arith.constant dense<0.000000e+00> : vector<16xf32>
    %433 = vector.multi_reduction <add>, %432, %cst_203 [1] : vector<16x32xf32> to vector<16xf32>
    %434 = vector.shape_cast %433 : vector<16xf32> to vector<16x1xf32>
    %cst_204 = arith.constant 3.200000e+01 : f32
    %435 = vector.broadcast %cst_204 : f32 to vector<16x1xf32>
    %436 = arith.divf %434, %435 : vector<16x1xf32>
    %cst_205 = arith.constant 9.99999974E-6 : f32
    %437 = vector.broadcast %cst_205 : f32 to vector<16x1xf32>
    %438 = arith.addf %436, %437 : vector<16x1xf32>
    %439 = math.rsqrt %438 : vector<16x1xf32>
    %440 = vector.broadcast %439 : vector<16x1xf32> to vector<16x32xf32>
    %441 = arith.mulf %431, %440 : vector<16x32xf32>
    %442 = vector.broadcast %423 : vector<1x32xf32> to vector<16x32xf32>
    %443 = arith.mulf %441, %442 : vector<16x32xf32>
    %444 = vector.broadcast %425 : vector<1x32xf32> to vector<16x32xf32>
    %445 = arith.addf %443, %444 : vector<16x32xf32>
    %c2 = arith.constant 2 : index
    %c0_206 = arith.constant 0 : index
    %c0_207 = arith.constant 0 : index
    %c0_208 = arith.constant 0 : index
    %446 = vector.load %arg10[%c2, %c0_206, %c0_207, %c0_208] : memref<3x2x32x16xf32, #tpu.memory_space<vmem>>, vector<1x2x32x16xf32>
    %447 = vector.shape_cast %446 : vector<1x2x32x16xf32> to vector<2x32x16xf32>
    %c2_209 = arith.constant 2 : index
    %c0_210 = arith.constant 0 : index
    %c0_211 = arith.constant 0 : index
    %c0_212 = arith.constant 0 : index
    %448 = vector.load %arg11[%c2_209, %c0_210, %c0_211, %c0_212] : memref<3x2x32x16xf32, #tpu.memory_space<vmem>>, vector<1x2x32x16xf32>
    %449 = vector.shape_cast %448 : vector<1x2x32x16xf32> to vector<2x32x16xf32>
    %c2_213 = arith.constant 2 : index
    %c0_214 = arith.constant 0 : index
    %c0_215 = arith.constant 0 : index
    %c0_216 = arith.constant 0 : index
    %450 = vector.load %arg12[%c2_213, %c0_214, %c0_215, %c0_216] : memref<3x2x32x16xf32, #tpu.memory_space<vmem>>, vector<1x2x32x16xf32>
    %451 = vector.shape_cast %450 : vector<1x2x32x16xf32> to vector<2x32x16xf32>
    %c2_217 = arith.constant 2 : index
    %c0_218 = arith.constant 0 : index
    %c0_219 = arith.constant 0 : index
    %c0_220 = arith.constant 0 : index
    %452 = vector.load %arg13[%c2_217, %c0_218, %c0_219, %c0_220] : memref<3x2x1x16xf32, #tpu.memory_space<vmem>>, vector<1x2x1x16xf32>
    %453 = vector.shape_cast %452 : vector<1x2x1x16xf32> to vector<2x1x16xf32>
    %c2_221 = arith.constant 2 : index
    %c0_222 = arith.constant 0 : index
    %c0_223 = arith.constant 0 : index
    %c0_224 = arith.constant 0 : index
    %454 = vector.load %arg14[%c2_221, %c0_222, %c0_223, %c0_224] : memref<3x2x1x16xf32, #tpu.memory_space<vmem>>, vector<1x2x1x16xf32>
    %455 = vector.shape_cast %454 : vector<1x2x1x16xf32> to vector<2x1x16xf32>
    %c2_225 = arith.constant 2 : index
    %c0_226 = arith.constant 0 : index
    %c0_227 = arith.constant 0 : index
    %c0_228 = arith.constant 0 : index
    %456 = vector.load %arg15[%c2_225, %c0_226, %c0_227, %c0_228] : memref<3x2x1x16xf32, #tpu.memory_space<vmem>>, vector<1x2x1x16xf32>
    %457 = vector.shape_cast %456 : vector<1x2x1x16xf32> to vector<2x1x16xf32>
    %c2_229 = arith.constant 2 : index
    %c0_230 = arith.constant 0 : index
    %c0_231 = arith.constant 0 : index
    %c0_232 = arith.constant 0 : index
    %458 = vector.load %arg16[%c2_229, %c0_230, %c0_231, %c0_232] : memref<3x2x16x32xf32, #tpu.memory_space<vmem>>, vector<1x2x16x32xf32>
    %459 = vector.shape_cast %458 : vector<1x2x16x32xf32> to vector<2x16x32xf32>
    %c2_233 = arith.constant 2 : index
    %c0_234 = arith.constant 0 : index
    %c0_235 = arith.constant 0 : index
    %460 = vector.load %arg17[%c2_233, %c0_234, %c0_235] : memref<3x1x32xf32, #tpu.memory_space<vmem>>, vector<1x1x32xf32>
    %461 = vector.shape_cast %460 : vector<1x1x32xf32> to vector<1x32xf32>
    %462 = vector.extract_strided_slice %447 {offsets = [0, 0, 0], sizes = [1, 32, 16], strides = [1, 1, 1]} : vector<2x32x16xf32> to vector<1x32x16xf32>
    %463 = vector.shape_cast %462 : vector<1x32x16xf32> to vector<32x16xf32>
    %cst_236 = arith.constant dense<0.000000e+00> : vector<16x16xf32>
    %464 = tpu.matmul %445, %463, %cst_236 {dimension_numbers = #tpu.dot_dimension_numbers<[1], [0], [0], [1], [0, 0, 1, 1], [], []>} : vector<16x32xf32>, vector<32x16xf32>, vector<16x16xf32> -> vector<16x16xf32>
    %465 = vector.extract_strided_slice %453 {offsets = [0, 0, 0], sizes = [1, 1, 16], strides = [1, 1, 1]} : vector<2x1x16xf32> to vector<1x1x16xf32>
    %466 = vector.shape_cast %465 : vector<1x1x16xf32> to vector<1x16xf32>
    %467 = vector.broadcast %466 : vector<1x16xf32> to vector<16x16xf32>
    %468 = arith.addf %464, %467 : vector<16x16xf32>
    %cst_237 = arith.constant 2.500000e-01 : f32
    %469 = vector.broadcast %cst_237 : f32 to vector<16x16xf32>
    %470 = arith.mulf %468, %469 : vector<16x16xf32>
    %471 = vector.extract_strided_slice %449 {offsets = [0, 0, 0], sizes = [1, 32, 16], strides = [1, 1, 1]} : vector<2x32x16xf32> to vector<1x32x16xf32>
    %472 = vector.shape_cast %471 : vector<1x32x16xf32> to vector<32x16xf32>
    %cst_238 = arith.constant dense<0.000000e+00> : vector<16x16xf32>
    %473 = tpu.matmul %445, %472, %cst_238 {dimension_numbers = #tpu.dot_dimension_numbers<[1], [0], [0], [1], [0, 0, 1, 1], [], []>} : vector<16x32xf32>, vector<32x16xf32>, vector<16x16xf32> -> vector<16x16xf32>
    %474 = vector.extract_strided_slice %455 {offsets = [0, 0, 0], sizes = [1, 1, 16], strides = [1, 1, 1]} : vector<2x1x16xf32> to vector<1x1x16xf32>
    %475 = vector.shape_cast %474 : vector<1x1x16xf32> to vector<1x16xf32>
    %476 = vector.broadcast %475 : vector<1x16xf32> to vector<16x16xf32>
    %477 = arith.addf %473, %476 : vector<16x16xf32>
    %478 = vector.extract_strided_slice %451 {offsets = [0, 0, 0], sizes = [1, 32, 16], strides = [1, 1, 1]} : vector<2x32x16xf32> to vector<1x32x16xf32>
    %479 = vector.shape_cast %478 : vector<1x32x16xf32> to vector<32x16xf32>
    %cst_239 = arith.constant dense<0.000000e+00> : vector<16x16xf32>
    %480 = tpu.matmul %445, %479, %cst_239 {dimension_numbers = #tpu.dot_dimension_numbers<[1], [0], [0], [1], [0, 0, 1, 1], [], []>} : vector<16x32xf32>, vector<32x16xf32>, vector<16x16xf32> -> vector<16x16xf32>
    %481 = vector.extract_strided_slice %457 {offsets = [0, 0, 0], sizes = [1, 1, 16], strides = [1, 1, 1]} : vector<2x1x16xf32> to vector<1x1x16xf32>
    %482 = vector.shape_cast %481 : vector<1x1x16xf32> to vector<1x16xf32>
    %483 = vector.broadcast %482 : vector<1x16xf32> to vector<16x16xf32>
    %484 = arith.addf %480, %483 : vector<16x16xf32>
    %485 = vector.extract_strided_slice %470 {offsets = [0, 0], sizes = [8, 16], strides = [1, 1]} : vector<16x16xf32> to vector<8x16xf32>
    %486 = vector.extract_strided_slice %477 {offsets = [0, 0], sizes = [8, 16], strides = [1, 1]} : vector<16x16xf32> to vector<8x16xf32>
    %487 = vector.extract_strided_slice %484 {offsets = [0, 0], sizes = [8, 16], strides = [1, 1]} : vector<16x16xf32> to vector<8x16xf32>
    %cst_240 = arith.constant dense<0.000000e+00> : vector<8x8xf32>
    %488 = tpu.matmul %485, %486, %cst_240 {dimension_numbers = #tpu.dot_dimension_numbers<[1], [1], [0], [0], [0, 0, 1, 0], [], []>} : vector<8x16xf32>, vector<8x16xf32>, vector<8x8xf32> -> vector<8x8xf32>
    %489 = vector.extract_strided_slice %23 {offsets = [0, 0, 0], sizes = [1, 1, 8], strides = [1, 1, 1]} : vector<2x1x8xf32> to vector<1x1x8xf32>
    %490 = vector.shape_cast %489 : vector<1x1x8xf32> to vector<1x8xf32>
    %491 = vector.broadcast %490 : vector<1x8xf32> to vector<8x8xf32>
    %492 = arith.addf %488, %491 : vector<8x8xf32>
    %cst_241 = arith.constant dense<0xFF800000> : vector<8xf32>
    %493 = vector.multi_reduction <maximumf>, %492, %cst_241 [1] : vector<8x8xf32> to vector<8xf32>
    %494 = vector.shape_cast %493 : vector<8xf32> to vector<8x1xf32>
    %495 = vector.broadcast %494 : vector<8x1xf32> to vector<8x8xf32>
    %496 = arith.subf %492, %495 : vector<8x8xf32>
    %497 = math.exp %496 : vector<8x8xf32>
    %cst_242 = arith.constant dense<0.000000e+00> : vector<8xf32>
    %498 = vector.multi_reduction <add>, %497, %cst_242 [1] : vector<8x8xf32> to vector<8xf32>
    %499 = vector.shape_cast %498 : vector<8xf32> to vector<8x1xf32>
    %500 = vector.broadcast %499 : vector<8x1xf32> to vector<8x8xf32>
    %501 = arith.divf %497, %500 : vector<8x8xf32>
    %cst_243 = arith.constant dense<0.000000e+00> : vector<8x16xf32>
    %502 = tpu.matmul %501, %487, %cst_243 {dimension_numbers = #tpu.dot_dimension_numbers<[1], [0], [0], [1], [0, 0, 1, 1], [], []>} : vector<8x8xf32>, vector<8x16xf32>, vector<8x16xf32> -> vector<8x16xf32>
    %503 = vector.extract_strided_slice %470 {offsets = [8, 0], sizes = [8, 16], strides = [1, 1]} : vector<16x16xf32> to vector<8x16xf32>
    %504 = vector.extract_strided_slice %477 {offsets = [8, 0], sizes = [8, 16], strides = [1, 1]} : vector<16x16xf32> to vector<8x16xf32>
    %505 = vector.extract_strided_slice %484 {offsets = [8, 0], sizes = [8, 16], strides = [1, 1]} : vector<16x16xf32> to vector<8x16xf32>
    %cst_244 = arith.constant dense<0.000000e+00> : vector<8x8xf32>
    %506 = tpu.matmul %503, %504, %cst_244 {dimension_numbers = #tpu.dot_dimension_numbers<[1], [1], [0], [0], [0, 0, 1, 0], [], []>} : vector<8x16xf32>, vector<8x16xf32>, vector<8x8xf32> -> vector<8x8xf32>
    %507 = vector.extract_strided_slice %23 {offsets = [1, 0, 0], sizes = [1, 1, 8], strides = [1, 1, 1]} : vector<2x1x8xf32> to vector<1x1x8xf32>
    %508 = vector.shape_cast %507 : vector<1x1x8xf32> to vector<1x8xf32>
    %509 = vector.broadcast %508 : vector<1x8xf32> to vector<8x8xf32>
    %510 = arith.addf %506, %509 : vector<8x8xf32>
    %cst_245 = arith.constant dense<0xFF800000> : vector<8xf32>
    %511 = vector.multi_reduction <maximumf>, %510, %cst_245 [1] : vector<8x8xf32> to vector<8xf32>
    %512 = vector.shape_cast %511 : vector<8xf32> to vector<8x1xf32>
    %513 = vector.broadcast %512 : vector<8x1xf32> to vector<8x8xf32>
    %514 = arith.subf %510, %513 : vector<8x8xf32>
    %515 = math.exp %514 : vector<8x8xf32>
    %cst_246 = arith.constant dense<0.000000e+00> : vector<8xf32>
    %516 = vector.multi_reduction <add>, %515, %cst_246 [1] : vector<8x8xf32> to vector<8xf32>
    %517 = vector.shape_cast %516 : vector<8xf32> to vector<8x1xf32>
    %518 = vector.broadcast %517 : vector<8x1xf32> to vector<8x8xf32>
    %519 = arith.divf %515, %518 : vector<8x8xf32>
    %cst_247 = arith.constant dense<0.000000e+00> : vector<8x16xf32>
    %520 = tpu.matmul %519, %505, %cst_247 {dimension_numbers = #tpu.dot_dimension_numbers<[1], [0], [0], [1], [0, 0, 1, 1], [], []>} : vector<8x8xf32>, vector<8x16xf32>, vector<8x16xf32> -> vector<8x16xf32>
    %521 = tpu.concatenate %502, %520 in 0 : vector<8x16xf32>, vector<8x16xf32> -> vector<16x16xf32>
    %522 = vector.extract_strided_slice %459 {offsets = [0, 0, 0], sizes = [1, 16, 32], strides = [1, 1, 1]} : vector<2x16x32xf32> to vector<1x16x32xf32>
    %523 = vector.shape_cast %522 : vector<1x16x32xf32> to vector<16x32xf32>
    %cst_248 = arith.constant dense<0.000000e+00> : vector<16x32xf32>
    %524 = tpu.matmul %521, %523, %cst_248 {dimension_numbers = #tpu.dot_dimension_numbers<[1], [0], [0], [1], [0, 0, 1, 1], [], []>} : vector<16x16xf32>, vector<16x32xf32>, vector<16x32xf32> -> vector<16x32xf32>
    %525 = vector.broadcast %461 : vector<1x32xf32> to vector<16x32xf32>
    %526 = arith.addf %525, %524 : vector<16x32xf32>
    %527 = vector.extract_strided_slice %447 {offsets = [1, 0, 0], sizes = [1, 32, 16], strides = [1, 1, 1]} : vector<2x32x16xf32> to vector<1x32x16xf32>
    %528 = vector.shape_cast %527 : vector<1x32x16xf32> to vector<32x16xf32>
    %cst_249 = arith.constant dense<0.000000e+00> : vector<16x16xf32>
    %529 = tpu.matmul %445, %528, %cst_249 {dimension_numbers = #tpu.dot_dimension_numbers<[1], [0], [0], [1], [0, 0, 1, 1], [], []>} : vector<16x32xf32>, vector<32x16xf32>, vector<16x16xf32> -> vector<16x16xf32>
    %530 = vector.extract_strided_slice %453 {offsets = [1, 0, 0], sizes = [1, 1, 16], strides = [1, 1, 1]} : vector<2x1x16xf32> to vector<1x1x16xf32>
    %531 = vector.shape_cast %530 : vector<1x1x16xf32> to vector<1x16xf32>
    %532 = vector.broadcast %531 : vector<1x16xf32> to vector<16x16xf32>
    %533 = arith.addf %529, %532 : vector<16x16xf32>
    %cst_250 = arith.constant 2.500000e-01 : f32
    %534 = vector.broadcast %cst_250 : f32 to vector<16x16xf32>
    %535 = arith.mulf %533, %534 : vector<16x16xf32>
    %536 = vector.extract_strided_slice %449 {offsets = [1, 0, 0], sizes = [1, 32, 16], strides = [1, 1, 1]} : vector<2x32x16xf32> to vector<1x32x16xf32>
    %537 = vector.shape_cast %536 : vector<1x32x16xf32> to vector<32x16xf32>
    %cst_251 = arith.constant dense<0.000000e+00> : vector<16x16xf32>
    %538 = tpu.matmul %445, %537, %cst_251 {dimension_numbers = #tpu.dot_dimension_numbers<[1], [0], [0], [1], [0, 0, 1, 1], [], []>} : vector<16x32xf32>, vector<32x16xf32>, vector<16x16xf32> -> vector<16x16xf32>
    %539 = vector.extract_strided_slice %455 {offsets = [1, 0, 0], sizes = [1, 1, 16], strides = [1, 1, 1]} : vector<2x1x16xf32> to vector<1x1x16xf32>
    %540 = vector.shape_cast %539 : vector<1x1x16xf32> to vector<1x16xf32>
    %541 = vector.broadcast %540 : vector<1x16xf32> to vector<16x16xf32>
    %542 = arith.addf %538, %541 : vector<16x16xf32>
    %543 = vector.extract_strided_slice %451 {offsets = [1, 0, 0], sizes = [1, 32, 16], strides = [1, 1, 1]} : vector<2x32x16xf32> to vector<1x32x16xf32>
    %544 = vector.shape_cast %543 : vector<1x32x16xf32> to vector<32x16xf32>
    %cst_252 = arith.constant dense<0.000000e+00> : vector<16x16xf32>
    %545 = tpu.matmul %445, %544, %cst_252 {dimension_numbers = #tpu.dot_dimension_numbers<[1], [0], [0], [1], [0, 0, 1, 1], [], []>} : vector<16x32xf32>, vector<32x16xf32>, vector<16x16xf32> -> vector<16x16xf32>
    %546 = vector.extract_strided_slice %457 {offsets = [1, 0, 0], sizes = [1, 1, 16], strides = [1, 1, 1]} : vector<2x1x16xf32> to vector<1x1x16xf32>
    %547 = vector.shape_cast %546 : vector<1x1x16xf32> to vector<1x16xf32>
    %548 = vector.broadcast %547 : vector<1x16xf32> to vector<16x16xf32>
    %549 = arith.addf %545, %548 : vector<16x16xf32>
    %550 = vector.extract_strided_slice %535 {offsets = [0, 0], sizes = [8, 16], strides = [1, 1]} : vector<16x16xf32> to vector<8x16xf32>
    %551 = vector.extract_strided_slice %542 {offsets = [0, 0], sizes = [8, 16], strides = [1, 1]} : vector<16x16xf32> to vector<8x16xf32>
    %552 = vector.extract_strided_slice %549 {offsets = [0, 0], sizes = [8, 16], strides = [1, 1]} : vector<16x16xf32> to vector<8x16xf32>
    %cst_253 = arith.constant dense<0.000000e+00> : vector<8x8xf32>
    %553 = tpu.matmul %550, %551, %cst_253 {dimension_numbers = #tpu.dot_dimension_numbers<[1], [1], [0], [0], [0, 0, 1, 0], [], []>} : vector<8x16xf32>, vector<8x16xf32>, vector<8x8xf32> -> vector<8x8xf32>
    %554 = vector.extract_strided_slice %23 {offsets = [0, 0, 0], sizes = [1, 1, 8], strides = [1, 1, 1]} : vector<2x1x8xf32> to vector<1x1x8xf32>
    %555 = vector.shape_cast %554 : vector<1x1x8xf32> to vector<1x8xf32>
    %556 = vector.broadcast %555 : vector<1x8xf32> to vector<8x8xf32>
    %557 = arith.addf %553, %556 : vector<8x8xf32>
    %cst_254 = arith.constant dense<0xFF800000> : vector<8xf32>
    %558 = vector.multi_reduction <maximumf>, %557, %cst_254 [1] : vector<8x8xf32> to vector<8xf32>
    %559 = vector.shape_cast %558 : vector<8xf32> to vector<8x1xf32>
    %560 = vector.broadcast %559 : vector<8x1xf32> to vector<8x8xf32>
    %561 = arith.subf %557, %560 : vector<8x8xf32>
    %562 = math.exp %561 : vector<8x8xf32>
    %cst_255 = arith.constant dense<0.000000e+00> : vector<8xf32>
    %563 = vector.multi_reduction <add>, %562, %cst_255 [1] : vector<8x8xf32> to vector<8xf32>
    %564 = vector.shape_cast %563 : vector<8xf32> to vector<8x1xf32>
    %565 = vector.broadcast %564 : vector<8x1xf32> to vector<8x8xf32>
    %566 = arith.divf %562, %565 : vector<8x8xf32>
    %cst_256 = arith.constant dense<0.000000e+00> : vector<8x16xf32>
    %567 = tpu.matmul %566, %552, %cst_256 {dimension_numbers = #tpu.dot_dimension_numbers<[1], [0], [0], [1], [0, 0, 1, 1], [], []>} : vector<8x8xf32>, vector<8x16xf32>, vector<8x16xf32> -> vector<8x16xf32>
    %568 = vector.extract_strided_slice %535 {offsets = [8, 0], sizes = [8, 16], strides = [1, 1]} : vector<16x16xf32> to vector<8x16xf32>
    %569 = vector.extract_strided_slice %542 {offsets = [8, 0], sizes = [8, 16], strides = [1, 1]} : vector<16x16xf32> to vector<8x16xf32>
    %570 = vector.extract_strided_slice %549 {offsets = [8, 0], sizes = [8, 16], strides = [1, 1]} : vector<16x16xf32> to vector<8x16xf32>
    %cst_257 = arith.constant dense<0.000000e+00> : vector<8x8xf32>
    %571 = tpu.matmul %568, %569, %cst_257 {dimension_numbers = #tpu.dot_dimension_numbers<[1], [1], [0], [0], [0, 0, 1, 0], [], []>} : vector<8x16xf32>, vector<8x16xf32>, vector<8x8xf32> -> vector<8x8xf32>
    %572 = vector.extract_strided_slice %23 {offsets = [1, 0, 0], sizes = [1, 1, 8], strides = [1, 1, 1]} : vector<2x1x8xf32> to vector<1x1x8xf32>
    %573 = vector.shape_cast %572 : vector<1x1x8xf32> to vector<1x8xf32>
    %574 = vector.broadcast %573 : vector<1x8xf32> to vector<8x8xf32>
    %575 = arith.addf %571, %574 : vector<8x8xf32>
    %cst_258 = arith.constant dense<0xFF800000> : vector<8xf32>
    %576 = vector.multi_reduction <maximumf>, %575, %cst_258 [1] : vector<8x8xf32> to vector<8xf32>
    %577 = vector.shape_cast %576 : vector<8xf32> to vector<8x1xf32>
    %578 = vector.broadcast %577 : vector<8x1xf32> to vector<8x8xf32>
    %579 = arith.subf %575, %578 : vector<8x8xf32>
    %580 = math.exp %579 : vector<8x8xf32>
    %cst_259 = arith.constant dense<0.000000e+00> : vector<8xf32>
    %581 = vector.multi_reduction <add>, %580, %cst_259 [1] : vector<8x8xf32> to vector<8xf32>
    %582 = vector.shape_cast %581 : vector<8xf32> to vector<8x1xf32>
    %583 = vector.broadcast %582 : vector<8x1xf32> to vector<8x8xf32>
    %584 = arith.divf %580, %583 : vector<8x8xf32>
    %cst_260 = arith.constant dense<0.000000e+00> : vector<8x16xf32>
    %585 = tpu.matmul %584, %570, %cst_260 {dimension_numbers = #tpu.dot_dimension_numbers<[1], [0], [0], [1], [0, 0, 1, 1], [], []>} : vector<8x8xf32>, vector<8x16xf32>, vector<8x16xf32> -> vector<8x16xf32>
    %586 = tpu.concatenate %567, %585 in 0 : vector<8x16xf32>, vector<8x16xf32> -> vector<16x16xf32>
    %587 = vector.extract_strided_slice %459 {offsets = [1, 0, 0], sizes = [1, 16, 32], strides = [1, 1, 1]} : vector<2x16x32xf32> to vector<1x16x32xf32>
    %588 = vector.shape_cast %587 : vector<1x16x32xf32> to vector<16x32xf32>
    %cst_261 = arith.constant dense<0.000000e+00> : vector<16x32xf32>
    %589 = tpu.matmul %586, %588, %cst_261 {dimension_numbers = #tpu.dot_dimension_numbers<[1], [0], [0], [1], [0, 0, 1, 1], [], []>} : vector<16x16xf32>, vector<16x32xf32>, vector<16x32xf32> -> vector<16x32xf32>
    %590 = arith.addf %526, %589 : vector<16x32xf32>
    %591 = arith.addf %445, %590 : vector<16x32xf32>
    %c2_262 = arith.constant 2 : index
    %c0_263 = arith.constant 0 : index
    %c0_264 = arith.constant 0 : index
    %592 = vector.load %arg18[%c2_262, %c0_263, %c0_264] : memref<3x1x32xf32, #tpu.memory_space<vmem>>, vector<1x1x32xf32>
    %593 = vector.shape_cast %592 : vector<1x1x32xf32> to vector<1x32xf32>
    %c2_265 = arith.constant 2 : index
    %c0_266 = arith.constant 0 : index
    %c0_267 = arith.constant 0 : index
    %594 = vector.load %arg19[%c2_265, %c0_266, %c0_267] : memref<3x1x32xf32, #tpu.memory_space<vmem>>, vector<1x1x32xf32>
    %595 = vector.shape_cast %594 : vector<1x1x32xf32> to vector<1x32xf32>
    %cst_268 = arith.constant dense<0.000000e+00> : vector<16xf32>
    %596 = vector.multi_reduction <add>, %591, %cst_268 [1] : vector<16x32xf32> to vector<16xf32>
    %597 = vector.shape_cast %596 : vector<16xf32> to vector<16x1xf32>
    %cst_269 = arith.constant 3.200000e+01 : f32
    %598 = vector.broadcast %cst_269 : f32 to vector<16x1xf32>
    %599 = arith.divf %597, %598 : vector<16x1xf32>
    %600 = vector.broadcast %599 : vector<16x1xf32> to vector<16x32xf32>
    %601 = arith.subf %591, %600 : vector<16x32xf32>
    %602 = arith.mulf %601, %601 : vector<16x32xf32>
    %cst_270 = arith.constant dense<0.000000e+00> : vector<16xf32>
    %603 = vector.multi_reduction <add>, %602, %cst_270 [1] : vector<16x32xf32> to vector<16xf32>
    %604 = vector.shape_cast %603 : vector<16xf32> to vector<16x1xf32>
    %cst_271 = arith.constant 3.200000e+01 : f32
    %605 = vector.broadcast %cst_271 : f32 to vector<16x1xf32>
    %606 = arith.divf %604, %605 : vector<16x1xf32>
    %cst_272 = arith.constant 9.99999974E-6 : f32
    %607 = vector.broadcast %cst_272 : f32 to vector<16x1xf32>
    %608 = arith.addf %606, %607 : vector<16x1xf32>
    %609 = math.rsqrt %608 : vector<16x1xf32>
    %610 = vector.broadcast %609 : vector<16x1xf32> to vector<16x32xf32>
    %611 = arith.mulf %601, %610 : vector<16x32xf32>
    %612 = vector.broadcast %593 : vector<1x32xf32> to vector<16x32xf32>
    %613 = arith.mulf %611, %612 : vector<16x32xf32>
    %614 = vector.broadcast %595 : vector<1x32xf32> to vector<16x32xf32>
    %615 = arith.addf %613, %614 : vector<16x32xf32>
    %c2_273 = arith.constant 2 : index
    %c0_274 = arith.constant 0 : index
    %c0_275 = arith.constant 0 : index
    %616 = vector.load %arg20[%c2_273, %c0_274, %c0_275] : memref<3x32x2048xf32, #tpu.memory_space<vmem>>, vector<1x32x2048xf32>
    %617 = vector.shape_cast %616 : vector<1x32x2048xf32> to vector<32x2048xf32>
    %cst_276 = arith.constant dense<0.000000e+00> : vector<16x2048xf32>
    %618 = tpu.matmul %615, %617, %cst_276 {dimension_numbers = #tpu.dot_dimension_numbers<[1], [0], [0], [1], [0, 0, 1, 1], [], []>} : vector<16x32xf32>, vector<32x2048xf32>, vector<16x2048xf32> -> vector<16x2048xf32>
    %c2_277 = arith.constant 2 : index
    %c0_278 = arith.constant 0 : index
    %c0_279 = arith.constant 0 : index
    %619 = vector.load %arg21[%c2_277, %c0_278, %c0_279] : memref<3x1x2048xf32, #tpu.memory_space<vmem>>, vector<1x1x2048xf32>
    %620 = vector.shape_cast %619 : vector<1x1x2048xf32> to vector<1x2048xf32>
    %621 = vector.broadcast %620 : vector<1x2048xf32> to vector<16x2048xf32>
    %622 = arith.addf %618, %621 : vector<16x2048xf32>
    %cst_280 = arith.constant 0.000000e+00 : f32
    %623 = vector.broadcast %cst_280 : f32 to vector<16x2048xf32>
    %624 = arith.maximumf %622, %623 : vector<16x2048xf32>
    %c2_281 = arith.constant 2 : index
    %c0_282 = arith.constant 0 : index
    %c0_283 = arith.constant 0 : index
    %625 = vector.load %arg22[%c2_281, %c0_282, %c0_283] : memref<3x2048x32xf32, #tpu.memory_space<vmem>>, vector<1x2048x32xf32>
    %626 = vector.shape_cast %625 : vector<1x2048x32xf32> to vector<2048x32xf32>
    %cst_284 = arith.constant dense<0.000000e+00> : vector<16x32xf32>
    %627 = tpu.matmul %624, %626, %cst_284 {dimension_numbers = #tpu.dot_dimension_numbers<[1], [0], [0], [1], [0, 0, 1, 1], [], []>} : vector<16x2048xf32>, vector<2048x32xf32>, vector<16x32xf32> -> vector<16x32xf32>
    %c2_285 = arith.constant 2 : index
    %c0_286 = arith.constant 0 : index
    %c0_287 = arith.constant 0 : index
    %628 = vector.load %arg23[%c2_285, %c0_286, %c0_287] : memref<3x1x32xf32, #tpu.memory_space<vmem>>, vector<1x1x32xf32>
    %629 = vector.shape_cast %628 : vector<1x1x32xf32> to vector<1x32xf32>
    %630 = vector.broadcast %629 : vector<1x32xf32> to vector<16x32xf32>
    %631 = arith.addf %627, %630 : vector<16x32xf32>
    %632 = arith.addf %615, %631 : vector<16x32xf32>
    %c2_288 = arith.constant 2 : index
    %c0_289 = arith.constant 0 : index
    %c0_290 = arith.constant 0 : index
    %633 = vector.load %arg24[%c2_288, %c0_289, %c0_290] : memref<3x1x32xf32, #tpu.memory_space<vmem>>, vector<1x1x32xf32>
    %634 = vector.shape_cast %633 : vector<1x1x32xf32> to vector<1x32xf32>
    %c2_291 = arith.constant 2 : index
    %c0_292 = arith.constant 0 : index
    %c0_293 = arith.constant 0 : index
    %635 = vector.load %arg25[%c2_291, %c0_292, %c0_293] : memref<3x1x32xf32, #tpu.memory_space<vmem>>, vector<1x1x32xf32>
    %636 = vector.shape_cast %635 : vector<1x1x32xf32> to vector<1x32xf32>
    %cst_294 = arith.constant dense<0.000000e+00> : vector<16xf32>
    %637 = vector.multi_reduction <add>, %632, %cst_294 [1] : vector<16x32xf32> to vector<16xf32>
    %638 = vector.shape_cast %637 : vector<16xf32> to vector<16x1xf32>
    %cst_295 = arith.constant 3.200000e+01 : f32
    %639 = vector.broadcast %cst_295 : f32 to vector<16x1xf32>
    %640 = arith.divf %638, %639 : vector<16x1xf32>
    %641 = vector.broadcast %640 : vector<16x1xf32> to vector<16x32xf32>
    %642 = arith.subf %632, %641 : vector<16x32xf32>
    %643 = arith.mulf %642, %642 : vector<16x32xf32>
    %cst_296 = arith.constant dense<0.000000e+00> : vector<16xf32>
    %644 = vector.multi_reduction <add>, %643, %cst_296 [1] : vector<16x32xf32> to vector<16xf32>
    %645 = vector.shape_cast %644 : vector<16xf32> to vector<16x1xf32>
    %cst_297 = arith.constant 3.200000e+01 : f32
    %646 = vector.broadcast %cst_297 : f32 to vector<16x1xf32>
    %647 = arith.divf %645, %646 : vector<16x1xf32>
    %cst_298 = arith.constant 9.99999974E-6 : f32
    %648 = vector.broadcast %cst_298 : f32 to vector<16x1xf32>
    %649 = arith.addf %647, %648 : vector<16x1xf32>
    %650 = math.rsqrt %649 : vector<16x1xf32>
    %651 = vector.broadcast %650 : vector<16x1xf32> to vector<16x32xf32>
    %652 = arith.mulf %642, %651 : vector<16x32xf32>
    %653 = vector.broadcast %634 : vector<1x32xf32> to vector<16x32xf32>
    %654 = arith.mulf %652, %653 : vector<16x32xf32>
    %655 = vector.broadcast %636 : vector<1x32xf32> to vector<16x32xf32>
    %656 = arith.addf %654, %655 : vector<16x32xf32>
    %c0_299 = arith.constant 0 : index
    %c0_300 = arith.constant 0 : index
    %c0_301 = arith.constant 0 : index
    %657 = vector.load %arg4[%c0_299, %c0_300, %c0_301] : memref<1x2x300xf32, #tpu.memory_space<vmem>>, vector<1x2x300xf32>
    %658 = vector.shape_cast %657 : vector<1x2x300xf32> to vector<2x300xf32>
    %c0_302 = arith.constant 0 : index
    %c0_303 = arith.constant 0 : index
    %659 = vector.load %arg26[%c0_302, %c0_303] : memref<300x32xf32, #tpu.memory_space<vmem>>, vector<300x32xf32>
    %cst_304 = arith.constant dense<0.000000e+00> : vector<2x32xf32>
    %660 = tpu.matmul %658, %659, %cst_304 {dimension_numbers = #tpu.dot_dimension_numbers<[1], [0], [0], [1], [0, 0, 1, 1], [], []>} : vector<2x300xf32>, vector<300x32xf32>, vector<2x32xf32> -> vector<2x32xf32>
    %c0_305 = arith.constant 0 : index
    %c0_306 = arith.constant 0 : index
    %661 = vector.load %arg27[%c0_305, %c0_306] : memref<1x32xf32, #tpu.memory_space<vmem>>, vector<1x32xf32>
    %662 = vector.broadcast %661 : vector<1x32xf32> to vector<2x32xf32>
    %663 = arith.addf %660, %662 : vector<2x32xf32>
    %c0_307 = arith.constant 0 : index
    %c0_308 = arith.constant 0 : index
    %664 = vector.load %arg30[%c0_307, %c0_308] : memref<1x1024xf32, #tpu.memory_space<vmem>>, vector<1x1024xf32>
    %665 = vector.extract_strided_slice %656 {offsets = [0, 0], sizes = [8, 32], strides = [1, 1]} : vector<16x32xf32> to vector<8x32xf32>
    %c0_309 = arith.constant 0 : index
    %c0_310 = arith.constant 0 : index
    %c0_311 = arith.constant 0 : index
    %666 = vector.load %arg3[%c0_309, %c0_310, %c0_311] : memref<2x8x1xf32, #tpu.memory_space<vmem>>, vector<1x8x1xf32>
    %667 = vector.shape_cast %666 : vector<1x8x1xf32> to vector<8x1xf32>
    %668 = vector.broadcast %667 : vector<8x1xf32> to vector<8x32xf32>
    %669 = arith.mulf %665, %668 : vector<8x32xf32>
    %cst_312 = arith.constant dense<0.000000e+00> : vector<32xf32>
    %670 = vector.multi_reduction <add>, %669, %cst_312 [0] : vector<8x32xf32> to vector<32xf32>
    %671 = vector.shape_cast %670 : vector<32xf32> to vector<1x32xf32>
    %cst_313 = arith.constant dense<0.000000e+00> : vector<1xf32>
    %672 = vector.multi_reduction <add>, %667, %cst_313 [0] : vector<8x1xf32> to vector<1xf32>
    %673 = vector.shape_cast %672 : vector<1xf32> to vector<1x1xf32>
    %674 = vector.broadcast %673 : vector<1x1xf32> to vector<1x32xf32>
    %675 = arith.divf %671, %674 : vector<1x32xf32>
    %c0_314 = arith.constant 0 : index
    %c0_315 = arith.constant 0 : index
    %c0_316 = arith.constant 0 : index
    %676 = vector.load %arg28[%c0_314, %c0_315, %c0_316] : memref<2x32x1024xf32, #tpu.memory_space<vmem>>, vector<1x32x1024xf32>
    %677 = vector.shape_cast %676 : vector<1x32x1024xf32> to vector<32x1024xf32>
    %cst_317 = arith.constant dense<0.000000e+00> : vector<1x1024xf32>
    %678 = tpu.matmul %675, %677, %cst_317 {dimension_numbers = #tpu.dot_dimension_numbers<[1], [0], [0], [1], [0, 0, 1, 1], [], []>} : vector<1x32xf32>, vector<32x1024xf32>, vector<1x1024xf32> -> vector<1x1024xf32>
    %679 = arith.addf %664, %678 : vector<1x1024xf32>
    %680 = vector.extract_strided_slice %663 {offsets = [0, 0], sizes = [1, 32], strides = [1, 1]} : vector<2x32xf32> to vector<1x32xf32>
    %c0_318 = arith.constant 0 : index
    %c0_319 = arith.constant 0 : index
    %c0_320 = arith.constant 0 : index
    %681 = vector.load %arg29[%c0_318, %c0_319, %c0_320] : memref<2x32x1024xf32, #tpu.memory_space<vmem>>, vector<1x32x1024xf32>
    %682 = vector.shape_cast %681 : vector<1x32x1024xf32> to vector<32x1024xf32>
    %cst_321 = arith.constant dense<0.000000e+00> : vector<1x1024xf32>
    %683 = tpu.matmul %680, %682, %cst_321 {dimension_numbers = #tpu.dot_dimension_numbers<[1], [0], [0], [1], [0, 0, 1, 1], [], []>} : vector<1x32xf32>, vector<32x1024xf32>, vector<1x1024xf32> -> vector<1x1024xf32>
    %684 = arith.addf %679, %683 : vector<1x1024xf32>
    %685 = vector.extract_strided_slice %656 {offsets = [8, 0], sizes = [8, 32], strides = [1, 1]} : vector<16x32xf32> to vector<8x32xf32>
    %c1_322 = arith.constant 1 : index
    %c0_323 = arith.constant 0 : index
    %c0_324 = arith.constant 0 : index
    %686 = vector.load %arg3[%c1_322, %c0_323, %c0_324] : memref<2x8x1xf32, #tpu.memory_space<vmem>>, vector<1x8x1xf32>
    %687 = vector.shape_cast %686 : vector<1x8x1xf32> to vector<8x1xf32>
    %688 = vector.broadcast %687 : vector<8x1xf32> to vector<8x32xf32>
    %689 = arith.mulf %685, %688 : vector<8x32xf32>
    %cst_325 = arith.constant dense<0.000000e+00> : vector<32xf32>
    %690 = vector.multi_reduction <add>, %689, %cst_325 [0] : vector<8x32xf32> to vector<32xf32>
    %691 = vector.shape_cast %690 : vector<32xf32> to vector<1x32xf32>
    %cst_326 = arith.constant dense<0.000000e+00> : vector<1xf32>
    %692 = vector.multi_reduction <add>, %687, %cst_326 [0] : vector<8x1xf32> to vector<1xf32>
    %693 = vector.shape_cast %692 : vector<1xf32> to vector<1x1xf32>
    %694 = vector.broadcast %693 : vector<1x1xf32> to vector<1x32xf32>
    %695 = arith.divf %691, %694 : vector<1x32xf32>
    %c1_327 = arith.constant 1 : index
    %c0_328 = arith.constant 0 : index
    %c0_329 = arith.constant 0 : index
    %696 = vector.load %arg28[%c1_327, %c0_328, %c0_329] : memref<2x32x1024xf32, #tpu.memory_space<vmem>>, vector<1x32x1024xf32>
    %697 = vector.shape_cast %696 : vector<1x32x1024xf32> to vector<32x1024xf32>
    %cst_330 = arith.constant dense<0.000000e+00> : vector<1x1024xf32>
    %698 = tpu.matmul %695, %697, %cst_330 {dimension_numbers = #tpu.dot_dimension_numbers<[1], [0], [0], [1], [0, 0, 1, 1], [], []>} : vector<1x32xf32>, vector<32x1024xf32>, vector<1x1024xf32> -> vector<1x1024xf32>
    %699 = arith.addf %684, %698 : vector<1x1024xf32>
    %700 = vector.extract_strided_slice %663 {offsets = [1, 0], sizes = [1, 32], strides = [1, 1]} : vector<2x32xf32> to vector<1x32xf32>
    %c1_331 = arith.constant 1 : index
    %c0_332 = arith.constant 0 : index
    %c0_333 = arith.constant 0 : index
    %701 = vector.load %arg29[%c1_331, %c0_332, %c0_333] : memref<2x32x1024xf32, #tpu.memory_space<vmem>>, vector<1x32x1024xf32>
    %702 = vector.shape_cast %701 : vector<1x32x1024xf32> to vector<32x1024xf32>
    %cst_334 = arith.constant dense<0.000000e+00> : vector<1x1024xf32>
    %703 = tpu.matmul %700, %702, %cst_334 {dimension_numbers = #tpu.dot_dimension_numbers<[1], [0], [0], [1], [0, 0, 1, 1], [], []>} : vector<1x32xf32>, vector<32x1024xf32>, vector<1x1024xf32> -> vector<1x1024xf32>
    %704 = arith.addf %699, %703 : vector<1x1024xf32>
    %c0_335 = arith.constant 0 : index
    %c0_336 = arith.constant 0 : index
    %c0_337 = arith.constant 0 : index
    %705 = vector.load %arg31[%c0_335, %c0_336, %c0_337] : memref<1x1x1024xf32, #tpu.memory_space<vmem>>, vector<1x1x1024xf32>
    %706 = vector.shape_cast %705 : vector<1x1x1024xf32> to vector<1x1024xf32>
    %707 = vector.shape_cast %704 : vector<1x1024xf32> to vector<1x1x1024xf32>
    tpu.vector_store %arg31[%c0_335, %c0_336, %c0_337], %707 {strides = array<i32>} : memref<1x1x1024xf32, #tpu.memory_space<vmem>>, vector<1x1x1024xf32>,
    return
  }
  func.func @transform_0(%arg0: i32) -> (i32, i32) {
    %c0_i32 = arith.constant 0 : i32
    %c0_i32_0 = arith.constant 0 : i32
    return %arg0, %c0_i32 : i32, i32
  }
  func.func @transform_1(%arg0: i32) -> (i32, i32, i32) {
    %c0_i32 = arith.constant 0 : i32
    %c0_i32_0 = arith.constant 0 : i32
    %c0_i32_1 = arith.constant 0 : i32
    return %arg0, %c0_i32, %c0_i32_0 : i32, i32, i32
  }
  func.func @transform_2(%arg0: i32) -> (i32, i32, i32) {
    %c0_i32 = arith.constant 0 : i32
    %c0_i32_0 = arith.constant 0 : i32
    %c0_i32_1 = arith.constant 0 : i32
    return %arg0, %c0_i32, %c0_i32_0 : i32, i32, i32
  }
  func.func @transform_3(%arg0: i32) -> (i32, i32, i32) {
    %c0_i32 = arith.constant 0 : i32
    %c0_i32_0 = arith.constant 0 : i32
    %c0_i32_1 = arith.constant 0 : i32
    return %arg0, %c0_i32, %c0_i32_0 : i32, i32, i32
  }
  func.func @transform_4(%arg0: i32) -> (i32, i32) {
    %c0_i32 = arith.constant 0 : i32
    %c0_i32_0 = arith.constant 0 : i32
    %c0_i32_1 = arith.constant 0 : i32
    return %c0_i32, %c0_i32_0 : i32, i32
  }
  func.func @transform_5(%arg0: i32) -> (i32, i32) {
    %c0_i32 = arith.constant 0 : i32
    %c0_i32_0 = arith.constant 0 : i32
    %c0_i32_1 = arith.constant 0 : i32
    return %c0_i32, %c0_i32_0 : i32, i32
  }
  func.func @transform_6(%arg0: i32) -> (i32, i32) {
    %c0_i32 = arith.constant 0 : i32
    %c0_i32_0 = arith.constant 0 : i32
    %c0_i32_1 = arith.constant 0 : i32
    return %c0_i32, %c0_i32_0 : i32, i32
  }
  func.func @transform_7(%arg0: i32) -> (i32, i32) {
    %c0_i32 = arith.constant 0 : i32
    %c0_i32_0 = arith.constant 0 : i32
    %c0_i32_1 = arith.constant 0 : i32
    return %c0_i32, %c0_i32_0 : i32, i32
  }
  func.func @transform_8(%arg0: i32) -> (i32, i32) {
    %c0_i32 = arith.constant 0 : i32
    %c0_i32_0 = arith.constant 0 : i32
    %c0_i32_1 = arith.constant 0 : i32
    return %c0_i32, %c0_i32_0 : i32, i32
  }
  func.func @transform_9(%arg0: i32) -> (i32, i32, i32, i32) {
    %c0_i32 = arith.constant 0 : i32
    %c0_i32_0 = arith.constant 0 : i32
    %c0_i32_1 = arith.constant 0 : i32
    %c0_i32_2 = arith.constant 0 : i32
    %c0_i32_3 = arith.constant 0 : i32
    return %c0_i32, %c0_i32_0, %c0_i32_1, %c0_i32_2 : i32, i32, i32, i32
  }
  func.func @transform_10(%arg0: i32) -> (i32, i32, i32, i32) {
    %c0_i32 = arith.constant 0 : i32
    %c0_i32_0 = arith.constant 0 : i32
    %c0_i32_1 = arith.constant 0 : i32
    %c0_i32_2 = arith.constant 0 : i32
    %c0_i32_3 = arith.constant 0 : i32
    return %c0_i32, %c0_i32_0, %c0_i32_1, %c0_i32_2 : i32, i32, i32, i32
  }
  func.func @transform_11(%arg0: i32) -> (i32, i32, i32, i32) {
    %c0_i32 = arith.constant 0 : i32
    %c0_i32_0 = arith.constant 0 : i32
    %c0_i32_1 = arith.constant 0 : i32
    %c0_i32_2 = arith.constant 0 : i32
    %c0_i32_3 = arith.constant 0 : i32
    return %c0_i32, %c0_i32_0, %c0_i32_1, %c0_i32_2 : i32, i32, i32, i32
  }
  func.func @transform_12(%arg0: i32) -> (i32, i32, i32, i32) {
    %c0_i32 = arith.constant 0 : i32
    %c0_i32_0 = arith.constant 0 : i32
    %c0_i32_1 = arith.constant 0 : i32
    %c0_i32_2 = arith.constant 0 : i32
    %c0_i32_3 = arith.constant 0 : i32
    return %c0_i32, %c0_i32_0, %c0_i32_1, %c0_i32_2 : i32, i32, i32, i32
  }
  func.func @transform_13(%arg0: i32) -> (i32, i32, i32, i32) {
    %c0_i32 = arith.constant 0 : i32
    %c0_i32_0 = arith.constant 0 : i32
    %c0_i32_1 = arith.constant 0 : i32
    %c0_i32_2 = arith.constant 0 : i32
    %c0_i32_3 = arith.constant 0 : i32
    return %c0_i32, %c0_i32_0, %c0_i32_1, %c0_i32_2 : i32, i32, i32, i32
  }
  func.func @transform_14(%arg0: i32) -> (i32, i32, i32, i32) {
    %c0_i32 = arith.constant 0 : i32
    %c0_i32_0 = arith.constant 0 : i32
    %c0_i32_1 = arith.constant 0 : i32
    %c0_i32_2 = arith.constant 0 : i32
    %c0_i32_3 = arith.constant 0 : i32
    return %c0_i32, %c0_i32_0, %c0_i32_1, %c0_i32_2 : i32, i32, i32, i32
  }
  func.func @transform_15(%arg0: i32) -> (i32, i32, i32, i32) {
    %c0_i32 = arith.constant 0 : i32
    %c0_i32_0 = arith.constant 0 : i32
    %c0_i32_1 = arith.constant 0 : i32
    %c0_i32_2 = arith.constant 0 : i32
    %c0_i32_3 = arith.constant 0 : i32
    return %c0_i32, %c0_i32_0, %c0_i32_1, %c0_i32_2 : i32, i32, i32, i32
  }
  func.func @transform_16(%arg0: i32) -> (i32, i32, i32) {
    %c0_i32 = arith.constant 0 : i32
    %c0_i32_0 = arith.constant 0 : i32
    %c0_i32_1 = arith.constant 0 : i32
    %c0_i32_2 = arith.constant 0 : i32
    return %c0_i32, %c0_i32_0, %c0_i32_1 : i32, i32, i32
  }
  func.func @transform_17(%arg0: i32) -> (i32, i32, i32) {
    %c0_i32 = arith.constant 0 : i32
    %c0_i32_0 = arith.constant 0 : i32
    %c0_i32_1 = arith.constant 0 : i32
    %c0_i32_2 = arith.constant 0 : i32
    return %c0_i32, %c0_i32_0, %c0_i32_1 : i32, i32, i32
  }
  func.func @transform_18(%arg0: i32) -> (i32, i32, i32) {
    %c0_i32 = arith.constant 0 : i32
    %c0_i32_0 = arith.constant 0 : i32
    %c0_i32_1 = arith.constant 0 : i32
    %c0_i32_2 = arith.constant 0 : i32
    return %c0_i32, %c0_i32_0, %c0_i32_1 : i32, i32, i32
  }
  func.func @transform_19(%arg0: i32) -> (i32, i32, i32) {
    %c0_i32 = arith.constant 0 : i32
    %c0_i32_0 = arith.constant 0 : i32
    %c0_i32_1 = arith.constant 0 : i32
    %c0_i32_2 = arith.constant 0 : i32
    return %c0_i32, %c0_i32_0, %c0_i32_1 : i32, i32, i32
  }
  func.func @transform_20(%arg0: i32) -> (i32, i32, i32) {
    %c0_i32 = arith.constant 0 : i32
    %c0_i32_0 = arith.constant 0 : i32
    %c0_i32_1 = arith.constant 0 : i32
    %c0_i32_2 = arith.constant 0 : i32
    return %c0_i32, %c0_i32_0, %c0_i32_1 : i32, i32, i32
  }
  func.func @transform_21(%arg0: i32) -> (i32, i32, i32) {
    %c0_i32 = arith.constant 0 : i32
    %c0_i32_0 = arith.constant 0 : i32
    %c0_i32_1 = arith.constant 0 : i32
    %c0_i32_2 = arith.constant 0 : i32
    return %c0_i32, %c0_i32_0, %c0_i32_1 : i32, i32, i32
  }
  func.func @transform_22(%arg0: i32) -> (i32, i32, i32) {
    %c0_i32 = arith.constant 0 : i32
    %c0_i32_0 = arith.constant 0 : i32
    %c0_i32_1 = arith.constant 0 : i32
    %c0_i32_2 = arith.constant 0 : i32
    return %c0_i32, %c0_i32_0, %c0_i32_1 : i32, i32, i32
  }
  func.func @transform_23(%arg0: i32) -> (i32, i32, i32) {
    %c0_i32 = arith.constant 0 : i32
    %c0_i32_0 = arith.constant 0 : i32
    %c0_i32_1 = arith.constant 0 : i32
    %c0_i32_2 = arith.constant 0 : i32
    return %c0_i32, %c0_i32_0, %c0_i32_1 : i32, i32, i32
  }
  func.func @transform_24(%arg0: i32) -> (i32, i32, i32) {
    %c0_i32 = arith.constant 0 : i32
    %c0_i32_0 = arith.constant 0 : i32
    %c0_i32_1 = arith.constant 0 : i32
    %c0_i32_2 = arith.constant 0 : i32
    return %c0_i32, %c0_i32_0, %c0_i32_1 : i32, i32, i32
  }
  func.func @transform_25(%arg0: i32) -> (i32, i32) {
    %c0_i32 = arith.constant 0 : i32
    %c0_i32_0 = arith.constant 0 : i32
    %c0_i32_1 = arith.constant 0 : i32
    return %c0_i32, %c0_i32_0 : i32, i32
  }
  func.func @transform_26(%arg0: i32) -> (i32, i32) {
    %c0_i32 = arith.constant 0 : i32
    %c0_i32_0 = arith.constant 0 : i32
    %c0_i32_1 = arith.constant 0 : i32
    return %c0_i32, %c0_i32_0 : i32, i32
  }
  func.func @transform_27(%arg0: i32) -> (i32, i32, i32) {
    %c0_i32 = arith.constant 0 : i32
    %c0_i32_0 = arith.constant 0 : i32
    %c0_i32_1 = arith.constant 0 : i32
    %c0_i32_2 = arith.constant 0 : i32
    return %c0_i32, %c0_i32_0, %c0_i32_1 : i32, i32, i32
  }
  func.func @transform_28(%arg0: i32) -> (i32, i32, i32) {
    %c0_i32 = arith.constant 0 : i32
    %c0_i32_0 = arith.constant 0 : i32
    %c0_i32_1 = arith.constant 0 : i32
    %c0_i32_2 = arith.constant 0 : i32
    return %c0_i32, %c0_i32_0, %c0_i32_1 : i32, i32, i32
  }
  func.func @transform_29(%arg0: i32) -> (i32, i32) {
    %c0_i32 = arith.constant 0 : i32
    %c0_i32_0 = arith.constant 0 : i32
    %c0_i32_1 = arith.constant 0 : i32
    return %c0_i32, %c0_i32_0 : i32, i32
  }
  func.func @transform_30(%arg0: i32) -> (i32, i32, i32) {
    %c0_i32 = arith.constant 0 : i32
    %c0_i32_0 = arith.constant 0 : i32
    %c0_i32_1 = arith.constant 0 : i32
    return %arg0, %c0_i32, %c0_i32_0 : i32, i32, i32
  }
}

</mosaic_0001>

<bundles_post_ra>
// kernel: obj_branch_forward.1
= control target key start
LH: loop header
LB: loop body
LE: loop exit
PB: predicated region body
PF: predicated region fallthrough
CT: control target
= control target key end

     0   :  { %s8957_s6 = smov 1   ;;  %s8958_s10 = smov 2   ;;  %s11310_s0 = inlined_call_operand.smem [shape: u32[31], index: -1, kind: input, shape index: {}] }
   0x1   :  { %s8997_s5 = sld [smem:[%s11310_s0]]   ;;  %s8959_s14 = smov 3  }
   0x2   :  { %s9002_s9 = sld [smem:[%s11310_s0 + %s8957_s6]]   ;;  %s8960_s18 = smov 4  }
   0x3   :  { %s9007_s13 = sld [smem:[%s11310_s0 + %s8958_s10]]   ;;  %s8961_s22 = smov 5  }
   0x4   :  { %s9012_s17 = sld [smem:[%s11310_s0 + %s8959_s14]]   ;;  %s8962_s26 = smov 6  }
   0x5   :  { %s9017_s21 = sld [smem:[%s11310_s0 + %s8960_s18]]   ;;  %s8963_s30 = smov 7  }
   0x6   :  { %s9022_s25 = sld [smem:[%s11310_s0 + %s8961_s22]]   ;;  %s8964_s4 = smov 8  }
   0x7   :  { %11327 = sst [smem:[#allocation2_spill]] %s8997_s5  ;;  %s8965_s10 = smov 9  }
   0x8   :  { %s9027_s29 = sld [smem:[%s11310_s0 + %s8962_s26]]   ;;  %s8966_s15 = smov 10  }
   0x9   :  { %11328 = sst [smem:[#allocation3_spill]] %s9007_s13  ;;  %s8967_s20 = smov 11  }
   0xa   :  { %11329 = sst [smem:[#allocation4_spill]] %s9012_s17  ;;  %s8968_s26 = smov 12  }
   0xb   :  { %s9032_s3 = sld [smem:[%s11310_s0 + %s8963_s30]]   ;;  %s8969_s1 = smov 13  }
   0xc   :  { %s9037_s8 = sld [smem:[%s11310_s0 + %s8964_s4]]   ;;  %s8970_s7 = smov 14  }
   0xd   :  { %s9042_s14 = sld [smem:[%s11310_s0 + %s8965_s10]]   ;;  %s8972_s22 = smov 16  }
   0xe   :  { %s9047_s19 = sld [smem:[%s11310_s0 + %s8966_s15]]   ;;  %s8971_s15 = smov 15  }
   0xf   :  { %s9052_s24 = sld [smem:[%s11310_s0 + %s8967_s20]]   ;;  %s8973_s28 = smov 17  }
  0x10   :  { %s9057_s30 = sld [smem:[%s11310_s0 + %s8968_s26]]  }
  0x11   :  { %11330 = sst [smem:[#allocation5_spill]] %s9032_s3 }
  0x12   :  { %s9062_s6 = sld [smem:[%s11310_s0 + %s8969_s1]]  }
  0x13   :  { %s9067_s12 = sld [smem:[%s11310_s0 + %s8970_s7]]   ;;  %s8974_s7 = smov 18  }
  0x14   :  { %s9072_s20 = sld [smem:[%s11310_s0 + %s8971_s15]]   ;;  %s8975_s15 = smov 19  }
  0x15   :  { %s9077_s27 = sld [smem:[%s11310_s0 + %s8972_s22]]   ;;  %s8976_s22 = smov 20  }
  0x16   :  { %s9082_s4 = sld [smem:[%s11310_s0 + %s8973_s28]]   ;;  %s8977_s28 = smov 21  }
  0x17   :  { %s9087_s17 = sld [smem:[%s11310_s0 + %s8974_s7]]   ;;  %s8978_s7 = smov 22  }
  0x18   :  { %11331 = sst [smem:[#allocation6_spill]] %s9062_s6 }
  0x19   :  { %s9092_s13 = sld [smem:[%s11310_s0 + %s8975_s15]]   ;;  %s8979_s15 = smov 23  }
  0x1b   :  { %11332 = sst [smem:[#allocation7_spill]] %s9077_s27 }
  0x1c   :  { %11333 = sst [smem:[#allocation8_spill]] %s9082_s4 }
  0x1d   :  { %11334 = sst [smem:[#allocation9_spill]] %s9087_s17 }
  0x1e   :  { %s9097_s27 = sld [smem:[%s11310_s0 + %s8976_s22]]   ;;  %s8980_s22 = smov 24  }
  0x1f   :  { %11335 = sst [smem:[#allocation10_spill]] %s9092_s13 }
  0x20   :  { %s9102_s4 = sld [smem:[%s11310_s0 + %s8977_s28]]   ;;  %s8981_s28 = smov 25  }
  0x21   :  { %s9107_s17 = sld [smem:[%s11310_s0 + %s8978_s7]]   ;;  %s8982_s7 = smov 26  }
  0x22   :  { %s9112_s13 = sld [smem:[%s11310_s0 + %s8979_s15]]   ;;  %s8983_s15 = smov 27  }
  0x24   :  { %11336 = sst [smem:[#allocation11_spill]] %s9097_s27 }
  0x25   :  { %s9117_s27 = sld [smem:[%s11310_s0 + %s8980_s22]]   ;;  %s8984_s22 = smov 28  }
  0x26   :  { %11337 = sst [smem:[#allocation12_spill]] %s9102_s4 }
  0x27   :  { %11338 = sst [smem:[#allocation13_spill]] %s9107_s17 }
  0x28   :  { %11339 = sst [smem:[#allocation14_spill]] %s9112_s13 }
  0x29   :  { %s9122_s4 = sld [smem:[%s11310_s0 + %s8981_s28]]   ;;  %s8985_s28 = smov 29  }
  0x2a   :  { %s9127_s17 = sld [smem:[%s11310_s0 + %s8982_s7]]   ;;  %s8986_s7 = smov 30  }
  0x2b   :  { %11340 = sst [smem:[#allocation15_spill]] %s9117_s27 }
  0x2c   :  { %s9132_s13 = sld [smem:[%s11310_s0 + %s8983_s15]]   ;;  %s9149_s15 = smov 0  }
  0x2d   :  { %s9137_s27 = sld [smem:[%s11310_s0 + %s8984_s22]]  }
  0x2f   :  { %11341 = sst [smem:[#allocation16_spill]] %s9122_s4 }
  0x30   :  { %11342 = sst [smem:[#allocation17_spill]] %s9127_s17 }
  0x31   :  { %s9142_s4 = sld [smem:[%s11310_s0 + %s8985_s28]]  }
  0x32   :  { %s9147_s17 = sld [smem:[%s11310_s0 + %s8986_s7]]  }
  0x33 LB: > { %s11343_s6 = sld [smem:[#allocation6_spill]]  ;;  %s9155_s16 = sadd.s32 4294967295, %s8955_s15   ;;  %s8955_s15 = sphi %s9149_s15, %s71_s15  }
  0x34   : > { %s11344_s3 = sld [smem:[#allocation5_spill]]  ;;  %p7764_p0 = scmp.ge.s32.totalorder %s8955_s15, 1 }
  0x35   : > { %p875_p1 = scmp.lt.s32.totalorder %s8955_s15, 3 }
  0x37   : > { %p876_p2 = pnand %p7764_p0, %p875_p1 }
  0x38   : > { %s11345_s5 = sld [smem:[#allocation2_spill]] (!%p876_p2)  ;;  %s7765_s0 = sshll.u32 (!%p876_p2), %s9155_s16, 1 }
  0x39   : > { %879 = sbr.rel (%p876_p2) target bundleno = 7261 (0x1c5d), region = 140  ;;  %p967_p3 = scmp.lt.s32.totalorder (!%p876_p2), %s7765_s0, 3 }
  0x3a   : > { %s11346_s26 = sld [smem:[#allocation7_spill]] (!%p876_p2)  ;;  %p983_p4 = scmp.lt.s32.totalorder (!%p876_p2), %s9155_s16, 1 }
  0x3b   : > { %s11347_s28 = sld [smem:[#allocation10_spill]] (!%p876_p2) }
  0x3c   : > { %s11348_s1 = sld [smem:[#allocation8_spill]] (!%p876_p2) }
  0x3d   : > { %s11349_s2 = sld [smem:[#allocation9_spill]] (!%p876_p2) }
  0x3e   : > { %v994_v0 = vld [vmem:[%s9022_s25] sm:$0xf]  ;;  %vm1006_vm0 = vcmask 1043456   ;;  %s11363_s0 = smov (!%p967_p3, %s7765_s0), 3  ;;  %vm999_vm1 = vcmask 31744   ;;  %v1040_v3 = vld [vmem:[%s11344_s3 + $0x8] sm:$0xff] }
  0x3f   : > { %7772 = vmatpush.msk.msra.mxu0 %vm1006_vm0, %v994_v0  ;;  %s11321_s18 = sshll.u32 %s11363_s0, 3  ;;  %s9167_s22 = scalar_lea.vmem %s9002_s9, %s11363_s0  ;;  %v1039_v4 = vld [vmem:[%s11344_s3] sm:$0xff]  ;;  %1066 = vmatpush.msra.mxu1 %v1040_v3  ;;  %vm1045_vm3 = vcmask 130048   ;;  %v1090_v14 = vld [vmem:[%s9042_s14 + $0x18] sm:$0xff]  ;;  %v1089_v17 = vld [vmem:[%s9042_s14 + $0x10] sm:$0xff]  ;;  %vm1125_vm6 = vcmask 261120  }
  0x40   : > { %s970_s23 = scalar_lea.vmem %s11345_s5, %s11321_s18  ;;  %v8828_v5 = vld [vmem:[%s9027_s29] ss:$0 sm:$0xff]  ;;  %v1098_v15 = vld [vmem:[%s9047_s19 + $0x18] sm:$0xff]  ;;  %1144 = vmatpush.msra.mxu2 %v1090_v14  ;;  %v1097_v18 = vld [vmem:[%s9047_s19 + $0x10] sm:$0xff]  ;;  %vm1238_vm8 = vcmask 64512   ;;  %s11350_s7 = sld [smem:[#allocation12_spill]] }
  0x41   : > { %v992_v1 = vld [vmem:[%s970_s23] sm:$0xff]  ;;  %v993_v2 = vld [vmem:[%s970_s23 + $0x8] sm:$0xff]  ;;  %1067 = vmatpush.msra.mxu1 %v1039_v4  ;;  %v1106_v16 = vld [vmem:[%s9052_s24 + $0x18] sm:$0xff]  ;;  %1172 = vmatpush.msra.mxu3 %v1098_v15  ;;  %s11351_s10 = sld [smem:[#allocation11_spill]]  ;;  %s11365_s16 = smov (!%p983_p4, %s9155_s16), 1 }
  0x42   : > { %7773 = vmatmul.msk.f32.vlgmr.msra.gmra.mxu0 %vm999_vm1, %v992_v1  ;;  %v1105_v19 = vld [vmem:[%s9052_s24 + $0x10] sm:$0xff]  ;;  %1145 = vmatpush.msra.mxu2 %v1089_v17  ;;  %v1088_v20 = vld [vmem:[%s9042_s14 + $0x8] sm:$0xff]  ;;  %v1087_v23 = vld [vmem:[%s9042_s14] sm:$0xff]  ;;  %s11352_s11 = sld [smem:[#allocation13_spill]]  ;;  %s8782_s3 = smul.u32 6, %s11365_s16 }
  0x43   : > { %1198 = vmatpush.msrb.mxu0 %v1106_v16  ;;  %1173 = vmatpush.msra.mxu3 %v1097_v18  ;;  %v1096_v21 = vld [vmem:[%s9047_s19 + $0x8] sm:$0xff]  ;;  %v1095_v24 = vld [vmem:[%s9047_s19] sm:$0xff]  ;;  %v1102_v26 = vld [vmem:[%s9047_s19 + $0x38] sm:$0xff]  ;;  %s11353_s23 = sld [smem:[#allocation14_spill]]  ;;  %s11358_s5 = sshll.u32 %s11363_s0, 3 }
  0x44   : > { %v1104_v22 = vld [vmem:[%s9052_s24 + $0x8] sm:$0xff]  ;;  %1146 = vmatpush.msra.mxu2 %v1088_v20  ;;  %v1103_v25 = vld [vmem:[%s9052_s24] sm:$0xff]  ;;  %v1101_v27 = vld [vmem:[%s9047_s19 + $0x30] sm:$0xff]  ;;  %s11354_s18 = sld [smem:[#allocation15_spill]] }
  0x45   : > { %1199 = vmatpush.msrb.mxu0 %v1105_v19  ;;  %1174 = vmatpush.msra.mxu3 %v1096_v21  ;;  %v1100_v28 = vld [vmem:[%s9047_s19 + $0x28] sm:$0xff]  ;;  %v1099_v29 = vld [vmem:[%s9047_s19 + $0x20] sm:$0xff]  ;;  %v1094_v59 = vld [vmem:[%s9042_s14 + $0x38] sm:$0xff] }
  0x46   : > { %1147 = vmatpush.msra.mxu2 %v1087_v23  ;;  %v8829_v30 = vld [vmem:[%s9037_s8] ss:$0 sm:$0xff]  ;;  %v1082_v40 = vld [vmem:[%s9017_s21 + $0x8] sm:$0xff]  ;;  %v1093_v62 = vld [vmem:[%s9042_s14 + $0x30] sm:$0xff] }
  0x47   : > { %1200 = vmatpush.msrb.mxu0 %v1104_v22  ;;  %1175 = vmatpush.msra.mxu3 %v1095_v24  ;;  %v1081_v34 = vld [vmem:[%s9017_s21] sm:$0xff]  ;;  %v1092_v63 = vld [vmem:[%s9042_s14 + $0x28] sm:$0xff] }
  0x48   : > { %v8830_v43 = vld [vmem:[%s9067_s12] ss:$0 sm:$0xff]  ;;  %v9230_v1 = vld [vmem:[%s11343_s6 + $0x1] ss:$0 sm:$0xff] }
  0x49   : > { %1201 = vmatpush.msrb.mxu0 %v1103_v25  ;;  %v8831_v46 = vld [vmem:[%s9057_s30] ss:$0 sm:$0xff] }
  0x4a   : > { %7774 = vmatmul.msk.f32.gmra.mxu0 %vm999_vm1, %v993_v2  ;;  %v8832_v47 = vld [vmem:[%s11343_s6] ss:$0 sm:$0xff] }
  0x4b   : > { %1439 = vmatpush.msra.mxu0 %v1102_v26  ;;  %v1091_v0 = vld [vmem:[%s9042_s14 + $0x20] sm:$0xff] }
  0x4c   : > { %v9239_v4 = vld [vmem:[%s9167_s22] ss:$0 sm:$0xff] }
  0x4d   : > { %1440 = vmatpush.msra.mxu0 %v1101_v27  ;;  %v1118_v27 = vld [vmem:[%s9072_s20 + $0x8] sm:$0xff] }
  0x4f   : > { %1441 = vmatpush.msra.mxu0 %v1100_v28  ;;  %v1117_v28 = vld [vmem:[%s9072_s20] sm:$0xff] }
  0x51   : > { %1442 = vmatpush.msra.mxu0 %v1099_v29 }
  0xbf   : > { %v1027_v6 = vpop.f32.mrf.mxu0 }
  0xc0   : > { %v1028_v7 = vadd.f32 %v8828_v5, %v1027_v6 }
  0xc2   : > { %vm1033_vm2 = vcmp.ge.f32.partialorder %v1028_v7, 0.0  ;;  %v1035_v8 = vmul.f32 0.01, %v1028_v7 }
  0xc4   : > { %v1037_v9 = vsel %vm1033_vm2, %v1028_v7, %v1035_v8  ;;  %v9244_v8 = vld [vmem:[%s9167_s22 + $0x1] ss:$0 sm:$0xff] }
  0xc5   : > { %7775 = vmatmul.msk.f32.vlgmr.msra.gmra.mxu1 %vm1045_vm3, %v1037_v9 }
  0xc7   : > { %v1030_v10 = vpop.f32.mrf.mxu0 }
  0xc8   : > { %v1031_v11 = vadd.f32 %v8828_v5, %v1030_v10 }
  0xca   : > { %vm1034_vm4 = vcmp.ge.f32.partialorder %v1031_v11, 0.0  ;;  %v1036_v12 = vmul.f32 0.01, %v1031_v11 }
  0xcc   : > { %v1038_v13 = vsel %vm1034_vm4, %v1031_v11, %v1036_v12 }
  0xcd   : > { %7776 = vmatmul.msk.f32.gmra.mxu1 %vm1045_vm3, %v1038_v13  ;;  %v9251_v13 = vld [vmem:[%s9057_s30 + $0x1] ss:$0 sm:$0xff] }
 0x142   : > { %v1069_v31 = vpop.f32.mrf.mxu1 }
 0x143   : > { %v1070_v32 = vadd.f32 %v8829_v30, %v1069_v31  ;;  %v1109_v31 = vld [vmem:[%s9052_s24 + $0x30] sm:$0xff] }
 0x145   : > { %vm1075_vm5 = vcmp.ge.f32.partialorder %v1070_v32, 0.0  ;;  %v1077_v33 = vmul.f32 0.01, %v1070_v32 }
 0x147   : > { %v1079_v35 = vsel %vm1075_vm5, %v1070_v32, %v1077_v33  ;;  %v1108_v32 = vld [vmem:[%s9052_s24 + $0x28] sm:$0xff]  ;;  %v1107_v33 = vld [vmem:[%s9052_s24 + $0x20] sm:$0xff] }
 0x148   : > { %v9195_v36 = vadd.f32 %v1081_v34, %v1079_v35 }
 0x14a   : > { %v1072_v37 = vpop.f32.mrf.mxu1  ;;  %7777 = vmatmul.msk.f32.vlgmr.msra.gmra.mxu2 %vm1125_vm6, %v9195_v36  ;;  %7779 = vmatmul.msk.f32.vlgmr.msra.gmra.mxu3 %vm1125_vm6, %v9195_v36 }
 0x14b   : > { %v1073_v38 = vadd.f32 %v8829_v30, %v1072_v37  ;;  %7781 = vmatmul.msk.f32.vlgmr.msrb.gmra.mxu0 %vm1125_vm6, %v9195_v36  ;;  %v1110_v30 = vld [vmem:[%s9052_s24 + $0x38] sm:$0xff] }
 0x14d   : > { %vm1076_vm7 = vcmp.ge.f32.partialorder %v1073_v38, 0.0  ;;  %v1078_v39 = vmul.f32 0.01, %v1073_v38 }
 0x14f   : > { %v1080_v41 = vsel %vm1076_vm7, %v1073_v38, %v1078_v39 }
 0x150   : > { %v9204_v42 = vadd.f32 %v1082_v40, %v1080_v41 }
 0x152   : > { %7778 = vmatmul.msk.f32.gmra.mxu2 %vm1125_vm6, %v9204_v42  ;;  %7780 = vmatmul.msk.f32.gmra.mxu3 %vm1125_vm6, %v9204_v42 }
 0x153   : > { %7782 = vmatmul.msk.f32.gmra.mxu0 %vm1125_vm6, %v9204_v42 }
 0x15b   : > { %7793 = vmatmul.msk.f32.vlgmr.msra.gmra.mxu0 %vm1125_vm6, %v9195_v36 }
 0x163   : > { %7794 = vmatmul.msk.f32.gmra.mxu0 %vm1125_vm6, %v9204_v42 }
 0x1c8   : > { %v1203_v44 = vpop.f32.mrf.mxu0 }
 0x1c9   : > { %v1204_v45 = vadd.f32 %v8830_v43, %v1203_v44 }
 0x1cb   : > { %1281 = vmatpush.msrb.mxu2 %v1204_v45 }
 0x1cd   : > { %v1149_v48 = vpop.f32.mrf.mxu2  ;;  %v1177_v49 = vpop.f32.mrf.mxu3  ;;  %1382 = vmatpush.msra.mxu2 %v1118_v27 }
 0x1ce   : > { %v1150_v50 = vadd.f32 %v8831_v46, %v1149_v48  ;;  %v1178_v51 = vadd.f32 %v8832_v47, %v1177_v49 }
 0x1cf   : > { %1383 = vmatpush.msra.mxu2 %v1117_v28 }
 0x1d0   : > { %v1155_v52 = vmul.f32 0.25, %v1150_v50  ;;  %v1206_v53 = vpop.f32.mrf.mxu0  ;;  %7783 = vmatpush.xpose.msk.msrb.mxu1 %vm1045_vm3, %v1178_v51 }
 0x1d1   : > { %v1207_v54 = vadd.f32 %v8830_v43, %v1206_v53 }
 0x1d3   : > { %7784 = vmatmul.msk.f32.vlgmr.msrb.gmra.mxu1 %vm1045_vm3, %v1155_v52 }
 0x1d4   : > { %1357 = vmatpush.msra.mxu1 %v1207_v54 }
 0x1d5   : > { %v1152_v55 = vpop.f32.mrf.mxu2  ;;  %v1180_v56 = vpop.f32.mrf.mxu3 }
 0x1d6   : > { %v1153_v57 = vadd.f32 %v8831_v46, %v1152_v55  ;;  %v1181_v58 = vadd.f32 %v8832_v47, %v1180_v56  ;;  %1465 = vmatpush.msrb.mxu1 %v1110_v30 }
 0x1d8   : > { %v1156_v60 = vmul.f32 0.25, %v1153_v57  ;;  %v9222_v61 = vpop.f32.mrf.mxu0  ;;  %7786 = vmatpush.xpose.msk.msrb.mxu3 %vm1045_vm3, %v1181_v58  ;;  %1466 = vmatpush.msrb.mxu1 %v1109_v31 }
 0x1d9   : > { %v1445_v48 = vadd.f32 %v9230_v1, %v9222_v61 }
 0x1da   : > { %1467 = vmatpush.msrb.mxu1 %v1108_v32 }
 0x1db   : > { %7787 = vmatmul.msk.f32.vlgmr.msrb.gmra.mxu3 %vm1045_vm3, %v1156_v60 }
 0x1dc   : > { %1411 = vmatpush.msra.mxu3 %v1094_v59  ;;  %1468 = vmatpush.msrb.mxu1 %v1107_v33 }
 0x1de   : > { %1412 = vmatpush.msra.mxu3 %v1093_v62 }
 0x1e0   : > { %1413 = vmatpush.msra.mxu3 %v1092_v63  ;;  %v1447_v2 = vpop.f32.mrf.mxu0  ;;  %v8835_v63 = vld [vmem:[%s9067_s12 + $0x1] ss:$0 sm:$0xff] }
 0x1e1   : > { %v1448_v3 = vadd.f32 %v9230_v1, %v1447_v2 }
 0x1e2   : > { %1414 = vmatpush.msra.mxu3 %v1091_v0 }
 0x1e3   : > { %7800 = vmatpush.xpose.msk.msrb.mxu0 %vm1045_vm3, %v1448_v3  ;;  %7791 = vmatmul.msk.f32.vlgmr.msra.gmra.mxu3 %vm1125_vm6, %v9195_v36 }
 0x1eb   : > { %7792 = vmatmul.msk.f32.gmra.mxu3 %vm1125_vm6, %v9204_v42 }
 0x250   : > { %v1235_v5 = vpop.f32.mrf.mxu1 }
 0x251   : > { %v1236_v6 = vadd.f32 %v9239_v4, %v1235_v5 }
 0x253   : > { %v1239_v7 = vsel %vm1238_vm8, %v1236_v6, -inf }
 0x254   : > { %1240 = vmax.xlane.f32.xlu0 %v1239_v7 }
 0x25e   : > { %v1312_v9 = vpop.f32.mrf.mxu3 }
 0x25f   : > { %v1313_v10 = vadd.f32 %v9244_v8, %v1312_v9 }
 0x261   : > { %v1315_v11 = vsel %vm1238_vm8, %v1313_v10, -inf }
 0x262   : > { %1316 = vmax.xlane.f32.xlu0 %v1315_v11 }
 0x266   : > { %v9248_v12 = vpop.f32.mrf.mxu3 }
 0x267   : > { %v1417_v62 = vadd.f32 %v9251_v13, %v9248_v12 }
 0x269   : > { %v1422_v0 = vmul.f32 0.25, %v1417_v62 }
 0x26e   : > { %v1419_v14 = vpop.f32.mrf.mxu3 }
 0x26f   : > { %v1420_v15 = vadd.f32 %v9251_v13, %v1419_v14 }
 0x271   : > { %v1423_v16 = vmul.f32 0.25, %v1420_v15 }
 0x273   : > { %7801 = vmatmul.msk.f32.vlgmr.msrb.gmra.mxu0 %vm1045_vm3, %v1423_v16 }
 0x2c7   : > { %v1241_v17 = vpop.xlane.xlu0 %1240 }
 0x2c8   : > { %v1242_v18 = vsub.f32 %v1236_v6, %v1241_v17 }
 0x2ca   : > { %v1243_v19 = vmul.f32 1.442695, %v1242_v18 }
 0x2cc   : > { %8867 = vpow2.f32 %v1243_v19 }
 0x2d2   : > { %v8868_v20 = vpop.eup %8867 }
 0x2d3   : > { %v1245_v21 = vsel %vm1238_vm8, %v8868_v20, 0.0 }
 0x2d4   : > { %1246 = vadd.xlane.f32.xlu1 %v1245_v21 }
 0x2d5   : > { %v1317_v22 = vpop.xlane.xlu0 %1316 }
 0x2d6   : > { %v1318_v23 = vsub.f32 %v1313_v10, %v1317_v22 }
 0x2d8   : > { %v1319_v24 = vmul.f32 1.442695, %v1318_v23 }
 0x2da   : > { %8869 = vpow2.f32 %v1319_v24 }
 0x2e0   : > { %v8870_v25 = vpop.eup %8869 }
 0x2e1   : > { %v1321_v26 = vsel %vm1238_vm8, %v8870_v25, 0.0 }
 0x2e2   : > { %1322 = vadd.xlane.f32.xlu1 %v1321_v26 }
 0x2f0   : > { %v1572_v12 = vpop.f32.mrf.mxu0 }
 0x2f1   : > { %v1573_v13 = vadd.f32 %v9244_v8, %v1572_v12  ;;  %v1120_v8 = vld [vmem:[%s9072_s20 + $0x18] sm:$0xff] }
 0x2f3   : > { %v1575_v14 = vsel %vm1238_vm8, %v1573_v13, -inf }
 0x347   : > { %v1247_v29 = vpop.xlane.xlu1 %1246 }
 0x348   : > { %8871 = vrcp.f32 %v1247_v29  ;;  %v1259_v38 = vand.u32 2147483648, %v1247_v29  ;;  %v1257_v40 = vand.u32 2147483647, %v1247_v29  ;;  %vm1253_vm10 = vweird.f32 %v1247_v29 }
 0x34a   : > { %v1260_v44 = vor.u32 1.1754944e-38, %v1259_v38  ;;  %vm1258_vm12 = vcmp.eq.f32.partialorder %v1257_v40, 8.507059e+37 }
 0x34e   : > { %v8872_v34 = vpop.eup %8871 }
 0x34f   : > { %v1249_v35 = vmul.f32 %v8872_v34, %v1247_v29  ;;  %vm1254_vm9 = vweird.f32 %v8872_v34 }
 0x350   : > { %vm1255_vm11 = vmor %vm1253_vm10, %vm1254_vm9 }
 0x351   : > { %v1250_v37 = vsub.f32 1.0, %v1249_v35 }
 0x353   : > { %v1251_v39 = vmul.f32 %v8872_v34, %v1250_v37 }
 0x355   : > { %v1323_v41 = vpop.xlane.xlu1 %1322  ;;  %v1252_v43 = vadd.f32 %v8872_v34, %v1251_v39 }
 0x356   : > { %8873 = vrcp.f32 %v1323_v41  ;;  %v1335_v52 = vand.u32 2147483648, %v1323_v41  ;;  %v1333_v54 = vand.u32 2147483647, %v1323_v41  ;;  %vm1329_vm14 = vweird.f32 %v1323_v41 }
 0x357   : > { %v1256_v45 = vsel %vm1255_vm11, %v8872_v34, %v1252_v43 }
 0x358   : > { %v1261_v46 = vsel %vm1258_vm12, %v1260_v44, %v1256_v45  ;;  %v1336_v56 = vor.u32 1.1754944e-38, %v1335_v52  ;;  %vm1334_vm1 = vcmp.eq.f32.partialorder %v1333_v54, 8.507059e+37 }
 0x359   : > { %v1262_v47 = vmul.f32 %v8868_v20, %v1261_v46 }
 0x35b   : > { %7785 = vmatmul.msk.f32.vlgmr.msrb.gmra.mxu2 %vm1238_vm8, %v1262_v47 }
 0x35c   : > { %v8874_v49 = vpop.eup %8873  ;;  %7797 = vmatpush.xpose.msk.msrb.mxu2 %vm1045_vm3, %v1445_v48 }
 0x35d   : > { %v1325_v50 = vmul.f32 %v8874_v49, %v1323_v41  ;;  %vm1330_vm13 = vweird.f32 %v8874_v49 }
 0x35e   : > { %vm1331_vm15 = vmor %vm1329_vm14, %vm1330_vm13 }
 0x35f   : > { %v1326_v51 = vsub.f32 1.0, %v1325_v50  ;;  %v1119_v50 = vld [vmem:[%s9072_s20 + $0x10] sm:$0xff] }
 0x361   : > { %v1327_v53 = vmul.f32 %v8874_v49, %v1326_v51 }
 0x363   : > { %v1328_v55 = vadd.f32 %v8874_v49, %v1327_v53  ;;  %v8836_v53 = vld [vmem:[%s11346_s26] ss:$0 sm:$0xff] }
 0x365   : > { %v1332_v57 = vsel %vm1331_vm15, %v8874_v49, %v1328_v55 }
 0x366   : > { %v1337_v58 = vsel %vm1334_vm1, %v1336_v56, %v1332_v57 }
 0x367   : > { %v1338_v59 = vmul.f32 %v8870_v25, %v1337_v58 }
 0x369   : > { %7788 = vmatmul.msk.f32.vlgmr.msra.gmra.mxu1 %vm1238_vm8, %v1338_v59 }
 0x371   : > { %7795 = vmatmul.msk.f32.vlgmr.msrb.gmra.mxu1 %vm1125_vm6, %v9195_v36 }
 0x379   : > { %7796 = vmatmul.msk.f32.gmra.mxu1 %vm1125_vm6, %v9204_v42 }
 0x3de   : > { %v1283_v60 = vpop.f32.mrf.mxu2 }
 0x3df   : > { %7789 = vmatmul.msk.f32.vlgmr.msra.gmra.mxu2 %vm1045_vm3, %v1283_v60 }
 0x3e0   : > { %1642 = vmatpush.msra.mxu2 %v1120_v8  ;;  %v1734_v8 = vld [vmem:[%s11347_s28 + $0x80] sm:$0xff] }
 0x3e2   : > { %1643 = vmatpush.msra.mxu2 %v1119_v50  ;;  %v1722_v50 = vld [vmem:[%s11347_s28 + $0x20] sm:$0xff] }
 0x3e6   : > { %v1359_v61 = vpop.f32.mrf.mxu1 }
 0x3e7   : > { %7790 = vmatmul.msk.f32.gmra.mxu2 %vm1045_vm3, %v1359_v61 }
 0x3ee   : > { %v1470_v1 = vpop.f32.mrf.mxu1 }
 0x3ef   : > { %v1471_v2 = vadd.f32 %v8835_v63, %v1470_v1  ;;  %7798 = vmatmul.msk.f32.vlgmr.msrb.gmra.mxu2 %vm1045_vm3, %v1422_v0  ;;  %v8987_v0 = vmov 32.0  }
 0x3f1   : > { %1544 = vmatpush.msrb.mxu3 %v1471_v2 }
 0x3f6   : > { %v1473_v3 = vpop.f32.mrf.mxu1 }
 0x3f7   : > { %v1474_v5 = vadd.f32 %v8835_v63, %v1473_v3 }
 0x3f9   : > { %1617 = vmatpush.msra.mxu1 %v1474_v5 }
 0x462   : > { %v9278_v6 = vpop.f32.mrf.mxu2 }
 0x463   : > { %v1394_v54 = vadd.f32 %v8836_v53, %v9278_v6 }
 0x46a   : > { %v9280_v7 = vpop.f32.mrf.mxu2 }
 0x46b   : > { %v1395_v59 = vadd.f32 %v8836_v53, %v9280_v7 }
 0x472   : > { %v1499_v9 = vpop.f32.mrf.mxu2 }
 0x473   : > { %v1500_v10 = vadd.f32 %v9239_v4, %v1499_v9 }
 0x475   : > { %v1502_v11 = vsel %vm1238_vm8, %v1500_v10, -inf }
 0x476   : > { %1503 = vmax.xlane.f32.xlu2 %v1502_v11 }
 0x47e   : > { %1576 = vmax.xlane.f32.xlu2 %v1575_v14 }
 0x4e9   : > { %v1504_v15 = vpop.xlane.xlu2 %1503 }
 0x4ea   : > { %v1505_v16 = vsub.f32 %v1500_v10, %v1504_v15 }
 0x4ec   : > { %v1506_v17 = vmul.f32 1.442695, %v1505_v16 }
 0x4ee   : > { %8875 = vpow2.f32 %v1506_v17  ;;  %v1766_v17 = vld [vmem:[%s11347_s28 + $0x180] sm:$0xff] }
 0x4ef   : > { %1836 = vmatpush.msra.mxu3 %v1766_v17  ;;  %v1759_v17 = vld [vmem:[%s11347_s28 + $0x148] sm:$0xff] }
 0x4f1   : > { %v1577_v18 = vpop.xlane.xlu2 %1576 }
 0x4f2   : > { %v1578_v19 = vsub.f32 %v1573_v13, %v1577_v18  ;;  %v1767_v18 = vld [vmem:[%s11347_s28 + $0x188] sm:$0xff] }
 0x4f3   : > { %1859 = vmatpush.msra.mxu0 %v1767_v18 }
 0x4f4   : > { %v8876_v20 = vpop.eup %8875  ;;  %v1579_v21 = vmul.f32 1.442695, %v1578_v19  ;;  %v1768_v19 = vld [vmem:[%s11347_s28 + $0x190] sm:$0xff] }
 0x4f5   : > { %v1508_v4 = vsel %vm1238_vm8, %v8876_v20, 0.0  ;;  %1882 = vmatpush.msrb.mxu1 %v1768_v19  ;;  %v1760_v19 = vld [vmem:[%s11347_s28 + $0x150] sm:$0xff] }
 0x4f6   : > { %8877 = vpow2.f32 %v1579_v21  ;;  %1509 = vadd.xlane.f32.xlu0 %v1508_v4  ;;  %v1750_v21 = vld [vmem:[%s11347_s28 + $0x100] sm:$0xff]  ;;  %v1751_v4 = vld [vmem:[%s11347_s28 + $0x108] sm:$0xff] }
 0x4f7   : > { %1837 = vmatpush.msra.mxu3 %v1750_v21  ;;  %1860 = vmatpush.msra.mxu0 %v1751_v4  ;;  %v1742_v21 = vld [vmem:[%s11347_s28 + $0xc0] sm:$0xff]  ;;  %v1743_v4 = vld [vmem:[%s11347_s28 + $0xc8] sm:$0xff] }
 0x4f9   : > { %1838 = vmatpush.msra.mxu3 %v1734_v8  ;;  %v1745_v8 = vld [vmem:[%s11347_s28 + $0xd8] sm:$0xff] }
 0x4fc   : > { %v8878_v22 = vpop.eup %8877 }
 0x4fd   : > { %v1581_v23 = vsel %vm1238_vm8, %v8878_v22, 0.0 }
 0x4fe   : > { %1582 = vadd.xlane.f32.xlu1 %v1581_v23  ;;  %v1753_v23 = vld [vmem:[%s11347_s28 + $0x118] sm:$0xff] }
 0x569   : > { %v1510_v24 = vpop.xlane.xlu0 %1509 }
 0x56a   : > { %8879 = vrcp.f32 %v1510_v24  ;;  %v1522_v29 = vand.u32 2147483648, %v1510_v24  ;;  %v1520_v31 = vand.u32 2147483647, %v1510_v24  ;;  %vm1516_vm4 = vweird.f32 %v1510_v24 }
 0x56c   : > { %v1523_v34 = vor.u32 1.1754944e-38, %v1522_v29  ;;  %vm1521_vm7 = vcmp.eq.f32.partialorder %v1520_v31, 8.507059e+37  ;;  %v1720_v29 = vld [vmem:[%s11347_s28 + $0x10] sm:$0xff] }
 0x570   : > { %v8880_v25 = vpop.eup %8879 }
 0x571   : > { %v1512_v26 = vmul.f32 %v8880_v25, %v1510_v24  ;;  %v1583_v27 = vpop.xlane.xlu1 %1582  ;;  %vm1517_vm2 = vweird.f32 %v8880_v25  ;;  %v1735_v24 = vld [vmem:[%s11347_s28 + $0x88] sm:$0xff] }
 0x572   : > { %8881 = vrcp.f32 %v1583_v27  ;;  %vm1518_vm5 = vmor %vm1516_vm4, %vm1517_vm2  ;;  %v1595_v41 = vand.u32 2147483648, %v1583_v27  ;;  %v1593_v44 = vand.u32 2147483647, %v1583_v27  ;;  %vm1589_vm10 = vweird.f32 %v1583_v27  ;;  %1861 = vmatpush.msra.mxu0 %v1735_v24  ;;  %v1726_v24 = vld [vmem:[%s11347_s28 + $0x40] sm:$0xff] }
 0x573   : > { %v1513_v28 = vsub.f32 1.0, %v1512_v26  ;;  %8883 = vrcp.f32 %v8987_v0  ;;  %v1737_v26 = vld [vmem:[%s11347_s28 + $0x98] sm:$0xff] }
 0x574   : > { %v1596_v46 = vor.u32 1.1754944e-38, %v1595_v41  ;;  %vm1594_vm12 = vcmp.eq.f32.partialorder %v1593_v44, 8.507059e+37  ;;  %v1757_v44 = vld [vmem:[%s11347_s28 + $0x138] sm:$0xff] }
 0x575   : > { %v1514_v30 = vmul.f32 %v8880_v25, %v1513_v28  ;;  %v1719_v28 = vld [vmem:[%s11347_s28 + $0x8] sm:$0xff] }
 0x576   : > { %1862 = vmatpush.msra.mxu0 %v1719_v28  ;;  %v1778_v28 = vld [vmem:[%s11347_s28 + $0x1e0] sm:$0xff] }
 0x577   : > { %v1515_v32 = vadd.f32 %v8880_v25, %v1514_v30  ;;  %v1721_v30 = vld [vmem:[%s11347_s28 + $0x18] sm:$0xff] }
 0x578   : > { %v8882_v33 = vpop.eup %8881 }
 0x579   : > { %v1519_v35 = vsel %vm1518_vm5, %v8880_v25, %v1515_v32  ;;  %v1585_v37 = vmul.f32 %v8882_v33, %v1583_v27  ;;  %vm1590_vm9 = vweird.f32 %v8882_v33  ;;  %v8884_v1 = vpop.eup %8883  ;;  %v1736_v25 = vld [vmem:[%s11347_s28 + $0x90] sm:$0xff]  ;;  %v1718_v27 = vld [vmem:[%s11347_s28] sm:$0xff] }
 0x57a   : > { %v1524_v38 = vsel %vm1521_vm7, %v1523_v34, %v1519_v35  ;;  %vm1591_vm11 = vmor %vm1589_vm10, %vm1590_vm9  ;;  %v1664_v2 = vmul.f32 32.0, %v8884_v1  ;;  %vm1668_vm13 = vweird.f32 %v8884_v1  ;;  %1839 = vmatpush.msra.mxu3 %v1718_v27  ;;  %v1770_v34 = vld [vmem:[%s11347_s28 + $0x1a0] sm:$0xff]  ;;  %v1771_v35 = vld [vmem:[%s11347_s28 + $0x1a8] sm:$0xff] }
 0x57b   : > { %v1586_v39 = vsub.f32 1.0, %v1585_v37  ;;  %v1525_v40 = vmul.f32 %v8876_v20, %v1524_v38  ;;  %v1769_v20 = vld [vmem:[%s11347_s28 + $0x198] sm:$0xff]  ;;  %v1772_v37 = vld [vmem:[%s11347_s28 + $0x1b0] sm:$0xff]  ;;  %1951 = vmatpush.msrb.mxu0 %v1771_v35 }
 0x57c   : > { %v1665_v3 = vsub.f32 1.0, %v1664_v2  ;;  %1905 = vmatpush.msrb.mxu2 %v1769_v20  ;;  %v1773_v38 = vld [vmem:[%s11347_s28 + $0x1b8] sm:$0xff]  ;;  %v8838_v2 = vld [vmem:[%s11349_s2] ss:$0 sm:$0xff] }
 0x57d   : > { %v1587_v43 = vmul.f32 %v8882_v33, %v1586_v39  ;;  %7799 = vmatmul.msk.f32.vlgmr.msrb.gmra.mxu3 %vm1238_vm8, %v1525_v40  ;;  %v1754_v39 = vld [vmem:[%s11347_s28 + $0x120] sm:$0xff]  ;;  %v1755_v40 = vld [vmem:[%s11347_s28 + $0x128] sm:$0xff]  ;;  %v1761_v20 = vld [vmem:[%s11347_s28 + $0x158] sm:$0xff] }
 0x57e   : > { %v1666_v5 = vmul.f32 %v8884_v1, %v1665_v3  ;;  %1906 = vmatpush.msrb.mxu2 %v1753_v23  ;;  %1928 = vmatpush.msrb.mxu3 %v1770_v34  ;;  %v1744_v23 = vld [vmem:[%s11347_s28 + $0xd0] sm:$0xff]  ;;  %v1729_v27 = vld [vmem:[%s11347_s28 + $0x58] sm:$0xff] }
 0x57f   : > { %v1588_v45 = vadd.f32 %v8882_v33, %v1587_v43  ;;  %v1756_v43 = vld [vmem:[%s11347_s28 + $0x130] sm:$0xff]  ;;  %1952 = vmatpush.msrb.mxu0 %v1755_v40  ;;  %v1765_v35 = vld [vmem:[%s11347_s28 + $0x178] sm:$0xff] }
 0x580   : > { %1907 = vmatpush.msrb.mxu2 %v1737_v26  ;;  %1929 = vmatpush.msrb.mxu3 %v1754_v39  ;;  %v1728_v26 = vld [vmem:[%s11347_s28 + $0x50] sm:$0xff]  ;;  %v1749_v40 = vld [vmem:[%s11347_s28 + $0xf8] sm:$0xff] }
 0x581   : > { %v1592_v47 = vsel %vm1591_vm11, %v8882_v33, %v1588_v45  ;;  %v1738_v45 = vld [vmem:[%s11347_s28 + $0xa0] sm:$0xff]  ;;  %v1764_v34 = vld [vmem:[%s11347_s28 + $0x170] sm:$0xff] }
 0x582   : > { %v1597_v48 = vsel %vm1594_vm12, %v1596_v46, %v1592_v47  ;;  %1908 = vmatpush.msrb.mxu2 %v1721_v30  ;;  %v1739_v47 = vld [vmem:[%s11347_s28 + $0xa8] sm:$0xff]  ;;  %1930 = vmatpush.msrb.mxu3 %v1738_v45  ;;  %v1780_v30 = vld [vmem:[%s11347_s28 + $0x1f0] sm:$0xff]  ;;  %v1733_v45 = vld [vmem:[%s11347_s28 + $0x78] sm:$0xff] }
 0x583   : > { %v1598_v49 = vmul.f32 %v8878_v22, %v1597_v48  ;;  %v1752_v22 = vld [vmem:[%s11347_s28 + $0x110] sm:$0xff]  ;;  %1953 = vmatpush.msrb.mxu0 %v1739_v47  ;;  %v2271_v47 = vld [vmem:[%s11350_s7 + $0x178] sm:$0xff] }
 0x584   : > { %1883 = vmatpush.msrb.mxu1 %v1752_v22  ;;  %v1740_v48 = vld [vmem:[%s11347_s28 + $0xb0] sm:$0xff]  ;;  %1931 = vmatpush.msrb.mxu3 %v1722_v50 }
 0x585   : > { %7802 = vmatmul.msk.f32.vlgmr.msra.gmra.mxu1 %vm1238_vm8, %v1598_v49  ;;  %v1741_v49 = vld [vmem:[%s11347_s28 + $0xb8] sm:$0xff]  ;;  %v1748_v39 = vld [vmem:[%s11347_s28 + $0xf0] sm:$0xff] }
 0x586   : > { %1884 = vmatpush.msrb.mxu1 %v1736_v25  ;;  %v1727_v25 = vld [vmem:[%s11347_s28 + $0x48] sm:$0xff]  ;;  %v2254_v50 = vld [vmem:[%s11350_s7 + $0xf0] sm:$0xff] }
 0x588   : > { %1885 = vmatpush.msrb.mxu1 %v1720_v29  ;;  %v1779_v29 = vld [vmem:[%s11347_s28 + $0x1e8] sm:$0xff] }
 0x58a   : > { %1974 = vmatpush.msra.mxu1 %v1772_v37  ;;  %v1746_v37 = vld [vmem:[%s11347_s28 + $0xe0] sm:$0xff] }
 0x58c   : > { %1975 = vmatpush.msra.mxu1 %v1756_v43  ;;  %v1731_v43 = vld [vmem:[%s11347_s28 + $0x68] sm:$0xff] }
 0x58e   : > { %1976 = vmatpush.msra.mxu1 %v1740_v48  ;;  %v2239_v48 = vld [vmem:[%s11350_s7 + $0x78] sm:$0xff] }
 0x600   : > { %v1546_v51 = vpop.f32.mrf.mxu3 }
 0x601   : > { %7803 = vmatmul.msk.f32.vlgmr.msra.gmra.mxu2 %vm1045_vm3, %v1546_v51  ;;  %v1723_v51 = vld [vmem:[%s11347_s28 + $0x28] sm:$0xff] }
 0x602   : > { %v1619_v52 = vpop.f32.mrf.mxu1  ;;  %1997 = vmatpush.msra.mxu2 %v1773_v38  ;;  %1954 = vmatpush.msrb.mxu0 %v1723_v51  ;;  %v1747_v38 = vld [vmem:[%s11347_s28 + $0xe8] sm:$0xff]  ;;  %v2270_v51 = vld [vmem:[%s11350_s7 + $0x170] sm:$0xff] }
 0x604   : > { %1998 = vmatpush.msra.mxu2 %v1757_v44  ;;  %v1732_v44 = vld [vmem:[%s11347_s28 + $0x70] sm:$0xff] }
 0x606   : > { %1999 = vmatpush.msra.mxu2 %v1741_v49  ;;  %v2287_v49 = vld [vmem:[%s11350_s7 + $0x1f8] sm:$0xff] }
 0x609   : > { %7804 = vmatmul.msk.f32.gmra.mxu2 %vm1045_vm3, %v1619_v52 }
 0x684   : > { %v1645_v55 = vpop.f32.mrf.mxu2 }
 0x685   : > { %v1651_v56 = vadd.f32 %v1645_v55, %v1394_v54  ;;  %v1724_v54 = vld [vmem:[%s11347_s28 + $0x30] sm:$0xff]  ;;  %v1725_v55 = vld [vmem:[%s11347_s28 + $0x38] sm:$0xff] }
 0x686   : > { %1977 = vmatpush.msra.mxu1 %v1724_v54  ;;  %2000 = vmatpush.msra.mxu2 %v1725_v55  ;;  %v2253_v54 = vld [vmem:[%s11350_s7 + $0xe8] sm:$0xff] }
 0x687   : > { %v1653_v57 = vadd.f32 %v1651_v56, %v9195_v36  ;;  %v1667_v36 = vadd.f32 %v8884_v1, %v1666_v5  ;;  %v2269_v55 = vld [vmem:[%s11350_s7 + $0x168] sm:$0xff] }
 0x689   : > { %v1657_v58 = vsel %vm1125_vm6, %v1653_v57, 0.0  ;;  %v9301_v6 = vsel %vm1668_vm13, %v8884_v1, %v1667_v36 }
 0x68a   : > { %1658 = vadd.xlane.f32.xlu2 %v1657_v58 }
 0x68c   : > { %v1648_v60 = vpop.f32.mrf.mxu2 }
 0x68d   : > { %v1652_v61 = vadd.f32 %v1648_v60, %v1395_v59 }
 0x68f   : > { %v1654_v62 = vadd.f32 %v1652_v61, %v9204_v42 }
 0x691   : > { %v1660_v63 = vsel %vm1125_vm6, %v1654_v62, 0.0 }
 0x692   : > { %1661 = vadd.xlane.f32.xlu0 %v1660_v63  ;;  %v8837_v63 = vld [vmem:[%s11348_s1] ss:$0 sm:$0xff] }
 0x6fd   : > { %v1659_v7 = vpop.xlane.xlu2 %1658 }
 0x6fe   : > { %v1670_v9 = vmul.f32 %v9301_v6, %v1659_v7 }
 0x700   : > { %v9304_v42 = vsub.f32 %v1653_v57, %v1670_v9 }
 0x702   : > { %v1674_v10 = vmul.f32 %v9304_v42, %v9304_v42 }
 0x704   : > { %v1676_v11 = vsel %vm1125_vm6, %v1674_v10, 0.0 }
 0x705   : > { %1677 = vadd.xlane.f32.xlu1 %v1676_v11  ;;  %v1662_v12 = vpop.xlane.xlu0 %1661  ;;  %v1774_v11 = vld [vmem:[%s11347_s28 + $0x1c0] sm:$0xff] }
 0x706   : > { %v1671_v13 = vmul.f32 %v9301_v6, %v1662_v12  ;;  %v1775_v12 = vld [vmem:[%s11347_s28 + $0x1c8] sm:$0xff] }
 0x708   : > { %v9310_v14 = vsub.f32 %v1654_v62, %v1671_v13  ;;  %v1777_v13 = vld [vmem:[%s11347_s28 + $0x1d8] sm:$0xff] }
 0x70a   : > { %v1675_v15 = vmul.f32 %v9310_v14, %v9310_v14 }
 0x70c   : > { %v1679_v16 = vsel %vm1125_vm6, %v1675_v15, 0.0 }
 0x70d   : > { %1680 = vadd.xlane.f32.xlu2 %v1679_v16  ;;  %v1758_v16 = vld [vmem:[%s11347_s28 + $0x140] sm:$0xff] }
 0x778   : > { %v1678_v31 = vpop.xlane.xlu1 %1677 }
 0x779   : > { %v1682_v32 = vmul.f32 %v1678_v31, %v9301_v6  ;;  %v1781_v31 = vld [vmem:[%s11347_s28 + $0x1f8] sm:$0xff] }
 0x77b   : > { %v1684_v33 = vadd.f32 1e-05, %v1682_v32  ;;  %v1762_v32 = vld [vmem:[%s11347_s28 + $0x160] sm:$0xff] }
 0x77d   : > { %8885 = vrsqrt.f32 %v1684_v33  ;;  %vm1692_vm15 = vweird.f32 %v1684_v33 }
 0x780   : > { %v1681_v41 = vpop.xlane.xlu2 %1680 }
 0x781   : > { %v1683_v46 = vmul.f32 %v1681_v41, %v9301_v6  ;;  %v1730_v41 = vld [vmem:[%s11347_s28 + $0x60] sm:$0xff] }
 0x783   : > { %v8886_v52 = vpop.eup %8885  ;;  %v1685_v53 = vadd.f32 1e-05, %v1683_v46  ;;  %v2255_v46 = vld [vmem:[%s11350_s7 + $0xf8] sm:$0xff] }
 0x784   : > { %v1687_v56 = vmul.f32 %v8886_v52, %v1684_v33  ;;  %vm1693_vm14 = vweird.f32 %v8886_v52  ;;  %v1763_v33 = vld [vmem:[%s11347_s28 + $0x168] sm:$0xff] }
 0x785   : > { %8887 = vrsqrt.f32 %v1685_v53  ;;  %vm1694_vm1 = vmor %vm1692_vm15, %vm1693_vm14  ;;  %vm1702_vm4 = vweird.f32 %v1685_v53 }
 0x786   : > { %v1688_v57 = vmul.f32 %v8886_v52, %v1687_v56  ;;  %v2237_v56 = vld [vmem:[%s11350_s7 + $0x68] sm:$0xff] }
 0x788   : > { %v1689_v58 = vmul.f32 0.5, %v1688_v57  ;;  %v2285_v57 = vld [vmem:[%s11350_s7 + $0x1e8] sm:$0xff] }
 0x78a   : > { %v1690_v59 = vsub.f32 1.5, %v1689_v58  ;;  %v2252_v58 = vld [vmem:[%s11350_s7 + $0xe0] sm:$0xff] }
 0x78b   : > { %v8888_v60 = vpop.eup %8887 }
 0x78c   : > { %v1691_v61 = vmul.f32 %v8886_v52, %v1690_v59  ;;  %v1697_v62 = vmul.f32 %v8888_v60, %v1685_v53  ;;  %vm1703_vm2 = vweird.f32 %v8888_v60  ;;  %v2286_v53 = vld [vmem:[%s11350_s7 + $0x1f0] sm:$0xff]  ;;  %v2268_v59 = vld [vmem:[%s11350_s7 + $0x160] sm:$0xff] }
 0x78d   : > { %vm1704_vm5 = vmor %vm1702_vm4, %vm1703_vm2 }
 0x78e   : > { %v1695_v0 = vsel %vm1694_vm1, %v8886_v52, %v1691_v61  ;;  %v1698_v1 = vmul.f32 %v8888_v60, %v1697_v62  ;;  %v2238_v52 = vld [vmem:[%s11350_s7 + $0x70] sm:$0xff]  ;;  %v2284_v61 = vld [vmem:[%s11350_s7 + $0x1e0] sm:$0xff]  ;;  %v2251_v62 = vld [vmem:[%s11350_s7 + $0xd8] sm:$0xff] }
 0x78f   : > { %v1706_v3 = vmul.f32 %v1695_v0, %v9304_v42  ;;  %v1776_v42 = vld [vmem:[%s11347_s28 + $0x1d0] sm:$0xff]  ;;  %v2235_v0 = vld [vmem:[%s11350_s7 + $0x58] sm:$0xff] }
 0x790   : > { %v1699_v5 = vmul.f32 0.5, %v1698_v1  ;;  %v2283_v1 = vld [vmem:[%s11350_s7 + $0x1d8] sm:$0xff] }
 0x791   : > { %v1711_v36 = vmul.f32 %v8837_v63, %v1706_v3  ;;  %v2266_v3 = vld [vmem:[%s11350_s7 + $0x150] sm:$0xff] }
 0x792   : > { %v1700_v7 = vsub.f32 1.5, %v1699_v5  ;;  %v2234_v5 = vld [vmem:[%s11350_s7 + $0x50] sm:$0xff] }
 0x793   : > { %v9352_v9 = vadd.f32 %v8838_v2, %v1711_v36  ;;  %v2282_v36 = vld [vmem:[%s11350_s7 + $0x1d0] sm:$0xff] }
 0x794   : > { %v1701_v10 = vmul.f32 %v8888_v60, %v1700_v7  ;;  %v2249_v7 = vld [vmem:[%s11350_s7 + $0xc8] sm:$0xff] }
 0x795   : > { %7805 = vmatmul.msk.f32.vlgmr.msra.gmra.mxu3 %vm1125_vm6, %v9352_v9  ;;  %7807 = vmatmul.msk.f32.vlgmr.msra.gmra.mxu0 %vm1125_vm6, %v9352_v9 }
 0x796   : > { %v1705_v15 = vsel %vm1704_vm5, %v8888_v60, %v1701_v10  ;;  %7809 = vmatmul.msk.f32.vlgmr.msrb.gmra.mxu1 %vm1125_vm6, %v9352_v9  ;;  %7811 = vmatmul.msk.f32.vlgmr.msrb.gmra.mxu2 %vm1125_vm6, %v9352_v9  ;;  %v2236_v60 = vld [vmem:[%s11350_s7 + $0x60] sm:$0xff]  ;;  %v2265_v10 = vld [vmem:[%s11350_s7 + $0x148] sm:$0xff] }
 0x797   : > { %v1707_v18 = vmul.f32 %v1705_v15, %v9310_v14  ;;  %2020 = vmatpush.msra.mxu3 %v1774_v11  ;;  %2043 = vmatpush.msra.mxu0 %v1775_v12  ;;  %v2233_v11 = vld [vmem:[%s11350_s7 + $0x48] sm:$0xff]  ;;  %v2232_v15 = vld [vmem:[%s11350_s7 + $0x40] sm:$0xff] }
 0x798   : > { %2066 = vmatpush.msrb.mxu1 %v1776_v42  ;;  %2089 = vmatpush.msrb.mxu2 %v1777_v13  ;;  %v2281_v12 = vld [vmem:[%s11350_s7 + $0x1c8] sm:$0xff]  ;;  %v2248_v42 = vld [vmem:[%s11350_s7 + $0xc0] sm:$0xff] }
 0x799   : > { %v1712_v22 = vmul.f32 %v8837_v63, %v1707_v18  ;;  %2021 = vmatpush.msra.mxu3 %v1758_v16  ;;  %2044 = vmatpush.msra.mxu0 %v1759_v17  ;;  %v2267_v63 = vld [vmem:[%s11350_s7 + $0x158] sm:$0xff]  ;;  %v2264_v13 = vld [vmem:[%s11350_s7 + $0x140] sm:$0xff] }
 0x79a   : > { %2067 = vmatpush.msrb.mxu1 %v1760_v19  ;;  %2090 = vmatpush.msrb.mxu2 %v1761_v20  ;;  %v2280_v16 = vld [vmem:[%s11350_s7 + $0x1c0] sm:$0xff]  ;;  %v2247_v17 = vld [vmem:[%s11350_s7 + $0xb8] sm:$0xff] }
 0x79b   : > { %v9375_v14 = vadd.f32 %v8838_v2, %v1712_v22  ;;  %2022 = vmatpush.msra.mxu3 %v1742_v21  ;;  %2045 = vmatpush.msra.mxu0 %v1743_v4  ;;  %v2250_v2 = vld [vmem:[%s11350_s7 + $0xd0] sm:$0xff]  ;;  %v2263_v18 = vld [vmem:[%s11350_s7 + $0x138] sm:$0xff] }
 0x79c   : > { %2068 = vmatpush.msrb.mxu1 %v1744_v23  ;;  %2091 = vmatpush.msrb.mxu2 %v1745_v8  ;;  %v2231_v19 = vld [vmem:[%s11350_s7 + $0x38] sm:$0xff]  ;;  %v2246_v21 = vld [vmem:[%s11350_s7 + $0xb0] sm:$0xff]  ;;  %v2245_v8 = vld [vmem:[%s11350_s7 + $0xa8] sm:$0xff] }
 0x79d   : > { %7806 = vmatmul.msk.f32.gmra.mxu3 %vm1125_vm6, %v9375_v14  ;;  %7808 = vmatmul.msk.f32.gmra.mxu0 %vm1125_vm6, %v9375_v14  ;;  %v2279_v20 = vld [vmem:[%s11350_s7 + $0x1b8] sm:$0xff]  ;;  %v2262_v4 = vld [vmem:[%s11350_s7 + $0x130] sm:$0xff] }
 0x79e   : > { %7810 = vmatmul.msk.f32.gmra.mxu1 %vm1125_vm6, %v9375_v14  ;;  %7812 = vmatmul.msk.f32.gmra.mxu2 %vm1125_vm6, %v9375_v14  ;;  %v2230_v22 = vld [vmem:[%s11350_s7 + $0x30] sm:$0xff] }
 0x79f   : > { %2023 = vmatpush.msra.mxu3 %v1726_v24  ;;  %2046 = vmatpush.msra.mxu0 %v1727_v25  ;;  %v2278_v23 = vld [vmem:[%s11350_s7 + $0x1b0] sm:$0xff]  ;;  %v2261_v24 = vld [vmem:[%s11350_s7 + $0x128] sm:$0xff] }
 0x7a0   : > { %2069 = vmatpush.msrb.mxu1 %v1728_v26  ;;  %2092 = vmatpush.msrb.mxu2 %v1729_v27  ;;  %v2229_v25 = vld [vmem:[%s11350_s7 + $0x28] sm:$0xff]  ;;  %v2244_v27 = vld [vmem:[%s11350_s7 + $0xa0] sm:$0xff] }
 0x7a1   : > { %v2277_v26 = vld [vmem:[%s11350_s7 + $0x1a8] sm:$0xff] }
 0x7a5   : > { %7813 = vmatmul.msk.f32.vlgmr.msrb.gmra.mxu3 %vm1125_vm6, %v9352_v9  ;;  %7815 = vmatmul.msk.f32.vlgmr.msrb.gmra.mxu0 %vm1125_vm6, %v9352_v9 }
 0x7a6   : > { %7817 = vmatmul.msk.f32.vlgmr.msra.gmra.mxu1 %vm1125_vm6, %v9352_v9  ;;  %7819 = vmatmul.msk.f32.vlgmr.msra.gmra.mxu2 %vm1125_vm6, %v9352_v9 }
 0x7a7   : > { %2112 = vmatpush.msrb.mxu3 %v1778_v28  ;;  %2135 = vmatpush.msrb.mxu0 %v1779_v29  ;;  %v2260_v28 = vld [vmem:[%s11350_s7 + $0x120] sm:$0xff] }
 0x7a8   : > { %2158 = vmatpush.msra.mxu1 %v1780_v30  ;;  %2181 = vmatpush.msra.mxu2 %v1781_v31  ;;  %v2228_v29 = vld [vmem:[%s11350_s7 + $0x20] sm:$0xff]  ;;  %v2243_v31 = vld [vmem:[%s11350_s7 + $0x98] sm:$0xff] }
 0x7a9   : > { %2113 = vmatpush.msrb.mxu3 %v1762_v32  ;;  %2136 = vmatpush.msrb.mxu0 %v1763_v33  ;;  %v2276_v30 = vld [vmem:[%s11350_s7 + $0x1a0] sm:$0xff]  ;;  %v2259_v32 = vld [vmem:[%s11350_s7 + $0x118] sm:$0xff] }
 0x7aa   : > { %2159 = vmatpush.msra.mxu1 %v1764_v34  ;;  %2182 = vmatpush.msra.mxu2 %v1765_v35  ;;  %v2227_v33 = vld [vmem:[%s11350_s7 + $0x18] sm:$0xff]  ;;  %v2242_v35 = vld [vmem:[%s11350_s7 + $0x90] sm:$0xff] }
 0x7ab   : > { %2114 = vmatpush.msrb.mxu3 %v1746_v37  ;;  %2137 = vmatpush.msrb.mxu0 %v1747_v38  ;;  %v2275_v34 = vld [vmem:[%s11350_s7 + $0x198] sm:$0xff]  ;;  %v2258_v37 = vld [vmem:[%s11350_s7 + $0x110] sm:$0xff] }
 0x7ac   : > { %2160 = vmatpush.msra.mxu1 %v1748_v39  ;;  %2183 = vmatpush.msra.mxu2 %v1749_v40  ;;  %v2226_v38 = vld [vmem:[%s11350_s7 + $0x10] sm:$0xff]  ;;  %v2241_v40 = vld [vmem:[%s11350_s7 + $0x88] sm:$0xff] }
 0x7ad   : > { %7814 = vmatmul.msk.f32.gmra.mxu3 %vm1125_vm6, %v9375_v14  ;;  %7816 = vmatmul.msk.f32.gmra.mxu0 %vm1125_vm6, %v9375_v14  ;;  %v2274_v39 = vld [vmem:[%s11350_s7 + $0x190] sm:$0xff] }
 0x7ae   : > { %7818 = vmatmul.msk.f32.gmra.mxu1 %vm1125_vm6, %v9375_v14  ;;  %7820 = vmatmul.msk.f32.gmra.mxu2 %vm1125_vm6, %v9375_v14 }
 0x7af   : > { %2115 = vmatpush.msrb.mxu3 %v1730_v41  ;;  %2138 = vmatpush.msrb.mxu0 %v1731_v43  ;;  %v2257_v41 = vld [vmem:[%s11350_s7 + $0x108] sm:$0xff] }
 0x7b0   : > { %2161 = vmatpush.msra.mxu1 %v1732_v44  ;;  %2184 = vmatpush.msra.mxu2 %v1733_v45  ;;  %v2225_v43 = vld [vmem:[%s11350_s7 + $0x8] sm:$0xff]  ;;  %v2240_v45 = vld [vmem:[%s11350_s7 + $0x80] sm:$0xff] }
 0x7b1   : > { %v2273_v44 = vld [vmem:[%s11350_s7 + $0x188] sm:$0xff] }
 0x7b5   : > { %7821 = vmatmul.msk.f32.vlgmr.msra.gmra.mxu3 %vm1125_vm6, %v9352_v9  ;;  %7823 = vmatmul.msk.f32.vlgmr.msra.gmra.mxu0 %vm1125_vm6, %v9352_v9 }
 0x7b6   : > { %7825 = vmatmul.msk.f32.vlgmr.msrb.gmra.mxu1 %vm1125_vm6, %v9352_v9  ;;  %7827 = vmatmul.msk.f32.vlgmr.msrb.gmra.mxu2 %vm1125_vm6, %v9352_v9 }
 0x7b7   : > { %2507 = vmatpush.msra.mxu0 %v2255_v46  ;;  %2530 = vmatpush.msrb.mxu1 %v2271_v47  ;;  %v2256_v46 = vld [vmem:[%s11350_s7 + $0x100] sm:$0xff]  ;;  %v2319_v47 = vld [vmem:[%s11350_s7 + $0x2f8] sm:$0xff] }
 0x7b8   : > { %2484 = vmatpush.msra.mxu3 %v2239_v48  ;;  %2553 = vmatpush.msrb.mxu2 %v2287_v49  ;;  %v2335_v48 = vld [vmem:[%s11350_s7 + $0x378] sm:$0xff]  ;;  %v2224_v49 = vld [vmem:[%s11350_s7] sm:$0xff] }
 0x7b9   : > { %2508 = vmatpush.msra.mxu0 %v2254_v50  ;;  %2531 = vmatpush.msrb.mxu1 %v2270_v51  ;;  %v2272_v50 = vld [vmem:[%s11350_s7 + $0x180] sm:$0xff]  ;;  %v2318_v51 = vld [vmem:[%s11350_s7 + $0x2f0] sm:$0xff] }
 0x7ba   : > { %2485 = vmatpush.msra.mxu3 %v2238_v52  ;;  %2554 = vmatpush.msrb.mxu2 %v2286_v53  ;;  %v2334_v52 = vld [vmem:[%s11350_s7 + $0x370] sm:$0xff]  ;;  %v2303_v53 = vld [vmem:[%s11350_s7 + $0x278] sm:$0xff] }
 0x7bb   : > { %2509 = vmatpush.msra.mxu0 %v2253_v54  ;;  %2532 = vmatpush.msrb.mxu1 %v2269_v55  ;;  %v2351_v54 = vld [vmem:[%s11350_s7 + $0x3f8] sm:$0xff]  ;;  %v2317_v55 = vld [vmem:[%s11350_s7 + $0x2e8] sm:$0xff] }
 0x7bc   : > { %2486 = vmatpush.msra.mxu3 %v2237_v56  ;;  %2555 = vmatpush.msrb.mxu2 %v2285_v57  ;;  %v2333_v56 = vld [vmem:[%s11350_s7 + $0x368] sm:$0xff]  ;;  %v2302_v57 = vld [vmem:[%s11350_s7 + $0x270] sm:$0xff] }
 0x7bd   : > { %7822 = vmatmul.msk.f32.gmra.mxu3 %vm1125_vm6, %v9375_v14  ;;  %7824 = vmatmul.msk.f32.gmra.mxu0 %vm1125_vm6, %v9375_v14 }
 0x7be   : > { %7826 = vmatmul.msk.f32.gmra.mxu1 %vm1125_vm6, %v9375_v14  ;;  %7828 = vmatmul.msk.f32.gmra.mxu2 %vm1125_vm6, %v9375_v14 }
 0x7bf   : > { %2510 = vmatpush.msra.mxu0 %v2252_v58  ;;  %2533 = vmatpush.msrb.mxu1 %v2268_v59  ;;  %v2350_v58 = vld [vmem:[%s11350_s7 + $0x3f0] sm:$0xff]  ;;  %v2316_v59 = vld [vmem:[%s11350_s7 + $0x2e0] sm:$0xff] }
 0x7c0   : > { %2487 = vmatpush.msra.mxu3 %v2236_v60  ;;  %2556 = vmatpush.msrb.mxu2 %v2284_v61  ;;  %v2332_v60 = vld [vmem:[%s11350_s7 + $0x360] sm:$0xff]  ;;  %v2301_v61 = vld [vmem:[%s11350_s7 + $0x268] sm:$0xff] }
 0x7c1   : > { %2511 = vmatpush.msra.mxu0 %v2251_v62  ;;  %2534 = vmatpush.msrb.mxu1 %v2267_v63  ;;  %v2349_v62 = vld [vmem:[%s11350_s7 + $0x3e8] sm:$0xff]  ;;  %v2315_v63 = vld [vmem:[%s11350_s7 + $0x2d8] sm:$0xff] }
 0x7c2   : > { %2488 = vmatpush.msra.mxu3 %v2235_v0  ;;  %2557 = vmatpush.msrb.mxu2 %v2283_v1  ;;  %v2331_v0 = vld [vmem:[%s11350_s7 + $0x358] sm:$0xff]  ;;  %v2300_v1 = vld [vmem:[%s11350_s7 + $0x260] sm:$0xff] }
 0x7c3   : > { %2512 = vmatpush.msra.mxu0 %v2250_v2  ;;  %2535 = vmatpush.msrb.mxu1 %v2266_v3  ;;  %v2348_v2 = vld [vmem:[%s11350_s7 + $0x3e0] sm:$0xff]  ;;  %v2314_v3 = vld [vmem:[%s11350_s7 + $0x2d0] sm:$0xff] }
 0x7c4   : > { %2489 = vmatpush.msra.mxu3 %v2234_v5  ;;  %2558 = vmatpush.msrb.mxu2 %v2282_v36  ;;  %v2330_v5 = vld [vmem:[%s11350_s7 + $0x350] sm:$0xff]  ;;  %v2299_v36 = vld [vmem:[%s11350_s7 + $0x258] sm:$0xff] }
 0x7c5   : > { %7829 = vmatmul.msk.f32.vlgmr.msrb.gmra.mxu3 %vm1125_vm6, %v9352_v9  ;;  %7831 = vmatmul.msk.f32.vlgmr.msrb.gmra.mxu0 %vm1125_vm6, %v9352_v9 }
 0x7c6   : > { %7833 = vmatmul.msk.f32.vlgmr.msra.gmra.mxu1 %vm1125_vm6, %v9352_v9  ;;  %7835 = vmatmul.msk.f32.vlgmr.msra.gmra.mxu2 %vm1125_vm6, %v9352_v9 }
 0x7c7   : > { %2513 = vmatpush.msra.mxu0 %v2249_v7  ;;  %2536 = vmatpush.msrb.mxu1 %v2265_v10  ;;  %v2347_v7 = vld [vmem:[%s11350_s7 + $0x3d8] sm:$0xff]  ;;  %v2313_v10 = vld [vmem:[%s11350_s7 + $0x2c8] sm:$0xff] }
 0x7c8   : > { %2490 = vmatpush.msra.mxu3 %v2233_v11  ;;  %2559 = vmatpush.msrb.mxu2 %v2281_v12  ;;  %v2329_v11 = vld [vmem:[%s11350_s7 + $0x348] sm:$0xff]  ;;  %v2298_v12 = vld [vmem:[%s11350_s7 + $0x250] sm:$0xff] }
 0x7c9   : > { %2514 = vmatpush.msra.mxu0 %v2248_v42  ;;  %2537 = vmatpush.msrb.mxu1 %v2264_v13  ;;  %v2346_v42 = vld [vmem:[%s11350_s7 + $0x3d0] sm:$0xff]  ;;  %v2312_v13 = vld [vmem:[%s11350_s7 + $0x2c0] sm:$0xff] }
 0x7ca   : > { %2491 = vmatpush.msra.mxu3 %v2232_v15  ;;  %2560 = vmatpush.msrb.mxu2 %v2280_v16  ;;  %v2328_v15 = vld [vmem:[%s11350_s7 + $0x340] sm:$0xff]  ;;  %v2297_v16 = vld [vmem:[%s11350_s7 + $0x248] sm:$0xff] }
 0x7cb   : > { %2515 = vmatpush.msra.mxu0 %v2247_v17  ;;  %2538 = vmatpush.msrb.mxu1 %v2263_v18  ;;  %v2345_v17 = vld [vmem:[%s11350_s7 + $0x3c8] sm:$0xff]  ;;  %v2311_v18 = vld [vmem:[%s11350_s7 + $0x2b8] sm:$0xff] }
 0x7cc   : > { %2492 = vmatpush.msra.mxu3 %v2231_v19  ;;  %2561 = vmatpush.msrb.mxu2 %v2279_v20  ;;  %v2327_v19 = vld [vmem:[%s11350_s7 + $0x338] sm:$0xff]  ;;  %v2296_v20 = vld [vmem:[%s11350_s7 + $0x240] sm:$0xff] }
 0x7cd   : > { %7830 = vmatmul.msk.f32.gmra.mxu3 %vm1125_vm6, %v9375_v14  ;;  %7832 = vmatmul.msk.f32.gmra.mxu0 %vm1125_vm6, %v9375_v14 }
 0x7ce   : > { %7834 = vmatmul.msk.f32.gmra.mxu1 %vm1125_vm6, %v9375_v14  ;;  %7836 = vmatmul.msk.f32.gmra.mxu2 %vm1125_vm6, %v9375_v14 }
 0x7cf   : > { %2516 = vmatpush.msra.mxu0 %v2246_v21  ;;  %2539 = vmatpush.msrb.mxu1 %v2262_v4  ;;  %v2344_v21 = vld [vmem:[%s11350_s7 + $0x3c0] sm:$0xff]  ;;  %v2310_v4 = vld [vmem:[%s11350_s7 + $0x2b0] sm:$0xff] }
 0x7d0   : > { %2493 = vmatpush.msra.mxu3 %v2230_v22  ;;  %2562 = vmatpush.msrb.mxu2 %v2278_v23  ;;  %v2326_v22 = vld [vmem:[%s11350_s7 + $0x330] sm:$0xff]  ;;  %v2295_v23 = vld [vmem:[%s11350_s7 + $0x238] sm:$0xff] }
 0x7d1   : > { %2517 = vmatpush.msra.mxu0 %v2245_v8  ;;  %2540 = vmatpush.msrb.mxu1 %v2261_v24  ;;  %v2343_v8 = vld [vmem:[%s11350_s7 + $0x3b8] sm:$0xff]  ;;  %v2309_v24 = vld [vmem:[%s11350_s7 + $0x2a8] sm:$0xff] }
 0x7d2   : > { %2494 = vmatpush.msra.mxu3 %v2229_v25  ;;  %2563 = vmatpush.msrb.mxu2 %v2277_v26  ;;  %v2325_v25 = vld [vmem:[%s11350_s7 + $0x328] sm:$0xff]  ;;  %v2294_v26 = vld [vmem:[%s11350_s7 + $0x230] sm:$0xff] }
 0x7d3   : > { %2518 = vmatpush.msra.mxu0 %v2244_v27  ;;  %2541 = vmatpush.msrb.mxu1 %v2260_v28  ;;  %v2342_v27 = vld [vmem:[%s11350_s7 + $0x3b0] sm:$0xff]  ;;  %v2308_v28 = vld [vmem:[%s11350_s7 + $0x2a0] sm:$0xff] }
 0x7d4   : > { %2495 = vmatpush.msra.mxu3 %v2228_v29  ;;  %2564 = vmatpush.msrb.mxu2 %v2276_v30  ;;  %v2324_v29 = vld [vmem:[%s11350_s7 + $0x320] sm:$0xff]  ;;  %v2307_v30 = vld [vmem:[%s11350_s7 + $0x298] sm:$0xff] }
 0x7d5   : > { %2519 = vmatpush.msra.mxu0 %v2243_v31  ;;  %2542 = vmatpush.msrb.mxu1 %v2259_v32  ;;  %v2323_v31 = vld [vmem:[%s11350_s7 + $0x318] sm:$0xff]  ;;  %v2293_v32 = vld [vmem:[%s11350_s7 + $0x228] sm:$0xff] }
 0x7d6   : > { %2496 = vmatpush.msra.mxu3 %v2227_v33  ;;  %2565 = vmatpush.msrb.mxu2 %v2275_v34  ;;  %v2306_v33 = vld [vmem:[%s11350_s7 + $0x290] sm:$0xff] }
 0x7d7   : > { %2520 = vmatpush.msra.mxu0 %v2242_v35  ;;  %2543 = vmatpush.msrb.mxu1 %v2258_v37  ;;  %v2322_v34 = vld [vmem:[%s11350_s7 + $0x310] sm:$0xff]  ;;  %v2341_v35 = vld [vmem:[%s11350_s7 + $0x3a8] sm:$0xff]  ;;  %v2292_v37 = vld [vmem:[%s11350_s7 + $0x220] sm:$0xff] }
 0x7d8   : > { %2497 = vmatpush.msra.mxu3 %v2226_v38  ;;  %2566 = vmatpush.msrb.mxu2 %v2274_v39  ;;  %v2305_v38 = vld [vmem:[%s11350_s7 + $0x288] sm:$0xff] }
 0x7d9   : > { %2521 = vmatpush.msra.mxu0 %v2241_v40  ;;  %2544 = vmatpush.msrb.mxu1 %v2257_v41  ;;  %v2321_v39 = vld [vmem:[%s11350_s7 + $0x308] sm:$0xff]  ;;  %v2340_v40 = vld [vmem:[%s11350_s7 + $0x3a0] sm:$0xff]  ;;  %v2291_v41 = vld [vmem:[%s11350_s7 + $0x218] sm:$0xff] }
 0x7da   : > { %2498 = vmatpush.msra.mxu3 %v2225_v43  ;;  %2567 = vmatpush.msrb.mxu2 %v2273_v44  ;;  %v2304_v43 = vld [vmem:[%s11350_s7 + $0x280] sm:$0xff] }
 0x7db   : > { %2522 = vmatpush.msra.mxu0 %v2240_v45  ;;  %2545 = vmatpush.msrb.mxu1 %v2256_v46  ;;  %v2320_v44 = vld [vmem:[%s11350_s7 + $0x300] sm:$0xff]  ;;  %v2339_v45 = vld [vmem:[%s11350_s7 + $0x398] sm:$0xff]  ;;  %v2290_v46 = vld [vmem:[%s11350_s7 + $0x210] sm:$0xff] }
 0x7dc   : > { %2499 = vmatpush.msra.mxu3 %v2224_v49  ;;  %2568 = vmatpush.msrb.mxu2 %v2272_v50  ;;  %v2337_v49 = vld [vmem:[%s11350_s7 + $0x388] sm:$0xff]  ;;  %v2288_v50 = vld [vmem:[%s11350_s7 + $0x200] sm:$0xff] }
 0x7dd   : > { %2599 = vmatpush.msrb.mxu0 %v2319_v47  ;;  %2622 = vmatpush.msra.mxu1 %v2335_v48  ;;  %v2338_v47 = vld [vmem:[%s11350_s7 + $0x390] sm:$0xff]  ;;  %v2289_v48 = vld [vmem:[%s11350_s7 + $0x208] sm:$0xff] }
 0x7de   : > { %2576 = vmatpush.msrb.mxu3 %v2303_v53  ;;  %2645 = vmatpush.msra.mxu2 %v2351_v54 }
 0x7df   : > { %2600 = vmatpush.msrb.mxu0 %v2318_v51  ;;  %2623 = vmatpush.msra.mxu1 %v2334_v52  ;;  %v2336_v51 = vld [vmem:[%s11350_s7 + $0x380] sm:$0xff] }
 0x7e0   : > { %2577 = vmatpush.msrb.mxu3 %v2302_v57  ;;  %2646 = vmatpush.msra.mxu2 %v2350_v58  ;;  %v9582_v52 = vld [vmem:[%s11351_s10] sm:$0xff] }
 0x7e1   : > { %2601 = vmatpush.msrb.mxu0 %v2317_v55  ;;  %2624 = vmatpush.msra.mxu1 %v2333_v56  ;;  %v1787_v53 = vperm.slane %v9582_v52, 1  ;;  %v1788_v54 = vperm.slane %v9582_v52, 2 }
 0x7e2   : > { %2578 = vmatpush.msrb.mxu3 %v2301_v61  ;;  %2647 = vmatpush.msra.mxu2 %v2349_v62  ;;  %v1786_v61 = vperm.slane %v9582_v52, 0 }
 0x7e3   : > { %2602 = vmatpush.msrb.mxu0 %v2316_v59  ;;  %2625 = vmatpush.msra.mxu1 %v2332_v60  ;;  %v2383_v60 = vld [vmem:[%s11350_s7 + $0x4f8] sm:$0xff] }
 0x7e4   : > { %2579 = vmatpush.msrb.mxu3 %v2300_v1  ;;  %2648 = vmatpush.msra.mxu2 %v2348_v2  ;;  %v2382_v1 = vld [vmem:[%s11350_s7 + $0x4f0] sm:$0xff] }
 0x7e5   : > { %2603 = vmatpush.msrb.mxu0 %v2315_v63  ;;  %2626 = vmatpush.msra.mxu1 %v2331_v0  ;;  %v2399_v63 = vld [vmem:[%s11350_s7 + $0x578] sm:$0xff]  ;;  %v1789_v0 = vperm.slane %v9582_v52, 3 }
 0x7e6   : > { %2580 = vmatpush.msrb.mxu3 %v2299_v36  ;;  %2649 = vmatpush.msra.mxu2 %v2347_v7  ;;  %v2381_v7 = vld [vmem:[%s11350_s7 + $0x4e8] sm:$0xff] }
 0x7e7   : > { %2604 = vmatpush.msrb.mxu0 %v2314_v3  ;;  %2627 = vmatpush.msra.mxu1 %v2330_v5  ;;  %v2398_v3 = vld [vmem:[%s11350_s7 + $0x570] sm:$0xff] }
 0x7e8   : > { %2581 = vmatpush.msrb.mxu3 %v2298_v12  ;;  %2650 = vmatpush.msra.mxu2 %v2346_v42  ;;  %v2397_v12 = vld [vmem:[%s11350_s7 + $0x568] sm:$0xff] }
 0x7e9   : > { %2605 = vmatpush.msrb.mxu0 %v2313_v10  ;;  %2628 = vmatpush.msra.mxu1 %v2329_v11 }
 0x7ea   : > { %2582 = vmatpush.msrb.mxu3 %v2297_v16  ;;  %2651 = vmatpush.msra.mxu2 %v2345_v17  ;;  %v2367_v16 = vld [vmem:[%s11350_s7 + $0x478] sm:$0xff] }
 0x7eb   : > { %2606 = vmatpush.msrb.mxu0 %v2312_v13  ;;  %2629 = vmatpush.msra.mxu1 %v2328_v15 }
 0x7ec   : > { %2583 = vmatpush.msrb.mxu3 %v2296_v20  ;;  %2652 = vmatpush.msra.mxu2 %v2344_v21  ;;  %v2396_v20 = vld [vmem:[%s11350_s7 + $0x560] sm:$0xff]  ;;  %v2415_v21 = vld [vmem:[%s11350_s7 + $0x5f8] sm:$0xff] }
 0x7ed   : > { %2607 = vmatpush.msrb.mxu0 %v2311_v18  ;;  %2630 = vmatpush.msra.mxu1 %v2327_v19  ;;  %v2380_v19 = vld [vmem:[%s11350_s7 + $0x4e0] sm:$0xff] }
 0x7ee   : > { %2584 = vmatpush.msrb.mxu3 %v2295_v23  ;;  %2653 = vmatpush.msra.mxu2 %v2343_v8  ;;  %v2366_v23 = vld [vmem:[%s11350_s7 + $0x470] sm:$0xff]  ;;  %v2379_v8 = vld [vmem:[%s11350_s7 + $0x4d8] sm:$0xff] }
 0x7ef   : > { %2608 = vmatpush.msrb.mxu0 %v2310_v4  ;;  %2631 = vmatpush.msra.mxu1 %v2326_v22 }
 0x7f0   : > { %2585 = vmatpush.msrb.mxu3 %v2294_v26  ;;  %2654 = vmatpush.msra.mxu2 %v2342_v27  ;;  %v2414_v26 = vld [vmem:[%s11350_s7 + $0x5f0] sm:$0xff] }
 0x7f1   : > { %2609 = vmatpush.msrb.mxu0 %v2309_v24  ;;  %2632 = vmatpush.msra.mxu1 %v2325_v25  ;;  %v2395_v24 = vld [vmem:[%s11350_s7 + $0x558] sm:$0xff]  ;;  %v1791_v25 = vperm.slane %v9582_v52, 5 }
 0x7f2   : > { %2586 = vmatpush.msrb.mxu3 %v2293_v32  ;;  %2655 = vmatpush.msra.mxu2 %v2341_v35  ;;  %v2378_v32 = vld [vmem:[%s11350_s7 + $0x4d0] sm:$0xff]  ;;  %v2413_v35 = vld [vmem:[%s11350_s7 + $0x5e8] sm:$0xff] }
 0x7f3   : > { %2610 = vmatpush.msrb.mxu0 %v2308_v28  ;;  %2633 = vmatpush.msra.mxu1 %v2324_v29  ;;  %v2365_v28 = vld [vmem:[%s11350_s7 + $0x468] sm:$0xff]  ;;  %v1792_v29 = vperm.slane %v9582_v52, 6 }
 0x7f4   : > { %2587 = vmatpush.msrb.mxu3 %v2292_v37  ;;  %2656 = vmatpush.msra.mxu2 %v2340_v40 }
 0x7f5   : > { %2611 = vmatpush.msrb.mxu0 %v2307_v30  ;;  %2634 = vmatpush.msra.mxu1 %v2323_v31 }
 0x7f6   : > { %2588 = vmatpush.msrb.mxu3 %v2291_v41  ;;  %2657 = vmatpush.msra.mxu2 %v2339_v45  ;;  %v2377_v41 = vld [vmem:[%s11350_s7 + $0x4c8] sm:$0xff] }
 0x7f7   : > { %2612 = vmatpush.msrb.mxu0 %v2306_v33  ;;  %2635 = vmatpush.msra.mxu1 %v2322_v34  ;;  %v2394_v33 = vld [vmem:[%s11350_s7 + $0x550] sm:$0xff] }
 0x7f8   : > { %2589 = vmatpush.msrb.mxu3 %v2290_v46  ;;  %2658 = vmatpush.msra.mxu2 %v2338_v47  ;;  %v2412_v46 = vld [vmem:[%s11350_s7 + $0x5e0] sm:$0xff] }
 0x7f9   : > { %2613 = vmatpush.msrb.mxu0 %v2305_v38  ;;  %2636 = vmatpush.msra.mxu1 %v2321_v39  ;;  %v2364_v38 = vld [vmem:[%s11350_s7 + $0x460] sm:$0xff] }
 0x7fa   : > { %2590 = vmatpush.msrb.mxu3 %v2289_v48  ;;  %2659 = vmatpush.msra.mxu2 %v2337_v49  ;;  %v2363_v48 = vld [vmem:[%s11350_s7 + $0x458] sm:$0xff]  ;;  %v1790_v49 = vperm.slane %v9582_v52, 4 }
 0x7fb   : > { %2614 = vmatpush.msrb.mxu0 %v2304_v43  ;;  %2637 = vmatpush.msra.mxu1 %v2320_v44  ;;  %v2393_v43 = vld [vmem:[%s11350_s7 + $0x548] sm:$0xff] }
 0x7fc   : > { %2591 = vmatpush.msrb.mxu3 %v2288_v50  ;;  %2660 = vmatpush.msra.mxu2 %v2336_v51  ;;  %v2376_v51 = vld [vmem:[%s11350_s7 + $0x4c0] sm:$0xff] }
 0x812   : > { %v1864_v55 = vpop.f32.mrf.mxu0 }
 0x813   : > { %v1865_v56 = vadd.f32 %v1864_v55, %v1787_v53  ;;  %v1887_v57 = vpop.f32.mrf.mxu1 }
 0x814   : > { %v1888_v58 = vadd.f32 %v1887_v57, %v1788_v54  ;;  %v2362_v57 = vld [vmem:[%s11350_s7 + $0x450] sm:$0xff] }
 0x815   : > { %v2193_v59 = vmax.f32 %v1865_v56, 0.0  ;;  %v2411_v56 = vld [vmem:[%s11350_s7 + $0x5d8] sm:$0xff] }
 0x816   : > { %v2194_v62 = vmax.f32 %v1888_v58, 0.0 }
 0x817   : > { %2523 = vmatmul.f32.vlgmr.msra.gmra.mxu0 %v2193_v59  ;;  %v2375_v59 = vld [vmem:[%s11350_s7 + $0x4b8] sm:$0xff] }
 0x818   : > { %2546 = vmatmul.f32.vlgmr.msrb.gmra.mxu1 %v2194_v62  ;;  %2691 = vmatpush.msra.mxu0 %v2383_v60  ;;  %v1841_v2 = vpop.f32.mrf.mxu3  ;;  %v2391_v60 = vld [vmem:[%s11350_s7 + $0x538] sm:$0xff] }
 0x819   : > { %2714 = vmatpush.msrb.mxu1 %v2399_v63  ;;  %v1842_v5 = vadd.f32 %v1841_v2, %v1786_v61  ;;  %v1910_v36 = vpop.f32.mrf.mxu2  ;;  %v2410_v63 = vld [vmem:[%s11350_s7 + $0x5d0] sm:$0xff] }
 0x81a   : > { %v1911_v10 = vadd.f32 %v1910_v36, %v1789_v0  ;;  %2692 = vmatpush.msra.mxu0 %v2382_v1  ;;  %v1867_v11 = vpop.f32.mrf.mxu0  ;;  %v2361_v1 = vld [vmem:[%s11350_s7 + $0x448] sm:$0xff] }
 0x81b   : > { %v2192_v42 = vmax.f32 %v1842_v5, 0.0  ;;  %2715 = vmatpush.msrb.mxu1 %v2398_v3  ;;  %v1868_v13 = vadd.f32 %v1867_v11, %v1787_v53  ;;  %v1890_v15 = vpop.f32.mrf.mxu1  ;;  %v2392_v53 = vld [vmem:[%s11350_s7 + $0x540] sm:$0xff]  ;;  %v2374_v3 = vld [vmem:[%s11350_s7 + $0x4b0] sm:$0xff] }
 0x81c   : > { %v2195_v17 = vmax.f32 %v1911_v10, 0.0  ;;  %v1891_v18 = vadd.f32 %v1890_v15, %v1788_v54  ;;  %2693 = vmatpush.msra.mxu0 %v2381_v7  ;;  %v1793_v54 = vperm.slane %v9582_v52, 7  ;;  %v2390_v5 = vld [vmem:[%s11350_s7 + $0x530] sm:$0xff]  ;;  %v2409_v7 = vld [vmem:[%s11350_s7 + $0x5c8] sm:$0xff]  ;;  %v2360_v11 = vld [vmem:[%s11350_s7 + $0x440] sm:$0xff] }
 0x81d   : > { %2716 = vmatpush.msrb.mxu1 %v2397_v12  ;;  %2500 = vmatmul.f32.vlgmr.msra.gmra.mxu3 %v2192_v42  ;;  %v2209_v4 = vmax.f32 %v1868_v13, 0.0  ;;  %v2373_v13 = vld [vmem:[%s11350_s7 + $0x4a8] sm:$0xff]  ;;  %v2356_v52 = vld [vmem:[%s11350_s7 + $0x420] sm:$0xff] }
 0x81e   : > { %2569 = vmatmul.f32.vlgmr.msrb.gmra.mxu2 %v2195_v17  ;;  %2668 = vmatpush.msra.mxu3 %v2367_v16  ;;  %v2210_v22 = vmax.f32 %v1891_v18, 0.0  ;;  %v2389_v15 = vld [vmem:[%s11350_s7 + $0x528] sm:$0xff]  ;;  %v2408_v17 = vld [vmem:[%s11350_s7 + $0x5c0] sm:$0xff]  ;;  %v2359_v18 = vld [vmem:[%s11350_s7 + $0x438] sm:$0xff] }
 0x81f   : > { %2694 = vmatpush.msra.mxu0 %v2380_v19  ;;  %2717 = vmatpush.msrb.mxu1 %v2396_v20  ;;  %v2372_v19 = vld [vmem:[%s11350_s7 + $0x4a0] sm:$0xff] }
 0x820   : > { %2737 = vmatpush.msrb.mxu2 %v2415_v21  ;;  %2526 = vmatmul.f32.gmra.mxu0 %v2209_v4  ;;  %v1844_v27 = vpop.f32.mrf.mxu3  ;;  %v2388_v20 = vld [vmem:[%s11350_s7 + $0x520] sm:$0xff] }
 0x821   : > { %2549 = vmatmul.f32.gmra.mxu1 %v2210_v22  ;;  %2669 = vmatpush.msra.mxu3 %v2366_v23  ;;  %v1845_v30 = vadd.f32 %v1844_v27, %v1786_v61  ;;  %v1913_v31 = vpop.f32.mrf.mxu2  ;;  %v2407_v22 = vld [vmem:[%s11350_s7 + $0x5b8] sm:$0xff] }
 0x822   : > { %2695 = vmatpush.msra.mxu0 %v2379_v8  ;;  %2718 = vmatpush.msrb.mxu1 %v2395_v24  ;;  %v1914_v34 = vadd.f32 %v1913_v31, %v1789_v0  ;;  %v1956_v37 = vpop.f32.mrf.mxu0  ;;  %v9647_v24 = vld [vmem:[%s11351_s10 + $0x8] sm:$0xff]  ;;  %v2387_v27 = vld [vmem:[%s11350_s7 + $0x518] sm:$0xff] }
 0x823   : > { %2738 = vmatpush.msrb.mxu2 %v2414_v26  ;;  %2670 = vmatpush.msra.mxu3 %v2365_v28  ;;  %v1957_v39 = vadd.f32 %v1956_v37, %v1791_v25  ;;  %v1979_v40 = vpop.f32.mrf.mxu1  ;;  %v2208_v44 = vmax.f32 %v1845_v30, 0.0  ;;  %v2371_v26 = vld [vmem:[%s11350_s7 + $0x498] sm:$0xff]  ;;  %v2357_v31 = vld [vmem:[%s11350_s7 + $0x428] sm:$0xff] }
 0x824   : > { %2696 = vmatpush.msra.mxu0 %v2378_v32  ;;  %2719 = vmatpush.msrb.mxu1 %v2394_v33  ;;  %v1980_v45 = vadd.f32 %v1979_v40, %v1792_v29  ;;  %v2211_v47 = vmax.f32 %v1914_v34, 0.0  ;;  %v1795_v32 = vperm.slane %v9647_v24, 1  ;;  %v1796_v33 = vperm.slane %v9647_v24, 2  ;;  %v2370_v34 = vld [vmem:[%s11350_s7 + $0x490] sm:$0xff]  ;;  %v2369_v40 = vld [vmem:[%s11350_s7 + $0x488] sm:$0xff] }
 0x825   : > { %2739 = vmatpush.msrb.mxu2 %v2413_v35  ;;  %2671 = vmatpush.msra.mxu3 %v2364_v38  ;;  %v2197_v50 = vmax.f32 %v1957_v39, 0.0  ;;  %v2386_v35 = vld [vmem:[%s11350_s7 + $0x510] sm:$0xff]  ;;  %v2405_v39 = vld [vmem:[%s11350_s7 + $0x5a8] sm:$0xff] }
 0x826   : > { %2697 = vmatpush.msra.mxu0 %v2377_v41  ;;  %2720 = vmatpush.msrb.mxu1 %v2393_v43  ;;  %v2198_v55 = vmax.f32 %v1980_v45, 0.0  ;;  %v2385_v41 = vld [vmem:[%s11350_s7 + $0x508] sm:$0xff] }
 0x827   : > { %2740 = vmatpush.msrb.mxu2 %v2412_v46  ;;  %2503 = vmatmul.f32.gmra.mxu3 %v2208_v44  ;;  %v2404_v46 = vld [vmem:[%s11350_s7 + $0x5a0] sm:$0xff] }
 0x828   : > { %2572 = vmatmul.f32.gmra.mxu2 %v2211_v47  ;;  %2672 = vmatpush.msra.mxu3 %v2363_v48  ;;  %v1933_v58 = vpop.f32.mrf.mxu3  ;;  %v2355_v48 = vld [vmem:[%s11350_s7 + $0x418] sm:$0xff] }
 0x829   : > { %2698 = vmatpush.msra.mxu0 %v2376_v51  ;;  %2721 = vmatpush.msrb.mxu1 %v2392_v53  ;;  %v1934_v61 = vadd.f32 %v1933_v58, %v1790_v49  ;;  %v2002_v62 = vpop.f32.mrf.mxu2  ;;  %v2403_v51 = vld [vmem:[%s11350_s7 + $0x598] sm:$0xff]  ;;  %v2354_v58 = vld [vmem:[%s11350_s7 + $0x410] sm:$0xff] }
 0x82a   : > { %2741 = vmatpush.msrb.mxu2 %v2411_v56  ;;  %2615 = vmatmul.f32.vlgmr.msrb.gmra.mxu0 %v2197_v50  ;;  %v2003_v0 = vadd.f32 %v2002_v62, %v1793_v54  ;;  %v1959_v2 = vpop.f32.mrf.mxu0  ;;  %v2384_v50 = vld [vmem:[%s11350_s7 + $0x500] sm:$0xff]  ;;  %v2447_v53 = vld [vmem:[%s11350_s7 + $0x6f8] sm:$0xff]  ;;  %v2402_v62 = vld [vmem:[%s11350_s7 + $0x590] sm:$0xff] }
 0x82b   : > { %2638 = vmatmul.f32.vlgmr.msra.gmra.mxu1 %v2198_v55  ;;  %2673 = vmatpush.msra.mxu3 %v2362_v57  ;;  %v1982_v36 = vpop.f32.mrf.mxu1  ;;  %v1960_v10 = vadd.f32 %v1959_v2, %v1791_v25  ;;  %v2196_v12 = vmax.f32 %v1934_v61, 0.0  ;;  %v2358_v25 = vld [vmem:[%s11350_s7 + $0x430] sm:$0xff]  ;;  %v2463_v57 = vld [vmem:[%s11350_s7 + $0x778] sm:$0xff]  ;;  %v2353_v2 = vld [vmem:[%s11350_s7 + $0x408] sm:$0xff] }
 0x82c   : > { %2699 = vmatpush.msra.mxu0 %v2375_v59  ;;  %2722 = vmatpush.msrb.mxu1 %v2391_v60  ;;  %v1983_v42 = vadd.f32 %v1982_v36, %v1792_v29  ;;  %v2199_v16 = vmax.f32 %v2003_v0, 0.0  ;;  %v2406_v29 = vld [vmem:[%s11350_s7 + $0x5b0] sm:$0xff]  ;;  %v1797_v60 = vperm.slane %v9647_v24, 3  ;;  %v2401_v36 = vld [vmem:[%s11350_s7 + $0x588] sm:$0xff] }
 0x82d   : > { %2742 = vmatpush.msrb.mxu2 %v2410_v63  ;;  %2674 = vmatpush.msra.mxu3 %v2361_v1  ;;  %v2213_v21 = vmax.f32 %v1960_v10, 0.0  ;;  %v2446_v63 = vld [vmem:[%s11350_s7 + $0x6f0] sm:$0xff]  ;;  %v2445_v10 = vld [vmem:[%s11350_s7 + $0x6e8] sm:$0xff] }
 0x82e   : > { %2700 = vmatpush.msra.mxu0 %v2374_v3  ;;  %2723 = vmatpush.msrb.mxu1 %v2390_v5  ;;  %v2214_v23 = vmax.f32 %v1983_v42, 0.0  ;;  %v2462_v1 = vld [vmem:[%s11350_s7 + $0x770] sm:$0xff] }
 0x82f   : > { %2743 = vmatpush.msrb.mxu2 %v2409_v7  ;;  %2675 = vmatpush.msra.mxu3 %v2360_v11  ;;  %v2461_v11 = vld [vmem:[%s11350_s7 + $0x768] sm:$0xff] }
 0x830   : > { %2701 = vmatpush.msra.mxu0 %v2373_v13  ;;  %2724 = vmatpush.msrb.mxu1 %v2389_v15  ;;  %v1936_v4 = vpop.f32.mrf.mxu3  ;;  %v2400_v13 = vld [vmem:[%s11350_s7 + $0x580] sm:$0xff]  ;;  %v2431_v15 = vld [vmem:[%s11350_s7 + $0x678] sm:$0xff] }
 0x831   : > { %2744 = vmatpush.msrb.mxu2 %v2408_v17  ;;  %2592 = vmatmul.f32.vlgmr.msrb.gmra.mxu3 %v2196_v12  ;;  %v2005_v8 = vpop.f32.mrf.mxu2  ;;  %v1937_v28 = vadd.f32 %v1936_v4, %v1790_v49  ;;  %v2368_v49 = vld [vmem:[%s11350_s7 + $0x480] sm:$0xff]  ;;  %v2430_v4 = vld [vmem:[%s11350_s7 + $0x670] sm:$0xff] }
 0x832   : > { %2661 = vmatmul.f32.vlgmr.msra.gmra.mxu2 %v2199_v16  ;;  %2676 = vmatpush.msra.mxu3 %v2359_v18  ;;  %v2006_v30 = vadd.f32 %v2005_v8, %v1793_v54  ;;  %v2048_v37 = vpop.f32.mrf.mxu0  ;;  %v1794_v54 = vperm.slane %v9647_v24, 0  ;;  %v2352_v12 = vld [vmem:[%s11350_s7 + $0x400] sm:$0xff] }
 0x833   : > { %2702 = vmatpush.msra.mxu0 %v2372_v19  ;;  %2725 = vmatpush.msrb.mxu1 %v2388_v20  ;;  %v2071_v38 = vpop.f32.mrf.mxu1  ;;  %v2212_v43 = vmax.f32 %v1937_v28, 0.0  ;;  %v2049_v44 = vadd.f32 %v2048_v37, %v1795_v32  ;;  %v2444_v18 = vld [vmem:[%s11350_s7 + $0x6e0] sm:$0xff]  ;;  %v2441_v37 = vld [vmem:[%s11350_s7 + $0x6c8] sm:$0xff] }
 0x834   : > { %2745 = vmatpush.msrb.mxu2 %v2407_v22  ;;  %2618 = vmatmul.f32.gmra.mxu0 %v2213_v21  ;;  %v2072_v45 = vadd.f32 %v2071_v38, %v1796_v33  ;;  %v2215_v47 = vmax.f32 %v2006_v30, 0.0  ;;  %v2460_v19 = vld [vmem:[%s11350_s7 + $0x760] sm:$0xff]  ;;  %v2479_v21 = vld [vmem:[%s11350_s7 + $0x7f8] sm:$0xff]  ;;  %v2457_v38 = vld [vmem:[%s11350_s7 + $0x748] sm:$0xff] }
 0x835   : > { %2641 = vmatmul.f32.gmra.mxu1 %v2214_v23  ;;  %2677 = vmatpush.msra.mxu3 %v2358_v25  ;;  %v2201_v55 = vmax.f32 %v2049_v44, 0.0  ;;  %v2443_v22 = vld [vmem:[%s11350_s7 + $0x6d8] sm:$0xff] }
 0x836   : > { %2703 = vmatpush.msra.mxu0 %v2371_v26  ;;  %2726 = vmatpush.msrb.mxu1 %v2387_v27  ;;  %v2202_v56 = vmax.f32 %v2072_v45, 0.0  ;;  %v2459_v23 = vld [vmem:[%s11350_s7 + $0x758] sm:$0xff]  ;;  %v2478_v26 = vld [vmem:[%s11350_s7 + $0x7f0] sm:$0xff] }
 0x837   : > { %2746 = vmatpush.msrb.mxu2 %v2406_v29  ;;  %2678 = vmatpush.msra.mxu3 %v2357_v31  ;;  %v2429_v29 = vld [vmem:[%s11350_s7 + $0x668] sm:$0xff]  ;;  %v2442_v31 = vld [vmem:[%s11350_s7 + $0x6d0] sm:$0xff]  ;;  %v2475_v44 = vld [vmem:[%s11350_s7 + $0x7d8] sm:$0xff] }
 0x838   : > { %2704 = vmatpush.msra.mxu0 %v2370_v34  ;;  %2727 = vmatpush.msrb.mxu1 %v2386_v35  ;;  %v2025_v59 = vpop.f32.mrf.mxu3  ;;  %v2477_v34 = vld [vmem:[%s11350_s7 + $0x7e8] sm:$0xff]  ;;  %v2428_v35 = vld [vmem:[%s11350_s7 + $0x660] sm:$0xff] }
 0x839   : > { %2747 = vmatpush.msrb.mxu2 %v2405_v39  ;;  %2679 = vmatpush.msra.mxu3 %v2356_v52  ;;  %v2094_v61 = vpop.f32.mrf.mxu2  ;;  %v2026_v0 = vadd.f32 %v2025_v59, %v1794_v54  ;;  %v2476_v39 = vld [vmem:[%s11350_s7 + $0x7e0] sm:$0xff]  ;;  %v2427_v52 = vld [vmem:[%s11350_s7 + $0x658] sm:$0xff] }
 0x83a   : > { %2705 = vmatpush.msra.mxu0 %v2369_v40  ;;  %2728 = vmatpush.msrb.mxu1 %v2385_v41  ;;  %v2051_v3 = vpop.f32.mrf.mxu0  ;;  %v2095_v5 = vadd.f32 %v2094_v61, %v1797_v60  ;;  %v2440_v40 = vld [vmem:[%s11350_s7 + $0x6c0] sm:$0xff]  ;;  %v2423_v59 = vld [vmem:[%s11350_s7 + $0x638] sm:$0xff] }
 0x83b   : > { %2748 = vmatpush.msrb.mxu2 %v2404_v46  ;;  %2595 = vmatmul.f32.gmra.mxu3 %v2212_v43  ;;  %v2074_v7 = vpop.f32.mrf.mxu1  ;;  %v2052_v42 = vadd.f32 %v2051_v3, %v1795_v32  ;;  %v2200_v16 = vmax.f32 %v2026_v0, 0.0  ;;  %v2458_v32 = vld [vmem:[%s11350_s7 + $0x750] sm:$0xff]  ;;  %v2456_v41 = vld [vmem:[%s11350_s7 + $0x740] sm:$0xff]  ;;  %v2435_v3 = vld [vmem:[%s11350_s7 + $0x698] sm:$0xff] }
 0x83c   : > { %2664 = vmatmul.f32.gmra.mxu2 %v2215_v47  ;;  %2680 = vmatpush.msra.mxu3 %v2355_v48  ;;  %v2075_v17 = vadd.f32 %v2074_v7, %v1796_v33  ;;  %v2203_v20 = vmax.f32 %v2095_v5, 0.0  ;;  %v2426_v46 = vld [vmem:[%s11350_s7 + $0x650] sm:$0xff]  ;;  %v2439_v47 = vld [vmem:[%s11350_s7 + $0x6b8] sm:$0xff]  ;;  %v2452_v61 = vld [vmem:[%s11350_s7 + $0x720] sm:$0xff] }
 0x83d   : > { %2706 = vmatpush.msra.mxu0 %v2368_v49  ;;  %2729 = vmatpush.msrb.mxu1 %v2384_v50  ;;  %v2217_v8 = vmax.f32 %v2052_v42, 0.0  ;;  %v2455_v48 = vld [vmem:[%s11350_s7 + $0x738] sm:$0xff]  ;;  %v2474_v49 = vld [vmem:[%s11350_s7 + $0x7d0] sm:$0xff]  ;;  %v2425_v50 = vld [vmem:[%s11350_s7 + $0x648] sm:$0xff] }
 0x83e   : > { %2749 = vmatpush.msrb.mxu2 %v2403_v51  ;;  %2681 = vmatpush.msra.mxu3 %v2354_v58  ;;  %v2218_v27 = vmax.f32 %v2075_v17, 0.0  ;;  %v2438_v51 = vld [vmem:[%s11350_s7 + $0x6b0] sm:$0xff]  ;;  %v2472_v58 = vld [vmem:[%s11350_s7 + $0x7c0] sm:$0xff]  ;;  %v2451_v5 = vld [vmem:[%s11350_s7 + $0x718] sm:$0xff] }
 0x83f   : > { %2783 = vmatpush.msrb.mxu0 %v2447_v53  ;;  %2806 = vmatpush.msra.mxu1 %v2463_v57  ;;  %v2454_v53 = vld [vmem:[%s11350_s7 + $0x730] sm:$0xff]  ;;  %v2453_v57 = vld [vmem:[%s11350_s7 + $0x728] sm:$0xff] }
 0x840   : > { %2707 = vmatmul.f32.vlgmr.msra.gmra.mxu0 %v2201_v55  ;;  %2730 = vmatmul.f32.vlgmr.msrb.gmra.mxu1 %v2202_v56  ;;  %v2028_v25 = vpop.f32.mrf.mxu3  ;;  %v2424_v55 = vld [vmem:[%s11350_s7 + $0x640] sm:$0xff]  ;;  %v2437_v56 = vld [vmem:[%s11350_s7 + $0x6a8] sm:$0xff]  ;;  %v2422_v0 = vld [vmem:[%s11350_s7 + $0x630] sm:$0xff] }
 0x841   : > { %2750 = vmatpush.msrb.mxu2 %v2402_v62  ;;  %2784 = vmatpush.msrb.mxu0 %v2446_v63  ;;  %v2097_v28 = vpop.f32.mrf.mxu2  ;;  %v2029_v30 = vadd.f32 %v2028_v25, %v1794_v54  ;;  %v2473_v54 = vld [vmem:[%s11350_s7 + $0x7c8] sm:$0xff]  ;;  %v2471_v63 = vld [vmem:[%s11350_s7 + $0x7b8] sm:$0xff]  ;;  %v2470_v7 = vld [vmem:[%s11350_s7 + $0x7b0] sm:$0xff]  ;;  %v1801_v25 = vperm.slane %v9647_v24, 7 }
 0x842   : > { %2807 = vmatpush.msra.mxu1 %v2462_v1  ;;  %2682 = vmatpush.msra.mxu3 %v2353_v2  ;;  %v2098_v33 = vadd.f32 %v2097_v28, %v1797_v60  ;;  %v2436_v60 = vld [vmem:[%s11350_s7 + $0x6a0] sm:$0xff]  ;;  %v2140_v62 = vpop.f32.mrf.mxu0  ;;  %v1799_v1 = vperm.slane %v9647_v24, 5  ;;  %v2469_v42 = vld [vmem:[%s11350_s7 + $0x7a8] sm:$0xff]  ;;  %v2418_v28 = vld [vmem:[%s11350_s7 + $0x610] sm:$0xff] }
 0x843   : > { %2751 = vmatpush.msrb.mxu2 %v2401_v36  ;;  %2785 = vmatpush.msrb.mxu0 %v2445_v10  ;;  %v2216_v43 = vmax.f32 %v2029_v30, 0.0  ;;  %v2163_v2 = vpop.f32.mrf.mxu1  ;;  %v1800_v36 = vperm.slane %v9647_v24, 6  ;;  %v2421_v10 = vld [vmem:[%s11350_s7 + $0x628] sm:$0xff] }
 0x844   : > { %2808 = vmatpush.msra.mxu1 %v2461_v11  ;;  %2683 = vmatpush.msra.mxu3 %v2352_v12  ;;  %v2219_v45 = vmax.f32 %v2098_v33, 0.0  ;;  %v2434_v11 = vld [vmem:[%s11350_s7 + $0x690] sm:$0xff]  ;;  %v2449_v17 = vld [vmem:[%s11350_s7 + $0x708] sm:$0xff] }
 0x845   : > { %2752 = vmatpush.msrb.mxu2 %v2400_v13  ;;  %2786 = vmatpush.msrb.mxu0 %v2444_v18  ;;  %v2450_v12 = vld [vmem:[%s11350_s7 + $0x710] sm:$0xff]  ;;  %v2420_v13 = vld [vmem:[%s11350_s7 + $0x620] sm:$0xff]  ;;  %v2164_v18 = vadd.f32 %v2163_v2, %v1800_v36 }
 0x846   : > { %2760 = vmatpush.msrb.mxu3 %v2431_v15  ;;  %2809 = vmatpush.msra.mxu1 %v2460_v19  ;;  %v2141_v15 = vadd.f32 %v2140_v62, %v1799_v1 }
 0x847   : > { %2829 = vmatpush.msra.mxu2 %v2479_v21  ;;  %2684 = vmatmul.f32.vlgmr.msra.gmra.mxu3 %v2200_v16  ;;  %v2433_v16 = vld [vmem:[%s11350_s7 + $0x688] sm:$0xff]  ;;  %v2419_v21 = vld [vmem:[%s11350_s7 + $0x618] sm:$0xff] }
 0x848   : > { %2753 = vmatmul.f32.vlgmr.msrb.gmra.mxu2 %v2203_v20  ;;  %2761 = vmatpush.msrb.mxu3 %v2430_v4  ;;  %v2117_v19 = vpop.f32.mrf.mxu3  ;;  %v2468_v20 = vld [vmem:[%s11350_s7 + $0x7a0] sm:$0xff]  ;;  %v1798_v4 = vperm.slane %v9647_v24, 4  ;;  %v2417_v24 = vld [vmem:[%s11350_s7 + $0x608] sm:$0xff] }
 0x849   : > { %2787 = vmatpush.msrb.mxu0 %v2443_v22  ;;  %2810 = vmatpush.msra.mxu1 %v2459_v23  ;;  %v2186_v22 = vpop.f32.mrf.mxu2  ;;  %v2432_v23 = vld [vmem:[%s11350_s7 + $0x680] sm:$0xff] }
 0x84a   : > { %2830 = vmatpush.msra.mxu2 %v2478_v26  ;;  %2710 = vmatmul.f32.gmra.mxu0 %v2217_v8  ;;  %v2448_v8 = vld [vmem:[%s11350_s7 + $0x700] sm:$0xff]  ;;  %v2467_v26 = vld [vmem:[%s11350_s7 + $0x798] sm:$0xff]  ;;  %v2143_v30 = vpop.f32.mrf.mxu0 }
 0x84b   : > { %2733 = vmatmul.f32.gmra.mxu1 %v2218_v27  ;;  %2762 = vmatpush.msrb.mxu3 %v2429_v29  ;;  %v2205_v27 = vmax.f32 %v2141_v15, 0.0  ;;  %v2206_v29 = vmax.f32 %v2164_v18, 0.0  ;;  %v2166_v33 = vpop.f32.mrf.mxu1 }
 0x84c   : > { %2788 = vmatpush.msrb.mxu0 %v2442_v31  ;;  %2811 = vmatpush.msra.mxu1 %v2458_v32  ;;  %v2466_v31 = vld [vmem:[%s11350_s7 + $0x790] sm:$0xff]  ;;  %v2118_v32 = vadd.f32 %v2117_v19, %v1798_v4 }
 0x84d   : > { %2831 = vmatpush.msra.mxu2 %v2477_v34  ;;  %2763 = vmatpush.msrb.mxu3 %v2428_v35  ;;  %v2187_v34 = vadd.f32 %v2186_v22, %v1801_v25  ;;  %v2465_v35 = vld [vmem:[%s11350_s7 + $0x788] sm:$0xff] }
 0x84e   : > { %2789 = vmatpush.msrb.mxu0 %v2441_v37  ;;  %2812 = vmatpush.msra.mxu1 %v2457_v38  ;;  %v2144_v37 = vadd.f32 %v2143_v30, %v1799_v1  ;;  %v2416_v38 = vld [vmem:[%s11350_s7 + $0x600] sm:$0xff] }
 0x84f   : > { %2832 = vmatpush.msra.mxu2 %v2476_v39  ;;  %2764 = vmatpush.msrb.mxu3 %v2427_v52  ;;  %v2167_v39 = vadd.f32 %v2166_v33, %v1800_v36  ;;  %v2464_v52 = vld [vmem:[%s11350_s7 + $0x780] sm:$0xff] }
 0x850   : > { %2790 = vmatpush.msrb.mxu0 %v2440_v40  ;;  %2813 = vmatpush.msra.mxu1 %v2456_v41  ;;  %v2204_v40 = vmax.f32 %v2118_v32, 0.0  ;;  %v2207_v41 = vmax.f32 %v2187_v34, 0.0 }
 0x851   : > { %2833 = vmatpush.msra.mxu2 %v2475_v44  ;;  %2687 = vmatmul.f32.gmra.mxu3 %v2216_v43  ;;  %v2120_v43 = vpop.f32.mrf.mxu3  ;;  %v2189_v44 = vpop.f32.mrf.mxu2 }
 0x852   : > { %2756 = vmatmul.f32.gmra.mxu2 %v2219_v45  ;;  %2765 = vmatpush.msrb.mxu3 %v2426_v46  ;;  %v2221_v45 = vmax.f32 %v2144_v37, 0.0  ;;  %v2222_v46 = vmax.f32 %v2167_v39, 0.0 }
 0x853   : > { %2791 = vmatpush.msrb.mxu0 %v2439_v47  ;;  %2814 = vmatpush.msra.mxu1 %v2455_v48  ;;  %v2121_v47 = vadd.f32 %v2120_v43, %v1798_v4  ;;  %v2190_v48 = vadd.f32 %v2189_v44, %v1801_v25 }
 0x854   : > { %2834 = vmatpush.msra.mxu2 %v2474_v49  ;;  %2766 = vmatpush.msrb.mxu3 %v2425_v50 }
 0x855   : > { %2792 = vmatpush.msrb.mxu0 %v2438_v51  ;;  %2815 = vmatpush.msra.mxu1 %v2454_v53  ;;  %v2220_v49 = vmax.f32 %v2121_v47, 0.0  ;;  %v2223_v50 = vmax.f32 %v2190_v48, 0.0 }
 0x856   : > { %2835 = vmatpush.msra.mxu2 %v2473_v54  ;;  %2767 = vmatpush.msrb.mxu3 %v2424_v55 }
 0x857   : > { %2793 = vmatpush.msrb.mxu0 %v2437_v56  ;;  %2816 = vmatpush.msra.mxu1 %v2453_v57 }
 0x858   : > { %2836 = vmatpush.msra.mxu2 %v2472_v58  ;;  %2768 = vmatpush.msrb.mxu3 %v2423_v59  ;;  %v8839_v59 = vld [vmem:[%s11352_s11] ss:$0 sm:$0xff] }
 0x859   : > { %2794 = vmatpush.msrb.mxu0 %v2436_v60  ;;  %2817 = vmatpush.msra.mxu1 %v2452_v61 }
 0x85a   : > { %2837 = vmatpush.msra.mxu2 %v2471_v63  ;;  %2769 = vmatpush.msrb.mxu3 %v2422_v0 }
 0x85b   : > { %2795 = vmatpush.msrb.mxu0 %v2435_v3  ;;  %2818 = vmatpush.msra.mxu1 %v2451_v5 }
 0x85c   : > { %2838 = vmatpush.msra.mxu2 %v2470_v7  ;;  %2770 = vmatpush.msrb.mxu3 %v2421_v10 }
 0x85d   : > { %2796 = vmatpush.msrb.mxu0 %v2434_v11  ;;  %2819 = vmatpush.msra.mxu1 %v2450_v12 }
 0x85e   : > { %2839 = vmatpush.msra.mxu2 %v2469_v42  ;;  %2771 = vmatpush.msrb.mxu3 %v2420_v13 }
 0x85f   : > { %2797 = vmatpush.msrb.mxu0 %v2433_v16  ;;  %2820 = vmatpush.msra.mxu1 %v2449_v17 }
 0x860   : > { %2840 = vmatpush.msra.mxu2 %v2468_v20  ;;  %2772 = vmatpush.msrb.mxu3 %v2419_v21 }
 0x861   : > { %2798 = vmatpush.msrb.mxu0 %v2432_v23  ;;  %2821 = vmatpush.msra.mxu1 %v2448_v8 }
 0x862   : > { %2841 = vmatpush.msra.mxu2 %v2467_v26  ;;  %2799 = vmatmul.f32.vlgmr.msrb.gmra.mxu0 %v2205_v27 }
 0x863   : > { %2822 = vmatmul.f32.vlgmr.msra.gmra.mxu1 %v2206_v29  ;;  %2773 = vmatpush.msrb.mxu3 %v2418_v28 }
 0x864   : > { %2842 = vmatpush.msra.mxu2 %v2466_v31 }
 0x865   : > { %2774 = vmatpush.msrb.mxu3 %v2417_v24 }
 0x866   : > { %2843 = vmatpush.msra.mxu2 %v2465_v35 }
 0x867   : > { %2775 = vmatpush.msrb.mxu3 %v2416_v38 }
 0x868   : > { %2844 = vmatpush.msra.mxu2 %v2464_v52  ;;  %2776 = vmatmul.f32.vlgmr.msrb.gmra.mxu3 %v2204_v40 }
 0x869   : > { %2845 = vmatmul.f32.vlgmr.msra.gmra.mxu2 %v2207_v41 }
 0x86a   : > { %2802 = vmatmul.f32.gmra.mxu0 %v2221_v45 }
 0x86b   : > { %2825 = vmatmul.f32.gmra.mxu1 %v2222_v46 }
 0x870   : > { %2779 = vmatmul.f32.gmra.mxu3 %v2220_v49 }
 0x871   : > { %2848 = vmatmul.f32.gmra.mxu2 %v2223_v50 }
 0x894   : > { %v2524_v51 = vpop.f32.mrf.mxu0 }
 0x895   : > { %v2547_v54 = vpop.f32.mrf.mxu1 }
 0x89d   : > { %v2527_v56 = vpop.f32.mrf.mxu0 }
 0x89e   : > { %v2550_v58 = vpop.f32.mrf.mxu1 }
 0x8a0   : > { %v2501_v53 = vpop.f32.mrf.mxu3 }
 0x8a1   : > { %v2570_v55 = vpop.f32.mrf.mxu2  ;;  %v2502_v61 = vadd.f32 %v8839_v59, %v2501_v53 }
 0x8a3   : > { %v2525_v0 = vadd.f32 %v2524_v51, %v2502_v61 }
 0x8a5   : > { %v2548_v3 = vadd.f32 %v2547_v54, %v2525_v0 }
 0x8a7   : > { %v2616_v62 = vpop.f32.mrf.mxu0  ;;  %v2571_v36 = vadd.f32 %v2570_v55, %v2548_v3 }
 0x8a8   : > { %v2639_v1 = vpop.f32.mrf.mxu1 }
 0x8aa   : > { %v2504_v57 = vpop.f32.mrf.mxu3 }
 0x8ab   : > { %v2573_v60 = vpop.f32.mrf.mxu2  ;;  %v2505_v5 = vadd.f32 %v8839_v59, %v2504_v57 }
 0x8ad   : > { %v2528_v7 = vadd.f32 %v2527_v56, %v2505_v5  ;;  %v7840_v5 = vld [vmem:[%s9042_s14 + $0x58] sm:$0xff] }
 0x8ae   : > { %2974 = vmatpush.msra.mxu3 %v7840_v5 }
 0x8af   : > { %v2551_v13 = vadd.f32 %v2550_v58, %v2528_v7  ;;  %v7856_v7 = vld [vmem:[%s9052_s24 + $0x58] sm:$0xff] }
 0x8b0   : > { %3028 = vmatpush.msrb.mxu1 %v7856_v7 }
 0x8b1   : > { %v2619_v10 = vpop.f32.mrf.mxu0  ;;  %v2574_v17 = vadd.f32 %v2573_v60, %v2551_v13  ;;  %v7846_v13 = vld [vmem:[%s9047_s19 + $0x48] sm:$0xff] }
 0x8b2   : > { %v2642_v42 = vpop.f32.mrf.mxu1 }
 0x8b4   : > { %v2593_v63 = vpop.f32.mrf.mxu3 }
 0x8b5   : > { %v2662_v2 = vpop.f32.mrf.mxu2  ;;  %v2594_v12 = vadd.f32 %v2593_v63, %v2571_v36  ;;  %v7848_v36 = vld [vmem:[%s9047_s19 + $0x58] sm:$0xff] }
 0x8b6   : > { %3002 = vmatpush.msra.mxu0 %v7848_v36  ;;  %v9827_v36 = vld [vmem:[%s9167_s22] ss:$0 sm:$0xff] }
 0x8b7   : > { %v2617_v16 = vadd.f32 %v2616_v62, %v2594_v12  ;;  %v7855_v12 = vld [vmem:[%s9052_s24 + $0x50] sm:$0xff] }
 0x8b8   : > { %3029 = vmatpush.msrb.mxu1 %v7855_v12 }
 0x8b9   : > { %v2640_v18 = vadd.f32 %v2639_v1, %v2617_v16  ;;  %v7837_v16 = vld [vmem:[%s9042_s14 + $0x40] sm:$0xff] }
 0x8bb   : > { %v2663_v22 = vadd.f32 %v2662_v2, %v2640_v18  ;;  %v7853_v18 = vld [vmem:[%s9052_s24 + $0x40] sm:$0xff] }
 0x8bd   : > { %v2708_v20 = vpop.f32.mrf.mxu0  ;;  %v2731_v4 = vpop.f32.mrf.mxu1 }
 0x8be   : > { %v2596_v11 = vpop.f32.mrf.mxu3 }
 0x8bf   : > { %v2665_v15 = vpop.f32.mrf.mxu2  ;;  %v2597_v19 = vadd.f32 %v2596_v11, %v2574_v17  ;;  %v7847_v11 = vld [vmem:[%s9047_s19 + $0x50] sm:$0xff]  ;;  %v7845_v17 = vld [vmem:[%s9047_s19 + $0x40] sm:$0xff] }
 0x8c0   : > { %3003 = vmatpush.msra.mxu0 %v7847_v11  ;;  %v9831_v11 = vld [vmem:[%s9167_s22 + $0x1] ss:$0 sm:$0xff] }
 0x8c1   : > { %v2620_v23 = vadd.f32 %v2619_v10, %v2597_v19  ;;  %v7839_v10 = vld [vmem:[%s9042_s14 + $0x50] sm:$0xff] }
 0x8c2   : > { %2975 = vmatpush.msra.mxu3 %v7839_v10  ;;  %3004 = vmatpush.msra.mxu0 %v7846_v13 }
 0x8c3   : > { %v2643_v26 = vadd.f32 %v2642_v42, %v2620_v23  ;;  %v7838_v42 = vld [vmem:[%s9042_s14 + $0x48] sm:$0xff] }
 0x8c4   : > { %2976 = vmatpush.msra.mxu3 %v7838_v42  ;;  %3005 = vmatpush.msra.mxu0 %v7845_v17 }
 0x8c5   : > { %v2666_v30 = vadd.f32 %v2665_v15, %v2643_v26  ;;  %v7854_v15 = vld [vmem:[%s9052_s24 + $0x48] sm:$0xff] }
 0x8c6   : > { %3030 = vmatpush.msrb.mxu1 %v7854_v15  ;;  %2977 = vmatpush.msra.mxu3 %v7837_v16  ;;  %v8845_v15 = vld [vmem:[%s11343_s6 + $0x3] ss:$0 sm:$0xff] }
 0x8c7   : > { %v2711_v28 = vpop.f32.mrf.mxu0 }
 0x8c8   : > { %v2734_v31 = vpop.f32.mrf.mxu1  ;;  %3031 = vmatpush.msrb.mxu1 %v7853_v18 }
 0x8ca   : > { %v2685_v21 = vpop.f32.mrf.mxu3 }
 0x8cb   : > { %v2754_v8 = vpop.f32.mrf.mxu2  ;;  %v2686_v25 = vadd.f32 %v2685_v21, %v2663_v22 }
 0x8cd   : > { %v2709_v27 = vadd.f32 %v2708_v20, %v2686_v25 }
 0x8cf   : > { %v2732_v32 = vadd.f32 %v2731_v4, %v2709_v27 }
 0x8d1   : > { %v2755_v34 = vadd.f32 %v2754_v8, %v2732_v32  ;;  %v8840_v32 = vld [vmem:[%s11353_s23] ss:$0 sm:$0xff] }
 0x8d4   : > { %v2688_v29 = vpop.f32.mrf.mxu3 }
 0x8d5   : > { %v2689_v33 = vadd.f32 %v2688_v29, %v2666_v30  ;;  %v2757_v24 = vpop.f32.mrf.mxu2 }
 0x8d7   : > { %v2712_v35 = vadd.f32 %v2711_v28, %v2689_v33 }
 0x8d9   : > { %v2735_v40 = vadd.f32 %v2734_v31, %v2712_v35 }
 0x8db   : > { %v2758_v45 = vadd.f32 %v2757_v24, %v2735_v40 }
 0x8df   : > { %v2800_v37 = vpop.f32.mrf.mxu0 }
 0x8e0   : > { %v2823_v52 = vpop.f32.mrf.mxu1 }
 0x8e7   : > { %v2803_v50 = vpop.f32.mrf.mxu0 }
 0x8e8   : > { %v2826_v54 = vpop.f32.mrf.mxu1 }
 0x8eb   : > { %v2777_v38 = vpop.f32.mrf.mxu3 }
 0x8ec   : > { %v2778_v39 = vadd.f32 %v2777_v38, %v2755_v34  ;;  %v2846_v43 = vpop.f32.mrf.mxu2  ;;  %v8841_v34 = vld [vmem:[%s11354_s18] ss:$0 sm:$0xff] }
 0x8ee   : > { %v2801_v41 = vadd.f32 %v2800_v37, %v2778_v39 }
 0x8f0   : > { %v2824_v44 = vadd.f32 %v2823_v52, %v2801_v41 }
 0x8f2   : > { %v2847_v46 = vadd.f32 %v2846_v43, %v2824_v44 }
 0x8f3   : > { %v2780_v47 = vpop.f32.mrf.mxu3 }
 0x8f4   : > { %v2781_v48 = vadd.f32 %v2780_v47, %v2758_v45  ;;  %v2852_v49 = vadd.f32 %v2847_v46, %v9352_v9  ;;  %v2849_v56 = vpop.f32.mrf.mxu2  ;;  %v8842_v46 = vld [vmem:[%s11343_s6 + $0x2] ss:$0 sm:$0xff] }
 0x8f5   : > { %v8843_v47 = vld [vmem:[%s9067_s12 + $0x2] ss:$0 sm:$0xff] }
 0x8f6   : > { %v2804_v51 = vadd.f32 %v2803_v50, %v2781_v48  ;;  %v2856_v53 = vsel %vm1125_vm6, %v2852_v49, 0.0 }
 0x8f7   : > { %2857 = vadd.xlane.f32.xlu0 %v2856_v53  ;;  %v8844_v53 = vld [vmem:[%s9057_s30 + $0x2] ss:$0 sm:$0xff] }
 0x8f8   : > { %v2827_v55 = vadd.f32 %v2826_v54, %v2804_v51 }
 0x8fa   : > { %v2850_v57 = vadd.f32 %v2849_v56, %v2827_v55 }
 0x8fc   : > { %v2853_v58 = vadd.f32 %v2850_v57, %v9375_v14 }
 0x8fe   : > { %v2859_v59 = vsel %vm1125_vm6, %v2853_v58, 0.0 }
 0x8ff   : > { %2860 = vadd.xlane.f32.xlu1 %v2859_v59 }
 0x96a   : > { %v2858_v60 = vpop.xlane.xlu0 %2857 }
 0x96b   : > { %v2862_v9 = vmul.f32 %v2858_v60, %v9301_v6  ;;  %v7852_v60 = vld [vmem:[%s9047_s19 + $0x78] sm:$0xff] }
 0x96d   : > { %v2864_v61 = vsub.f32 %v2852_v49, %v2862_v9 }
 0x96f   : > { %v2866_v62 = vmul.f32 %v2864_v61, %v2864_v61 }
 0x971   : > { %v2868_v63 = vsel %vm1125_vm6, %v2866_v62, 0.0  ;;  %v7850_v62 = vld [vmem:[%s9047_s19 + $0x68] sm:$0xff] }
 0x972   : > { %2869 = vadd.xlane.f32.xlu2 %v2868_v63  ;;  %v2861_v0 = vpop.xlane.xlu1 %2860 }
 0x973   : > { %v2863_v1 = vmul.f32 %v2861_v0, %v9301_v6 }
 0x975   : > { %v9771_v14 = vsub.f32 %v2853_v58, %v2863_v1  ;;  %v7849_v1 = vld [vmem:[%s9047_s19 + $0x60] sm:$0xff] }
 0x977   : > { %v2867_v2 = vmul.f32 %v9771_v14, %v9771_v14 }
 0x979   : > { %v2871_v3 = vsel %vm1125_vm6, %v2867_v2, 0.0  ;;  %v7868_v2 = vld [vmem:[%s9072_s20 + $0x28] sm:$0xff] }
 0x97a   : > { %2872 = vadd.xlane.f32.xlu0 %v2871_v3  ;;  %v7867_v3 = vld [vmem:[%s9072_s20 + $0x20] sm:$0xff] }
 0x9e5   : > { %v2870_v19 = vpop.xlane.xlu2 %2869 }
 0x9e6   : > { %v2874_v20 = vmul.f32 %v2870_v19, %v9301_v6 }
 0x9e8   : > { %v2876_v21 = vadd.f32 1e-05, %v2874_v20 }
 0x9ea   : > { %8889 = vrsqrt.f32 %v2876_v21  ;;  %vm2884_vm9 = vweird.f32 %v2876_v21 }
 0x9ed   : > { %v2873_v4 = vpop.xlane.xlu0 %2872 }
 0x9ee   : > { %v2875_v22 = vmul.f32 %v2873_v4, %v9301_v6 }
 0x9f0   : > { %v8890_v23 = vpop.eup %8889  ;;  %v2877_v8 = vadd.f32 1e-05, %v2875_v22 }
 0x9f1   : > { %v2879_v25 = vmul.f32 %v8890_v23, %v2876_v21  ;;  %vm2885_vm7 = vweird.f32 %v8890_v23 }
 0x9f2   : > { %8891 = vrsqrt.f32 %v2877_v8  ;;  %vm2886_vm10 = vmor %vm2884_vm9, %vm2885_vm7  ;;  %vm2894_vm12 = vweird.f32 %v2877_v8 }
 0x9f3   : > { %v2880_v26 = vmul.f32 %v8890_v23, %v2879_v25 }
 0x9f5   : > { %v2881_v27 = vmul.f32 0.5, %v2880_v26 }
 0x9f7   : > { %v2882_v28 = vsub.f32 1.5, %v2881_v27 }
 0x9f8   : > { %v8892_v29 = vpop.eup %8891 }
 0x9f9   : > { %v2883_v30 = vmul.f32 %v8890_v23, %v2882_v28  ;;  %v2889_v31 = vmul.f32 %v8892_v29, %v2877_v8  ;;  %vm2895_vm11 = vweird.f32 %v8892_v29 }
 0x9fa   : > { %vm2896_vm13 = vmor %vm2894_vm12, %vm2895_vm11 }
 0x9fb   : > { %v2887_v33 = vsel %vm2886_vm10, %v8890_v23, %v2883_v30  ;;  %v2890_v24 = vmul.f32 %v8892_v29, %v2889_v31  ;;  %v7843_v30 = vld [vmem:[%s9042_s14 + $0x70] sm:$0xff]  ;;  %v7860_v31 = vld [vmem:[%s9052_s24 + $0x78] sm:$0xff] }
 0x9fc   : > { %v2898_v35 = vmul.f32 %v2887_v33, %v2864_v61  ;;  %v7851_v61 = vld [vmem:[%s9047_s19 + $0x70] sm:$0xff] }
 0x9fd   : > { %v2891_v37 = vmul.f32 0.5, %v2890_v24  ;;  %v7859_v33 = vld [vmem:[%s9052_s24 + $0x70] sm:$0xff]  ;;  %v7841_v24 = vld [vmem:[%s9042_s14 + $0x60] sm:$0xff] }
 0x9fe   : > { %v2903_v38 = vmul.f32 %v8840_v32, %v2898_v35  ;;  %v7857_v35 = vld [vmem:[%s9052_s24 + $0x60] sm:$0xff] }
 0x9ff   : > { %v2892_v39 = vsub.f32 1.5, %v2891_v37 }
 0xa00   : > { %v9792_v52 = vadd.f32 %v8841_v34, %v2903_v38 }
 0xa01   : > { %v2893_v40 = vmul.f32 %v8892_v29, %v2892_v39 }
 0xa02   : > { %7872 = vmatmul.msk.f32.vlgmr.msra.gmra.mxu3 %vm1125_vm6, %v9792_v52  ;;  %7874 = vmatmul.msk.f32.vlgmr.msra.gmra.mxu0 %vm1125_vm6, %v9792_v52 }
 0xa03   : > { %v2897_v41 = vsel %vm2896_vm13, %v8892_v29, %v2893_v40  ;;  %7876 = vmatmul.msk.f32.vlgmr.msrb.gmra.mxu1 %vm1125_vm6, %v9792_v52  ;;  %v7844_v29 = vld [vmem:[%s9042_s14 + $0x78] sm:$0xff] }
 0xa04   : > { %v2899_v43 = vmul.f32 %v2897_v41, %v9771_v14 }
 0xa06   : > { %v2904_v44 = vmul.f32 %v8840_v32, %v2899_v43  ;;  %v7842_v32 = vld [vmem:[%s9042_s14 + $0x68] sm:$0xff] }
 0xa08   : > { %v9801_v45 = vadd.f32 %v8841_v34, %v2904_v44  ;;  %v7858_v34 = vld [vmem:[%s9052_s24 + $0x68] sm:$0xff] }
 0xa0a   : > { %7873 = vmatmul.msk.f32.gmra.mxu3 %vm1125_vm6, %v9801_v45  ;;  %7875 = vmatmul.msk.f32.gmra.mxu0 %vm1125_vm6, %v9801_v45 }
 0xa0b   : > { %7877 = vmatmul.msk.f32.gmra.mxu1 %vm1125_vm6, %v9801_v45 }
 0xa7f   : > { %v3007_v48 = vpop.f32.mrf.mxu0 }
 0xa80   : > { %v3008_v49 = vadd.f32 %v8842_v46, %v3007_v48  ;;  %v3033_v50 = vpop.f32.mrf.mxu1 }
 0xa81   : > { %v3034_v51 = vadd.f32 %v8843_v47, %v3033_v50 }
 0xa82   : > { %7878 = vmatpush.xpose.msk.msrb.mxu2 %vm1045_vm3, %v3008_v49 }
 0xa83   : > { %3107 = vmatpush.msrb.mxu3 %v3034_v51 }
 0xa85   : > { %v2979_v54 = vpop.f32.mrf.mxu3  ;;  %3234 = vmatpush.msra.mxu3 %v7844_v29 }
 0xa86   : > { %v2980_v55 = vadd.f32 %v8844_v53, %v2979_v54  ;;  %3205 = vmatpush.msra.mxu2 %v7868_v2 }
 0xa87   : > { %v3010_v56 = vpop.f32.mrf.mxu0  ;;  %3235 = vmatpush.msra.mxu3 %v7843_v30 }
 0xa88   : > { %v2985_v57 = vmul.f32 0.25, %v2980_v55  ;;  %v3011_v58 = vadd.f32 %v8842_v46, %v3010_v56  ;;  %v3036_v59 = vpop.f32.mrf.mxu1  ;;  %3206 = vmatpush.msra.mxu2 %v7867_v3  ;;  %v8847_v3 = vld [vmem:[%s9057_s30 + $0x3] ss:$0 sm:$0xff] }
 0xa89   : > { %v3037_v9 = vadd.f32 %v8843_v47, %v3036_v59  ;;  %3236 = vmatpush.msra.mxu3 %v7842_v32 }
 0xa8a   : > { %7879 = vmatmul.msk.f32.vlgmr.msrb.gmra.mxu2 %vm1045_vm3, %v2985_v57  ;;  %7881 = vmatpush.xpose.msk.msrb.mxu0 %vm1045_vm3, %v3011_v58 }
 0xa8b   : > { %3180 = vmatpush.msra.mxu1 %v3037_v9  ;;  %3237 = vmatpush.msra.mxu3 %v7841_v24 }
 0xa8d   : > { %v2982_v63 = vpop.f32.mrf.mxu3  ;;  %3288 = vmatpush.msrb.mxu1 %v7860_v31 }
 0xa8e   : > { %3262 = vmatpush.msra.mxu0 %v7852_v60  ;;  %v2983_v0 = vadd.f32 %v8844_v53, %v2982_v63 }
 0xa8f   : > { %3289 = vmatpush.msrb.mxu1 %v7859_v33 }
 0xa90   : > { %3263 = vmatpush.msra.mxu0 %v7851_v61  ;;  %v2986_v14 = vmul.f32 0.25, %v2983_v0 }
 0xa91   : > { %3290 = vmatpush.msrb.mxu1 %v7858_v34 }
 0xa92   : > { %3264 = vmatpush.msra.mxu0 %v7850_v62 }
 0xa93   : > { %7882 = vmatmul.msk.f32.vlgmr.msrb.gmra.mxu0 %vm1045_vm3, %v2986_v14  ;;  %3291 = vmatpush.msrb.mxu1 %v7857_v35 }
 0xa94   : > { %3265 = vmatpush.msra.mxu0 %v7849_v1  ;;  %v8846_v1 = vld [vmem:[%s9067_s12 + $0x3] ss:$0 sm:$0xff] }
 0xa9b   : > { %7888 = vmatmul.msk.f32.vlgmr.msra.gmra.mxu0 %vm1125_vm6, %v9792_v52 }
 0xaa3   : > { %7889 = vmatmul.msk.f32.gmra.mxu0 %vm1125_vm6, %v9801_v45 }
 0xb0d   : > { %v3062_v5 = vpop.f32.mrf.mxu2 }
 0xb0e   : > { %v3063_v7 = vadd.f32 %v9827_v36, %v3062_v5 }
 0xb10   : > { %v3135_v10 = vpop.f32.mrf.mxu0  ;;  %v3065_v42 = vsel %vm1238_vm8, %v3063_v7, -inf }
 0xb11   : > { %v3136_v12 = vadd.f32 %v9831_v11, %v3135_v10  ;;  %3066 = vmax.xlane.f32.xlu1 %v3065_v42 }
 0xb13   : > { %v3138_v13 = vsel %vm1238_vm8, %v3136_v12, -inf }
 0xb14   : > { %3139 = vmax.xlane.f32.xlu2 %v3138_v13 }
 0xb18   : > { %v3267_v16 = vpop.f32.mrf.mxu0 }
 0xb19   : > { %v3268_v17 = vadd.f32 %v8845_v15, %v3267_v16 }
 0xb1b   : > { %7892 = vmatpush.xpose.msk.msrb.mxu2 %vm1045_vm3, %v3268_v17 }
 0xb20   : > { %v3270_v18 = vpop.f32.mrf.mxu0 }
 0xb21   : > { %v3271_v19 = vadd.f32 %v8845_v15, %v3270_v18 }
 0xb23   : > { %7895 = vmatpush.xpose.msk.msrb.mxu0 %vm1045_vm3, %v3271_v19 }
 0xb84   : > { %v3067_v20 = vpop.xlane.xlu1 %3066 }
 0xb85   : > { %v3068_v21 = vsub.f32 %v3063_v7, %v3067_v20 }
 0xb87   : > { %v3140_v4 = vpop.xlane.xlu2 %3139  ;;  %v3069_v22 = vmul.f32 1.442695, %v3068_v21 }
 0xb88   : > { %v3141_v23 = vsub.f32 %v3136_v12, %v3140_v4 }
 0xb89   : > { %8893 = vpow2.f32 %v3069_v22 }
 0xb8a   : > { %v3142_v8 = vmul.f32 1.442695, %v3141_v23 }
 0xb8c   : > { %8895 = vpow2.f32 %v3142_v8 }
 0xb8f   : > { %v8894_v25 = vpop.eup %8893 }
 0xb90   : > { %v3071_v26 = vsel %vm1238_vm8, %v8894_v25, 0.0 }
 0xb91   : > { %3072 = vadd.xlane.f32.xlu0 %v3071_v26 }
 0xb92   : > { %v8896_v27 = vpop.eup %8895 }
 0xb93   : > { %v3144_v28 = vsel %vm1238_vm8, %v8896_v27, 0.0 }
 0xb94   : > { %3145 = vadd.xlane.f32.xlu1 %v3144_v28 }
 0xc04   : > { %v3073_v37 = vpop.xlane.xlu0 %3072 }
 0xc05   : > { %8897 = vrcp.f32 %v3073_v37  ;;  %v3085_v46 = vand.u32 2147483648, %v3073_v37  ;;  %v3083_v48 = vand.u32 2147483647, %v3073_v37  ;;  %vm3079_vm15 = vweird.f32 %v3073_v37 }
 0xc07   : > { %v3146_v38 = vpop.xlane.xlu1 %3145  ;;  %v3086_v55 = vor.u32 1.1754944e-38, %v3085_v46  ;;  %vm3084_vm4 = vcmp.eq.f32.partialorder %v3083_v48, 8.507059e+37 }
 0xc08   : > { %8899 = vrcp.f32 %v3146_v38  ;;  %v3158_v50 = vand.u32 2147483648, %v3146_v38  ;;  %v3156_v54 = vand.u32 2147483647, %v3146_v38  ;;  %vm3152_vm5 = vweird.f32 %v3146_v38 }
 0xc0a   : > { %v3159_v59 = vor.u32 1.1754944e-38, %v3158_v50  ;;  %vm3157_vm9 = vcmp.eq.f32.partialorder %v3156_v54, 8.507059e+37 }
 0xc0b   : > { %v8898_v39 = vpop.eup %8897 }
 0xc0c   : > { %v3075_v40 = vmul.f32 %v8898_v39, %v3073_v37  ;;  %vm3080_vm14 = vweird.f32 %v8898_v39 }
 0xc0d   : > { %vm3081_vm2 = vmor %vm3079_vm15, %vm3080_vm14 }
 0xc0e   : > { %v8900_v41 = vpop.eup %8899  ;;  %v3076_v43 = vsub.f32 1.0, %v3075_v40 }
 0xc0f   : > { %v3148_v44 = vmul.f32 %v8900_v41, %v3146_v38  ;;  %vm3153_vm1 = vweird.f32 %v8900_v41 }
 0xc10   : > { %v3077_v47 = vmul.f32 %v8898_v39, %v3076_v43  ;;  %vm3154_vm7 = vmor %vm3152_vm5, %vm3153_vm1 }
 0xc11   : > { %v3149_v49 = vsub.f32 1.0, %v3148_v44 }
 0xc12   : > { %v3078_v51 = vadd.f32 %v8898_v39, %v3077_v47 }
 0xc13   : > { %v3150_v53 = vmul.f32 %v8900_v41, %v3149_v49 }
 0xc14   : > { %v3082_v56 = vsel %vm3081_vm2, %v8898_v39, %v3078_v51 }
 0xc15   : > { %v3151_v57 = vadd.f32 %v8900_v41, %v3150_v53  ;;  %v3087_v58 = vsel %vm3084_vm4, %v3086_v55, %v3082_v56 }
 0xc16   : > { %v3088_v60 = vmul.f32 %v8894_v25, %v3087_v58 }
 0xc17   : > { %v3155_v9 = vsel %vm3154_vm7, %v8900_v41, %v3151_v57 }
 0xc18   : > { %v3160_v61 = vsel %vm3157_vm9, %v3159_v59, %v3155_v9  ;;  %7880 = vmatmul.msk.f32.vlgmr.msrb.gmra.mxu3 %vm1238_vm8, %v3088_v60  ;;  %v7870_v59 = vld [vmem:[%s9072_s20 + $0x38] sm:$0xff]  ;;  %v7869_v60 = vld [vmem:[%s9072_s20 + $0x30] sm:$0xff] }
 0xc19   : > { %v3161_v62 = vmul.f32 %v8896_v27, %v3160_v61 }
 0xc1b   : > { %7883 = vmatmul.msk.f32.vlgmr.msra.gmra.mxu1 %vm1238_vm8, %v3161_v62  ;;  %v8848_v62 = vld [vmem:[%s11346_s26 + $0x1] ss:$0 sm:$0xff] }
 0xc20   : > { %7886 = vmatmul.msk.f32.vlgmr.msra.gmra.mxu3 %vm1125_vm6, %v9792_v52 }
 0xc23   : > { %7890 = vmatmul.msk.f32.vlgmr.msrb.gmra.mxu1 %vm1125_vm6, %v9792_v52 }
 0xc28   : > { %7887 = vmatmul.msk.f32.gmra.mxu3 %vm1125_vm6, %v9801_v45 }
 0xc2b   : > { %7891 = vmatmul.msk.f32.gmra.mxu1 %vm1125_vm6, %v9801_v45 }
 0xc98   : > { %v3182_v63 = vpop.f32.mrf.mxu1 }
 0xc9b   : > { %v3109_v0 = vpop.f32.mrf.mxu3 }
 0xc9c   : > { %7884 = vmatmul.msk.f32.vlgmr.msra.gmra.mxu2 %vm1045_vm3, %v3109_v0 }
 0xc9d   : > { %3465 = vmatpush.msra.mxu2 %v7870_v59  ;;  %v7909_v59 = vld [vmem:[%s11347_s28 + $0x238] sm:$0xff] }
 0xc9f   : > { %3466 = vmatpush.msra.mxu2 %v7869_v60 }
 0xca0   : > { %v3293_v14 = vpop.f32.mrf.mxu1 }
 0xca1   : > { %v3294_v2 = vadd.f32 %v8846_v1, %v3293_v14 }
 0xca3   : > { %3367 = vmatpush.msrb.mxu3 %v3294_v2  ;;  %v3239_v5 = vpop.f32.mrf.mxu3 }
 0xca4   : > { %7885 = vmatmul.msk.f32.gmra.mxu2 %vm1045_vm3, %v3182_v63  ;;  %v3240_v7 = vadd.f32 %v8847_v3, %v3239_v5 }
 0xca6   : > { %v3245_v42 = vmul.f32 0.25, %v3240_v7 }
 0xca8   : > { %v3296_v10 = vpop.f32.mrf.mxu1 }
 0xca9   : > { %v3297_v12 = vadd.f32 %v8846_v1, %v3296_v10 }
 0xcab   : > { %3440 = vmatpush.msra.mxu1 %v3297_v12  ;;  %v3242_v13 = vpop.f32.mrf.mxu3 }
 0xcac   : > { %v3243_v15 = vadd.f32 %v8847_v3, %v3242_v13  ;;  %7893 = vmatmul.msk.f32.vlgmr.msrb.gmra.mxu2 %vm1045_vm3, %v3245_v42 }
 0xcae   : > { %v3246_v16 = vmul.f32 0.25, %v3243_v15 }
 0xcb0   : > { %7896 = vmatmul.msk.f32.vlgmr.msrb.gmra.mxu0 %vm1045_vm3, %v3246_v16 }
 0xd1f   : > { %v9865_v17 = vpop.f32.mrf.mxu2 }
 0xd20   : > { %v3217_v63 = vadd.f32 %v8848_v62, %v9865_v17 }
 0xd27   : > { %v9867_v18 = vpop.f32.mrf.mxu2 }
 0xd28   : > { %v3218_v3 = vadd.f32 %v8848_v62, %v9867_v18 }
 0xd2d   : > { %v3395_v19 = vpop.f32.mrf.mxu0 }
 0xd2e   : > { %v3396_v20 = vadd.f32 %v9831_v11, %v3395_v19 }
 0xd2f   : > { %v3322_v21 = vpop.f32.mrf.mxu2 }
 0xd30   : > { %v3323_v4 = vadd.f32 %v9827_v36, %v3322_v21  ;;  %v3398_v22 = vsel %vm1238_vm8, %v3396_v20, -inf  ;;  %v7950_v21 = vld [vmem:[%s11347_s28 + $0x380] sm:$0xff] }
 0xd31   : > { %3399 = vmax.xlane.f32.xlu0 %v3398_v22  ;;  %v7952_v22 = vld [vmem:[%s11347_s28 + $0x390] sm:$0xff]  ;;  %3656 = vmatpush.msra.mxu3 %v7950_v21  ;;  %v7943_v21 = vld [vmem:[%s11347_s28 + $0x348] sm:$0xff] }
 0xd32   : > { %v3325_v23 = vsel %vm1238_vm8, %v3323_v4, -inf  ;;  %3702 = vmatpush.msrb.mxu1 %v7952_v22  ;;  %v7944_v22 = vld [vmem:[%s11347_s28 + $0x350] sm:$0xff] }
 0xd33   : > { %3326 = vmax.xlane.f32.xlu2 %v3325_v23  ;;  %v7953_v23 = vld [vmem:[%s11347_s28 + $0x398] sm:$0xff] }
 0xd34   : > { %3725 = vmatpush.msrb.mxu2 %v7953_v23  ;;  %v7945_v23 = vld [vmem:[%s11347_s28 + $0x358] sm:$0xff] }
 0xda4   : > { %v3400_v8 = vpop.xlane.xlu0 %3399 }
 0xda5   : > { %v3401_v25 = vsub.f32 %v3396_v20, %v3400_v8  ;;  %v7934_v8 = vld [vmem:[%s11347_s28 + $0x300] sm:$0xff] }
 0xda6   : > { %v3327_v26 = vpop.xlane.xlu2 %3326  ;;  %3657 = vmatpush.msra.mxu3 %v7934_v8  ;;  %v7926_v8 = vld [vmem:[%s11347_s28 + $0x2c0] sm:$0xff] }
 0xda7   : > { %v3402_v27 = vmul.f32 1.442695, %v3401_v25  ;;  %v3328_v28 = vsub.f32 %v3323_v4, %v3327_v26  ;;  %v7951_v4 = vld [vmem:[%s11347_s28 + $0x388] sm:$0xff]  ;;  %v7936_v26 = vld [vmem:[%s11347_s28 + $0x310] sm:$0xff] }
 0xda8   : > { %3679 = vmatpush.msra.mxu0 %v7951_v4  ;;  %v7935_v25 = vld [vmem:[%s11347_s28 + $0x308] sm:$0xff]  ;;  %3703 = vmatpush.msrb.mxu1 %v7936_v26 }
 0xda9   : > { %8901 = vpow2.f32 %v3402_v27  ;;  %v3329_v29 = vmul.f32 1.442695, %v3328_v28  ;;  %v7937_v27 = vld [vmem:[%s11347_s28 + $0x318] sm:$0xff]  ;;  %v7918_v28 = vld [vmem:[%s11347_s28 + $0x280] sm:$0xff] }
 0xdaa   : > { %3680 = vmatpush.msra.mxu0 %v7935_v25  ;;  %3726 = vmatpush.msrb.mxu2 %v7937_v27  ;;  %v7927_v25 = vld [vmem:[%s11347_s28 + $0x2c8] sm:$0xff]  ;;  %v7928_v27 = vld [vmem:[%s11347_s28 + $0x2d0] sm:$0xff] }
 0xdab   : > { %8903 = vpow2.f32 %v3329_v29  ;;  %v7919_v29 = vld [vmem:[%s11347_s28 + $0x288] sm:$0xff]  ;;  %3658 = vmatpush.msra.mxu3 %v7918_v28  ;;  %v7929_v28 = vld [vmem:[%s11347_s28 + $0x2d8] sm:$0xff] }
 0xdac   : > { %3681 = vmatpush.msra.mxu0 %v7919_v29  ;;  %v7910_v29 = vld [vmem:[%s11347_s28 + $0x240] sm:$0xff] }
 0xdaf   : > { %v8902_v30 = vpop.eup %8901 }
 0xdb0   : > { %v3404_v11 = vsel %vm1238_vm8, %v8902_v30, 0.0 }
 0xdb1   : > { %v8904_v31 = vpop.eup %8903  ;;  %3405 = vadd.xlane.f32.xlu2 %v3404_v11  ;;  %v7921_v11 = vld [vmem:[%s11347_s28 + $0x298] sm:$0xff] }
 0xdb2   : > { %v3331_v36 = vsel %vm1238_vm8, %v8904_v31, 0.0  ;;  %3727 = vmatpush.msrb.mxu2 %v7921_v11  ;;  %v7912_v11 = vld [vmem:[%s11347_s28 + $0x250] sm:$0xff] }
 0xdb3   : > { %3332 = vadd.xlane.f32.xlu1 %v3331_v36  ;;  %v7903_v36 = vld [vmem:[%s11347_s28 + $0x208] sm:$0xff] }
 0xdb4   : > { %3682 = vmatpush.msra.mxu0 %v7903_v36  ;;  %v7962_v36 = vld [vmem:[%s11347_s28 + $0x3e0] sm:$0xff] }
 0xe24   : > { %v3406_v32 = vpop.xlane.xlu2 %3405 }
 0xe25   : > { %8905 = vrcp.f32 %v3406_v32  ;;  %v3418_v39 = vand.u32 2147483648, %v3406_v32  ;;  %v3416_v41 = vand.u32 2147483647, %v3406_v32  ;;  %vm3412_vm11 = vweird.f32 %v3406_v32 }
 0xe26   : > { %v3333_v33 = vpop.xlane.xlu1 %3332 }
 0xe27   : > { %8907 = vrcp.f32 %v3333_v33  ;;  %v3345_v44 = vand.u32 2147483648, %v3333_v33  ;;  %v3343_v48 = vand.u32 2147483647, %v3333_v33  ;;  %v3419_v49 = vor.u32 1.1754944e-38, %v3418_v39  ;;  %v7956_v39 = vld [vmem:[%s11347_s28 + $0x3b0] sm:$0xff] }
 0xe28   : > { %vm3417_vm14 = vcmp.eq.f32.partialorder %v3416_v41, 8.507059e+37  ;;  %vm3339_vm15 = vweird.f32 %v3333_v33  ;;  %v7938_v41 = vld [vmem:[%s11347_s28 + $0x320] sm:$0xff] }
 0xe29   : > { %v3346_v54 = vor.u32 1.1754944e-38, %v3345_v44  ;;  %vm3344_vm2 = vcmp.eq.f32.partialorder %v3343_v48, 8.507059e+37  ;;  %v7922_v48 = vld [vmem:[%s11347_s28 + $0x2a0] sm:$0xff] }
 0xe2b   : > { %v8906_v24 = vpop.eup %8905 }
 0xe2c   : > { %v3408_v34 = vmul.f32 %v8906_v24, %v3406_v32  ;;  %vm3413_vm10 = vweird.f32 %v8906_v24  ;;  %v7904_v32 = vld [vmem:[%s11347_s28 + $0x210] sm:$0xff] }
 0xe2d   : > { %v8908_v35 = vpop.eup %8907  ;;  %vm3414_vm13 = vmor %vm3412_vm11, %vm3413_vm10 }
 0xe2e   : > { %v3409_v37 = vsub.f32 1.0, %v3408_v34  ;;  %v3335_v38 = vmul.f32 %v8908_v35, %v3333_v33  ;;  %vm3340_vm12 = vweird.f32 %v8908_v35  ;;  %v7905_v33 = vld [vmem:[%s11347_s28 + $0x218] sm:$0xff] }
 0xe2f   : > { %vm3341_vm1 = vmor %vm3339_vm15, %vm3340_vm12  ;;  %3728 = vmatpush.msrb.mxu2 %v7905_v33  ;;  %v7964_v33 = vld [vmem:[%s11347_s28 + $0x3f0] sm:$0xff] }
 0xe30   : > { %v3410_v40 = vmul.f32 %v8906_v24, %v3409_v37  ;;  %v3336_v43 = vsub.f32 1.0, %v3335_v38  ;;  %v7954_v37 = vld [vmem:[%s11347_s28 + $0x3a0] sm:$0xff]  ;;  %v7955_v38 = vld [vmem:[%s11347_s28 + $0x3a8] sm:$0xff] }
 0xe31   : > { %3771 = vmatpush.msrb.mxu0 %v7955_v38  ;;  %v7949_v38 = vld [vmem:[%s11347_s28 + $0x378] sm:$0xff] }
 0xe32   : > { %v3411_v46 = vadd.f32 %v8906_v24, %v3410_v40  ;;  %v3337_v47 = vmul.f32 %v8908_v35, %v3336_v43  ;;  %v7957_v40 = vld [vmem:[%s11347_s28 + $0x3b8] sm:$0xff]  ;;  %v7939_v43 = vld [vmem:[%s11347_s28 + $0x328] sm:$0xff] }
 0xe33   : > { %3772 = vmatpush.msrb.mxu0 %v7939_v43  ;;  %v7933_v43 = vld [vmem:[%s11347_s28 + $0x2f8] sm:$0xff] }
 0xe34   : > { %v3415_v50 = vsel %vm3414_vm13, %v8906_v24, %v3411_v46  ;;  %v3338_v51 = vadd.f32 %v8908_v35, %v3337_v47  ;;  %v7940_v46 = vld [vmem:[%s11347_s28 + $0x330] sm:$0xff]  ;;  %v7941_v47 = vld [vmem:[%s11347_s28 + $0x338] sm:$0xff] }
 0xe35   : > { %v3420_v53 = vsel %vm3417_vm14, %v3419_v49, %v3415_v50  ;;  %v7923_v50 = vld [vmem:[%s11347_s28 + $0x2a8] sm:$0xff] }
 0xe36   : > { %v3421_v55 = vmul.f32 %v8902_v30, %v3420_v53  ;;  %v3342_v56 = vsel %vm3341_vm1, %v8908_v35, %v3338_v51  ;;  %v7920_v30 = vld [vmem:[%s11347_s28 + $0x290] sm:$0xff]  ;;  %v7925_v53 = vld [vmem:[%s11347_s28 + $0x2b8] sm:$0xff]  ;;  %3773 = vmatpush.msrb.mxu0 %v7923_v50 }
 0xe37   : > { %v3347_v57 = vsel %vm3344_vm2, %v3346_v54, %v3342_v56  ;;  %3704 = vmatpush.msrb.mxu1 %v7920_v30  ;;  %v7924_v51 = vld [vmem:[%s11347_s28 + $0x2b0] sm:$0xff]  ;;  %v7906_v54 = vld [vmem:[%s11347_s28 + $0x220] sm:$0xff]  ;;  %v7911_v30 = vld [vmem:[%s11347_s28 + $0x248] sm:$0xff] }
 0xe38   : > { %v3348_v58 = vmul.f32 %v8904_v31, %v3347_v57  ;;  %7897 = vmatmul.msk.f32.vlgmr.msra.gmra.mxu1 %vm1238_vm8, %v3421_v55  ;;  %v7902_v31 = vld [vmem:[%s11347_s28 + $0x200] sm:$0xff]  ;;  %v7907_v55 = vld [vmem:[%s11347_s28 + $0x228] sm:$0xff]  ;;  %v8047_v50 = vld [vmem:[%s11350_s7 + $0x978] sm:$0xff] }
 0xe39   : > { %3659 = vmatpush.msra.mxu3 %v7902_v31  ;;  %3705 = vmatpush.msrb.mxu1 %v7904_v32  ;;  %v7913_v31 = vld [vmem:[%s11347_s28 + $0x258] sm:$0xff]  ;;  %v7963_v32 = vld [vmem:[%s11347_s28 + $0x3e8] sm:$0xff] }
 0xe3a   : > { %7894 = vmatmul.msk.f32.vlgmr.msrb.gmra.mxu3 %vm1238_vm8, %v3348_v58  ;;  %v7908_v58 = vld [vmem:[%s11347_s28 + $0x230] sm:$0xff]  ;;  %3774 = vmatpush.msrb.mxu0 %v7907_v55 }
 0xe3b   : > { %3748 = vmatpush.msrb.mxu3 %v7954_v37  ;;  %3794 = vmatpush.msra.mxu1 %v7956_v39  ;;  %v7948_v37 = vld [vmem:[%s11347_s28 + $0x370] sm:$0xff]  ;;  %v7930_v39 = vld [vmem:[%s11347_s28 + $0x2e0] sm:$0xff] }
 0xe3c   : > { %v8046_v55 = vld [vmem:[%s11350_s7 + $0x970] sm:$0xff] }
 0xe3d   : > { %3749 = vmatpush.msrb.mxu3 %v7938_v41  ;;  %3795 = vmatpush.msra.mxu1 %v7940_v46  ;;  %v7932_v41 = vld [vmem:[%s11347_s28 + $0x2f0] sm:$0xff]  ;;  %v7915_v46 = vld [vmem:[%s11347_s28 + $0x268] sm:$0xff] }
 0xe3f   : > { %3750 = vmatpush.msrb.mxu3 %v7922_v48  ;;  %3796 = vmatpush.msra.mxu1 %v7924_v51  ;;  %v7917_v48 = vld [vmem:[%s11347_s28 + $0x278] sm:$0xff] }
 0xe40   : > { %v8015_v51 = vld [vmem:[%s11350_s7 + $0x878] sm:$0xff] }
 0xe41   : > { %3751 = vmatpush.msrb.mxu3 %v7906_v54  ;;  %3797 = vmatpush.msra.mxu1 %v7908_v58  ;;  %v8030_v54 = vld [vmem:[%s11350_s7 + $0x8f0] sm:$0xff]  ;;  %v8029_v58 = vld [vmem:[%s11350_s7 + $0x8e8] sm:$0xff] }
 0xeb5   : > { %v3442_v61 = vpop.f32.mrf.mxu1 }
 0xebd   : > { %v3369_v9 = vpop.f32.mrf.mxu3 }
 0xebe   : > { %7898 = vmatmul.msk.f32.vlgmr.msra.gmra.mxu2 %vm1045_vm3, %v3369_v9 }
 0xebf   : > { %3817 = vmatpush.msra.mxu2 %v7957_v40  ;;  %v7931_v40 = vld [vmem:[%s11347_s28 + $0x2e8] sm:$0xff] }
 0xec1   : > { %3818 = vmatpush.msra.mxu2 %v7941_v47  ;;  %v7916_v47 = vld [vmem:[%s11347_s28 + $0x270] sm:$0xff] }
 0xec3   : > { %3819 = vmatpush.msra.mxu2 %v7925_v53  ;;  %v8063_v53 = vld [vmem:[%s11350_s7 + $0x9f8] sm:$0xff] }
 0xec5   : > { %3820 = vmatpush.msra.mxu2 %v7909_v59  ;;  %v8045_v59 = vld [vmem:[%s11350_s7 + $0x968] sm:$0xff] }
 0xec6   : > { %7899 = vmatmul.msk.f32.gmra.mxu2 %vm1045_vm3, %v3442_v61 }
 0xf41   : > { %v3468_v0 = vpop.f32.mrf.mxu2 }
 0xf42   : > { %v3474_v1 = vadd.f32 %v3468_v0, %v3217_v63 }
 0xf44   : > { %v3476_v14 = vadd.f32 %v3474_v1, %v9792_v52 }
 0xf46   : > { %v3482_v2 = vsel %vm1125_vm6, %v3476_v14, 0.0 }
 0xf47   : > { %3483 = vadd.xlane.f32.xlu0 %v3482_v2 }
 0xf49   : > { %v3471_v5 = vpop.f32.mrf.mxu2 }
 0xf4a   : > { %v3475_v7 = vadd.f32 %v3471_v5, %v3218_v3  ;;  %v8850_v5 = vld [vmem:[%s11349_s2 + $0x1] ss:$0 sm:$0xff] }
 0xf4c   : > { %v3477_v10 = vadd.f32 %v3475_v7, %v9801_v45 }
 0xf4e   : > { %v3485_v12 = vsel %vm1125_vm6, %v3477_v10, 0.0 }
 0xf4f   : > { %3486 = vadd.xlane.f32.xlu1 %v3485_v12 }
 0xfba   : > { %v3484_v42 = vpop.xlane.xlu0 %3483 }
 0xfbb   : > { %v3488_v13 = vmul.f32 %v3484_v42, %v9301_v6 }
 0xfbd   : > { %v9889_v52 = vsub.f32 %v3476_v14, %v3488_v13  ;;  %v8849_v14 = vld [vmem:[%s11348_s1 + $0x1] ss:$0 sm:$0xff] }
 0xfbf   : > { %v3492_v15 = vmul.f32 %v9889_v52, %v9889_v52 }
 0xfc1   : > { %v3494_v16 = vsel %vm1125_vm6, %v3492_v15, 0.0 }
 0xfc2   : > { %3495 = vadd.xlane.f32.xlu2 %v3494_v16  ;;  %v3487_v45 = vpop.xlane.xlu1 %3486  ;;  %v7958_v16 = vld [vmem:[%s11347_s28 + $0x3c0] sm:$0xff] }
 0xfc3   : > { %v3489_v17 = vmul.f32 %v3487_v45, %v9301_v6  ;;  %v7959_v45 = vld [vmem:[%s11347_s28 + $0x3c8] sm:$0xff] }
 0xfc5   : > { %v9895_v18 = vsub.f32 %v3477_v10, %v3489_v17  ;;  %v7961_v17 = vld [vmem:[%s11347_s28 + $0x3d8] sm:$0xff] }
 0xfc7   : > { %v3493_v19 = vmul.f32 %v9895_v18, %v9895_v18 }
 0xfc9   : > { %v3497_v20 = vsel %vm1125_vm6, %v3493_v19, 0.0 }
 0xfca   : > { %3498 = vadd.xlane.f32.xlu0 %v3497_v20  ;;  %v7942_v20 = vld [vmem:[%s11347_s28 + $0x340] sm:$0xff] }
0x1035   : > { %v3496_v24 = vpop.xlane.xlu2 %3495 }
0x1036   : > { %v3500_v34 = vmul.f32 %v3496_v24, %v9301_v6  ;;  %v7965_v24 = vld [vmem:[%s11347_s28 + $0x3f8] sm:$0xff] }
0x1038   : > { %v3502_v35 = vadd.f32 1e-05, %v3500_v34  ;;  %v7946_v34 = vld [vmem:[%s11347_s28 + $0x360] sm:$0xff] }
0x103a   : > { %8909 = vrsqrt.f32 %v3502_v35  ;;  %vm3510_vm5 = vweird.f32 %v3502_v35 }
0x103d   : > { %v3499_v44 = vpop.xlane.xlu0 %3498 }
0x103e   : > { %v3501_v49 = vmul.f32 %v3499_v44, %v9301_v6  ;;  %v7914_v44 = vld [vmem:[%s11347_s28 + $0x260] sm:$0xff] }
0x1040   : > { %v8910_v56 = vpop.eup %8909  ;;  %v3503_v57 = vadd.f32 1e-05, %v3501_v49  ;;  %v8031_v49 = vld [vmem:[%s11350_s7 + $0x8f8] sm:$0xff] }
0x1041   : > { %v3505_v60 = vmul.f32 %v8910_v56, %v3502_v35  ;;  %vm3511_vm4 = vweird.f32 %v8910_v56  ;;  %v7947_v35 = vld [vmem:[%s11347_s28 + $0x368] sm:$0xff] }
0x1042   : > { %8911 = vrsqrt.f32 %v3503_v57  ;;  %vm3512_vm7 = vmor %vm3510_vm5, %vm3511_vm4  ;;  %vm3520_vm10 = vweird.f32 %v3503_v57 }
0x1043   : > { %v3506_v9 = vmul.f32 %v8910_v56, %v3505_v60  ;;  %v8013_v60 = vld [vmem:[%s11350_s7 + $0x868] sm:$0xff] }
0x1045   : > { %v3507_v61 = vmul.f32 0.5, %v3506_v9  ;;  %v8061_v9 = vld [vmem:[%s11350_s7 + $0x9e8] sm:$0xff] }
0x1047   : > { %v3508_v62 = vsub.f32 1.5, %v3507_v61  ;;  %v8028_v61 = vld [vmem:[%s11350_s7 + $0x8e0] sm:$0xff] }
0x1048   : > { %v8912_v63 = vpop.eup %8911 }
0x1049   : > { %v3509_v0 = vmul.f32 %v8910_v56, %v3508_v62  ;;  %v3515_v1 = vmul.f32 %v8912_v63, %v3503_v57  ;;  %vm3521_vm9 = vweird.f32 %v8912_v63  ;;  %v8062_v57 = vld [vmem:[%s11350_s7 + $0x9f0] sm:$0xff]  ;;  %v8044_v62 = vld [vmem:[%s11350_s7 + $0x960] sm:$0xff] }
0x104a   : > { %vm3522_vm11 = vmor %vm3520_vm10, %vm3521_vm9 }
0x104b   : > { %v3513_v2 = vsel %vm3512_vm7, %v8910_v56, %v3509_v0  ;;  %v3516_v3 = vmul.f32 %v8912_v63, %v3515_v1  ;;  %v8014_v56 = vld [vmem:[%s11350_s7 + $0x870] sm:$0xff]  ;;  %v8060_v0 = vld [vmem:[%s11350_s7 + $0x9e0] sm:$0xff]  ;;  %v8027_v1 = vld [vmem:[%s11350_s7 + $0x8d8] sm:$0xff] }
0x104c   : > { %v3524_v7 = vmul.f32 %v3513_v2, %v9889_v52  ;;  %v7960_v52 = vld [vmem:[%s11347_s28 + $0x3d0] sm:$0xff]  ;;  %v8011_v2 = vld [vmem:[%s11350_s7 + $0x858] sm:$0xff] }
0x104d   : > { %v3517_v10 = vmul.f32 0.5, %v3516_v3  ;;  %v8059_v3 = vld [vmem:[%s11350_s7 + $0x9d8] sm:$0xff] }
0x104e   : > { %v3529_v12 = vmul.f32 %v8849_v14, %v3524_v7  ;;  %v8042_v7 = vld [vmem:[%s11350_s7 + $0x950] sm:$0xff] }
0x104f   : > { %v3518_v42 = vsub.f32 1.5, %v3517_v10  ;;  %v8010_v10 = vld [vmem:[%s11350_s7 + $0x850] sm:$0xff] }
0x1050   : > { %v9937_v13 = vadd.f32 %v8850_v5, %v3529_v12  ;;  %v8058_v12 = vld [vmem:[%s11350_s7 + $0x9d0] sm:$0xff] }
0x1051   : > { %v3519_v15 = vmul.f32 %v8912_v63, %v3518_v42  ;;  %v8025_v42 = vld [vmem:[%s11350_s7 + $0x8c8] sm:$0xff] }
0x1052   : > { %7968 = vmatmul.msk.f32.vlgmr.msra.gmra.mxu3 %vm1125_vm6, %v9937_v13  ;;  %7970 = vmatmul.msk.f32.vlgmr.msra.gmra.mxu0 %vm1125_vm6, %v9937_v13 }
0x1053   : > { %v3523_v19 = vsel %vm3522_vm11, %v8912_v63, %v3519_v15  ;;  %7972 = vmatmul.msk.f32.vlgmr.msrb.gmra.mxu1 %vm1125_vm6, %v9937_v13  ;;  %7974 = vmatmul.msk.f32.vlgmr.msrb.gmra.mxu2 %vm1125_vm6, %v9937_v13  ;;  %v8012_v63 = vld [vmem:[%s11350_s7 + $0x860] sm:$0xff]  ;;  %v8041_v15 = vld [vmem:[%s11350_s7 + $0x948] sm:$0xff] }
0x1054   : > { %v3525_v4 = vmul.f32 %v3523_v19, %v9895_v18  ;;  %3840 = vmatpush.msra.mxu3 %v7958_v16  ;;  %3863 = vmatpush.msra.mxu0 %v7959_v45  ;;  %v8009_v16 = vld [vmem:[%s11350_s7 + $0x848] sm:$0xff]  ;;  %v8008_v19 = vld [vmem:[%s11350_s7 + $0x840] sm:$0xff] }
0x1055   : > { %3886 = vmatpush.msrb.mxu1 %v7960_v52  ;;  %3909 = vmatpush.msrb.mxu2 %v7961_v17  ;;  %v8057_v45 = vld [vmem:[%s11350_s7 + $0x9c8] sm:$0xff]  ;;  %v8024_v52 = vld [vmem:[%s11350_s7 + $0x8c0] sm:$0xff] }
0x1056   : > { %v3530_v26 = vmul.f32 %v8849_v14, %v3525_v4  ;;  %3841 = vmatpush.msra.mxu3 %v7942_v20  ;;  %3864 = vmatpush.msra.mxu0 %v7943_v21  ;;  %v8043_v14 = vld [vmem:[%s11350_s7 + $0x958] sm:$0xff]  ;;  %v8040_v17 = vld [vmem:[%s11350_s7 + $0x940] sm:$0xff] }
0x1057   : > { %3887 = vmatpush.msrb.mxu1 %v7944_v22  ;;  %3910 = vmatpush.msrb.mxu2 %v7945_v23  ;;  %v8056_v20 = vld [vmem:[%s11350_s7 + $0x9c0] sm:$0xff]  ;;  %v8023_v21 = vld [vmem:[%s11350_s7 + $0x8b8] sm:$0xff] }
0x1058   : > { %v9960_v18 = vadd.f32 %v8850_v5, %v3530_v26  ;;  %3842 = vmatpush.msra.mxu3 %v7926_v8  ;;  %3865 = vmatpush.msra.mxu0 %v7927_v25  ;;  %v8026_v5 = vld [vmem:[%s11350_s7 + $0x8d0] sm:$0xff]  ;;  %v8039_v4 = vld [vmem:[%s11350_s7 + $0x938] sm:$0xff] }
0x1059   : > { %3888 = vmatpush.msrb.mxu1 %v7928_v27  ;;  %3911 = vmatpush.msrb.mxu2 %v7929_v28  ;;  %v8007_v22 = vld [vmem:[%s11350_s7 + $0x838] sm:$0xff]  ;;  %v8022_v8 = vld [vmem:[%s11350_s7 + $0x8b0] sm:$0xff]  ;;  %v8021_v28 = vld [vmem:[%s11350_s7 + $0x8a8] sm:$0xff] }
0x105a   : > { %7969 = vmatmul.msk.f32.gmra.mxu3 %vm1125_vm6, %v9960_v18  ;;  %7971 = vmatmul.msk.f32.gmra.mxu0 %vm1125_vm6, %v9960_v18  ;;  %v8055_v23 = vld [vmem:[%s11350_s7 + $0x9b8] sm:$0xff]  ;;  %v8038_v25 = vld [vmem:[%s11350_s7 + $0x930] sm:$0xff] }
0x105b   : > { %7973 = vmatmul.msk.f32.gmra.mxu1 %vm1125_vm6, %v9960_v18  ;;  %7975 = vmatmul.msk.f32.gmra.mxu2 %vm1125_vm6, %v9960_v18  ;;  %v8006_v26 = vld [vmem:[%s11350_s7 + $0x830] sm:$0xff] }
0x105c   : > { %3843 = vmatpush.msra.mxu3 %v7910_v29  ;;  %3866 = vmatpush.msra.mxu0 %v7911_v30  ;;  %v8054_v27 = vld [vmem:[%s11350_s7 + $0x9b0] sm:$0xff]  ;;  %v8037_v29 = vld [vmem:[%s11350_s7 + $0x928] sm:$0xff] }
0x105d   : > { %3889 = vmatpush.msrb.mxu1 %v7912_v11  ;;  %3912 = vmatpush.msrb.mxu2 %v7913_v31  ;;  %v8005_v30 = vld [vmem:[%s11350_s7 + $0x828] sm:$0xff]  ;;  %v8020_v31 = vld [vmem:[%s11350_s7 + $0x8a0] sm:$0xff] }
0x105e   : > { %v8053_v11 = vld [vmem:[%s11350_s7 + $0x9a8] sm:$0xff] }
0x1062   : > { %7976 = vmatmul.msk.f32.vlgmr.msrb.gmra.mxu3 %vm1125_vm6, %v9937_v13  ;;  %7978 = vmatmul.msk.f32.vlgmr.msrb.gmra.mxu0 %vm1125_vm6, %v9937_v13 }
0x1063   : > { %7980 = vmatmul.msk.f32.vlgmr.msra.gmra.mxu1 %vm1125_vm6, %v9937_v13  ;;  %7982 = vmatmul.msk.f32.vlgmr.msra.gmra.mxu2 %vm1125_vm6, %v9937_v13 }
0x1064   : > { %3932 = vmatpush.msrb.mxu3 %v7962_v36  ;;  %3955 = vmatpush.msrb.mxu0 %v7963_v32  ;;  %v8036_v36 = vld [vmem:[%s11350_s7 + $0x920] sm:$0xff] }
0x1065   : > { %3978 = vmatpush.msra.mxu1 %v7964_v33  ;;  %4001 = vmatpush.msra.mxu2 %v7965_v24  ;;  %v8004_v32 = vld [vmem:[%s11350_s7 + $0x820] sm:$0xff]  ;;  %v8019_v24 = vld [vmem:[%s11350_s7 + $0x898] sm:$0xff] }
0x1066   : > { %3933 = vmatpush.msrb.mxu3 %v7946_v34  ;;  %3956 = vmatpush.msrb.mxu0 %v7947_v35  ;;  %v8052_v33 = vld [vmem:[%s11350_s7 + $0x9a0] sm:$0xff]  ;;  %v8035_v34 = vld [vmem:[%s11350_s7 + $0x918] sm:$0xff] }
0x1067   : > { %3979 = vmatpush.msra.mxu1 %v7948_v37  ;;  %4002 = vmatpush.msra.mxu2 %v7949_v38  ;;  %v8003_v35 = vld [vmem:[%s11350_s7 + $0x818] sm:$0xff]  ;;  %v8018_v38 = vld [vmem:[%s11350_s7 + $0x890] sm:$0xff] }
0x1068   : > { %3934 = vmatpush.msrb.mxu3 %v7930_v39  ;;  %3957 = vmatpush.msrb.mxu0 %v7931_v40  ;;  %v8051_v37 = vld [vmem:[%s11350_s7 + $0x998] sm:$0xff]  ;;  %v8034_v39 = vld [vmem:[%s11350_s7 + $0x910] sm:$0xff] }
0x1069   : > { %3980 = vmatpush.msra.mxu1 %v7932_v41  ;;  %4003 = vmatpush.msra.mxu2 %v7933_v43  ;;  %v8002_v40 = vld [vmem:[%s11350_s7 + $0x810] sm:$0xff]  ;;  %v8017_v43 = vld [vmem:[%s11350_s7 + $0x888] sm:$0xff] }
0x106a   : > { %7977 = vmatmul.msk.f32.gmra.mxu3 %vm1125_vm6, %v9960_v18  ;;  %7979 = vmatmul.msk.f32.gmra.mxu0 %vm1125_vm6, %v9960_v18  ;;  %v8050_v41 = vld [vmem:[%s11350_s7 + $0x990] sm:$0xff] }
0x106b   : > { %7981 = vmatmul.msk.f32.gmra.mxu1 %vm1125_vm6, %v9960_v18  ;;  %7983 = vmatmul.msk.f32.gmra.mxu2 %vm1125_vm6, %v9960_v18 }
0x106c   : > { %3935 = vmatpush.msrb.mxu3 %v7914_v44  ;;  %3958 = vmatpush.msrb.mxu0 %v7915_v46  ;;  %v8033_v44 = vld [vmem:[%s11350_s7 + $0x908] sm:$0xff] }
0x106d   : > { %3981 = vmatpush.msra.mxu1 %v7916_v47  ;;  %4004 = vmatpush.msra.mxu2 %v7917_v48  ;;  %v8001_v46 = vld [vmem:[%s11350_s7 + $0x808] sm:$0xff]  ;;  %v8016_v48 = vld [vmem:[%s11350_s7 + $0x880] sm:$0xff] }
0x106e   : > { %v8049_v47 = vld [vmem:[%s11350_s7 + $0x988] sm:$0xff] }
0x1072   : > { %7984 = vmatmul.msk.f32.vlgmr.msra.gmra.mxu3 %vm1125_vm6, %v9937_v13  ;;  %7986 = vmatmul.msk.f32.vlgmr.msra.gmra.mxu0 %vm1125_vm6, %v9937_v13 }
0x1073   : > { %7988 = vmatmul.msk.f32.vlgmr.msrb.gmra.mxu1 %vm1125_vm6, %v9937_v13  ;;  %7990 = vmatmul.msk.f32.vlgmr.msrb.gmra.mxu2 %vm1125_vm6, %v9937_v13 }
0x1074   : > { %4329 = vmatpush.msra.mxu0 %v8031_v49  ;;  %4352 = vmatpush.msrb.mxu1 %v8047_v50  ;;  %v8032_v49 = vld [vmem:[%s11350_s7 + $0x900] sm:$0xff]  ;;  %v8095_v50 = vld [vmem:[%s11350_s7 + $0xaf8] sm:$0xff] }
0x1075   : > { %4306 = vmatpush.msra.mxu3 %v8015_v51  ;;  %4375 = vmatpush.msrb.mxu2 %v8063_v53  ;;  %v8111_v51 = vld [vmem:[%s11350_s7 + $0xb78] sm:$0xff]  ;;  %v8000_v53 = vld [vmem:[%s11350_s7 + $0x800] sm:$0xff] }
0x1076   : > { %4330 = vmatpush.msra.mxu0 %v8030_v54  ;;  %4353 = vmatpush.msrb.mxu1 %v8046_v55  ;;  %v8048_v54 = vld [vmem:[%s11350_s7 + $0x980] sm:$0xff]  ;;  %v8094_v55 = vld [vmem:[%s11350_s7 + $0xaf0] sm:$0xff] }
0x1077   : > { %4307 = vmatpush.msra.mxu3 %v8014_v56  ;;  %4376 = vmatpush.msrb.mxu2 %v8062_v57  ;;  %v8110_v56 = vld [vmem:[%s11350_s7 + $0xb70] sm:$0xff]  ;;  %v8079_v57 = vld [vmem:[%s11350_s7 + $0xa78] sm:$0xff] }
0x1078   : > { %4331 = vmatpush.msra.mxu0 %v8029_v58  ;;  %4354 = vmatpush.msrb.mxu1 %v8045_v59  ;;  %v8127_v58 = vld [vmem:[%s11350_s7 + $0xbf8] sm:$0xff]  ;;  %v8093_v59 = vld [vmem:[%s11350_s7 + $0xae8] sm:$0xff] }
0x1079   : > { %4308 = vmatpush.msra.mxu3 %v8013_v60  ;;  %4377 = vmatpush.msrb.mxu2 %v8061_v9  ;;  %v8109_v60 = vld [vmem:[%s11350_s7 + $0xb68] sm:$0xff]  ;;  %v8078_v9 = vld [vmem:[%s11350_s7 + $0xa70] sm:$0xff] }
0x107a   : > { %7985 = vmatmul.msk.f32.gmra.mxu3 %vm1125_vm6, %v9960_v18  ;;  %7987 = vmatmul.msk.f32.gmra.mxu0 %vm1125_vm6, %v9960_v18 }
0x107b   : > { %7989 = vmatmul.msk.f32.gmra.mxu1 %vm1125_vm6, %v9960_v18  ;;  %7991 = vmatmul.msk.f32.gmra.mxu2 %vm1125_vm6, %v9960_v18 }
0x107c   : > { %4332 = vmatpush.msra.mxu0 %v8028_v61  ;;  %4355 = vmatpush.msrb.mxu1 %v8044_v62  ;;  %v8126_v61 = vld [vmem:[%s11350_s7 + $0xbf0] sm:$0xff]  ;;  %v8092_v62 = vld [vmem:[%s11350_s7 + $0xae0] sm:$0xff] }
0x107d   : > { %4309 = vmatpush.msra.mxu3 %v8012_v63  ;;  %4378 = vmatpush.msrb.mxu2 %v8060_v0  ;;  %v8108_v63 = vld [vmem:[%s11350_s7 + $0xb60] sm:$0xff]  ;;  %v8077_v0 = vld [vmem:[%s11350_s7 + $0xa68] sm:$0xff] }
0x107e   : > { %4333 = vmatpush.msra.mxu0 %v8027_v1  ;;  %4356 = vmatpush.msrb.mxu1 %v8043_v14  ;;  %v8125_v1 = vld [vmem:[%s11350_s7 + $0xbe8] sm:$0xff]  ;;  %v8091_v14 = vld [vmem:[%s11350_s7 + $0xad8] sm:$0xff] }
0x107f   : > { %4310 = vmatpush.msra.mxu3 %v8011_v2  ;;  %4379 = vmatpush.msrb.mxu2 %v8059_v3  ;;  %v8107_v2 = vld [vmem:[%s11350_s7 + $0xb58] sm:$0xff]  ;;  %v8076_v3 = vld [vmem:[%s11350_s7 + $0xa60] sm:$0xff] }
0x1080   : > { %4334 = vmatpush.msra.mxu0 %v8026_v5  ;;  %4357 = vmatpush.msrb.mxu1 %v8042_v7  ;;  %v8124_v5 = vld [vmem:[%s11350_s7 + $0xbe0] sm:$0xff]  ;;  %v8090_v7 = vld [vmem:[%s11350_s7 + $0xad0] sm:$0xff] }
0x1081   : > { %4311 = vmatpush.msra.mxu3 %v8010_v10  ;;  %4380 = vmatpush.msrb.mxu2 %v8058_v12  ;;  %v8106_v10 = vld [vmem:[%s11350_s7 + $0xb50] sm:$0xff]  ;;  %v8075_v12 = vld [vmem:[%s11350_s7 + $0xa58] sm:$0xff] }
0x1082   : > { %7992 = vmatmul.msk.f32.vlgmr.msrb.gmra.mxu3 %vm1125_vm6, %v9937_v13  ;;  %7994 = vmatmul.msk.f32.vlgmr.msrb.gmra.mxu0 %vm1125_vm6, %v9937_v13 }
0x1083   : > { %7996 = vmatmul.msk.f32.vlgmr.msra.gmra.mxu1 %vm1125_vm6, %v9937_v13  ;;  %7998 = vmatmul.msk.f32.vlgmr.msra.gmra.mxu2 %vm1125_vm6, %v9937_v13 }
0x1084   : > { %4335 = vmatpush.msra.mxu0 %v8025_v42  ;;  %4358 = vmatpush.msrb.mxu1 %v8041_v15  ;;  %v8123_v42 = vld [vmem:[%s11350_s7 + $0xbd8] sm:$0xff]  ;;  %v8089_v15 = vld [vmem:[%s11350_s7 + $0xac8] sm:$0xff] }
0x1085   : > { %4312 = vmatpush.msra.mxu3 %v8009_v16  ;;  %4381 = vmatpush.msrb.mxu2 %v8057_v45  ;;  %v8105_v16 = vld [vmem:[%s11350_s7 + $0xb48] sm:$0xff]  ;;  %v8074_v45 = vld [vmem:[%s11350_s7 + $0xa50] sm:$0xff] }
0x1086   : > { %4336 = vmatpush.msra.mxu0 %v8024_v52  ;;  %4359 = vmatpush.msrb.mxu1 %v8040_v17  ;;  %v8122_v52 = vld [vmem:[%s11350_s7 + $0xbd0] sm:$0xff]  ;;  %v8088_v17 = vld [vmem:[%s11350_s7 + $0xac0] sm:$0xff] }
0x1087   : > { %4313 = vmatpush.msra.mxu3 %v8008_v19  ;;  %4382 = vmatpush.msrb.mxu2 %v8056_v20  ;;  %v8104_v19 = vld [vmem:[%s11350_s7 + $0xb40] sm:$0xff]  ;;  %v8073_v20 = vld [vmem:[%s11350_s7 + $0xa48] sm:$0xff] }
0x1088   : > { %4337 = vmatpush.msra.mxu0 %v8023_v21  ;;  %4360 = vmatpush.msrb.mxu1 %v8039_v4  ;;  %v8121_v21 = vld [vmem:[%s11350_s7 + $0xbc8] sm:$0xff]  ;;  %v8087_v4 = vld [vmem:[%s11350_s7 + $0xab8] sm:$0xff] }
0x1089   : > { %4314 = vmatpush.msra.mxu3 %v8007_v22  ;;  %4383 = vmatpush.msrb.mxu2 %v8055_v23  ;;  %v8103_v22 = vld [vmem:[%s11350_s7 + $0xb38] sm:$0xff]  ;;  %v8072_v23 = vld [vmem:[%s11350_s7 + $0xa40] sm:$0xff] }
0x108a   : > { %7993 = vmatmul.msk.f32.gmra.mxu3 %vm1125_vm6, %v9960_v18  ;;  %7995 = vmatmul.msk.f32.gmra.mxu0 %vm1125_vm6, %v9960_v18 }
0x108b   : > { %7997 = vmatmul.msk.f32.gmra.mxu1 %vm1125_vm6, %v9960_v18  ;;  %7999 = vmatmul.msk.f32.gmra.mxu2 %vm1125_vm6, %v9960_v18 }
0x108c   : > { %4338 = vmatpush.msra.mxu0 %v8022_v8  ;;  %4361 = vmatpush.msrb.mxu1 %v8038_v25  ;;  %v8120_v8 = vld [vmem:[%s11350_s7 + $0xbc0] sm:$0xff]  ;;  %v8086_v25 = vld [vmem:[%s11350_s7 + $0xab0] sm:$0xff] }
0x108d   : > { %4315 = vmatpush.msra.mxu3 %v8006_v26  ;;  %4384 = vmatpush.msrb.mxu2 %v8054_v27  ;;  %v8102_v26 = vld [vmem:[%s11350_s7 + $0xb30] sm:$0xff]  ;;  %v8071_v27 = vld [vmem:[%s11350_s7 + $0xa38] sm:$0xff] }
0x108e   : > { %4339 = vmatpush.msra.mxu0 %v8021_v28  ;;  %4362 = vmatpush.msrb.mxu1 %v8037_v29  ;;  %v8119_v28 = vld [vmem:[%s11350_s7 + $0xbb8] sm:$0xff]  ;;  %v8085_v29 = vld [vmem:[%s11350_s7 + $0xaa8] sm:$0xff] }
0x108f   : > { %4316 = vmatpush.msra.mxu3 %v8005_v30  ;;  %4385 = vmatpush.msrb.mxu2 %v8053_v11  ;;  %v8101_v30 = vld [vmem:[%s11350_s7 + $0xb28] sm:$0xff]  ;;  %v8070_v11 = vld [vmem:[%s11350_s7 + $0xa30] sm:$0xff] }
0x1090   : > { %4340 = vmatpush.msra.mxu0 %v8020_v31  ;;  %4363 = vmatpush.msrb.mxu1 %v8036_v36  ;;  %v8118_v31 = vld [vmem:[%s11350_s7 + $0xbb0] sm:$0xff]  ;;  %v8084_v36 = vld [vmem:[%s11350_s7 + $0xaa0] sm:$0xff] }
0x1091   : > { %4317 = vmatpush.msra.mxu3 %v8004_v32  ;;  %4386 = vmatpush.msrb.mxu2 %v8052_v33  ;;  %v8100_v32 = vld [vmem:[%s11350_s7 + $0xb20] sm:$0xff]  ;;  %v8083_v33 = vld [vmem:[%s11350_s7 + $0xa98] sm:$0xff] }
0x1092   : > { %4341 = vmatpush.msra.mxu0 %v8019_v24  ;;  %4364 = vmatpush.msrb.mxu1 %v8035_v34  ;;  %v8099_v24 = vld [vmem:[%s11350_s7 + $0xb18] sm:$0xff]  ;;  %v8069_v34 = vld [vmem:[%s11350_s7 + $0xa28] sm:$0xff] }
0x1093   : > { %4318 = vmatpush.msra.mxu3 %v8003_v35  ;;  %4387 = vmatpush.msrb.mxu2 %v8051_v37  ;;  %v8082_v35 = vld [vmem:[%s11350_s7 + $0xa90] sm:$0xff] }
0x1094   : > { %4342 = vmatpush.msra.mxu0 %v8018_v38  ;;  %4365 = vmatpush.msrb.mxu1 %v8034_v39  ;;  %v8098_v37 = vld [vmem:[%s11350_s7 + $0xb10] sm:$0xff]  ;;  %v8117_v38 = vld [vmem:[%s11350_s7 + $0xba8] sm:$0xff]  ;;  %v8068_v39 = vld [vmem:[%s11350_s7 + $0xa20] sm:$0xff] }
0x1095   : > { %4319 = vmatpush.msra.mxu3 %v8002_v40  ;;  %4388 = vmatpush.msrb.mxu2 %v8050_v41  ;;  %v8081_v40 = vld [vmem:[%s11350_s7 + $0xa88] sm:$0xff] }
0x1096   : > { %4343 = vmatpush.msra.mxu0 %v8017_v43  ;;  %4366 = vmatpush.msrb.mxu1 %v8033_v44  ;;  %v8097_v41 = vld [vmem:[%s11350_s7 + $0xb08] sm:$0xff]  ;;  %v8116_v43 = vld [vmem:[%s11350_s7 + $0xba0] sm:$0xff]  ;;  %v8067_v44 = vld [vmem:[%s11350_s7 + $0xa18] sm:$0xff] }
0x1097   : > { %4320 = vmatpush.msra.mxu3 %v8001_v46  ;;  %4389 = vmatpush.msrb.mxu2 %v8049_v47  ;;  %v8080_v46 = vld [vmem:[%s11350_s7 + $0xa80] sm:$0xff] }
0x1098   : > { %4344 = vmatpush.msra.mxu0 %v8016_v48  ;;  %4367 = vmatpush.msrb.mxu1 %v8032_v49  ;;  %v8096_v47 = vld [vmem:[%s11350_s7 + $0xb00] sm:$0xff]  ;;  %v8115_v48 = vld [vmem:[%s11350_s7 + $0xb98] sm:$0xff]  ;;  %v8066_v49 = vld [vmem:[%s11350_s7 + $0xa10] sm:$0xff] }
0x1099   : > { %4321 = vmatpush.msra.mxu3 %v8000_v53  ;;  %4390 = vmatpush.msrb.mxu2 %v8048_v54  ;;  %v8113_v53 = vld [vmem:[%s11350_s7 + $0xb88] sm:$0xff]  ;;  %v8064_v54 = vld [vmem:[%s11350_s7 + $0xa00] sm:$0xff] }
0x109a   : > { %4421 = vmatpush.msrb.mxu0 %v8095_v50  ;;  %4444 = vmatpush.msra.mxu1 %v8111_v51  ;;  %v8114_v50 = vld [vmem:[%s11350_s7 + $0xb90] sm:$0xff]  ;;  %v8065_v51 = vld [vmem:[%s11350_s7 + $0xa08] sm:$0xff] }
0x109b   : > { %4398 = vmatpush.msrb.mxu3 %v8079_v57  ;;  %4467 = vmatpush.msra.mxu2 %v8127_v58 }
0x109c   : > { %4422 = vmatpush.msrb.mxu0 %v8094_v55  ;;  %4445 = vmatpush.msra.mxu1 %v8110_v56  ;;  %v8112_v55 = vld [vmem:[%s11350_s7 + $0xb80] sm:$0xff]  ;;  %v10167_v56 = vld [vmem:[%s11351_s10 + $0x10] sm:$0xff] }
0x109d   : > { %4399 = vmatpush.msrb.mxu3 %v8078_v9  ;;  %4468 = vmatpush.msra.mxu2 %v8126_v61  ;;  %v3607_v57 = vperm.slane %v10167_v56, 1  ;;  %v3608_v58 = vperm.slane %v10167_v56, 2 }
0x109e   : > { %4423 = vmatpush.msrb.mxu0 %v8093_v59  ;;  %4446 = vmatpush.msra.mxu1 %v8109_v60 }
0x109f   : > { %4400 = vmatpush.msrb.mxu3 %v8077_v0  ;;  %4469 = vmatpush.msra.mxu2 %v8125_v1  ;;  %v3606_v0 = vperm.slane %v10167_v56, 0 }
0x10a0   : > { %4424 = vmatpush.msrb.mxu0 %v8092_v62  ;;  %4447 = vmatpush.msra.mxu1 %v8108_v63  ;;  %v8159_v63 = vld [vmem:[%s11350_s7 + $0xcf8] sm:$0xff] }
0x10a1   : > { %4401 = vmatpush.msrb.mxu3 %v8076_v3  ;;  %4470 = vmatpush.msra.mxu2 %v8124_v5  ;;  %v8158_v3 = vld [vmem:[%s11350_s7 + $0xcf0] sm:$0xff] }
0x10a2   : > { %4425 = vmatpush.msrb.mxu0 %v8091_v14  ;;  %4448 = vmatpush.msra.mxu1 %v8107_v2  ;;  %v8175_v14 = vld [vmem:[%s11350_s7 + $0xd78] sm:$0xff]  ;;  %v3609_v2 = vperm.slane %v10167_v56, 3 }
0x10a3   : > { %4402 = vmatpush.msrb.mxu3 %v8075_v12  ;;  %4471 = vmatpush.msra.mxu2 %v8123_v42  ;;  %v8157_v42 = vld [vmem:[%s11350_s7 + $0xce8] sm:$0xff] }
0x10a4   : > { %4426 = vmatpush.msrb.mxu0 %v8090_v7  ;;  %4449 = vmatpush.msra.mxu1 %v8106_v10  ;;  %v8174_v7 = vld [vmem:[%s11350_s7 + $0xd70] sm:$0xff] }
0x10a5   : > { %4403 = vmatpush.msrb.mxu3 %v8074_v45  ;;  %4472 = vmatpush.msra.mxu2 %v8122_v52  ;;  %v8173_v45 = vld [vmem:[%s11350_s7 + $0xd68] sm:$0xff] }
0x10a6   : > { %4427 = vmatpush.msrb.mxu0 %v8089_v15  ;;  %4450 = vmatpush.msra.mxu1 %v8105_v16 }
0x10a7   : > { %4404 = vmatpush.msrb.mxu3 %v8073_v20  ;;  %4473 = vmatpush.msra.mxu2 %v8121_v21  ;;  %v8143_v20 = vld [vmem:[%s11350_s7 + $0xc78] sm:$0xff] }
0x10a8   : > { %4428 = vmatpush.msrb.mxu0 %v8088_v17  ;;  %4451 = vmatpush.msra.mxu1 %v8104_v19 }
0x10a9   : > { %4405 = vmatpush.msrb.mxu3 %v8072_v23  ;;  %4474 = vmatpush.msra.mxu2 %v8120_v8  ;;  %v8172_v23 = vld [vmem:[%s11350_s7 + $0xd60] sm:$0xff] }
0x10aa   : > { %4429 = vmatpush.msrb.mxu0 %v8087_v4  ;;  %4452 = vmatpush.msra.mxu1 %v8103_v22  ;;  %v8156_v22 = vld [vmem:[%s11350_s7 + $0xce0] sm:$0xff] }
0x10ab   : > { %4406 = vmatpush.msrb.mxu3 %v8071_v27  ;;  %4475 = vmatpush.msra.mxu2 %v8119_v28  ;;  %v8142_v27 = vld [vmem:[%s11350_s7 + $0xc70] sm:$0xff]  ;;  %v8155_v28 = vld [vmem:[%s11350_s7 + $0xcd8] sm:$0xff] }
0x10ac   : > { %4430 = vmatpush.msrb.mxu0 %v8086_v25  ;;  %4453 = vmatpush.msra.mxu1 %v8102_v26  ;;  %v8191_v25 = vld [vmem:[%s11350_s7 + $0xdf8] sm:$0xff] }
0x10ad   : > { %4407 = vmatpush.msrb.mxu3 %v8070_v11  ;;  %4476 = vmatpush.msra.mxu2 %v8118_v31  ;;  %v8190_v11 = vld [vmem:[%s11350_s7 + $0xdf0] sm:$0xff] }
0x10ae   : > { %4431 = vmatpush.msrb.mxu0 %v8085_v29  ;;  %4454 = vmatpush.msra.mxu1 %v8101_v30  ;;  %v8171_v29 = vld [vmem:[%s11350_s7 + $0xd58] sm:$0xff]  ;;  %v3611_v30 = vperm.slane %v10167_v56, 5 }
0x10af   : > { %4408 = vmatpush.msrb.mxu3 %v8069_v34  ;;  %4477 = vmatpush.msra.mxu2 %v8117_v38  ;;  %v8154_v34 = vld [vmem:[%s11350_s7 + $0xcd0] sm:$0xff]  ;;  %v8189_v38 = vld [vmem:[%s11350_s7 + $0xde8] sm:$0xff] }
0x10b0   : > { %4432 = vmatpush.msrb.mxu0 %v8084_v36  ;;  %4455 = vmatpush.msra.mxu1 %v8100_v32  ;;  %v8141_v36 = vld [vmem:[%s11350_s7 + $0xc68] sm:$0xff]  ;;  %v3612_v32 = vperm.slane %v10167_v56, 6 }
0x10b1   : > { %4409 = vmatpush.msrb.mxu3 %v8068_v39  ;;  %4478 = vmatpush.msra.mxu2 %v8116_v43 }
0x10b2   : > { %4433 = vmatpush.msrb.mxu0 %v8083_v33  ;;  %4456 = vmatpush.msra.mxu1 %v8099_v24 }
0x10b3   : > { %4410 = vmatpush.msrb.mxu3 %v8067_v44  ;;  %4479 = vmatpush.msra.mxu2 %v8115_v48 }
0x10b4   : > { %4434 = vmatpush.msrb.mxu0 %v8082_v35  ;;  %4457 = vmatpush.msra.mxu1 %v8098_v37  ;;  %v8170_v35 = vld [vmem:[%s11350_s7 + $0xd50] sm:$0xff] }
0x10b5   : > { %4411 = vmatpush.msrb.mxu3 %v8066_v49  ;;  %4480 = vmatpush.msra.mxu2 %v8114_v50  ;;  %v8188_v50 = vld [vmem:[%s11350_s7 + $0xde0] sm:$0xff] }
0x10b6   : > { %4435 = vmatpush.msrb.mxu0 %v8081_v40  ;;  %4458 = vmatpush.msra.mxu1 %v8097_v41  ;;  %v8140_v40 = vld [vmem:[%s11350_s7 + $0xc60] sm:$0xff] }
0x10b7   : > { %4412 = vmatpush.msrb.mxu3 %v8065_v51  ;;  %4481 = vmatpush.msra.mxu2 %v8113_v53  ;;  %v8139_v51 = vld [vmem:[%s11350_s7 + $0xc58] sm:$0xff]  ;;  %v3610_v53 = vperm.slane %v10167_v56, 4 }
0x10b8   : > { %4436 = vmatpush.msrb.mxu0 %v8080_v46  ;;  %4459 = vmatpush.msra.mxu1 %v8096_v47  ;;  %v8153_v46 = vld [vmem:[%s11350_s7 + $0xcc8] sm:$0xff] }
0x10b9   : > { %4413 = vmatpush.msrb.mxu3 %v8064_v54  ;;  %4482 = vmatpush.msra.mxu2 %v8112_v55  ;;  %v8169_v47 = vld [vmem:[%s11350_s7 + $0xd48] sm:$0xff]  ;;  %v8152_v55 = vld [vmem:[%s11350_s7 + $0xcc0] sm:$0xff] }
0x10cf   : > { %v3684_v59 = vpop.f32.mrf.mxu0 }
0x10d0   : > { %v3685_v60 = vadd.f32 %v3684_v59, %v3607_v57  ;;  %v3707_v9 = vpop.f32.mrf.mxu1 }
0x10d1   : > { %v3708_v61 = vadd.f32 %v3707_v9, %v3608_v58  ;;  %v8138_v9 = vld [vmem:[%s11350_s7 + $0xc50] sm:$0xff] }
0x10d2   : > { %v4013_v62 = vmax.f32 %v3685_v60, 0.0  ;;  %v8187_v60 = vld [vmem:[%s11350_s7 + $0xdd8] sm:$0xff] }
0x10d3   : > { %v4014_v1 = vmax.f32 %v3708_v61, 0.0 }
0x10d4   : > { %4345 = vmatmul.f32.vlgmr.msra.gmra.mxu0 %v4013_v62  ;;  %v8151_v62 = vld [vmem:[%s11350_s7 + $0xcb8] sm:$0xff] }
0x10d5   : > { %4368 = vmatmul.f32.vlgmr.msrb.gmra.mxu1 %v4014_v1  ;;  %4513 = vmatpush.msra.mxu0 %v8159_v63  ;;  %v3661_v5 = vpop.f32.mrf.mxu3  ;;  %v8167_v63 = vld [vmem:[%s11350_s7 + $0xd38] sm:$0xff] }
0x10d6   : > { %4536 = vmatpush.msrb.mxu1 %v8175_v14  ;;  %v3662_v10 = vadd.f32 %v3661_v5, %v3606_v0  ;;  %v3730_v12 = vpop.f32.mrf.mxu2  ;;  %v8186_v14 = vld [vmem:[%s11350_s7 + $0xdd0] sm:$0xff] }
0x10d7   : > { %v3731_v15 = vadd.f32 %v3730_v12, %v3609_v2  ;;  %4514 = vmatpush.msra.mxu0 %v8158_v3  ;;  %v3687_v16 = vpop.f32.mrf.mxu0  ;;  %v8137_v3 = vld [vmem:[%s11350_s7 + $0xc48] sm:$0xff] }
0x10d8   : > { %v4012_v52 = vmax.f32 %v3662_v10, 0.0  ;;  %4537 = vmatpush.msrb.mxu1 %v8174_v7  ;;  %v3688_v17 = vadd.f32 %v3687_v16, %v3607_v57  ;;  %v3710_v19 = vpop.f32.mrf.mxu1  ;;  %v8168_v57 = vld [vmem:[%s11350_s7 + $0xd40] sm:$0xff]  ;;  %v8150_v7 = vld [vmem:[%s11350_s7 + $0xcb0] sm:$0xff] }
0x10d9   : > { %v4015_v21 = vmax.f32 %v3731_v15, 0.0  ;;  %v3711_v4 = vadd.f32 %v3710_v19, %v3608_v58  ;;  %4515 = vmatpush.msra.mxu0 %v8157_v42  ;;  %v3613_v58 = vperm.slane %v10167_v56, 7  ;;  %v8166_v10 = vld [vmem:[%s11350_s7 + $0xd30] sm:$0xff]  ;;  %v8185_v42 = vld [vmem:[%s11350_s7 + $0xdc8] sm:$0xff]  ;;  %v8136_v16 = vld [vmem:[%s11350_s7 + $0xc40] sm:$0xff] }
0x10da   : > { %v4029_v8 = vmax.f32 %v3688_v17, 0.0  ;;  %4538 = vmatpush.msrb.mxu1 %v8173_v45  ;;  %4322 = vmatmul.f32.vlgmr.msra.gmra.mxu3 %v4012_v52  ;;  %v8149_v17 = vld [vmem:[%s11350_s7 + $0xca8] sm:$0xff]  ;;  %v8132_v56 = vld [vmem:[%s11350_s7 + $0xc20] sm:$0xff] }
0x10db   : > { %v4030_v26 = vmax.f32 %v3711_v4, 0.0  ;;  %4391 = vmatmul.f32.vlgmr.msrb.gmra.mxu2 %v4015_v21  ;;  %4490 = vmatpush.msra.mxu3 %v8143_v20  ;;  %v8165_v19 = vld [vmem:[%s11350_s7 + $0xd28] sm:$0xff]  ;;  %v8184_v21 = vld [vmem:[%s11350_s7 + $0xdc0] sm:$0xff]  ;;  %v8135_v4 = vld [vmem:[%s11350_s7 + $0xc38] sm:$0xff] }
0x10dc   : > { %4516 = vmatpush.msra.mxu0 %v8156_v22  ;;  %4539 = vmatpush.msrb.mxu1 %v8172_v23  ;;  %v8148_v23 = vld [vmem:[%s11350_s7 + $0xca0] sm:$0xff] }
0x10dd   : > { %4559 = vmatpush.msrb.mxu2 %v8191_v25  ;;  %4348 = vmatmul.f32.gmra.mxu0 %v4029_v8  ;;  %v3664_v31 = vpop.f32.mrf.mxu3  ;;  %v8164_v8 = vld [vmem:[%s11350_s7 + $0xd20] sm:$0xff] }
0x10de   : > { %4371 = vmatmul.f32.gmra.mxu1 %v4030_v26  ;;  %4491 = vmatpush.msra.mxu3 %v8142_v27  ;;  %v3665_v33 = vadd.f32 %v3664_v31, %v3606_v0  ;;  %v3733_v24 = vpop.f32.mrf.mxu2  ;;  %v8183_v27 = vld [vmem:[%s11350_s7 + $0xdb8] sm:$0xff] }
0x10df   : > { %4517 = vmatpush.msra.mxu0 %v8155_v28  ;;  %4540 = vmatpush.msrb.mxu1 %v8171_v29  ;;  %v3734_v37 = vadd.f32 %v3733_v24, %v3609_v2  ;;  %v3776_v39 = vpop.f32.mrf.mxu0  ;;  %v10232_v29 = vld [vmem:[%s11351_s10 + $0x18] sm:$0xff]  ;;  %v8133_v24 = vld [vmem:[%s11350_s7 + $0xc28] sm:$0xff] }
0x10e0   : > { %4560 = vmatpush.msrb.mxu2 %v8190_v11  ;;  %v4028_v41 = vmax.f32 %v3665_v33, 0.0  ;;  %4492 = vmatpush.msra.mxu3 %v8141_v36  ;;  %v3777_v43 = vadd.f32 %v3776_v39, %v3611_v30  ;;  %v3799_v44 = vpop.f32.mrf.mxu1  ;;  %v8147_v11 = vld [vmem:[%s11350_s7 + $0xc98] sm:$0xff] }
0x10e1   : > { %v4031_v48 = vmax.f32 %v3734_v37, 0.0  ;;  %4518 = vmatpush.msra.mxu0 %v8154_v34  ;;  %4541 = vmatpush.msrb.mxu1 %v8170_v35  ;;  %v3800_v49 = vadd.f32 %v3799_v44, %v3612_v32  ;;  %v8163_v31 = vld [vmem:[%s11350_s7 + $0xd18] sm:$0xff]  ;;  %v3615_v34 = vperm.slane %v10232_v29, 1  ;;  %v3616_v35 = vperm.slane %v10232_v29, 2  ;;  %v8146_v37 = vld [vmem:[%s11350_s7 + $0xc90] sm:$0xff]  ;;  %v8145_v44 = vld [vmem:[%s11350_s7 + $0xc88] sm:$0xff] }
0x10e2   : > { %4561 = vmatpush.msrb.mxu2 %v8189_v38  ;;  %4493 = vmatpush.msra.mxu3 %v8140_v40  ;;  %v4017_v54 = vmax.f32 %v3777_v43, 0.0  ;;  %v8162_v38 = vld [vmem:[%s11350_s7 + $0xd10] sm:$0xff] }
0x10e3   : > { %4519 = vmatpush.msra.mxu0 %v8153_v46  ;;  %4542 = vmatpush.msrb.mxu1 %v8169_v47  ;;  %v4018_v59 = vmax.f32 %v3800_v49, 0.0  ;;  %v8161_v46 = vld [vmem:[%s11350_s7 + $0xd08] sm:$0xff] }
0x10e4   : > { %4562 = vmatpush.msrb.mxu2 %v8188_v50  ;;  %4325 = vmatmul.f32.gmra.mxu3 %v4028_v41  ;;  %v8181_v41 = vld [vmem:[%s11350_s7 + $0xda8] sm:$0xff]  ;;  %v8180_v50 = vld [vmem:[%s11350_s7 + $0xda0] sm:$0xff] }
0x10e5   : > { %4394 = vmatmul.f32.gmra.mxu2 %v4031_v48  ;;  %4494 = vmatpush.msra.mxu3 %v8139_v51  ;;  %v3753_v61 = vpop.f32.mrf.mxu3  ;;  %v8131_v51 = vld [vmem:[%s11350_s7 + $0xc18] sm:$0xff] }
0x10e6   : > { %4520 = vmatpush.msra.mxu0 %v8152_v55  ;;  %4543 = vmatpush.msrb.mxu1 %v8168_v57  ;;  %v3754_v0 = vadd.f32 %v3753_v61, %v3610_v53  ;;  %v3822_v1 = vpop.f32.mrf.mxu2  ;;  %v8179_v55 = vld [vmem:[%s11350_s7 + $0xd98] sm:$0xff]  ;;  %v8130_v61 = vld [vmem:[%s11350_s7 + $0xc10] sm:$0xff] }
0x10e7   : > { %4563 = vmatpush.msrb.mxu2 %v8187_v60  ;;  %4437 = vmatmul.f32.vlgmr.msrb.gmra.mxu0 %v4017_v54  ;;  %v3823_v2 = vadd.f32 %v3822_v1, %v3613_v58  ;;  %v3779_v5 = vpop.f32.mrf.mxu0  ;;  %v8160_v54 = vld [vmem:[%s11350_s7 + $0xd00] sm:$0xff]  ;;  %v8223_v57 = vld [vmem:[%s11350_s7 + $0xef8] sm:$0xff]  ;;  %v8178_v1 = vld [vmem:[%s11350_s7 + $0xd90] sm:$0xff] }
0x10e8   : > { %4460 = vmatmul.f32.vlgmr.msra.gmra.mxu1 %v4018_v59  ;;  %4495 = vmatpush.msra.mxu3 %v8138_v9  ;;  %v3802_v12 = vpop.f32.mrf.mxu1  ;;  %v3780_v15 = vadd.f32 %v3779_v5, %v3611_v30  ;;  %v4016_v45 = vmax.f32 %v3754_v0, 0.0  ;;  %v8134_v30 = vld [vmem:[%s11350_s7 + $0xc30] sm:$0xff]  ;;  %v8239_v9 = vld [vmem:[%s11350_s7 + $0xf78] sm:$0xff]  ;;  %v8129_v5 = vld [vmem:[%s11350_s7 + $0xc08] sm:$0xff] }
0x10e9   : > { %4521 = vmatpush.msra.mxu0 %v8151_v62  ;;  %4544 = vmatpush.msrb.mxu1 %v8167_v63  ;;  %v3803_v52 = vadd.f32 %v3802_v12, %v3612_v32  ;;  %v4019_v20 = vmax.f32 %v3823_v2, 0.0  ;;  %v8182_v32 = vld [vmem:[%s11350_s7 + $0xdb0] sm:$0xff]  ;;  %v3617_v63 = vperm.slane %v10232_v29, 3  ;;  %v8177_v12 = vld [vmem:[%s11350_s7 + $0xd88] sm:$0xff] }
0x10ea   : > { %4564 = vmatpush.msrb.mxu2 %v8186_v14  ;;  %4496 = vmatpush.msra.mxu3 %v8137_v3  ;;  %v4033_v22 = vmax.f32 %v3780_v15, 0.0  ;;  %v8222_v14 = vld [vmem:[%s11350_s7 + $0xef0] sm:$0xff]  ;;  %v8221_v15 = vld [vmem:[%s11350_s7 + $0xee8] sm:$0xff] }
0x10eb   : > { %4522 = vmatpush.msra.mxu0 %v8150_v7  ;;  %4545 = vmatpush.msrb.mxu1 %v8166_v10  ;;  %v4034_v26 = vmax.f32 %v3803_v52, 0.0  ;;  %v8238_v3 = vld [vmem:[%s11350_s7 + $0xf70] sm:$0xff] }
0x10ec   : > { %4565 = vmatpush.msrb.mxu2 %v8185_v42  ;;  %4497 = vmatpush.msra.mxu3 %v8136_v16  ;;  %v8237_v16 = vld [vmem:[%s11350_s7 + $0xf68] sm:$0xff] }
0x10ed   : > { %4523 = vmatpush.msra.mxu0 %v8149_v17  ;;  %4546 = vmatpush.msrb.mxu1 %v8165_v19  ;;  %v3756_v25 = vpop.f32.mrf.mxu3  ;;  %v8176_v17 = vld [vmem:[%s11350_s7 + $0xd80] sm:$0xff]  ;;  %v8207_v19 = vld [vmem:[%s11350_s7 + $0xe78] sm:$0xff] }
0x10ee   : > { %4566 = vmatpush.msrb.mxu2 %v8184_v21  ;;  %4414 = vmatmul.f32.vlgmr.msrb.gmra.mxu3 %v4016_v45  ;;  %v3825_v28 = vpop.f32.mrf.mxu2  ;;  %v3757_v36 = vadd.f32 %v3756_v25, %v3610_v53  ;;  %v8144_v53 = vld [vmem:[%s11350_s7 + $0xc80] sm:$0xff]  ;;  %v8206_v25 = vld [vmem:[%s11350_s7 + $0xe70] sm:$0xff] }
0x10ef   : > { %4483 = vmatmul.f32.vlgmr.msra.gmra.mxu2 %v4019_v20  ;;  %4498 = vmatpush.msra.mxu3 %v8135_v4  ;;  %v3826_v33 = vadd.f32 %v3825_v28, %v3613_v58  ;;  %v3868_v39 = vpop.f32.mrf.mxu0  ;;  %v3614_v58 = vperm.slane %v10232_v29, 0  ;;  %v8128_v45 = vld [vmem:[%s11350_s7 + $0xc00] sm:$0xff]  ;;  %v8235_v28 = vld [vmem:[%s11350_s7 + $0xf58] sm:$0xff] }
0x10f0   : > { %4524 = vmatpush.msra.mxu0 %v8148_v23  ;;  %4547 = vmatpush.msrb.mxu1 %v8164_v8  ;;  %v3891_v40 = vpop.f32.mrf.mxu1  ;;  %v4032_v43 = vmax.f32 %v3757_v36, 0.0  ;;  %v3869_v48 = vadd.f32 %v3868_v39, %v3615_v34  ;;  %v8220_v4 = vld [vmem:[%s11350_s7 + $0xee0] sm:$0xff]  ;;  %v8255_v8 = vld [vmem:[%s11350_s7 + $0xff8] sm:$0xff]  ;;  %v8217_v39 = vld [vmem:[%s11350_s7 + $0xec8] sm:$0xff] }
0x10f1   : > { %4567 = vmatpush.msrb.mxu2 %v8183_v27  ;;  %4440 = vmatmul.f32.gmra.mxu0 %v4033_v22  ;;  %v4035_v47 = vmax.f32 %v3826_v33, 0.0  ;;  %v3892_v49 = vadd.f32 %v3891_v40, %v3616_v35  ;;  %v8236_v22 = vld [vmem:[%s11350_s7 + $0xf60] sm:$0xff]  ;;  %v8219_v27 = vld [vmem:[%s11350_s7 + $0xed8] sm:$0xff]  ;;  %v8233_v40 = vld [vmem:[%s11350_s7 + $0xf48] sm:$0xff] }
0x10f2   : > { %4463 = vmatmul.f32.gmra.mxu1 %v4034_v26  ;;  %4499 = vmatpush.msra.mxu3 %v8134_v30  ;;  %v4021_v59 = vmax.f32 %v3869_v48, 0.0  ;;  %v8251_v48 = vld [vmem:[%s11350_s7 + $0xfd8] sm:$0xff] }
0x10f3   : > { %4525 = vmatpush.msra.mxu0 %v8147_v11  ;;  %4548 = vmatpush.msrb.mxu1 %v8163_v31  ;;  %v4022_v60 = vmax.f32 %v3892_v49, 0.0  ;;  %v8254_v31 = vld [vmem:[%s11350_s7 + $0xff0] sm:$0xff] }
0x10f4   : > { %4568 = vmatpush.msrb.mxu2 %v8182_v32  ;;  %4500 = vmatpush.msra.mxu3 %v8133_v24  ;;  %v8205_v32 = vld [vmem:[%s11350_s7 + $0xe68] sm:$0xff]  ;;  %v8218_v24 = vld [vmem:[%s11350_s7 + $0xed0] sm:$0xff] }
0x10f5   : > { %4526 = vmatpush.msra.mxu0 %v8146_v37  ;;  %4549 = vmatpush.msrb.mxu1 %v8162_v38  ;;  %v3845_v62 = vpop.f32.mrf.mxu3  ;;  %v8253_v37 = vld [vmem:[%s11350_s7 + $0xfe8] sm:$0xff]  ;;  %v8204_v38 = vld [vmem:[%s11350_s7 + $0xe60] sm:$0xff]  ;;  %v8202_v49 = vld [vmem:[%s11350_s7 + $0xe50] sm:$0xff] }
0x10f6   : > { %4569 = vmatpush.msrb.mxu2 %v8181_v41  ;;  %4501 = vmatpush.msra.mxu3 %v8132_v56  ;;  %v3914_v0 = vpop.f32.mrf.mxu2  ;;  %v3846_v2 = vadd.f32 %v3845_v62, %v3614_v58  ;;  %v8252_v41 = vld [vmem:[%s11350_s7 + $0xfe0] sm:$0xff]  ;;  %v8203_v56 = vld [vmem:[%s11350_s7 + $0xe58] sm:$0xff] }
0x10f7   : > { %4527 = vmatpush.msra.mxu0 %v8145_v44  ;;  %4550 = vmatpush.msrb.mxu1 %v8161_v46  ;;  %v3871_v7 = vpop.f32.mrf.mxu0  ;;  %v3915_v10 = vadd.f32 %v3914_v0, %v3617_v63  ;;  %v8216_v44 = vld [vmem:[%s11350_s7 + $0xec0] sm:$0xff]  ;;  %v8199_v62 = vld [vmem:[%s11350_s7 + $0xe38] sm:$0xff] }
0x10f8   : > { %4570 = vmatpush.msrb.mxu2 %v8180_v50  ;;  %4417 = vmatmul.f32.gmra.mxu3 %v4032_v43  ;;  %v3894_v42 = vpop.f32.mrf.mxu1  ;;  %v3872_v52 = vadd.f32 %v3871_v7, %v3615_v34  ;;  %v4020_v20 = vmax.f32 %v3846_v2, 0.0  ;;  %v8234_v34 = vld [vmem:[%s11350_s7 + $0xf50] sm:$0xff]  ;;  %v8232_v46 = vld [vmem:[%s11350_s7 + $0xf40] sm:$0xff]  ;;  %v8215_v50 = vld [vmem:[%s11350_s7 + $0xeb8] sm:$0xff] }
0x10f9   : > { %4486 = vmatmul.f32.gmra.mxu2 %v4035_v47  ;;  %4502 = vmatpush.msra.mxu3 %v8131_v51  ;;  %v3895_v21 = vadd.f32 %v3894_v42, %v3616_v35  ;;  %v4023_v23 = vmax.f32 %v3915_v10, 0.0  ;;  %v8231_v51 = vld [vmem:[%s11350_s7 + $0xf38] sm:$0xff]  ;;  %v8228_v0 = vld [vmem:[%s11350_s7 + $0xf20] sm:$0xff]  ;;  %v8198_v2 = vld [vmem:[%s11350_s7 + $0xe30] sm:$0xff] }
0x10fa   : > { %4528 = vmatpush.msra.mxu0 %v8144_v53  ;;  %4551 = vmatpush.msrb.mxu1 %v8160_v54  ;;  %v4037_v26 = vmax.f32 %v3872_v52, 0.0  ;;  %v8250_v53 = vld [vmem:[%s11350_s7 + $0xfd0] sm:$0xff]  ;;  %v8201_v54 = vld [vmem:[%s11350_s7 + $0xe48] sm:$0xff]  ;;  %v8211_v7 = vld [vmem:[%s11350_s7 + $0xe98] sm:$0xff] }
0x10fb   : > { %4571 = vmatpush.msrb.mxu2 %v8179_v55  ;;  %4503 = vmatpush.msra.mxu3 %v8130_v61  ;;  %v4038_v11 = vmax.f32 %v3895_v21, 0.0  ;;  %v8214_v55 = vld [vmem:[%s11350_s7 + $0xeb0] sm:$0xff]  ;;  %v8248_v61 = vld [vmem:[%s11350_s7 + $0xfc0] sm:$0xff]  ;;  %v8227_v10 = vld [vmem:[%s11350_s7 + $0xf18] sm:$0xff] }
0x10fc   : > { %4605 = vmatpush.msrb.mxu0 %v8223_v57  ;;  %4628 = vmatpush.msra.mxu1 %v8239_v9  ;;  %v8230_v57 = vld [vmem:[%s11350_s7 + $0xf30] sm:$0xff]  ;;  %v8229_v9 = vld [vmem:[%s11350_s7 + $0xf28] sm:$0xff] }
0x10fd   : > { %4529 = vmatmul.f32.vlgmr.msra.gmra.mxu0 %v4021_v59  ;;  %4552 = vmatmul.f32.vlgmr.msrb.gmra.mxu1 %v4022_v60  ;;  %v3848_v30 = vpop.f32.mrf.mxu3  ;;  %v8200_v59 = vld [vmem:[%s11350_s7 + $0xe40] sm:$0xff]  ;;  %v8213_v60 = vld [vmem:[%s11350_s7 + $0xea8] sm:$0xff]  ;;  %v8246_v42 = vld [vmem:[%s11350_s7 + $0xfb0] sm:$0xff] }
0x10fe   : > { %4572 = vmatpush.msrb.mxu2 %v8178_v1  ;;  %4606 = vmatpush.msrb.mxu0 %v8222_v14  ;;  %v3917_v36 = vpop.f32.mrf.mxu2  ;;  %v3849_v33 = vadd.f32 %v3848_v30, %v3614_v58  ;;  %v8249_v58 = vld [vmem:[%s11350_s7 + $0xfc8] sm:$0xff]  ;;  %v8247_v14 = vld [vmem:[%s11350_s7 + $0xfb8] sm:$0xff]  ;;  %v3621_v30 = vperm.slane %v10232_v29, 7 }
0x10ff   : > { %4629 = vmatpush.msra.mxu1 %v8238_v3  ;;  %4504 = vmatpush.msra.mxu3 %v8129_v5  ;;  %v3918_v35 = vadd.f32 %v3917_v36, %v3617_v63  ;;  %v8212_v63 = vld [vmem:[%s11350_s7 + $0xea0] sm:$0xff]  ;;  %v3960_v1 = vpop.f32.mrf.mxu0  ;;  %v3619_v3 = vperm.slane %v10232_v29, 5  ;;  %v8245_v52 = vld [vmem:[%s11350_s7 + $0xfa8] sm:$0xff]  ;;  %v8194_v36 = vld [vmem:[%s11350_s7 + $0xe10] sm:$0xff] }
0x1100   : > { %4573 = vmatpush.msrb.mxu2 %v8177_v12  ;;  %4607 = vmatpush.msrb.mxu0 %v8221_v15  ;;  %v4036_v43 = vmax.f32 %v3849_v33, 0.0  ;;  %v3983_v5 = vpop.f32.mrf.mxu1  ;;  %v3620_v12 = vperm.slane %v10232_v29, 6  ;;  %v8197_v15 = vld [vmem:[%s11350_s7 + $0xe28] sm:$0xff] }
0x1101   : > { %4630 = vmatpush.msra.mxu1 %v8237_v16  ;;  %4505 = vmatpush.msra.mxu3 %v8128_v45  ;;  %v4039_v47 = vmax.f32 %v3918_v35, 0.0  ;;  %v8210_v16 = vld [vmem:[%s11350_s7 + $0xe90] sm:$0xff]  ;;  %v8225_v21 = vld [vmem:[%s11350_s7 + $0xf08] sm:$0xff] }
0x1102   : > { %4574 = vmatpush.msrb.mxu2 %v8176_v17  ;;  %4608 = vmatpush.msrb.mxu0 %v8220_v4  ;;  %v8226_v45 = vld [vmem:[%s11350_s7 + $0xf10] sm:$0xff]  ;;  %v8196_v17 = vld [vmem:[%s11350_s7 + $0xe20] sm:$0xff]  ;;  %v3984_v4 = vadd.f32 %v3983_v5, %v3620_v12 }
0x1103   : > { %4582 = vmatpush.msrb.mxu3 %v8207_v19  ;;  %4631 = vmatpush.msra.mxu1 %v8236_v22  ;;  %v3961_v19 = vadd.f32 %v3960_v1, %v3619_v3 }
0x1104   : > { %4651 = vmatpush.msra.mxu2 %v8255_v8  ;;  %4506 = vmatmul.f32.vlgmr.msra.gmra.mxu3 %v4020_v20  ;;  %v8209_v20 = vld [vmem:[%s11350_s7 + $0xe88] sm:$0xff]  ;;  %v8195_v8 = vld [vmem:[%s11350_s7 + $0xe18] sm:$0xff] }
0x1105   : > { %4575 = vmatmul.f32.vlgmr.msrb.gmra.mxu2 %v4023_v23  ;;  %4583 = vmatpush.msrb.mxu3 %v8206_v25  ;;  %v3937_v22 = vpop.f32.mrf.mxu3  ;;  %v8244_v23 = vld [vmem:[%s11350_s7 + $0xfa0] sm:$0xff]  ;;  %v3618_v25 = vperm.slane %v10232_v29, 4  ;;  %v8193_v29 = vld [vmem:[%s11350_s7 + $0xe08] sm:$0xff] }
0x1106   : > { %4609 = vmatpush.msrb.mxu0 %v8219_v27  ;;  %4632 = vmatpush.msra.mxu1 %v8235_v28  ;;  %v8208_v27 = vld [vmem:[%s11350_s7 + $0xe80] sm:$0xff] }
0x1107   : > { %4652 = vmatpush.msra.mxu2 %v8254_v31  ;;  %4532 = vmatmul.f32.gmra.mxu0 %v4037_v26  ;;  %v4006_v26 = vpop.f32.mrf.mxu2  ;;  %v8224_v28 = vld [vmem:[%s11350_s7 + $0xf00] sm:$0xff]  ;;  %v4025_v31 = vmax.f32 %v3961_v19, 0.0  ;;  %v3963_v33 = vpop.f32.mrf.mxu0 }
0x1108   : > { %4555 = vmatmul.f32.gmra.mxu1 %v4038_v11  ;;  %4584 = vmatpush.msrb.mxu3 %v8205_v32  ;;  %v8243_v11 = vld [vmem:[%s11350_s7 + $0xf98] sm:$0xff]  ;;  %v4026_v32 = vmax.f32 %v3984_v4, 0.0  ;;  %v3986_v35 = vpop.f32.mrf.mxu1 }
0x1109   : > { %4610 = vmatpush.msrb.mxu0 %v8218_v24  ;;  %4633 = vmatpush.msra.mxu1 %v8234_v34  ;;  %v8242_v24 = vld [vmem:[%s11350_s7 + $0xf90] sm:$0xff]  ;;  %v3938_v34 = vadd.f32 %v3937_v22, %v3618_v25 }
0x110a   : > { %4653 = vmatpush.msra.mxu2 %v8253_v37  ;;  %4585 = vmatpush.msrb.mxu3 %v8204_v38  ;;  %v4007_v37 = vadd.f32 %v4006_v26, %v3621_v30  ;;  %v8241_v38 = vld [vmem:[%s11350_s7 + $0xf88] sm:$0xff] }
0x110b   : > { %4611 = vmatpush.msrb.mxu0 %v8217_v39  ;;  %4634 = vmatpush.msra.mxu1 %v8233_v40  ;;  %v3964_v39 = vadd.f32 %v3963_v33, %v3619_v3  ;;  %v8192_v40 = vld [vmem:[%s11350_s7 + $0xe00] sm:$0xff] }
0x110c   : > { %4654 = vmatpush.msra.mxu2 %v8252_v41  ;;  %4586 = vmatpush.msrb.mxu3 %v8203_v56  ;;  %v3987_v41 = vadd.f32 %v3986_v35, %v3620_v12  ;;  %v8240_v56 = vld [vmem:[%s11350_s7 + $0xf80] sm:$0xff] }
0x110d   : > { %4612 = vmatpush.msrb.mxu0 %v8216_v44  ;;  %4635 = vmatpush.msra.mxu1 %v8232_v46  ;;  %v4027_v44 = vmax.f32 %v4007_v37, 0.0  ;;  %v3940_v46 = vpop.f32.mrf.mxu3 }
0x110e   : > { %4655 = vmatpush.msra.mxu2 %v8251_v48  ;;  %4509 = vmatmul.f32.gmra.mxu3 %v4036_v43  ;;  %v4024_v43 = vmax.f32 %v3938_v34, 0.0 }
0x110f   : > { %4578 = vmatmul.f32.gmra.mxu2 %v4039_v47  ;;  %4587 = vmatpush.msrb.mxu3 %v8202_v49  ;;  %v4041_v47 = vmax.f32 %v3964_v39, 0.0  ;;  %v4009_v48 = vpop.f32.mrf.mxu2  ;;  %v4042_v49 = vmax.f32 %v3987_v41, 0.0 }
0x1110   : > { %4613 = vmatpush.msrb.mxu0 %v8215_v50  ;;  %4636 = vmatpush.msra.mxu1 %v8231_v51  ;;  %v3941_v50 = vadd.f32 %v3940_v46, %v3618_v25  ;;  %v4010_v51 = vadd.f32 %v4009_v48, %v3621_v30 }
0x1111   : > { %4656 = vmatpush.msra.mxu2 %v8250_v53  ;;  %4588 = vmatpush.msrb.mxu3 %v8201_v54 }
0x1112   : > { %4614 = vmatpush.msrb.mxu0 %v8214_v55  ;;  %4637 = vmatpush.msra.mxu1 %v8230_v57  ;;  %v4040_v53 = vmax.f32 %v3941_v50, 0.0  ;;  %v4043_v54 = vmax.f32 %v4010_v51, 0.0 }
0x1113   : > { %4657 = vmatpush.msra.mxu2 %v8249_v58  ;;  %4589 = vmatpush.msrb.mxu3 %v8200_v59 }
0x1114   : > { %4615 = vmatpush.msrb.mxu0 %v8213_v60  ;;  %4638 = vmatpush.msra.mxu1 %v8229_v9 }
0x1115   : > { %4658 = vmatpush.msra.mxu2 %v8248_v61  ;;  %4590 = vmatpush.msrb.mxu3 %v8199_v62  ;;  %v8851_v62 = vld [vmem:[%s11352_s11 + $0x1] ss:$0 sm:$0xff] }
0x1116   : > { %4616 = vmatpush.msrb.mxu0 %v8212_v63  ;;  %4639 = vmatpush.msra.mxu1 %v8228_v0 }
0x1117   : > { %4659 = vmatpush.msra.mxu2 %v8247_v14  ;;  %4591 = vmatpush.msrb.mxu3 %v8198_v2 }
0x1118   : > { %4617 = vmatpush.msrb.mxu0 %v8211_v7  ;;  %4640 = vmatpush.msra.mxu1 %v8227_v10 }
0x1119   : > { %4660 = vmatpush.msra.mxu2 %v8246_v42  ;;  %4592 = vmatpush.msrb.mxu3 %v8197_v15 }
0x111a   : > { %4618 = vmatpush.msrb.mxu0 %v8210_v16  ;;  %4641 = vmatpush.msra.mxu1 %v8226_v45 }
0x111b   : > { %4661 = vmatpush.msra.mxu2 %v8245_v52  ;;  %4593 = vmatpush.msrb.mxu3 %v8196_v17 }
0x111c   : > { %4619 = vmatpush.msrb.mxu0 %v8209_v20  ;;  %4642 = vmatpush.msra.mxu1 %v8225_v21 }
0x111d   : > { %4662 = vmatpush.msra.mxu2 %v8244_v23  ;;  %4594 = vmatpush.msrb.mxu3 %v8195_v8 }
0x111e   : > { %4620 = vmatpush.msrb.mxu0 %v8208_v27  ;;  %4643 = vmatpush.msra.mxu1 %v8224_v28 }
0x111f   : > { %4663 = vmatpush.msra.mxu2 %v8243_v11  ;;  %4621 = vmatmul.f32.vlgmr.msrb.gmra.mxu0 %v4025_v31 }
0x1120   : > { %4644 = vmatmul.f32.vlgmr.msra.gmra.mxu1 %v4026_v32  ;;  %4595 = vmatpush.msrb.mxu3 %v8194_v36 }
0x1121   : > { %4664 = vmatpush.msra.mxu2 %v8242_v24 }
0x1122   : > { %4596 = vmatpush.msrb.mxu3 %v8193_v29 }
0x1123   : > { %4665 = vmatpush.msra.mxu2 %v8241_v38 }
0x1124   : > { %4597 = vmatpush.msrb.mxu3 %v8192_v40 }
0x1125   : > { %4666 = vmatpush.msra.mxu2 %v8240_v56  ;;  %4598 = vmatmul.f32.vlgmr.msrb.gmra.mxu3 %v4024_v43 }
0x1126   : > { %4667 = vmatmul.f32.vlgmr.msra.gmra.mxu2 %v4027_v44 }
0x1127   : > { %4624 = vmatmul.f32.gmra.mxu0 %v4041_v47 }
0x1128   : > { %4647 = vmatmul.f32.gmra.mxu1 %v4042_v49 }
0x112d   : > { %4601 = vmatmul.f32.gmra.mxu3 %v4040_v53 }
0x112e   : > { %4670 = vmatmul.f32.gmra.mxu2 %v4043_v54 }
0x1151   : > { %v4346_v55 = vpop.f32.mrf.mxu0 }
0x1152   : > { %v4369_v58 = vpop.f32.mrf.mxu1 }
0x115a   : > { %v4349_v60 = vpop.f32.mrf.mxu0 }
0x115b   : > { %v4372_v61 = vpop.f32.mrf.mxu1 }
0x115d   : > { %v4323_v57 = vpop.f32.mrf.mxu3 }
0x115e   : > { %v4392_v59 = vpop.f32.mrf.mxu2  ;;  %v4324_v0 = vadd.f32 %v8851_v62, %v4323_v57 }
0x1160   : > { %v4347_v2 = vadd.f32 %v4346_v55, %v4324_v0 }
0x1162   : > { %v4370_v7 = vadd.f32 %v4369_v58, %v4347_v2 }
0x1164   : > { %v4438_v1 = vpop.f32.mrf.mxu0  ;;  %v4393_v12 = vadd.f32 %v4392_v59, %v4370_v7 }
0x1165   : > { %v4461_v3 = vpop.f32.mrf.mxu1 }
0x1167   : > { %v4326_v9 = vpop.f32.mrf.mxu3 }
0x1168   : > { %v4395_v63 = vpop.f32.mrf.mxu2  ;;  %v4327_v10 = vadd.f32 %v8851_v62, %v4326_v9 }
0x116a   : > { %v4350_v42 = vadd.f32 %v4349_v60, %v4327_v10  ;;  %v8262_v10 = vld [vmem:[%s9042_s14 + $0x98] sm:$0xff] }
0x116b   : > { %4798 = vmatpush.msra.mxu3 %v8262_v10 }
0x116c   : > { %v4373_v17 = vadd.f32 %v4372_v61, %v4350_v42  ;;  %v8278_v42 = vld [vmem:[%s9052_s24 + $0x98] sm:$0xff] }
0x116d   : > { %4852 = vmatpush.msrb.mxu1 %v8278_v42 }
0x116e   : > { %v4441_v15 = vpop.f32.mrf.mxu0  ;;  %v4396_v21 = vadd.f32 %v4395_v63, %v4373_v17  ;;  %v8268_v17 = vld [vmem:[%s9047_s19 + $0x88] sm:$0xff] }
0x116f   : > { %v4464_v52 = vpop.f32.mrf.mxu1 }
0x1171   : > { %v4415_v14 = vpop.f32.mrf.mxu3 }
0x1172   : > { %v4484_v5 = vpop.f32.mrf.mxu2  ;;  %v4416_v45 = vadd.f32 %v4415_v14, %v4393_v12  ;;  %v8270_v12 = vld [vmem:[%s9047_s19 + $0x98] sm:$0xff] }
0x1173   : > { %4826 = vmatpush.msra.mxu0 %v8270_v12  ;;  %v10412_v12 = vld [vmem:[%s9167_s22] ss:$0 sm:$0xff] }
0x1174   : > { %v4439_v20 = vadd.f32 %v4438_v1, %v4416_v45  ;;  %v8277_v45 = vld [vmem:[%s9052_s24 + $0x90] sm:$0xff] }
0x1175   : > { %4853 = vmatpush.msrb.mxu1 %v8277_v45 }
0x1176   : > { %v4462_v4 = vadd.f32 %v4461_v3, %v4439_v20  ;;  %v8259_v20 = vld [vmem:[%s9042_s14 + $0x80] sm:$0xff] }
0x1178   : > { %v4485_v26 = vadd.f32 %v4484_v5, %v4462_v4  ;;  %v8275_v4 = vld [vmem:[%s9052_s24 + $0x80] sm:$0xff] }
0x117a   : > { %v4530_v23 = vpop.f32.mrf.mxu0  ;;  %v4553_v25 = vpop.f32.mrf.mxu1 }
0x117b   : > { %v4418_v16 = vpop.f32.mrf.mxu3 }
0x117c   : > { %v4487_v19 = vpop.f32.mrf.mxu2  ;;  %v4419_v22 = vadd.f32 %v4418_v16, %v4396_v21  ;;  %v8269_v16 = vld [vmem:[%s9047_s19 + $0x90] sm:$0xff]  ;;  %v8267_v21 = vld [vmem:[%s9047_s19 + $0x80] sm:$0xff] }
0x117d   : > { %4827 = vmatpush.msra.mxu0 %v8269_v16  ;;  %v10416_v16 = vld [vmem:[%s9167_s22 + $0x1] ss:$0 sm:$0xff]  ;;  %s11355_s22 = sld [smem:[#allocation16_spill]] }
0x117e   : > { %v4442_v27 = vadd.f32 %v4441_v15, %v4419_v22  ;;  %v8261_v15 = vld [vmem:[%s9042_s14 + $0x90] sm:$0xff] }
0x117f   : > { %4799 = vmatpush.msra.mxu3 %v8261_v15  ;;  %4828 = vmatpush.msra.mxu0 %v8268_v17 }
0x1180   : > { %v4465_v11 = vadd.f32 %v4464_v52, %v4442_v27  ;;  %v8260_v52 = vld [vmem:[%s9042_s14 + $0x88] sm:$0xff] }
0x1181   : > { %4800 = vmatpush.msra.mxu3 %v8260_v52  ;;  %4829 = vmatpush.msra.mxu0 %v8267_v21 }
0x1182   : > { %v4488_v33 = vadd.f32 %v4487_v19, %v4465_v11  ;;  %v8276_v19 = vld [vmem:[%s9052_s24 + $0x88] sm:$0xff] }
0x1183   : > { %4854 = vmatpush.msrb.mxu1 %v8276_v19  ;;  %4801 = vmatpush.msra.mxu3 %v8259_v20  ;;  %v8857_v19 = vld [vmem:[%s11343_s6 + $0x5] ss:$0 sm:$0xff] }
0x1184   : > { %v4533_v36 = vpop.f32.mrf.mxu0 }
0x1185   : > { %v4556_v24 = vpop.f32.mrf.mxu1  ;;  %4855 = vmatpush.msrb.mxu1 %v8275_v4 }
0x1187   : > { %v4507_v8 = vpop.f32.mrf.mxu3 }
0x1188   : > { %v4576_v28 = vpop.f32.mrf.mxu2  ;;  %v4508_v30 = vadd.f32 %v4507_v8, %v4485_v26 }
0x118a   : > { %v4531_v31 = vadd.f32 %v4530_v23, %v4508_v30 }
0x118c   : > { %v4554_v34 = vadd.f32 %v4553_v25, %v4531_v31 }
0x118e   : > { %v4577_v37 = vadd.f32 %v4576_v28, %v4554_v34  ;;  %v8852_v34 = vld [vmem:[%s11353_s23 + $0x1] ss:$0 sm:$0xff] }
0x1191   : > { %v4510_v32 = vpop.f32.mrf.mxu3 }
0x1192   : > { %v4511_v35 = vadd.f32 %v4510_v32, %v4488_v33  ;;  %v4579_v29 = vpop.f32.mrf.mxu2 }
0x1194   : > { %v4534_v38 = vadd.f32 %v4533_v36, %v4511_v35 }
0x1196   : > { %v4557_v43 = vadd.f32 %v4556_v24, %v4534_v38 }
0x1198   : > { %v4580_v48 = vadd.f32 %v4579_v29, %v4557_v43 }
0x119c   : > { %v4622_v39 = vpop.f32.mrf.mxu0 }
0x119d   : > { %v4645_v56 = vpop.f32.mrf.mxu1 }
0x11a4   : > { %v4625_v54 = vpop.f32.mrf.mxu0 }
0x11a5   : > { %v4648_v58 = vpop.f32.mrf.mxu1 }
0x11a8   : > { %v4599_v40 = vpop.f32.mrf.mxu3 }
0x11a9   : > { %v4600_v41 = vadd.f32 %v4599_v40, %v4577_v37  ;;  %v4668_v46 = vpop.f32.mrf.mxu2  ;;  %v8853_v37 = vld [vmem:[%s11354_s18 + $0x1] ss:$0 sm:$0xff] }
0x11ab   : > { %v4623_v44 = vadd.f32 %v4622_v39, %v4600_v41 }
0x11ad   : > { %v4646_v47 = vadd.f32 %v4645_v56, %v4623_v44 }
0x11af   : > { %v4669_v49 = vadd.f32 %v4668_v46, %v4646_v47 }
0x11b0   : > { %v4602_v50 = vpop.f32.mrf.mxu3 }
0x11b1   : > { %v4603_v51 = vadd.f32 %v4602_v50, %v4580_v48  ;;  %v4674_v53 = vadd.f32 %v4669_v49, %v9937_v13  ;;  %v4671_v60 = vpop.f32.mrf.mxu2  ;;  %v8854_v49 = vld [vmem:[%s11343_s6 + $0x4] ss:$0 sm:$0xff] }
0x11b2   : > { %v8855_v50 = vld [vmem:[%s9067_s12 + $0x4] ss:$0 sm:$0xff] }
0x11b3   : > { %v4626_v55 = vadd.f32 %v4625_v54, %v4603_v51  ;;  %v4680_v57 = vsel %vm1125_vm6, %v4674_v53, 0.0 }
0x11b4   : > { %4681 = vadd.xlane.f32.xlu1 %v4680_v57  ;;  %v8856_v57 = vld [vmem:[%s9057_s30 + $0x4] ss:$0 sm:$0xff] }
0x11b5   : > { %v4649_v59 = vadd.f32 %v4648_v58, %v4626_v55 }
0x11b7   : > { %v4672_v9 = vadd.f32 %v4671_v60, %v4649_v59 }
0x11b9   : > { %v4675_v61 = vadd.f32 %v4672_v9, %v9960_v18 }
0x11bb   : > { %v4683_v62 = vsel %vm1125_vm6, %v4675_v61, 0.0 }
0x11bc   : > { %4684 = vadd.xlane.f32.xlu2 %v4683_v62 }
0x1227   : > { %v4682_v63 = vpop.xlane.xlu1 %4681 }
0x1228   : > { %v4686_v13 = vmul.f32 %v4682_v63, %v9301_v6  ;;  %v8274_v63 = vld [vmem:[%s9047_s19 + $0xb8] sm:$0xff] }
0x122a   : > { %v4688_v0 = vsub.f32 %v4674_v53, %v4686_v13 }
0x122c   : > { %v4690_v1 = vmul.f32 %v4688_v0, %v4688_v0 }
0x122e   : > { %v4692_v14 = vsel %vm1125_vm6, %v4690_v1, 0.0  ;;  %v8272_v1 = vld [vmem:[%s9047_s19 + $0xa8] sm:$0xff] }
0x122f   : > { %4693 = vadd.xlane.f32.xlu0 %v4692_v14  ;;  %v4685_v2 = vpop.xlane.xlu2 %4684 }
0x1230   : > { %v4687_v3 = vmul.f32 %v4685_v2, %v9301_v6 }
0x1232   : > { %v10356_v18 = vsub.f32 %v4675_v61, %v4687_v3  ;;  %v8271_v3 = vld [vmem:[%s9047_s19 + $0xa0] sm:$0xff] }
0x1234   : > { %v4691_v5 = vmul.f32 %v10356_v18, %v10356_v18 }
0x1236   : > { %v4695_v7 = vsel %vm1125_vm6, %v4691_v5, 0.0  ;;  %v8290_v5 = vld [vmem:[%s9072_s20 + $0x48] sm:$0xff] }
0x1237   : > { %4696 = vadd.xlane.f32.xlu1 %v4695_v7  ;;  %v8289_v7 = vld [vmem:[%s9072_s20 + $0x40] sm:$0xff] }
0x12a2   : > { %v4694_v22 = vpop.xlane.xlu0 %4693 }
0x12a3   : > { %v4698_v23 = vmul.f32 %v4694_v22, %v9301_v6 }
0x12a5   : > { %v4700_v8 = vadd.f32 1e-05, %v4698_v23 }
0x12a7   : > { %8913 = vrsqrt.f32 %v4700_v8  ;;  %vm4708_vm13 = vweird.f32 %v4700_v8 }
0x12aa   : > { %v4697_v25 = vpop.xlane.xlu1 %4696 }
0x12ab   : > { %v4699_v26 = vmul.f32 %v4697_v25, %v9301_v6 }
0x12ad   : > { %v8914_v27 = vpop.eup %8913  ;;  %v4701_v28 = vadd.f32 1e-05, %v4699_v26 }
0x12ae   : > { %v4703_v30 = vmul.f32 %v8914_v27, %v4700_v8  ;;  %vm4709_vm12 = vweird.f32 %v8914_v27 }
0x12af   : > { %8915 = vrsqrt.f32 %v4701_v28  ;;  %vm4710_vm14 = vmor %vm4708_vm13, %vm4709_vm12  ;;  %vm4718_vm1 = vweird.f32 %v4701_v28 }
0x12b0   : > { %v4704_v11 = vmul.f32 %v8914_v27, %v4703_v30 }
0x12b2   : > { %v4705_v31 = vmul.f32 0.5, %v4704_v11 }
0x12b4   : > { %v4706_v36 = vsub.f32 1.5, %v4705_v31 }
0x12b5   : > { %v8916_v32 = vpop.eup %8915 }
0x12b6   : > { %v4707_v33 = vmul.f32 %v8914_v27, %v4706_v36  ;;  %v4713_v24 = vmul.f32 %v8916_v32, %v4701_v28  ;;  %vm4719_vm15 = vweird.f32 %v8916_v32 }
0x12b7   : > { %vm4720_vm2 = vmor %vm4718_vm1, %vm4719_vm15 }
0x12b8   : > { %v4711_v35 = vsel %vm4710_vm14, %v8914_v27, %v4707_v33  ;;  %v4714_v29 = vmul.f32 %v8916_v32, %v4713_v24  ;;  %v8265_v33 = vld [vmem:[%s9042_s14 + $0xb0] sm:$0xff]  ;;  %v8282_v24 = vld [vmem:[%s9052_s24 + $0xb8] sm:$0xff] }
0x12b9   : > { %v4722_v38 = vmul.f32 %v4711_v35, %v4688_v0  ;;  %v8273_v0 = vld [vmem:[%s9047_s19 + $0xb0] sm:$0xff] }
0x12ba   : > { %v4715_v39 = vmul.f32 0.5, %v4714_v29  ;;  %v8281_v35 = vld [vmem:[%s9052_s24 + $0xb0] sm:$0xff]  ;;  %v8263_v29 = vld [vmem:[%s9042_s14 + $0xa0] sm:$0xff] }
0x12bb   : > { %v4727_v40 = vmul.f32 %v8852_v34, %v4722_v38  ;;  %v8279_v38 = vld [vmem:[%s9052_s24 + $0xa0] sm:$0xff] }
0x12bc   : > { %v4716_v41 = vsub.f32 1.5, %v4715_v39 }
0x12bd   : > { %v10377_v56 = vadd.f32 %v8853_v37, %v4727_v40 }
0x12be   : > { %v4717_v43 = vmul.f32 %v8916_v32, %v4716_v41 }
0x12bf   : > { %8294 = vmatmul.msk.f32.vlgmr.msra.gmra.mxu3 %vm1125_vm6, %v10377_v56  ;;  %8296 = vmatmul.msk.f32.vlgmr.msra.gmra.mxu0 %vm1125_vm6, %v10377_v56 }
0x12c0   : > { %v4721_v44 = vsel %vm4720_vm2, %v8916_v32, %v4717_v43  ;;  %8298 = vmatmul.msk.f32.vlgmr.msrb.gmra.mxu1 %vm1125_vm6, %v10377_v56  ;;  %v8266_v32 = vld [vmem:[%s9042_s14 + $0xb8] sm:$0xff] }
0x12c1   : > { %v4723_v46 = vmul.f32 %v4721_v44, %v10356_v18 }
0x12c3   : > { %v4728_v47 = vmul.f32 %v8852_v34, %v4723_v46  ;;  %v8264_v34 = vld [vmem:[%s9042_s14 + $0xa8] sm:$0xff] }
0x12c5   : > { %v10386_v48 = vadd.f32 %v8853_v37, %v4728_v47  ;;  %v8280_v37 = vld [vmem:[%s9052_s24 + $0xa8] sm:$0xff] }
0x12c7   : > { %8295 = vmatmul.msk.f32.gmra.mxu3 %vm1125_vm6, %v10386_v48  ;;  %8297 = vmatmul.msk.f32.gmra.mxu0 %vm1125_vm6, %v10386_v48 }
0x12c8   : > { %8299 = vmatmul.msk.f32.gmra.mxu1 %vm1125_vm6, %v10386_v48 }
0x133c   : > { %v4831_v51 = vpop.f32.mrf.mxu0 }
0x133d   : > { %v4832_v53 = vadd.f32 %v8854_v49, %v4831_v51  ;;  %v4857_v54 = vpop.f32.mrf.mxu1 }
0x133e   : > { %v4858_v55 = vadd.f32 %v8855_v50, %v4857_v54 }
0x133f   : > { %8300 = vmatpush.xpose.msk.msrb.mxu2 %vm1045_vm3, %v4832_v53 }
0x1340   : > { %4931 = vmatpush.msrb.mxu3 %v4858_v55 }
0x1342   : > { %v4803_v58 = vpop.f32.mrf.mxu3  ;;  %5058 = vmatpush.msra.mxu3 %v8266_v32 }
0x1343   : > { %v4804_v59 = vadd.f32 %v8856_v57, %v4803_v58  ;;  %5029 = vmatpush.msra.mxu2 %v8290_v5 }
0x1344   : > { %v4834_v60 = vpop.f32.mrf.mxu0  ;;  %5059 = vmatpush.msra.mxu3 %v8265_v33 }
0x1345   : > { %v4809_v9 = vmul.f32 0.25, %v4804_v59  ;;  %v4835_v61 = vadd.f32 %v8854_v49, %v4834_v60  ;;  %v4860_v62 = vpop.f32.mrf.mxu1  ;;  %5030 = vmatpush.msra.mxu2 %v8289_v7  ;;  %v8859_v7 = vld [vmem:[%s9057_s30 + $0x5] ss:$0 sm:$0xff] }
0x1346   : > { %v4861_v13 = vadd.f32 %v8855_v50, %v4860_v62  ;;  %5060 = vmatpush.msra.mxu3 %v8264_v34 }
0x1347   : > { %8301 = vmatmul.msk.f32.vlgmr.msrb.gmra.mxu2 %vm1045_vm3, %v4809_v9  ;;  %8303 = vmatpush.xpose.msk.msrb.mxu0 %vm1045_vm3, %v4835_v61 }
0x1348   : > { %5004 = vmatpush.msra.mxu1 %v4861_v13  ;;  %5061 = vmatpush.msra.mxu3 %v8263_v29 }
0x134a   : > { %v4806_v14 = vpop.f32.mrf.mxu3  ;;  %5112 = vmatpush.msrb.mxu1 %v8282_v24 }
0x134b   : > { %5086 = vmatpush.msra.mxu0 %v8274_v63  ;;  %v4807_v2 = vadd.f32 %v8856_v57, %v4806_v14 }
0x134c   : > { %5113 = vmatpush.msrb.mxu1 %v8281_v35 }
0x134d   : > { %5087 = vmatpush.msra.mxu0 %v8273_v0  ;;  %v4810_v18 = vmul.f32 0.25, %v4807_v2 }
0x134e   : > { %5114 = vmatpush.msrb.mxu1 %v8280_v37 }
0x134f   : > { %5088 = vmatpush.msra.mxu0 %v8272_v1 }
0x1350   : > { %8304 = vmatmul.msk.f32.vlgmr.msrb.gmra.mxu0 %vm1045_vm3, %v4810_v18  ;;  %5115 = vmatpush.msrb.mxu1 %v8279_v38 }
0x1351   : > { %5089 = vmatpush.msra.mxu0 %v8271_v3  ;;  %v8858_v3 = vld [vmem:[%s9067_s12 + $0x5] ss:$0 sm:$0xff] }
0x1358   : > { %8310 = vmatmul.msk.f32.vlgmr.msra.gmra.mxu0 %vm1125_vm6, %v10377_v56 }
0x1360   : > { %8311 = vmatmul.msk.f32.gmra.mxu0 %vm1125_vm6, %v10386_v48 }
0x13ca   : > { %v4886_v10 = vpop.f32.mrf.mxu2 }
0x13cb   : > { %v4887_v42 = vadd.f32 %v10412_v12, %v4886_v10 }
0x13cd   : > { %v4959_v15 = vpop.f32.mrf.mxu0  ;;  %v4889_v52 = vsel %vm1238_vm8, %v4887_v42, -inf }
0x13ce   : > { %v4960_v45 = vadd.f32 %v10416_v16, %v4959_v15  ;;  %4890 = vmax.xlane.f32.xlu2 %v4889_v52 }
0x13d0   : > { %v4962_v17 = vsel %vm1238_vm8, %v4960_v45, -inf }
0x13d1   : > { %4963 = vmax.xlane.f32.xlu0 %v4962_v17 }
0x13d5   : > { %v5091_v20 = vpop.f32.mrf.mxu0 }
0x13d6   : > { %v5092_v21 = vadd.f32 %v8857_v19, %v5091_v20 }
0x13d8   : > { %8314 = vmatpush.xpose.msk.msrb.mxu2 %vm1045_vm3, %v5092_v21 }
0x13dd   : > { %v5094_v4 = vpop.f32.mrf.mxu0 }
0x13de   : > { %v5095_v22 = vadd.f32 %v8857_v19, %v5094_v4 }
0x13e0   : > { %8317 = vmatpush.xpose.msk.msrb.mxu0 %vm1045_vm3, %v5095_v22 }
0x1441   : > { %v4891_v23 = vpop.xlane.xlu2 %4890 }
0x1442   : > { %v4892_v8 = vsub.f32 %v4887_v42, %v4891_v23 }
0x1444   : > { %v4964_v25 = vpop.xlane.xlu0 %4963  ;;  %v4893_v26 = vmul.f32 1.442695, %v4892_v8 }
0x1445   : > { %v4965_v27 = vsub.f32 %v4960_v45, %v4964_v25 }
0x1446   : > { %8917 = vpow2.f32 %v4893_v26 }
0x1447   : > { %v4966_v28 = vmul.f32 1.442695, %v4965_v27 }
0x1449   : > { %8919 = vpow2.f32 %v4966_v28 }
0x144c   : > { %v8918_v30 = vpop.eup %8917 }
0x144d   : > { %v4895_v11 = vsel %vm1238_vm8, %v8918_v30, 0.0 }
0x144e   : > { %4896 = vadd.xlane.f32.xlu1 %v4895_v11 }
0x144f   : > { %v8920_v31 = vpop.eup %8919 }
0x1450   : > { %v4968_v36 = vsel %vm1238_vm8, %v8920_v31, 0.0 }
0x1451   : > { %4969 = vadd.xlane.f32.xlu2 %v4968_v36 }
0x14c1   : > { %v4897_v39 = vpop.xlane.xlu1 %4896 }
0x14c2   : > { %8921 = vrcp.f32 %v4897_v39  ;;  %v4909_v49 = vand.u32 2147483648, %v4897_v39  ;;  %v4907_v51 = vand.u32 2147483647, %v4897_v39  ;;  %vm4903_vm5 = vweird.f32 %v4897_v39 }
0x14c4   : > { %v4970_v40 = vpop.xlane.xlu2 %4969  ;;  %v4910_v59 = vor.u32 1.1754944e-38, %v4909_v49  ;;  %vm4908_vm10 = vcmp.eq.f32.partialorder %v4907_v51, 8.507059e+37 }
0x14c5   : > { %8923 = vrcp.f32 %v4970_v40  ;;  %v4982_v54 = vand.u32 2147483648, %v4970_v40  ;;  %v4980_v58 = vand.u32 2147483647, %v4970_v40  ;;  %vm4976_vm11 = vweird.f32 %v4970_v40 }
0x14c7   : > { %v4983_v62 = vor.u32 1.1754944e-38, %v4982_v54  ;;  %vm4981_vm13 = vcmp.eq.f32.partialorder %v4980_v58, 8.507059e+37 }
0x14c8   : > { %v8922_v41 = vpop.eup %8921 }
0x14c9   : > { %v4899_v43 = vmul.f32 %v8922_v41, %v4897_v39  ;;  %vm4904_vm4 = vweird.f32 %v8922_v41 }
0x14ca   : > { %vm4905_vm9 = vmor %vm4903_vm5, %vm4904_vm4 }
0x14cb   : > { %v8924_v44 = vpop.eup %8923  ;;  %v4900_v46 = vsub.f32 1.0, %v4899_v43 }
0x14cc   : > { %v4972_v47 = vmul.f32 %v8924_v44, %v4970_v40  ;;  %vm4977_vm7 = vweird.f32 %v8924_v44 }
0x14cd   : > { %v4901_v50 = vmul.f32 %v8922_v41, %v4900_v46  ;;  %vm4978_vm12 = vmor %vm4976_vm11, %vm4977_vm7 }
0x14ce   : > { %v4973_v53 = vsub.f32 1.0, %v4972_v47 }
0x14cf   : > { %v4902_v55 = vadd.f32 %v8922_v41, %v4901_v50 }
0x14d0   : > { %v4974_v57 = vmul.f32 %v8924_v44, %v4973_v53 }
0x14d1   : > { %v4906_v60 = vsel %vm4905_vm9, %v8922_v41, %v4902_v55 }
0x14d2   : > { %v4975_v9 = vadd.f32 %v8924_v44, %v4974_v57  ;;  %v4911_v61 = vsel %vm4908_vm10, %v4910_v59, %v4906_v60 }
0x14d3   : > { %v4912_v63 = vmul.f32 %v8918_v30, %v4911_v61 }
0x14d4   : > { %v4979_v13 = vsel %vm4978_vm12, %v8924_v44, %v4975_v9 }
0x14d5   : > { %v4984_v0 = vsel %vm4981_vm13, %v4983_v62, %v4979_v13  ;;  %8302 = vmatmul.msk.f32.vlgmr.msrb.gmra.mxu3 %vm1238_vm8, %v4912_v63  ;;  %v8292_v62 = vld [vmem:[%s9072_s20 + $0x58] sm:$0xff]  ;;  %v8291_v63 = vld [vmem:[%s9072_s20 + $0x50] sm:$0xff] }
0x14d6   : > { %v4985_v1 = vmul.f32 %v8920_v31, %v4984_v0 }
0x14d8   : > { %8305 = vmatmul.msk.f32.vlgmr.msra.gmra.mxu1 %vm1238_vm8, %v4985_v1  ;;  %v8860_v1 = vld [vmem:[%s11346_s26 + $0x2] ss:$0 sm:$0xff] }
0x14dd   : > { %8308 = vmatmul.msk.f32.vlgmr.msra.gmra.mxu3 %vm1125_vm6, %v10377_v56 }
0x14e0   : > { %8312 = vmatmul.msk.f32.vlgmr.msrb.gmra.mxu1 %vm1125_vm6, %v10377_v56 }
0x14e5   : > { %8309 = vmatmul.msk.f32.gmra.mxu3 %vm1125_vm6, %v10386_v48 }
0x14e8   : > { %8313 = vmatmul.msk.f32.gmra.mxu1 %vm1125_vm6, %v10386_v48 }
0x1555   : > { %v5006_v14 = vpop.f32.mrf.mxu1 }
0x1558   : > { %v4933_v2 = vpop.f32.mrf.mxu3 }
0x1559   : > { %8306 = vmatmul.msk.f32.vlgmr.msra.gmra.mxu2 %vm1045_vm3, %v4933_v2 }
0x155a   : > { %5289 = vmatpush.msra.mxu2 %v8292_v62  ;;  %v8331_v62 = vld [vmem:[%s11347_s28 + $0x438] sm:$0xff] }
0x155c   : > { %5290 = vmatpush.msra.mxu2 %v8291_v63 }
0x155d   : > { %v5117_v18 = vpop.f32.mrf.mxu1 }
0x155e   : > { %v5118_v5 = vadd.f32 %v8858_v3, %v5117_v18 }
0x1560   : > { %5191 = vmatpush.msrb.mxu3 %v5118_v5  ;;  %v5063_v10 = vpop.f32.mrf.mxu3 }
0x1561   : > { %8307 = vmatmul.msk.f32.gmra.mxu2 %vm1045_vm3, %v5006_v14  ;;  %v5064_v42 = vadd.f32 %v8859_v7, %v5063_v10 }
0x1563   : > { %v5069_v52 = vmul.f32 0.25, %v5064_v42 }
0x1565   : > { %v5120_v15 = vpop.f32.mrf.mxu1 }
0x1566   : > { %v5121_v45 = vadd.f32 %v8858_v3, %v5120_v15 }
0x1568   : > { %5264 = vmatpush.msra.mxu1 %v5121_v45  ;;  %v5066_v17 = vpop.f32.mrf.mxu3 }
0x1569   : > { %v5067_v19 = vadd.f32 %v8859_v7, %v5066_v17  ;;  %8315 = vmatmul.msk.f32.vlgmr.msrb.gmra.mxu2 %vm1045_vm3, %v5069_v52 }
0x156b   : > { %v5070_v20 = vmul.f32 0.25, %v5067_v19 }
0x156d   : > { %8318 = vmatmul.msk.f32.vlgmr.msrb.gmra.mxu0 %vm1045_vm3, %v5070_v20 }
0x15dc   : > { %v10450_v21 = vpop.f32.mrf.mxu2 }
0x15dd   : > { %v5041_v14 = vadd.f32 %v8860_v1, %v10450_v21 }
0x15e4   : > { %v10452_v4 = vpop.f32.mrf.mxu2 }
0x15e5   : > { %v5042_v7 = vadd.f32 %v8860_v1, %v10452_v4 }
0x15ea   : > { %v5219_v22 = vpop.f32.mrf.mxu0 }
0x15eb   : > { %v5220_v23 = vadd.f32 %v10416_v16, %v5219_v22 }
0x15ec   : > { %v5146_v8 = vpop.f32.mrf.mxu2 }
0x15ed   : > { %v5147_v25 = vadd.f32 %v10412_v12, %v5146_v8  ;;  %v5222_v26 = vsel %vm1238_vm8, %v5220_v23, -inf  ;;  %v8372_v8 = vld [vmem:[%s11347_s28 + $0x580] sm:$0xff] }
0x15ee   : > { %5223 = vmax.xlane.f32.xlu1 %v5222_v26  ;;  %v8374_v26 = vld [vmem:[%s11347_s28 + $0x590] sm:$0xff]  ;;  %5480 = vmatpush.msra.mxu3 %v8372_v8  ;;  %v8365_v8 = vld [vmem:[%s11347_s28 + $0x548] sm:$0xff] }
0x15ef   : > { %v5149_v27 = vsel %vm1238_vm8, %v5147_v25, -inf  ;;  %5526 = vmatpush.msrb.mxu1 %v8374_v26  ;;  %v8366_v26 = vld [vmem:[%s11347_s28 + $0x550] sm:$0xff] }
0x15f0   : > { %5150 = vmax.xlane.f32.xlu0 %v5149_v27  ;;  %v8375_v27 = vld [vmem:[%s11347_s28 + $0x598] sm:$0xff] }
0x15f1   : > { %5549 = vmatpush.msrb.mxu2 %v8375_v27  ;;  %v8367_v27 = vld [vmem:[%s11347_s28 + $0x558] sm:$0xff] }
0x1661   : > { %v5224_v28 = vpop.xlane.xlu1 %5223 }
0x1662   : > { %v5225_v30 = vsub.f32 %v5220_v23, %v5224_v28  ;;  %v8356_v28 = vld [vmem:[%s11347_s28 + $0x500] sm:$0xff] }
0x1663   : > { %v5151_v11 = vpop.xlane.xlu0 %5150  ;;  %5481 = vmatpush.msra.mxu3 %v8356_v28  ;;  %v8348_v28 = vld [vmem:[%s11347_s28 + $0x4c0] sm:$0xff] }
0x1664   : > { %v5226_v31 = vmul.f32 1.442695, %v5225_v30  ;;  %v5152_v36 = vsub.f32 %v5147_v25, %v5151_v11  ;;  %v8373_v25 = vld [vmem:[%s11347_s28 + $0x588] sm:$0xff]  ;;  %v8358_v11 = vld [vmem:[%s11347_s28 + $0x510] sm:$0xff] }
0x1665   : > { %5503 = vmatpush.msra.mxu0 %v8373_v25  ;;  %v8357_v30 = vld [vmem:[%s11347_s28 + $0x508] sm:$0xff]  ;;  %5527 = vmatpush.msrb.mxu1 %v8358_v11 }
0x1666   : > { %8925 = vpow2.f32 %v5226_v31  ;;  %v5153_v32 = vmul.f32 1.442695, %v5152_v36  ;;  %v8359_v31 = vld [vmem:[%s11347_s28 + $0x518] sm:$0xff]  ;;  %v8340_v36 = vld [vmem:[%s11347_s28 + $0x480] sm:$0xff] }
0x1667   : > { %5504 = vmatpush.msra.mxu0 %v8357_v30  ;;  %5550 = vmatpush.msrb.mxu2 %v8359_v31  ;;  %v8349_v30 = vld [vmem:[%s11347_s28 + $0x4c8] sm:$0xff]  ;;  %v8350_v31 = vld [vmem:[%s11347_s28 + $0x4d0] sm:$0xff] }
0x1668   : > { %8927 = vpow2.f32 %v5153_v32  ;;  %v8341_v32 = vld [vmem:[%s11347_s28 + $0x488] sm:$0xff]  ;;  %5482 = vmatpush.msra.mxu3 %v8340_v36  ;;  %v8351_v36 = vld [vmem:[%s11347_s28 + $0x4d8] sm:$0xff] }
0x1669   : > { %5505 = vmatpush.msra.mxu0 %v8341_v32  ;;  %v8332_v32 = vld [vmem:[%s11347_s28 + $0x440] sm:$0xff] }
0x166c   : > { %v8926_v33 = vpop.eup %8925 }
0x166d   : > { %v5228_v16 = vsel %vm1238_vm8, %v8926_v33, 0.0 }
0x166e   : > { %v8928_v24 = vpop.eup %8927  ;;  %5229 = vadd.xlane.f32.xlu0 %v5228_v16  ;;  %v8343_v16 = vld [vmem:[%s11347_s28 + $0x498] sm:$0xff] }
0x166f   : > { %v5155_v12 = vsel %vm1238_vm8, %v8928_v24, 0.0  ;;  %5551 = vmatpush.msrb.mxu2 %v8343_v16  ;;  %v8334_v16 = vld [vmem:[%s11347_s28 + $0x450] sm:$0xff] }
0x1670   : > { %5156 = vadd.xlane.f32.xlu2 %v5155_v12  ;;  %v8325_v12 = vld [vmem:[%s11347_s28 + $0x408] sm:$0xff] }
0x1671   : > { %5506 = vmatpush.msra.mxu0 %v8325_v12  ;;  %v8384_v12 = vld [vmem:[%s11347_s28 + $0x5e0] sm:$0xff] }
0x16e1   : > { %v5230_v34 = vpop.xlane.xlu0 %5229 }
0x16e2   : > { %8929 = vrcp.f32 %v5230_v34  ;;  %v5242_v41 = vand.u32 2147483648, %v5230_v34  ;;  %v5240_v44 = vand.u32 2147483647, %v5230_v34  ;;  %vm5236_vm15 = vweird.f32 %v5230_v34 }
0x16e3   : > { %v5157_v35 = vpop.xlane.xlu2 %5156 }
0x16e4   : > { %8931 = vrcp.f32 %v5157_v35  ;;  %v5169_v47 = vand.u32 2147483648, %v5157_v35  ;;  %v5167_v51 = vand.u32 2147483647, %v5157_v35  ;;  %v5243_v53 = vor.u32 1.1754944e-38, %v5242_v41  ;;  %v8378_v41 = vld [vmem:[%s11347_s28 + $0x5b0] sm:$0xff] }
0x16e5   : > { %vm5241_vm4 = vcmp.eq.f32.partialorder %v5240_v44, 8.507059e+37  ;;  %vm5163_vm5 = vweird.f32 %v5157_v35  ;;  %v8360_v44 = vld [vmem:[%s11347_s28 + $0x520] sm:$0xff] }
0x16e6   : > { %v5170_v58 = vor.u32 1.1754944e-38, %v5169_v47  ;;  %vm5168_vm9 = vcmp.eq.f32.partialorder %v5167_v51, 8.507059e+37  ;;  %v8344_v51 = vld [vmem:[%s11347_s28 + $0x4a0] sm:$0xff] }
0x16e8   : > { %v8930_v29 = vpop.eup %8929 }
0x16e9   : > { %v5232_v37 = vmul.f32 %v8930_v29, %v5230_v34  ;;  %vm5237_vm14 = vweird.f32 %v8930_v29  ;;  %v8326_v34 = vld [vmem:[%s11347_s28 + $0x410] sm:$0xff] }
0x16ea   : > { %v8932_v38 = vpop.eup %8931  ;;  %vm5238_vm2 = vmor %vm5236_vm15, %vm5237_vm14  ;;  %vm6689_vm14 = vcmask 7168   ;;  %vm6608_vm15 = vcmask 359424  }
0x16eb   : > { %v5233_v39 = vsub.f32 1.0, %v5232_v37  ;;  %v5159_v40 = vmul.f32 %v8932_v38, %v5157_v35  ;;  %vm5164_vm1 = vweird.f32 %v8932_v38  ;;  %v8327_v35 = vld [vmem:[%s11347_s28 + $0x418] sm:$0xff] }
0x16ec   : > { %vm5165_vm7 = vmor %vm5163_vm5, %vm5164_vm1  ;;  %5552 = vmatpush.msrb.mxu2 %v8327_v35  ;;  %v8386_v35 = vld [vmem:[%s11347_s28 + $0x5f0] sm:$0xff] }
0x16ed   : > { %v5234_v43 = vmul.f32 %v8930_v29, %v5233_v39  ;;  %v5160_v46 = vsub.f32 1.0, %v5159_v40  ;;  %v8376_v39 = vld [vmem:[%s11347_s28 + $0x5a0] sm:$0xff]  ;;  %v8377_v40 = vld [vmem:[%s11347_s28 + $0x5a8] sm:$0xff] }
0x16ee   : > { %5595 = vmatpush.msrb.mxu0 %v8377_v40  ;;  %v8371_v40 = vld [vmem:[%s11347_s28 + $0x578] sm:$0xff] }
0x16ef   : > { %v5235_v49 = vadd.f32 %v8930_v29, %v5234_v43  ;;  %v5161_v50 = vmul.f32 %v8932_v38, %v5160_v46  ;;  %v8379_v43 = vld [vmem:[%s11347_s28 + $0x5b8] sm:$0xff]  ;;  %v8361_v46 = vld [vmem:[%s11347_s28 + $0x528] sm:$0xff] }
0x16f0   : > { %5596 = vmatpush.msrb.mxu0 %v8361_v46  ;;  %v8355_v46 = vld [vmem:[%s11347_s28 + $0x4f8] sm:$0xff] }
0x16f1   : > { %v5239_v54 = vsel %vm5238_vm2, %v8930_v29, %v5235_v49  ;;  %v5162_v55 = vadd.f32 %v8932_v38, %v5161_v50  ;;  %v8362_v49 = vld [vmem:[%s11347_s28 + $0x530] sm:$0xff]  ;;  %v8363_v50 = vld [vmem:[%s11347_s28 + $0x538] sm:$0xff] }
0x16f2   : > { %v5244_v57 = vsel %vm5241_vm4, %v5243_v53, %v5239_v54  ;;  %v8345_v54 = vld [vmem:[%s11347_s28 + $0x4a8] sm:$0xff] }
0x16f3   : > { %v5245_v59 = vmul.f32 %v8926_v33, %v5244_v57  ;;  %v5166_v60 = vsel %vm5165_vm7, %v8932_v38, %v5162_v55  ;;  %v8342_v33 = vld [vmem:[%s11347_s28 + $0x490] sm:$0xff]  ;;  %v8347_v57 = vld [vmem:[%s11347_s28 + $0x4b8] sm:$0xff]  ;;  %5597 = vmatpush.msrb.mxu0 %v8345_v54 }
0x16f4   : > { %v5171_v9 = vsel %vm5168_vm9, %v5170_v58, %v5166_v60  ;;  %5528 = vmatpush.msrb.mxu1 %v8342_v33  ;;  %v8346_v55 = vld [vmem:[%s11347_s28 + $0x4b0] sm:$0xff]  ;;  %v8328_v58 = vld [vmem:[%s11347_s28 + $0x420] sm:$0xff]  ;;  %v8333_v33 = vld [vmem:[%s11347_s28 + $0x448] sm:$0xff] }
0x16f5   : > { %v5172_v61 = vmul.f32 %v8928_v24, %v5171_v9  ;;  %8319 = vmatmul.msk.f32.vlgmr.msra.gmra.mxu1 %vm1238_vm8, %v5245_v59  ;;  %v8324_v24 = vld [vmem:[%s11347_s28 + $0x400] sm:$0xff]  ;;  %v8329_v59 = vld [vmem:[%s11347_s28 + $0x428] sm:$0xff]  ;;  %v8469_v54 = vld [vmem:[%s11350_s7 + $0x1178] sm:$0xff] }
0x16f6   : > { %5483 = vmatpush.msra.mxu3 %v8324_v24  ;;  %5529 = vmatpush.msrb.mxu1 %v8326_v34  ;;  %v8335_v24 = vld [vmem:[%s11347_s28 + $0x458] sm:$0xff]  ;;  %v8385_v34 = vld [vmem:[%s11347_s28 + $0x5e8] sm:$0xff] }
0x16f7   : > { %8316 = vmatmul.msk.f32.vlgmr.msrb.gmra.mxu3 %vm1238_vm8, %v5172_v61  ;;  %v8330_v61 = vld [vmem:[%s11347_s28 + $0x430] sm:$0xff]  ;;  %5598 = vmatpush.msrb.mxu0 %v8329_v59 }
0x16f8   : > { %5572 = vmatpush.msrb.mxu3 %v8376_v39  ;;  %5618 = vmatpush.msra.mxu1 %v8378_v41  ;;  %v8370_v39 = vld [vmem:[%s11347_s28 + $0x570] sm:$0xff]  ;;  %v8352_v41 = vld [vmem:[%s11347_s28 + $0x4e0] sm:$0xff] }
0x16f9   : > { %v8468_v59 = vld [vmem:[%s11350_s7 + $0x1170] sm:$0xff] }
0x16fa   : > { %5573 = vmatpush.msrb.mxu3 %v8360_v44  ;;  %5619 = vmatpush.msra.mxu1 %v8362_v49  ;;  %v8354_v44 = vld [vmem:[%s11347_s28 + $0x4f0] sm:$0xff]  ;;  %v8337_v49 = vld [vmem:[%s11347_s28 + $0x468] sm:$0xff] }
0x16fc   : > { %5574 = vmatpush.msrb.mxu3 %v8344_v51  ;;  %5620 = vmatpush.msra.mxu1 %v8346_v55  ;;  %v8339_v51 = vld [vmem:[%s11347_s28 + $0x478] sm:$0xff] }
0x16fd   : > { %v8437_v55 = vld [vmem:[%s11350_s7 + $0x1078] sm:$0xff] }
0x16fe   : > { %5575 = vmatpush.msrb.mxu3 %v8328_v58  ;;  %5621 = vmatpush.msra.mxu1 %v8330_v61  ;;  %v8452_v58 = vld [vmem:[%s11350_s7 + $0x10f0] sm:$0xff]  ;;  %v8451_v61 = vld [vmem:[%s11350_s7 + $0x10e8] sm:$0xff] }
0x1772   : > { %v5266_v0 = vpop.f32.mrf.mxu1 }
0x177a   : > { %v5193_v13 = vpop.f32.mrf.mxu3 }
0x177b   : > { %8320 = vmatmul.msk.f32.vlgmr.msra.gmra.mxu2 %vm1045_vm3, %v5193_v13 }
0x177c   : > { %5641 = vmatpush.msra.mxu2 %v8379_v43  ;;  %v8353_v43 = vld [vmem:[%s11347_s28 + $0x4e8] sm:$0xff] }
0x177e   : > { %5642 = vmatpush.msra.mxu2 %v8363_v50  ;;  %v8338_v50 = vld [vmem:[%s11347_s28 + $0x470] sm:$0xff] }
0x1780   : > { %5643 = vmatpush.msra.mxu2 %v8347_v57  ;;  %v8485_v57 = vld [vmem:[%s11350_s7 + $0x11f8] sm:$0xff] }
0x1782   : > { %5644 = vmatpush.msra.mxu2 %v8331_v62  ;;  %v8467_v62 = vld [vmem:[%s11350_s7 + $0x1168] sm:$0xff] }
0x1783   : > { %8321 = vmatmul.msk.f32.gmra.mxu2 %vm1045_vm3, %v5266_v0 }
0x17fe   : > { %v5292_v2 = vpop.f32.mrf.mxu2 }
0x17ff   : > { %v5298_v3 = vadd.f32 %v5292_v2, %v5041_v14 }
0x1801   : > { %v5300_v18 = vadd.f32 %v5298_v3, %v10377_v56 }
0x1803   : > { %v5306_v5 = vsel %vm1125_vm6, %v5300_v18, 0.0 }
0x1804   : > { %5307 = vadd.xlane.f32.xlu1 %v5306_v5 }
0x1806   : > { %v5295_v10 = vpop.f32.mrf.mxu2 }
0x1807   : > { %v5299_v42 = vadd.f32 %v5295_v10, %v5042_v7  ;;  %v8862_v10 = vld [vmem:[%s11349_s2 + $0x2] ss:$0 sm:$0xff]  ;;  %s11357_s2 = sld [smem:[#allocation4_spill]] }
0x1809   : > { %v5301_v15 = vadd.f32 %v5299_v42, %v10386_v48 }
0x180b   : > { %v5309_v45 = vsel %vm1125_vm6, %v5301_v15, 0.0 }
0x180c   : > { %5310 = vadd.xlane.f32.xlu2 %v5309_v45 }
0x1877   : > { %v5308_v52 = vpop.xlane.xlu1 %5307 }
0x1878   : > { %v5312_v17 = vmul.f32 %v5308_v52, %v9301_v6 }
0x187a   : > { %v10474_v56 = vsub.f32 %v5300_v18, %v5312_v17  ;;  %v8861_v18 = vld [vmem:[%s11348_s1 + $0x2] ss:$0 sm:$0xff]  ;;  %s11356_s1 = sld [smem:[#allocation3_spill]] }
0x187c   : > { %v5316_v19 = vmul.f32 %v10474_v56, %v10474_v56 }
0x187e   : > { %v5318_v20 = vsel %vm1125_vm6, %v5316_v19, 0.0 }
0x187f   : > { %5319 = vadd.xlane.f32.xlu0 %v5318_v20  ;;  %v5311_v48 = vpop.xlane.xlu2 %5310  ;;  %v8380_v20 = vld [vmem:[%s11347_s28 + $0x5c0] sm:$0xff] }
0x1880   : > { %v5313_v21 = vmul.f32 %v5311_v48, %v9301_v6  ;;  %v8381_v48 = vld [vmem:[%s11347_s28 + $0x5c8] sm:$0xff]  ;;  %s10965_s6 = scalar_lea.vmem %s11356_s1, %s11358_s5  ;;  %s11359_s5 = sld [smem:[#allocation17_spill]] }
0x1882   : > { %v10480_v4 = vsub.f32 %v5301_v15, %v5313_v21  ;;  %v8383_v21 = vld [vmem:[%s11347_s28 + $0x5d8] sm:$0xff] }
0x1884   : > { %v5317_v22 = vmul.f32 %v10480_v4, %v10480_v4 }
0x1886   : > { %v5321_v23 = vsel %vm1125_vm6, %v5317_v22, 0.0 }
0x1887   : > { %5322 = vadd.xlane.f32.xlu1 %v5321_v23  ;;  %v8364_v23 = vld [vmem:[%s11347_s28 + $0x540] sm:$0xff] }
0x18f2   : > { %v5320_v29 = vpop.xlane.xlu0 %5319 }
0x18f3   : > { %v5324_v37 = vmul.f32 %v5320_v29, %v9301_v6  ;;  %v8387_v29 = vld [vmem:[%s11347_s28 + $0x5f8] sm:$0xff] }
0x18f5   : > { %v5326_v38 = vadd.f32 1e-05, %v5324_v37  ;;  %v8368_v37 = vld [vmem:[%s11347_s28 + $0x560] sm:$0xff] }
0x18f7   : > { %8933 = vrsqrt.f32 %v5326_v38  ;;  %vm5334_vm8 = vweird.f32 %v5326_v38 }
0x18fa   : > { %v5323_v47 = vpop.xlane.xlu1 %5322 }
0x18fb   : > { %v5325_v53 = vmul.f32 %v5323_v47, %v9301_v6  ;;  %v8336_v47 = vld [vmem:[%s11347_s28 + $0x460] sm:$0xff] }
0x18fd   : > { %v8934_v60 = vpop.eup %8933  ;;  %v5327_v9 = vadd.f32 1e-05, %v5325_v53  ;;  %v8453_v53 = vld [vmem:[%s11350_s7 + $0x10f8] sm:$0xff] }
0x18fe   : > { %v5329_v63 = vmul.f32 %v8934_v60, %v5326_v38  ;;  %vm5335_vm3 = vweird.f32 %v8934_v60  ;;  %v8369_v38 = vld [vmem:[%s11347_s28 + $0x568] sm:$0xff] }
0x18ff   : > { %8935 = vrsqrt.f32 %v5327_v9  ;;  %vm5336_vm10 = vmor %vm5334_vm8, %vm5335_vm3  ;;  %vm5344_vm12 = vweird.f32 %v5327_v9 }
0x1900   : > { %v5330_v13 = vmul.f32 %v8934_v60, %v5329_v63  ;;  %v8435_v63 = vld [vmem:[%s11350_s7 + $0x1068] sm:$0xff] }
0x1902   : > { %v5331_v0 = vmul.f32 0.5, %v5330_v13  ;;  %v8483_v13 = vld [vmem:[%s11350_s7 + $0x11e8] sm:$0xff] }
0x1904   : > { %v5332_v1 = vsub.f32 1.5, %v5331_v0  ;;  %v8450_v0 = vld [vmem:[%s11350_s7 + $0x10e0] sm:$0xff] }
0x1905   : > { %v8936_v14 = vpop.eup %8935 }
0x1906   : > { %v5333_v2 = vmul.f32 %v8934_v60, %v5332_v1  ;;  %v5339_v3 = vmul.f32 %v8936_v14, %v5327_v9  ;;  %vm5345_vm11 = vweird.f32 %v8936_v14  ;;  %v8484_v9 = vld [vmem:[%s11350_s7 + $0x11f0] sm:$0xff]  ;;  %v8466_v1 = vld [vmem:[%s11350_s7 + $0x1160] sm:$0xff] }
0x1907   : > { %vm5346_vm13 = vmor %vm5344_vm12, %vm5345_vm11 }
0x1908   : > { %v5337_v5 = vsel %vm5336_vm10, %v8934_v60, %v5333_v2  ;;  %v5340_v7 = vmul.f32 %v8936_v14, %v5339_v3  ;;  %v8436_v60 = vld [vmem:[%s11350_s7 + $0x1070] sm:$0xff]  ;;  %v8482_v2 = vld [vmem:[%s11350_s7 + $0x11e0] sm:$0xff]  ;;  %v8449_v3 = vld [vmem:[%s11350_s7 + $0x10d8] sm:$0xff] }
0x1909   : > { %v5348_v42 = vmul.f32 %v5337_v5, %v10474_v56  ;;  %v8382_v56 = vld [vmem:[%s11347_s28 + $0x5d0] sm:$0xff]  ;;  %v8433_v5 = vld [vmem:[%s11350_s7 + $0x1058] sm:$0xff] }
0x190a   : > { %v5341_v15 = vmul.f32 0.5, %v5340_v7  ;;  %v8481_v7 = vld [vmem:[%s11350_s7 + $0x11d8] sm:$0xff] }
0x190b   : > { %v5353_v45 = vmul.f32 %v8861_v18, %v5348_v42  ;;  %v8464_v42 = vld [vmem:[%s11350_s7 + $0x1150] sm:$0xff] }
0x190c   : > { %v5342_v52 = vsub.f32 1.5, %v5341_v15  ;;  %v8432_v15 = vld [vmem:[%s11350_s7 + $0x1050] sm:$0xff] }
0x190d   : > { %v10522_v17 = vadd.f32 %v8862_v10, %v5353_v45  ;;  %v8480_v45 = vld [vmem:[%s11350_s7 + $0x11d0] sm:$0xff] }
0x190e   : > { %v5343_v19 = vmul.f32 %v8936_v14, %v5342_v52  ;;  %v8447_v52 = vld [vmem:[%s11350_s7 + $0x10c8] sm:$0xff] }
0x190f   : > { %8390 = vmatmul.msk.f32.vlgmr.msra.gmra.mxu3 %vm1125_vm6, %v10522_v17  ;;  %8392 = vmatmul.msk.f32.vlgmr.msra.gmra.mxu0 %vm1125_vm6, %v10522_v17 }
0x1910   : > { %v5347_v22 = vsel %vm5346_vm13, %v8936_v14, %v5343_v19  ;;  %8394 = vmatmul.msk.f32.vlgmr.msrb.gmra.mxu1 %vm1125_vm6, %v10522_v17  ;;  %8396 = vmatmul.msk.f32.vlgmr.msrb.gmra.mxu2 %vm1125_vm6, %v10522_v17  ;;  %v8434_v14 = vld [vmem:[%s11350_s7 + $0x1060] sm:$0xff]  ;;  %v8463_v19 = vld [vmem:[%s11350_s7 + $0x1148] sm:$0xff] }
0x1911   : > { %v5349_v25 = vmul.f32 %v5347_v22, %v10480_v4  ;;  %5664 = vmatpush.msra.mxu3 %v8380_v20  ;;  %5687 = vmatpush.msra.mxu0 %v8381_v48  ;;  %v8431_v20 = vld [vmem:[%s11350_s7 + $0x1048] sm:$0xff]  ;;  %v8430_v22 = vld [vmem:[%s11350_s7 + $0x1040] sm:$0xff] }
0x1912   : > { %5710 = vmatpush.msrb.mxu1 %v8382_v56  ;;  %5733 = vmatpush.msrb.mxu2 %v8383_v21  ;;  %v8479_v48 = vld [vmem:[%s11350_s7 + $0x11c8] sm:$0xff]  ;;  %v8446_v56 = vld [vmem:[%s11350_s7 + $0x10c0] sm:$0xff] }
0x1913   : > { %v5354_v11 = vmul.f32 %v8861_v18, %v5349_v25  ;;  %5665 = vmatpush.msra.mxu3 %v8364_v23  ;;  %5688 = vmatpush.msra.mxu0 %v8365_v8  ;;  %v8465_v18 = vld [vmem:[%s11350_s7 + $0x1158] sm:$0xff]  ;;  %v8462_v21 = vld [vmem:[%s11350_s7 + $0x1140] sm:$0xff] }
0x1914   : > { %5711 = vmatpush.msrb.mxu1 %v8366_v26  ;;  %5734 = vmatpush.msrb.mxu2 %v8367_v27  ;;  %v8478_v23 = vld [vmem:[%s11350_s7 + $0x11c0] sm:$0xff]  ;;  %v8445_v8 = vld [vmem:[%s11350_s7 + $0x10b8] sm:$0xff] }
0x1915   : > { %v10545_v4 = vadd.f32 %v8862_v10, %v5354_v11  ;;  %5666 = vmatpush.msra.mxu3 %v8348_v28  ;;  %5689 = vmatpush.msra.mxu0 %v8349_v30  ;;  %v8448_v10 = vld [vmem:[%s11350_s7 + $0x10d0] sm:$0xff]  ;;  %v8461_v25 = vld [vmem:[%s11350_s7 + $0x1138] sm:$0xff] }
0x1916   : > { %5712 = vmatpush.msrb.mxu1 %v8350_v31  ;;  %5735 = vmatpush.msrb.mxu2 %v8351_v36  ;;  %v8429_v26 = vld [vmem:[%s11350_s7 + $0x1038] sm:$0xff]  ;;  %v8444_v28 = vld [vmem:[%s11350_s7 + $0x10b0] sm:$0xff]  ;;  %v8443_v36 = vld [vmem:[%s11350_s7 + $0x10a8] sm:$0xff] }
0x1917   : > { %8391 = vmatmul.msk.f32.gmra.mxu3 %vm1125_vm6, %v10545_v4  ;;  %8393 = vmatmul.msk.f32.gmra.mxu0 %vm1125_vm6, %v10545_v4  ;;  %v8477_v27 = vld [vmem:[%s11350_s7 + $0x11b8] sm:$0xff]  ;;  %v8460_v30 = vld [vmem:[%s11350_s7 + $0x1130] sm:$0xff] }
0x1918   : > { %8395 = vmatmul.msk.f32.gmra.mxu1 %vm1125_vm6, %v10545_v4  ;;  %8397 = vmatmul.msk.f32.gmra.mxu2 %vm1125_vm6, %v10545_v4  ;;  %v8428_v11 = vld [vmem:[%s11350_s7 + $0x1030] sm:$0xff] }
0x1919   : > { %5667 = vmatpush.msra.mxu3 %v8332_v32  ;;  %5690 = vmatpush.msra.mxu0 %v8333_v33  ;;  %v8476_v31 = vld [vmem:[%s11350_s7 + $0x11b0] sm:$0xff]  ;;  %v8459_v32 = vld [vmem:[%s11350_s7 + $0x1128] sm:$0xff] }
0x191a   : > { %5713 = vmatpush.msrb.mxu1 %v8334_v16  ;;  %5736 = vmatpush.msrb.mxu2 %v8335_v24  ;;  %v8427_v33 = vld [vmem:[%s11350_s7 + $0x1028] sm:$0xff]  ;;  %v8442_v24 = vld [vmem:[%s11350_s7 + $0x10a0] sm:$0xff] }
0x191b   : > { %v8475_v16 = vld [vmem:[%s11350_s7 + $0x11a8] sm:$0xff] }
0x191f   : > { %8398 = vmatmul.msk.f32.vlgmr.msrb.gmra.mxu3 %vm1125_vm6, %v10522_v17  ;;  %8400 = vmatmul.msk.f32.vlgmr.msrb.gmra.mxu0 %vm1125_vm6, %v10522_v17 }
0x1920   : > { %8402 = vmatmul.msk.f32.vlgmr.msra.gmra.mxu1 %vm1125_vm6, %v10522_v17  ;;  %8404 = vmatmul.msk.f32.vlgmr.msra.gmra.mxu2 %vm1125_vm6, %v10522_v17 }
0x1921   : > { %5756 = vmatpush.msrb.mxu3 %v8384_v12  ;;  %5779 = vmatpush.msrb.mxu0 %v8385_v34  ;;  %v8458_v12 = vld [vmem:[%s11350_s7 + $0x1120] sm:$0xff] }
0x1922   : > { %5802 = vmatpush.msra.mxu1 %v8386_v35  ;;  %5825 = vmatpush.msra.mxu2 %v8387_v29  ;;  %v8426_v34 = vld [vmem:[%s11350_s7 + $0x1020] sm:$0xff]  ;;  %v8441_v29 = vld [vmem:[%s11350_s7 + $0x1098] sm:$0xff] }
0x1923   : > { %5757 = vmatpush.msrb.mxu3 %v8368_v37  ;;  %5780 = vmatpush.msrb.mxu0 %v8369_v38  ;;  %v8474_v35 = vld [vmem:[%s11350_s7 + $0x11a0] sm:$0xff]  ;;  %v8457_v37 = vld [vmem:[%s11350_s7 + $0x1118] sm:$0xff] }
0x1924   : > { %5803 = vmatpush.msra.mxu1 %v8370_v39  ;;  %5826 = vmatpush.msra.mxu2 %v8371_v40  ;;  %v8425_v38 = vld [vmem:[%s11350_s7 + $0x1018] sm:$0xff]  ;;  %v8440_v40 = vld [vmem:[%s11350_s7 + $0x1090] sm:$0xff] }
0x1925   : > { %5758 = vmatpush.msrb.mxu3 %v8352_v41  ;;  %5781 = vmatpush.msrb.mxu0 %v8353_v43  ;;  %v8473_v39 = vld [vmem:[%s11350_s7 + $0x1198] sm:$0xff]  ;;  %v8456_v41 = vld [vmem:[%s11350_s7 + $0x1110] sm:$0xff] }
0x1926   : > { %5804 = vmatpush.msra.mxu1 %v8354_v44  ;;  %5827 = vmatpush.msra.mxu2 %v8355_v46  ;;  %v8424_v43 = vld [vmem:[%s11350_s7 + $0x1010] sm:$0xff]  ;;  %v8439_v46 = vld [vmem:[%s11350_s7 + $0x1088] sm:$0xff] }
0x1927   : > { %8399 = vmatmul.msk.f32.gmra.mxu3 %vm1125_vm6, %v10545_v4  ;;  %8401 = vmatmul.msk.f32.gmra.mxu0 %vm1125_vm6, %v10545_v4  ;;  %v8472_v44 = vld [vmem:[%s11350_s7 + $0x1190] sm:$0xff] }
0x1928   : > { %8403 = vmatmul.msk.f32.gmra.mxu1 %vm1125_vm6, %v10545_v4  ;;  %8405 = vmatmul.msk.f32.gmra.mxu2 %vm1125_vm6, %v10545_v4 }
0x1929   : > { %5759 = vmatpush.msrb.mxu3 %v8336_v47  ;;  %5782 = vmatpush.msrb.mxu0 %v8337_v49  ;;  %v8455_v47 = vld [vmem:[%s11350_s7 + $0x1108] sm:$0xff] }
0x192a   : > { %5805 = vmatpush.msra.mxu1 %v8338_v50  ;;  %5828 = vmatpush.msra.mxu2 %v8339_v51  ;;  %v8423_v49 = vld [vmem:[%s11350_s7 + $0x1008] sm:$0xff]  ;;  %v8438_v51 = vld [vmem:[%s11350_s7 + $0x1080] sm:$0xff] }
0x192b   : > { %v8471_v50 = vld [vmem:[%s11350_s7 + $0x1188] sm:$0xff] }
0x192f   : > { %8406 = vmatmul.msk.f32.vlgmr.msra.gmra.mxu3 %vm1125_vm6, %v10522_v17  ;;  %8408 = vmatmul.msk.f32.vlgmr.msra.gmra.mxu0 %vm1125_vm6, %v10522_v17 }
0x1930   : > { %8410 = vmatmul.msk.f32.vlgmr.msrb.gmra.mxu1 %vm1125_vm6, %v10522_v17  ;;  %8412 = vmatmul.msk.f32.vlgmr.msrb.gmra.mxu2 %vm1125_vm6, %v10522_v17 }
0x1931   : > { %6153 = vmatpush.msra.mxu0 %v8453_v53  ;;  %6176 = vmatpush.msrb.mxu1 %v8469_v54  ;;  %v8454_v53 = vld [vmem:[%s11350_s7 + $0x1100] sm:$0xff]  ;;  %v8517_v54 = vld [vmem:[%s11350_s7 + $0x12f8] sm:$0xff] }
0x1932   : > { %6130 = vmatpush.msra.mxu3 %v8437_v55  ;;  %6199 = vmatpush.msrb.mxu2 %v8485_v57  ;;  %v8533_v55 = vld [vmem:[%s11350_s7 + $0x1378] sm:$0xff]  ;;  %v8422_v57 = vld [vmem:[%s11350_s7 + $0x1000] sm:$0xff] }
0x1933   : > { %6154 = vmatpush.msra.mxu0 %v8452_v58  ;;  %6177 = vmatpush.msrb.mxu1 %v8468_v59  ;;  %v8470_v58 = vld [vmem:[%s11350_s7 + $0x1180] sm:$0xff]  ;;  %v8516_v59 = vld [vmem:[%s11350_s7 + $0x12f0] sm:$0xff] }
0x1934   : > { %6131 = vmatpush.msra.mxu3 %v8436_v60  ;;  %6200 = vmatpush.msrb.mxu2 %v8484_v9  ;;  %v8532_v60 = vld [vmem:[%s11350_s7 + $0x1370] sm:$0xff]  ;;  %v8501_v9 = vld [vmem:[%s11350_s7 + $0x1278] sm:$0xff] }
0x1935   : > { %6155 = vmatpush.msra.mxu0 %v8451_v61  ;;  %6178 = vmatpush.msrb.mxu1 %v8467_v62  ;;  %v8549_v61 = vld [vmem:[%s11350_s7 + $0x13f8] sm:$0xff]  ;;  %v8515_v62 = vld [vmem:[%s11350_s7 + $0x12e8] sm:$0xff] }
0x1936   : > { %6132 = vmatpush.msra.mxu3 %v8435_v63  ;;  %6201 = vmatpush.msrb.mxu2 %v8483_v13  ;;  %v8531_v63 = vld [vmem:[%s11350_s7 + $0x1368] sm:$0xff]  ;;  %v8500_v13 = vld [vmem:[%s11350_s7 + $0x1270] sm:$0xff] }
0x1937   : > { %8407 = vmatmul.msk.f32.gmra.mxu3 %vm1125_vm6, %v10545_v4  ;;  %8409 = vmatmul.msk.f32.gmra.mxu0 %vm1125_vm6, %v10545_v4 }
0x1938   : > { %8411 = vmatmul.msk.f32.gmra.mxu1 %vm1125_vm6, %v10545_v4  ;;  %8413 = vmatmul.msk.f32.gmra.mxu2 %vm1125_vm6, %v10545_v4 }
0x1939   : > { %6156 = vmatpush.msra.mxu0 %v8450_v0  ;;  %6179 = vmatpush.msrb.mxu1 %v8466_v1  ;;  %v8548_v0 = vld [vmem:[%s11350_s7 + $0x13f0] sm:$0xff]  ;;  %v8514_v1 = vld [vmem:[%s11350_s7 + $0x12e0] sm:$0xff] }
0x193a   : > { %6133 = vmatpush.msra.mxu3 %v8434_v14  ;;  %6202 = vmatpush.msrb.mxu2 %v8482_v2  ;;  %v8530_v14 = vld [vmem:[%s11350_s7 + $0x1360] sm:$0xff]  ;;  %v8499_v2 = vld [vmem:[%s11350_s7 + $0x1268] sm:$0xff] }
0x193b   : > { %6157 = vmatpush.msra.mxu0 %v8449_v3  ;;  %6180 = vmatpush.msrb.mxu1 %v8465_v18  ;;  %v8547_v3 = vld [vmem:[%s11350_s7 + $0x13e8] sm:$0xff]  ;;  %v8513_v18 = vld [vmem:[%s11350_s7 + $0x12d8] sm:$0xff] }
0x193c   : > { %6134 = vmatpush.msra.mxu3 %v8433_v5  ;;  %6203 = vmatpush.msrb.mxu2 %v8481_v7  ;;  %v8529_v5 = vld [vmem:[%s11350_s7 + $0x1358] sm:$0xff]  ;;  %v8498_v7 = vld [vmem:[%s11350_s7 + $0x1260] sm:$0xff] }
0x193d   : > { %6158 = vmatpush.msra.mxu0 %v8448_v10  ;;  %6181 = vmatpush.msrb.mxu1 %v8464_v42  ;;  %v8546_v10 = vld [vmem:[%s11350_s7 + $0x13e0] sm:$0xff]  ;;  %v8512_v42 = vld [vmem:[%s11350_s7 + $0x12d0] sm:$0xff] }
0x193e   : > { %6135 = vmatpush.msra.mxu3 %v8432_v15  ;;  %6204 = vmatpush.msrb.mxu2 %v8480_v45  ;;  %v8528_v15 = vld [vmem:[%s11350_s7 + $0x1350] sm:$0xff]  ;;  %v8497_v45 = vld [vmem:[%s11350_s7 + $0x1258] sm:$0xff] }
0x193f   : > { %8414 = vmatmul.msk.f32.vlgmr.msrb.gmra.mxu3 %vm1125_vm6, %v10522_v17  ;;  %8416 = vmatmul.msk.f32.vlgmr.msrb.gmra.mxu0 %vm1125_vm6, %v10522_v17 }
0x1940   : > { %8418 = vmatmul.msk.f32.vlgmr.msra.gmra.mxu1 %vm1125_vm6, %v10522_v17  ;;  %8420 = vmatmul.msk.f32.vlgmr.msra.gmra.mxu2 %vm1125_vm6, %v10522_v17 }
0x1941   : > { %6159 = vmatpush.msra.mxu0 %v8447_v52  ;;  %6182 = vmatpush.msrb.mxu1 %v8463_v19  ;;  %v8545_v52 = vld [vmem:[%s11350_s7 + $0x13d8] sm:$0xff]  ;;  %v8511_v19 = vld [vmem:[%s11350_s7 + $0x12c8] sm:$0xff] }
0x1942   : > { %6136 = vmatpush.msra.mxu3 %v8431_v20  ;;  %6205 = vmatpush.msrb.mxu2 %v8479_v48  ;;  %v8527_v20 = vld [vmem:[%s11350_s7 + $0x1348] sm:$0xff]  ;;  %v8496_v48 = vld [vmem:[%s11350_s7 + $0x1250] sm:$0xff] }
0x1943   : > { %6160 = vmatpush.msra.mxu0 %v8446_v56  ;;  %6183 = vmatpush.msrb.mxu1 %v8462_v21  ;;  %v8544_v56 = vld [vmem:[%s11350_s7 + $0x13d0] sm:$0xff]  ;;  %v8510_v21 = vld [vmem:[%s11350_s7 + $0x12c0] sm:$0xff] }
0x1944   : > { %6137 = vmatpush.msra.mxu3 %v8430_v22  ;;  %6206 = vmatpush.msrb.mxu2 %v8478_v23  ;;  %v8526_v22 = vld [vmem:[%s11350_s7 + $0x1340] sm:$0xff]  ;;  %v8495_v23 = vld [vmem:[%s11350_s7 + $0x1248] sm:$0xff] }
0x1945   : > { %6161 = vmatpush.msra.mxu0 %v8445_v8  ;;  %6184 = vmatpush.msrb.mxu1 %v8461_v25  ;;  %v8543_v8 = vld [vmem:[%s11350_s7 + $0x13c8] sm:$0xff]  ;;  %v8509_v25 = vld [vmem:[%s11350_s7 + $0x12b8] sm:$0xff] }
0x1946   : > { %6138 = vmatpush.msra.mxu3 %v8429_v26  ;;  %6207 = vmatpush.msrb.mxu2 %v8477_v27  ;;  %v8525_v26 = vld [vmem:[%s11350_s7 + $0x1338] sm:$0xff]  ;;  %v8494_v27 = vld [vmem:[%s11350_s7 + $0x1240] sm:$0xff] }
0x1947   : > { %8415 = vmatmul.msk.f32.gmra.mxu3 %vm1125_vm6, %v10545_v4  ;;  %8417 = vmatmul.msk.f32.gmra.mxu0 %vm1125_vm6, %v10545_v4 }
0x1948   : > { %8419 = vmatmul.msk.f32.gmra.mxu1 %vm1125_vm6, %v10545_v4  ;;  %8421 = vmatmul.msk.f32.gmra.mxu2 %vm1125_vm6, %v10545_v4 }
0x1949   : > { %6162 = vmatpush.msra.mxu0 %v8444_v28  ;;  %6185 = vmatpush.msrb.mxu1 %v8460_v30  ;;  %v8542_v28 = vld [vmem:[%s11350_s7 + $0x13c0] sm:$0xff]  ;;  %v8508_v30 = vld [vmem:[%s11350_s7 + $0x12b0] sm:$0xff] }
0x194a   : > { %6139 = vmatpush.msra.mxu3 %v8428_v11  ;;  %6208 = vmatpush.msrb.mxu2 %v8476_v31  ;;  %v8524_v11 = vld [vmem:[%s11350_s7 + $0x1330] sm:$0xff]  ;;  %v8493_v31 = vld [vmem:[%s11350_s7 + $0x1238] sm:$0xff] }
0x194b   : > { %6163 = vmatpush.msra.mxu0 %v8443_v36  ;;  %6186 = vmatpush.msrb.mxu1 %v8459_v32  ;;  %v8541_v36 = vld [vmem:[%s11350_s7 + $0x13b8] sm:$0xff]  ;;  %v8507_v32 = vld [vmem:[%s11350_s7 + $0x12a8] sm:$0xff] }
0x194c   : > { %6140 = vmatpush.msra.mxu3 %v8427_v33  ;;  %6209 = vmatpush.msrb.mxu2 %v8475_v16  ;;  %v8523_v33 = vld [vmem:[%s11350_s7 + $0x1328] sm:$0xff]  ;;  %v8492_v16 = vld [vmem:[%s11350_s7 + $0x1230] sm:$0xff] }
0x194d   : > { %6164 = vmatpush.msra.mxu0 %v8442_v24  ;;  %6187 = vmatpush.msrb.mxu1 %v8458_v12  ;;  %v8540_v24 = vld [vmem:[%s11350_s7 + $0x13b0] sm:$0xff]  ;;  %v8506_v12 = vld [vmem:[%s11350_s7 + $0x12a0] sm:$0xff] }
0x194e   : > { %6141 = vmatpush.msra.mxu3 %v8426_v34  ;;  %6210 = vmatpush.msrb.mxu2 %v8474_v35  ;;  %v8522_v34 = vld [vmem:[%s11350_s7 + $0x1320] sm:$0xff]  ;;  %v8505_v35 = vld [vmem:[%s11350_s7 + $0x1298] sm:$0xff] }
0x194f   : > { %6165 = vmatpush.msra.mxu0 %v8441_v29  ;;  %6188 = vmatpush.msrb.mxu1 %v8457_v37  ;;  %v8521_v29 = vld [vmem:[%s11350_s7 + $0x1318] sm:$0xff]  ;;  %v8491_v37 = vld [vmem:[%s11350_s7 + $0x1228] sm:$0xff] }
0x1950   : > { %6142 = vmatpush.msra.mxu3 %v8425_v38  ;;  %6211 = vmatpush.msrb.mxu2 %v8473_v39  ;;  %v8504_v38 = vld [vmem:[%s11350_s7 + $0x1290] sm:$0xff] }
0x1951   : > { %6166 = vmatpush.msra.mxu0 %v8440_v40  ;;  %6189 = vmatpush.msrb.mxu1 %v8456_v41  ;;  %v8520_v39 = vld [vmem:[%s11350_s7 + $0x1310] sm:$0xff]  ;;  %v8539_v40 = vld [vmem:[%s11350_s7 + $0x13a8] sm:$0xff]  ;;  %v8490_v41 = vld [vmem:[%s11350_s7 + $0x1220] sm:$0xff] }
0x1952   : > { %6143 = vmatpush.msra.mxu3 %v8424_v43  ;;  %6212 = vmatpush.msrb.mxu2 %v8472_v44  ;;  %v8503_v43 = vld [vmem:[%s11350_s7 + $0x1288] sm:$0xff] }
0x1953   : > { %6167 = vmatpush.msra.mxu0 %v8439_v46  ;;  %6190 = vmatpush.msrb.mxu1 %v8455_v47  ;;  %v8519_v44 = vld [vmem:[%s11350_s7 + $0x1308] sm:$0xff]  ;;  %v8538_v46 = vld [vmem:[%s11350_s7 + $0x13a0] sm:$0xff]  ;;  %v8489_v47 = vld [vmem:[%s11350_s7 + $0x1218] sm:$0xff] }
0x1954   : > { %6144 = vmatpush.msra.mxu3 %v8423_v49  ;;  %6213 = vmatpush.msrb.mxu2 %v8471_v50  ;;  %v8502_v49 = vld [vmem:[%s11350_s7 + $0x1280] sm:$0xff] }
0x1955   : > { %6168 = vmatpush.msra.mxu0 %v8438_v51  ;;  %6191 = vmatpush.msrb.mxu1 %v8454_v53  ;;  %v8518_v50 = vld [vmem:[%s11350_s7 + $0x1300] sm:$0xff]  ;;  %v8537_v51 = vld [vmem:[%s11350_s7 + $0x1398] sm:$0xff]  ;;  %v8488_v53 = vld [vmem:[%s11350_s7 + $0x1210] sm:$0xff] }
0x1956   : > { %6145 = vmatpush.msra.mxu3 %v8422_v57  ;;  %6214 = vmatpush.msrb.mxu2 %v8470_v58  ;;  %v8535_v57 = vld [vmem:[%s11350_s7 + $0x1388] sm:$0xff]  ;;  %v8486_v58 = vld [vmem:[%s11350_s7 + $0x1200] sm:$0xff] }
0x1957   : > { %6245 = vmatpush.msrb.mxu0 %v8517_v54  ;;  %6268 = vmatpush.msra.mxu1 %v8533_v55  ;;  %v8536_v54 = vld [vmem:[%s11350_s7 + $0x1390] sm:$0xff]  ;;  %v8487_v55 = vld [vmem:[%s11350_s7 + $0x1208] sm:$0xff] }
0x1958   : > { %6222 = vmatpush.msrb.mxu3 %v8501_v9  ;;  %6291 = vmatpush.msra.mxu2 %v8549_v61 }
0x1959   : > { %6246 = vmatpush.msrb.mxu0 %v8516_v59  ;;  %6269 = vmatpush.msra.mxu1 %v8532_v60  ;;  %v8534_v59 = vld [vmem:[%s11350_s7 + $0x1380] sm:$0xff] }
0x195a   : > { %6223 = vmatpush.msrb.mxu3 %v8500_v13  ;;  %6292 = vmatpush.msra.mxu2 %v8548_v0  ;;  %v10752_v60 = vld [vmem:[%s11351_s10 + $0x20] sm:$0xff] }
0x195b   : > { %6247 = vmatpush.msrb.mxu0 %v8515_v62  ;;  %6270 = vmatpush.msra.mxu1 %v8531_v63  ;;  %v5431_v9 = vperm.slane %v10752_v60, 1  ;;  %v5432_v61 = vperm.slane %v10752_v60, 2 }
0x195c   : > { %6224 = vmatpush.msrb.mxu3 %v8499_v2  ;;  %6293 = vmatpush.msra.mxu2 %v8547_v3  ;;  %v5430_v2 = vperm.slane %v10752_v60, 0 }
0x195d   : > { %6248 = vmatpush.msrb.mxu0 %v8514_v1  ;;  %6271 = vmatpush.msra.mxu1 %v8530_v14  ;;  %v8581_v14 = vld [vmem:[%s11350_s7 + $0x14f8] sm:$0xff] }
0x195e   : > { %6225 = vmatpush.msrb.mxu3 %v8498_v7  ;;  %6294 = vmatpush.msra.mxu2 %v8546_v10  ;;  %v8580_v7 = vld [vmem:[%s11350_s7 + $0x14f0] sm:$0xff] }
0x195f   : > { %6249 = vmatpush.msrb.mxu0 %v8513_v18  ;;  %6272 = vmatpush.msra.mxu1 %v8529_v5  ;;  %v8597_v18 = vld [vmem:[%s11350_s7 + $0x1578] sm:$0xff]  ;;  %v5433_v5 = vperm.slane %v10752_v60, 3 }
0x1960   : > { %6226 = vmatpush.msrb.mxu3 %v8497_v45  ;;  %6295 = vmatpush.msra.mxu2 %v8545_v52  ;;  %v8579_v52 = vld [vmem:[%s11350_s7 + $0x14e8] sm:$0xff] }
0x1961   : > { %6250 = vmatpush.msrb.mxu0 %v8512_v42  ;;  %6273 = vmatpush.msra.mxu1 %v8528_v15  ;;  %v8596_v42 = vld [vmem:[%s11350_s7 + $0x1570] sm:$0xff] }
0x1962   : > { %6227 = vmatpush.msrb.mxu3 %v8496_v48  ;;  %6296 = vmatpush.msra.mxu2 %v8544_v56  ;;  %v8595_v48 = vld [vmem:[%s11350_s7 + $0x1568] sm:$0xff] }
0x1963   : > { %6251 = vmatpush.msrb.mxu0 %v8511_v19  ;;  %6274 = vmatpush.msra.mxu1 %v8527_v20 }
0x1964   : > { %6228 = vmatpush.msrb.mxu3 %v8495_v23  ;;  %6297 = vmatpush.msra.mxu2 %v8543_v8  ;;  %v8565_v23 = vld [vmem:[%s11350_s7 + $0x1478] sm:$0xff] }
0x1965   : > { %6252 = vmatpush.msrb.mxu0 %v8510_v21  ;;  %6275 = vmatpush.msra.mxu1 %v8526_v22 }
0x1966   : > { %6229 = vmatpush.msrb.mxu3 %v8494_v27  ;;  %6298 = vmatpush.msra.mxu2 %v8542_v28  ;;  %v8594_v27 = vld [vmem:[%s11350_s7 + $0x1560] sm:$0xff] }
0x1967   : > { %6253 = vmatpush.msrb.mxu0 %v8509_v25  ;;  %6276 = vmatpush.msra.mxu1 %v8525_v26  ;;  %v8578_v26 = vld [vmem:[%s11350_s7 + $0x14e0] sm:$0xff] }
0x1968   : > { %6230 = vmatpush.msrb.mxu3 %v8493_v31  ;;  %6299 = vmatpush.msra.mxu2 %v8541_v36  ;;  %v8564_v31 = vld [vmem:[%s11350_s7 + $0x1470] sm:$0xff]  ;;  %v8577_v36 = vld [vmem:[%s11350_s7 + $0x14d8] sm:$0xff] }
0x1969   : > { %6254 = vmatpush.msrb.mxu0 %v8508_v30  ;;  %6277 = vmatpush.msra.mxu1 %v8524_v11  ;;  %v8613_v30 = vld [vmem:[%s11350_s7 + $0x15f8] sm:$0xff] }
0x196a   : > { %6231 = vmatpush.msrb.mxu3 %v8492_v16  ;;  %6300 = vmatpush.msra.mxu2 %v8540_v24  ;;  %v8612_v16 = vld [vmem:[%s11350_s7 + $0x15f0] sm:$0xff] }
0x196b   : > { %6255 = vmatpush.msrb.mxu0 %v8507_v32  ;;  %6278 = vmatpush.msra.mxu1 %v8523_v33  ;;  %v8593_v32 = vld [vmem:[%s11350_s7 + $0x1558] sm:$0xff]  ;;  %v5435_v33 = vperm.slane %v10752_v60, 5 }
0x196c   : > { %6232 = vmatpush.msrb.mxu3 %v8491_v37  ;;  %6301 = vmatpush.msra.mxu2 %v8539_v40  ;;  %v8576_v37 = vld [vmem:[%s11350_s7 + $0x14d0] sm:$0xff]  ;;  %v8611_v40 = vld [vmem:[%s11350_s7 + $0x15e8] sm:$0xff] }
0x196d   : > { %6256 = vmatpush.msrb.mxu0 %v8506_v12  ;;  %6279 = vmatpush.msra.mxu1 %v8522_v34  ;;  %v8563_v12 = vld [vmem:[%s11350_s7 + $0x1468] sm:$0xff]  ;;  %v5436_v34 = vperm.slane %v10752_v60, 6 }
0x196e   : > { %6233 = vmatpush.msrb.mxu3 %v8490_v41  ;;  %6302 = vmatpush.msra.mxu2 %v8538_v46 }
0x196f   : > { %6257 = vmatpush.msrb.mxu0 %v8505_v35  ;;  %6280 = vmatpush.msra.mxu1 %v8521_v29 }
0x1970   : > { %6234 = vmatpush.msrb.mxu3 %v8489_v47  ;;  %6303 = vmatpush.msra.mxu2 %v8537_v51 }
0x1971   : > { %6258 = vmatpush.msrb.mxu0 %v8504_v38  ;;  %6281 = vmatpush.msra.mxu1 %v8520_v39  ;;  %v8592_v38 = vld [vmem:[%s11350_s7 + $0x1550] sm:$0xff] }
0x1972   : > { %6235 = vmatpush.msrb.mxu3 %v8488_v53  ;;  %6304 = vmatpush.msra.mxu2 %v8536_v54  ;;  %v8610_v54 = vld [vmem:[%s11350_s7 + $0x15e0] sm:$0xff] }
0x1973   : > { %6259 = vmatpush.msrb.mxu0 %v8503_v43  ;;  %6282 = vmatpush.msra.mxu1 %v8519_v44  ;;  %v8562_v43 = vld [vmem:[%s11350_s7 + $0x1460] sm:$0xff] }
0x1974   : > { %6236 = vmatpush.msrb.mxu3 %v8487_v55  ;;  %6305 = vmatpush.msra.mxu2 %v8535_v57  ;;  %v8561_v55 = vld [vmem:[%s11350_s7 + $0x1458] sm:$0xff]  ;;  %v5434_v57 = vperm.slane %v10752_v60, 4 }
0x1975   : > { %6260 = vmatpush.msrb.mxu0 %v8502_v49  ;;  %6283 = vmatpush.msra.mxu1 %v8518_v50  ;;  %v8575_v49 = vld [vmem:[%s11350_s7 + $0x14c8] sm:$0xff] }
0x1976   : > { %6237 = vmatpush.msrb.mxu3 %v8486_v58  ;;  %6306 = vmatpush.msra.mxu2 %v8534_v59  ;;  %v8591_v50 = vld [vmem:[%s11350_s7 + $0x1548] sm:$0xff]  ;;  %v8574_v59 = vld [vmem:[%s11350_s7 + $0x14c0] sm:$0xff] }
0x198c   : > { %v5508_v62 = vpop.f32.mrf.mxu0 }
0x198d   : > { %v5509_v63 = vadd.f32 %v5508_v62, %v5431_v9  ;;  %v5531_v13 = vpop.f32.mrf.mxu1 }
0x198e   : > { %v5532_v0 = vadd.f32 %v5531_v13, %v5432_v61  ;;  %v8560_v13 = vld [vmem:[%s11350_s7 + $0x1450] sm:$0xff] }
0x198f   : > { %v5837_v1 = vmax.f32 %v5509_v63, 0.0  ;;  %v8609_v63 = vld [vmem:[%s11350_s7 + $0x15d8] sm:$0xff] }
0x1990   : > { %v5838_v3 = vmax.f32 %v5532_v0, 0.0 }
0x1991   : > { %6169 = vmatmul.f32.vlgmr.msra.gmra.mxu0 %v5837_v1  ;;  %v8573_v1 = vld [vmem:[%s11350_s7 + $0x14b8] sm:$0xff] }
0x1992   : > { %6192 = vmatmul.f32.vlgmr.msrb.gmra.mxu1 %v5838_v3  ;;  %6337 = vmatpush.msra.mxu0 %v8581_v14  ;;  %v5485_v10 = vpop.f32.mrf.mxu3  ;;  %v8589_v14 = vld [vmem:[%s11350_s7 + $0x1538] sm:$0xff] }
0x1993   : > { %6360 = vmatpush.msrb.mxu1 %v8597_v18  ;;  %v5486_v15 = vadd.f32 %v5485_v10, %v5430_v2  ;;  %v5554_v45 = vpop.f32.mrf.mxu2  ;;  %v8608_v18 = vld [vmem:[%s11350_s7 + $0x15d0] sm:$0xff] }
0x1994   : > { %v5555_v19 = vadd.f32 %v5554_v45, %v5433_v5  ;;  %6338 = vmatpush.msra.mxu0 %v8580_v7  ;;  %v5511_v20 = vpop.f32.mrf.mxu0  ;;  %v8559_v7 = vld [vmem:[%s11350_s7 + $0x1448] sm:$0xff] }
0x1995   : > { %v5836_v56 = vmax.f32 %v5486_v15, 0.0  ;;  %6361 = vmatpush.msrb.mxu1 %v8596_v42  ;;  %v5512_v21 = vadd.f32 %v5511_v20, %v5431_v9  ;;  %v5534_v22 = vpop.f32.mrf.mxu1  ;;  %v8590_v9 = vld [vmem:[%s11350_s7 + $0x1540] sm:$0xff]  ;;  %v8572_v42 = vld [vmem:[%s11350_s7 + $0x14b0] sm:$0xff] }
0x1996   : > { %v5839_v8 = vmax.f32 %v5555_v19, 0.0  ;;  %v5535_v25 = vadd.f32 %v5534_v22, %v5432_v61  ;;  %6339 = vmatpush.msra.mxu0 %v8579_v52  ;;  %v5437_v61 = vperm.slane %v10752_v60, 7  ;;  %v8588_v15 = vld [vmem:[%s11350_s7 + $0x1530] sm:$0xff]  ;;  %v8607_v52 = vld [vmem:[%s11350_s7 + $0x15c8] sm:$0xff]  ;;  %v8558_v20 = vld [vmem:[%s11350_s7 + $0x1440] sm:$0xff] }
0x1997   : > { %v5853_v28 = vmax.f32 %v5512_v21, 0.0  ;;  %6362 = vmatpush.msrb.mxu1 %v8595_v48  ;;  %6146 = vmatmul.f32.vlgmr.msra.gmra.mxu3 %v5836_v56  ;;  %v8571_v21 = vld [vmem:[%s11350_s7 + $0x14a8] sm:$0xff]  ;;  %v8554_v60 = vld [vmem:[%s11350_s7 + $0x1420] sm:$0xff] }
0x1998   : > { %v5854_v11 = vmax.f32 %v5535_v25, 0.0  ;;  %6215 = vmatmul.f32.vlgmr.msrb.gmra.mxu2 %v5839_v8  ;;  %6314 = vmatpush.msra.mxu3 %v8565_v23  ;;  %v8587_v22 = vld [vmem:[%s11350_s7 + $0x1528] sm:$0xff]  ;;  %v8606_v8 = vld [vmem:[%s11350_s7 + $0x15c0] sm:$0xff]  ;;  %v8557_v25 = vld [vmem:[%s11350_s7 + $0x1438] sm:$0xff] }
0x1999   : > { %6340 = vmatpush.msra.mxu0 %v8578_v26  ;;  %6363 = vmatpush.msrb.mxu1 %v8594_v27  ;;  %v8570_v27 = vld [vmem:[%s11350_s7 + $0x14a0] sm:$0xff] }
0x199a   : > { %6383 = vmatpush.msrb.mxu2 %v8613_v30  ;;  %6172 = vmatmul.f32.gmra.mxu0 %v5853_v28  ;;  %v5488_v24 = vpop.f32.mrf.mxu3  ;;  %v8586_v28 = vld [vmem:[%s11350_s7 + $0x1520] sm:$0xff] }
0x199b   : > { %6195 = vmatmul.f32.gmra.mxu1 %v5854_v11  ;;  %6315 = vmatpush.msra.mxu3 %v8564_v31  ;;  %v5489_v35 = vadd.f32 %v5488_v24, %v5430_v2  ;;  %v5557_v29 = vpop.f32.mrf.mxu2  ;;  %v8605_v31 = vld [vmem:[%s11350_s7 + $0x15b8] sm:$0xff] }
0x199c   : > { %6341 = vmatpush.msra.mxu0 %v8577_v36  ;;  %6364 = vmatpush.msrb.mxu1 %v8593_v32  ;;  %v5558_v39 = vadd.f32 %v5557_v29, %v5433_v5  ;;  %v5600_v41 = vpop.f32.mrf.mxu0  ;;  %v10817_v32 = vld [vmem:[%s11351_s10 + $0x28] sm:$0xff]  ;;  %v8585_v24 = vld [vmem:[%s11350_s7 + $0x1518] sm:$0xff] }
0x199d   : > { %6384 = vmatpush.msrb.mxu2 %v8612_v16  ;;  %v5852_v44 = vmax.f32 %v5489_v35, 0.0  ;;  %6316 = vmatpush.msra.mxu3 %v8563_v12  ;;  %v5601_v46 = vadd.f32 %v5600_v41, %v5435_v33  ;;  %v5623_v47 = vpop.f32.mrf.mxu1  ;;  %v8569_v16 = vld [vmem:[%s11350_s7 + $0x1498] sm:$0xff]  ;;  %v8555_v29 = vld [vmem:[%s11350_s7 + $0x1428] sm:$0xff] }
0x199e   : > { %v5855_v51 = vmax.f32 %v5558_v39, 0.0  ;;  %6342 = vmatpush.msra.mxu0 %v8576_v37  ;;  %6365 = vmatpush.msrb.mxu1 %v8592_v38  ;;  %v5624_v53 = vadd.f32 %v5623_v47, %v5436_v34  ;;  %v5439_v37 = vperm.slane %v10817_v32, 1  ;;  %v5440_v38 = vperm.slane %v10817_v32, 2  ;;  %v8568_v39 = vld [vmem:[%s11350_s7 + $0x1490] sm:$0xff]  ;;  %v8567_v47 = vld [vmem:[%s11350_s7 + $0x1488] sm:$0xff] }
0x199f   : > { %6385 = vmatpush.msrb.mxu2 %v8611_v40  ;;  %6317 = vmatpush.msra.mxu3 %v8562_v43  ;;  %v5841_v58 = vmax.f32 %v5601_v46, 0.0  ;;  %v8584_v40 = vld [vmem:[%s11350_s7 + $0x1510] sm:$0xff] }
0x19a0   : > { %6343 = vmatpush.msra.mxu0 %v8575_v49  ;;  %6366 = vmatpush.msrb.mxu1 %v8591_v50  ;;  %v5842_v62 = vmax.f32 %v5624_v53, 0.0  ;;  %v8583_v49 = vld [vmem:[%s11350_s7 + $0x1508] sm:$0xff] }
0x19a1   : > { %6386 = vmatpush.msrb.mxu2 %v8610_v54  ;;  %6149 = vmatmul.f32.gmra.mxu3 %v5852_v44  ;;  %v8603_v44 = vld [vmem:[%s11350_s7 + $0x15a8] sm:$0xff]  ;;  %v8602_v54 = vld [vmem:[%s11350_s7 + $0x15a0] sm:$0xff] }
0x19a2   : > { %6218 = vmatmul.f32.gmra.mxu2 %v5855_v51  ;;  %6318 = vmatpush.msra.mxu3 %v8561_v55  ;;  %v5577_v0 = vpop.f32.mrf.mxu3  ;;  %v8553_v55 = vld [vmem:[%s11350_s7 + $0x1418] sm:$0xff] }
0x19a3   : > { %6344 = vmatpush.msra.mxu0 %v8574_v59  ;;  %6367 = vmatpush.msrb.mxu1 %v8590_v9  ;;  %v5578_v2 = vadd.f32 %v5577_v0, %v5434_v57  ;;  %v5646_v3 = vpop.f32.mrf.mxu2  ;;  %v8601_v59 = vld [vmem:[%s11350_s7 + $0x1598] sm:$0xff]  ;;  %v8552_v0 = vld [vmem:[%s11350_s7 + $0x1410] sm:$0xff] }
0x19a4   : > { %6387 = vmatpush.msrb.mxu2 %v8609_v63  ;;  %6261 = vmatmul.f32.vlgmr.msrb.gmra.mxu0 %v5841_v58  ;;  %v5647_v5 = vadd.f32 %v5646_v3, %v5437_v61  ;;  %v5603_v10 = vpop.f32.mrf.mxu0  ;;  %v8582_v58 = vld [vmem:[%s11350_s7 + $0x1500] sm:$0xff]  ;;  %v8645_v9 = vld [vmem:[%s11350_s7 + $0x16f8] sm:$0xff]  ;;  %v8600_v3 = vld [vmem:[%s11350_s7 + $0x1590] sm:$0xff] }
0x19a5   : > { %6284 = vmatmul.f32.vlgmr.msra.gmra.mxu1 %v5842_v62  ;;  %6319 = vmatpush.msra.mxu3 %v8560_v13  ;;  %v5626_v45 = vpop.f32.mrf.mxu1  ;;  %v5604_v19 = vadd.f32 %v5603_v10, %v5435_v33  ;;  %v5840_v48 = vmax.f32 %v5578_v2, 0.0  ;;  %v8556_v33 = vld [vmem:[%s11350_s7 + $0x1430] sm:$0xff]  ;;  %v8661_v13 = vld [vmem:[%s11350_s7 + $0x1778] sm:$0xff]  ;;  %v8551_v10 = vld [vmem:[%s11350_s7 + $0x1408] sm:$0xff] }
0x19a6   : > { %6345 = vmatpush.msra.mxu0 %v8573_v1  ;;  %6368 = vmatpush.msrb.mxu1 %v8589_v14  ;;  %v5627_v56 = vadd.f32 %v5626_v45, %v5436_v34  ;;  %v5843_v23 = vmax.f32 %v5647_v5, 0.0  ;;  %v8604_v34 = vld [vmem:[%s11350_s7 + $0x15b0] sm:$0xff]  ;;  %v5441_v14 = vperm.slane %v10817_v32, 3  ;;  %v8599_v45 = vld [vmem:[%s11350_s7 + $0x1588] sm:$0xff] }
0x19a7   : > { %6388 = vmatpush.msrb.mxu2 %v8608_v18  ;;  %6320 = vmatpush.msra.mxu3 %v8559_v7  ;;  %v5857_v26 = vmax.f32 %v5604_v19, 0.0  ;;  %v8644_v18 = vld [vmem:[%s11350_s7 + $0x16f0] sm:$0xff]  ;;  %v8643_v19 = vld [vmem:[%s11350_s7 + $0x16e8] sm:$0xff] }
0x19a8   : > { %6346 = vmatpush.msra.mxu0 %v8572_v42  ;;  %6369 = vmatpush.msrb.mxu1 %v8588_v15  ;;  %v5858_v11 = vmax.f32 %v5627_v56, 0.0  ;;  %v8660_v7 = vld [vmem:[%s11350_s7 + $0x1770] sm:$0xff] }
0x19a9   : > { %6389 = vmatpush.msrb.mxu2 %v8607_v52  ;;  %6321 = vmatpush.msra.mxu3 %v8558_v20  ;;  %v8659_v20 = vld [vmem:[%s11350_s7 + $0x1768] sm:$0xff] }
0x19aa   : > { %6347 = vmatpush.msra.mxu0 %v8571_v21  ;;  %6370 = vmatpush.msrb.mxu1 %v8587_v22  ;;  %v5580_v30 = vpop.f32.mrf.mxu3  ;;  %v8598_v21 = vld [vmem:[%s11350_s7 + $0x1580] sm:$0xff]  ;;  %v8629_v22 = vld [vmem:[%s11350_s7 + $0x1678] sm:$0xff] }
0x19ab   : > { %6390 = vmatpush.msrb.mxu2 %v8606_v8  ;;  %6238 = vmatmul.f32.vlgmr.msrb.gmra.mxu3 %v5840_v48  ;;  %v5649_v36 = vpop.f32.mrf.mxu2  ;;  %v5581_v12 = vadd.f32 %v5580_v30, %v5434_v57  ;;  %v8566_v57 = vld [vmem:[%s11350_s7 + $0x1480] sm:$0xff]  ;;  %v8628_v30 = vld [vmem:[%s11350_s7 + $0x1670] sm:$0xff] }
0x19ac   : > { %6307 = vmatmul.f32.vlgmr.msra.gmra.mxu2 %v5843_v23  ;;  %6322 = vmatpush.msra.mxu3 %v8557_v25  ;;  %v5650_v35 = vadd.f32 %v5649_v36, %v5437_v61  ;;  %v5692_v41 = vpop.f32.mrf.mxu0  ;;  %v5438_v61 = vperm.slane %v10817_v32, 0  ;;  %v8550_v48 = vld [vmem:[%s11350_s7 + $0x1400] sm:$0xff]  ;;  %v8657_v36 = vld [vmem:[%s11350_s7 + $0x1758] sm:$0xff] }
0x19ad   : > { %6348 = vmatpush.msra.mxu0 %v8570_v27  ;;  %6371 = vmatpush.msrb.mxu1 %v8586_v28  ;;  %v5715_v43 = vpop.f32.mrf.mxu1  ;;  %v5856_v46 = vmax.f32 %v5581_v12, 0.0  ;;  %v5693_v51 = vadd.f32 %v5692_v41, %v5439_v37  ;;  %v8642_v25 = vld [vmem:[%s11350_s7 + $0x16e0] sm:$0xff]  ;;  %v8677_v28 = vld [vmem:[%s11350_s7 + $0x17f8] sm:$0xff]  ;;  %v8639_v41 = vld [vmem:[%s11350_s7 + $0x16c8] sm:$0xff] }
0x19ae   : > { %6391 = vmatpush.msrb.mxu2 %v8605_v31  ;;  %6264 = vmatmul.f32.gmra.mxu0 %v5857_v26  ;;  %v5859_v50 = vmax.f32 %v5650_v35, 0.0  ;;  %v5716_v53 = vadd.f32 %v5715_v43, %v5440_v38  ;;  %v8658_v26 = vld [vmem:[%s11350_s7 + $0x1760] sm:$0xff]  ;;  %v8641_v31 = vld [vmem:[%s11350_s7 + $0x16d8] sm:$0xff]  ;;  %v8655_v43 = vld [vmem:[%s11350_s7 + $0x1748] sm:$0xff] }
0x19af   : > { %6287 = vmatmul.f32.gmra.mxu1 %v5858_v11  ;;  %6323 = vmatpush.msra.mxu3 %v8556_v33  ;;  %v5845_v62 = vmax.f32 %v5693_v51, 0.0  ;;  %v8673_v51 = vld [vmem:[%s11350_s7 + $0x17d8] sm:$0xff] }
0x19b0   : > { %6349 = vmatpush.msra.mxu0 %v8569_v16  ;;  %6372 = vmatpush.msrb.mxu1 %v8585_v24  ;;  %v5846_v63 = vmax.f32 %v5716_v53, 0.0  ;;  %v8676_v24 = vld [vmem:[%s11350_s7 + $0x17f0] sm:$0xff] }
0x19b1   : > { %6392 = vmatpush.msrb.mxu2 %v8604_v34  ;;  %6324 = vmatpush.msra.mxu3 %v8555_v29  ;;  %v8627_v34 = vld [vmem:[%s11350_s7 + $0x1668] sm:$0xff]  ;;  %v8640_v29 = vld [vmem:[%s11350_s7 + $0x16d0] sm:$0xff] }
0x19b2   : > { %6350 = vmatpush.msra.mxu0 %v8568_v39  ;;  %6373 = vmatpush.msrb.mxu1 %v8584_v40  ;;  %v5669_v1 = vpop.f32.mrf.mxu3  ;;  %v8675_v39 = vld [vmem:[%s11350_s7 + $0x17e8] sm:$0xff]  ;;  %v8626_v40 = vld [vmem:[%s11350_s7 + $0x1660] sm:$0xff]  ;;  %v8624_v53 = vld [vmem:[%s11350_s7 + $0x1650] sm:$0xff] }
0x19b3   : > { %6393 = vmatpush.msrb.mxu2 %v8603_v44  ;;  %6325 = vmatpush.msra.mxu3 %v8554_v60  ;;  %v5738_v2 = vpop.f32.mrf.mxu2  ;;  %v5670_v5 = vadd.f32 %v5669_v1, %v5438_v61  ;;  %v8674_v44 = vld [vmem:[%s11350_s7 + $0x17e0] sm:$0xff]  ;;  %v8625_v60 = vld [vmem:[%s11350_s7 + $0x1658] sm:$0xff] }
0x19b4   : > { %6351 = vmatpush.msra.mxu0 %v8567_v47  ;;  %6374 = vmatpush.msrb.mxu1 %v8583_v49  ;;  %v5695_v42 = vpop.f32.mrf.mxu0  ;;  %v5739_v15 = vadd.f32 %v5738_v2, %v5441_v14  ;;  %v8638_v47 = vld [vmem:[%s11350_s7 + $0x16c0] sm:$0xff]  ;;  %v8621_v1 = vld [vmem:[%s11350_s7 + $0x1638] sm:$0xff] }
0x19b5   : > { %6394 = vmatpush.msrb.mxu2 %v8602_v54  ;;  %6241 = vmatmul.f32.gmra.mxu3 %v5856_v46  ;;  %v5718_v52 = vpop.f32.mrf.mxu1  ;;  %v5696_v56 = vadd.f32 %v5695_v42, %v5439_v37  ;;  %v5844_v23 = vmax.f32 %v5670_v5, 0.0  ;;  %v8656_v37 = vld [vmem:[%s11350_s7 + $0x1750] sm:$0xff]  ;;  %v8654_v49 = vld [vmem:[%s11350_s7 + $0x1740] sm:$0xff]  ;;  %v8637_v54 = vld [vmem:[%s11350_s7 + $0x16b8] sm:$0xff] }
0x19b6   : > { %6310 = vmatmul.f32.gmra.mxu2 %v5859_v50  ;;  %6326 = vmatpush.msra.mxu3 %v8553_v55  ;;  %v5719_v8 = vadd.f32 %v5718_v52, %v5440_v38  ;;  %v5847_v27 = vmax.f32 %v5739_v15, 0.0  ;;  %v8653_v55 = vld [vmem:[%s11350_s7 + $0x1738] sm:$0xff]  ;;  %v8650_v2 = vld [vmem:[%s11350_s7 + $0x1720] sm:$0xff]  ;;  %v8620_v5 = vld [vmem:[%s11350_s7 + $0x1630] sm:$0xff] }
0x19b7   : > { %6352 = vmatpush.msra.mxu0 %v8566_v57  ;;  %6375 = vmatpush.msrb.mxu1 %v8582_v58  ;;  %v5861_v11 = vmax.f32 %v5696_v56, 0.0  ;;  %v8672_v57 = vld [vmem:[%s11350_s7 + $0x17d0] sm:$0xff]  ;;  %v8623_v58 = vld [vmem:[%s11350_s7 + $0x1648] sm:$0xff]  ;;  %v8633_v42 = vld [vmem:[%s11350_s7 + $0x1698] sm:$0xff] }
0x19b8   : > { %6395 = vmatpush.msrb.mxu2 %v8601_v59  ;;  %6327 = vmatpush.msra.mxu3 %v8552_v0  ;;  %v5862_v16 = vmax.f32 %v5719_v8, 0.0  ;;  %v8636_v59 = vld [vmem:[%s11350_s7 + $0x16b0] sm:$0xff]  ;;  %v8670_v0 = vld [vmem:[%s11350_s7 + $0x17c0] sm:$0xff]  ;;  %v8649_v15 = vld [vmem:[%s11350_s7 + $0x1718] sm:$0xff] }
0x19b9   : > { %6429 = vmatpush.msrb.mxu0 %v8645_v9  ;;  %6452 = vmatpush.msra.mxu1 %v8661_v13  ;;  %v8652_v9 = vld [vmem:[%s11350_s7 + $0x1730] sm:$0xff]  ;;  %v8651_v13 = vld [vmem:[%s11350_s7 + $0x1728] sm:$0xff] }
0x19ba   : > { %6353 = vmatmul.f32.vlgmr.msra.gmra.mxu0 %v5845_v62  ;;  %6376 = vmatmul.f32.vlgmr.msrb.gmra.mxu1 %v5846_v63  ;;  %v5672_v33 = vpop.f32.mrf.mxu3  ;;  %v8622_v62 = vld [vmem:[%s11350_s7 + $0x1640] sm:$0xff]  ;;  %v8635_v63 = vld [vmem:[%s11350_s7 + $0x16a8] sm:$0xff]  ;;  %v8668_v52 = vld [vmem:[%s11350_s7 + $0x17b0] sm:$0xff] }
0x19bb   : > { %6396 = vmatpush.msrb.mxu2 %v8600_v3  ;;  %6430 = vmatpush.msrb.mxu0 %v8644_v18  ;;  %v5741_v12 = vpop.f32.mrf.mxu2  ;;  %v5673_v35 = vadd.f32 %v5672_v33, %v5438_v61  ;;  %v8671_v61 = vld [vmem:[%s11350_s7 + $0x17c8] sm:$0xff]  ;;  %v8669_v18 = vld [vmem:[%s11350_s7 + $0x17b8] sm:$0xff]  ;;  %v5445_v33 = vperm.slane %v10817_v32, 7 }
0x19bc   : > { %6453 = vmatpush.msra.mxu1 %v8660_v7  ;;  %6328 = vmatpush.msra.mxu3 %v8551_v10  ;;  %v5742_v38 = vadd.f32 %v5741_v12, %v5441_v14  ;;  %v8634_v14 = vld [vmem:[%s11350_s7 + $0x16a0] sm:$0xff]  ;;  %v5784_v3 = vpop.f32.mrf.mxu0  ;;  %v5443_v7 = vperm.slane %v10817_v32, 5  ;;  %v8667_v56 = vld [vmem:[%s11350_s7 + $0x17a8] sm:$0xff]  ;;  %v8616_v12 = vld [vmem:[%s11350_s7 + $0x1610] sm:$0xff] }
0x19bd   : > { %6397 = vmatpush.msrb.mxu2 %v8599_v45  ;;  %6431 = vmatpush.msrb.mxu0 %v8643_v19  ;;  %v5860_v46 = vmax.f32 %v5673_v35, 0.0  ;;  %v5807_v10 = vpop.f32.mrf.mxu1  ;;  %v5444_v45 = vperm.slane %v10817_v32, 6  ;;  %v8619_v19 = vld [vmem:[%s11350_s7 + $0x1628] sm:$0xff] }
0x19be   : > { %6454 = vmatpush.msra.mxu1 %v8659_v20  ;;  %6329 = vmatpush.msra.mxu3 %v8550_v48  ;;  %v5863_v50 = vmax.f32 %v5742_v38, 0.0  ;;  %v8632_v20 = vld [vmem:[%s11350_s7 + $0x1690] sm:$0xff]  ;;  %v8647_v8 = vld [vmem:[%s11350_s7 + $0x1708] sm:$0xff] }
0x19bf   : > { %6398 = vmatpush.msrb.mxu2 %v8598_v21  ;;  %6432 = vmatpush.msrb.mxu0 %v8642_v25  ;;  %v8648_v48 = vld [vmem:[%s11350_s7 + $0x1710] sm:$0xff]  ;;  %v8618_v21 = vld [vmem:[%s11350_s7 + $0x1620] sm:$0xff]  ;;  %v5808_v25 = vadd.f32 %v5807_v10, %v5444_v45 }
0x19c0   : > { %6406 = vmatpush.msrb.mxu3 %v8629_v22  ;;  %6455 = vmatpush.msra.mxu1 %v8658_v26  ;;  %v5785_v22 = vadd.f32 %v5784_v3, %v5443_v7 }
0x19c1   : > { %6475 = vmatpush.msra.mxu2 %v8677_v28  ;;  %6330 = vmatmul.f32.vlgmr.msra.gmra.mxu3 %v5844_v23  ;;  %v8631_v23 = vld [vmem:[%s11350_s7 + $0x1688] sm:$0xff]  ;;  %v8617_v28 = vld [vmem:[%s11350_s7 + $0x1618] sm:$0xff] }
0x19c2   : > { %6399 = vmatmul.f32.vlgmr.msrb.gmra.mxu2 %v5847_v27  ;;  %6407 = vmatpush.msrb.mxu3 %v8628_v30  ;;  %v5761_v26 = vpop.f32.mrf.mxu3  ;;  %v8666_v27 = vld [vmem:[%s11350_s7 + $0x17a0] sm:$0xff]  ;;  %v5442_v30 = vperm.slane %v10817_v32, 4  ;;  %v8615_v32 = vld [vmem:[%s11350_s7 + $0x1608] sm:$0xff] }
0x19c3   : > { %6433 = vmatpush.msrb.mxu0 %v8641_v31  ;;  %6456 = vmatpush.msra.mxu1 %v8657_v36  ;;  %v8630_v31 = vld [vmem:[%s11350_s7 + $0x1680] sm:$0xff] }
0x19c4   : > { %6476 = vmatpush.msra.mxu2 %v8676_v24  ;;  %6356 = vmatmul.f32.gmra.mxu0 %v5861_v11  ;;  %v5830_v11 = vpop.f32.mrf.mxu2  ;;  %v8646_v36 = vld [vmem:[%s11350_s7 + $0x1700] sm:$0xff]  ;;  %v5849_v24 = vmax.f32 %v5785_v22, 0.0  ;;  %v5787_v35 = vpop.f32.mrf.mxu0 }
0x19c5   : > { %6379 = vmatmul.f32.gmra.mxu1 %v5862_v16  ;;  %6408 = vmatpush.msrb.mxu3 %v8627_v34  ;;  %v8665_v16 = vld [vmem:[%s11350_s7 + $0x1798] sm:$0xff]  ;;  %v5850_v34 = vmax.f32 %v5808_v25, 0.0  ;;  %v5810_v38 = vpop.f32.mrf.mxu1 }
0x19c6   : > { %6434 = vmatpush.msrb.mxu0 %v8640_v29  ;;  %6457 = vmatpush.msra.mxu1 %v8656_v37  ;;  %v8664_v29 = vld [vmem:[%s11350_s7 + $0x1790] sm:$0xff]  ;;  %v5762_v37 = vadd.f32 %v5761_v26, %v5442_v30 }
0x19c7   : > { %6477 = vmatpush.msra.mxu2 %v8675_v39  ;;  %6409 = vmatpush.msrb.mxu3 %v8626_v40  ;;  %v5831_v39 = vadd.f32 %v5830_v11, %v5445_v33  ;;  %v8663_v40 = vld [vmem:[%s11350_s7 + $0x1788] sm:$0xff] }
0x19c8   : > { %6435 = vmatpush.msrb.mxu0 %v8639_v41  ;;  %6458 = vmatpush.msra.mxu1 %v8655_v43  ;;  %v5788_v41 = vadd.f32 %v5787_v35, %v5443_v7  ;;  %v8614_v43 = vld [vmem:[%s11350_s7 + $0x1600] sm:$0xff] }
0x19c9   : > { %6478 = vmatpush.msra.mxu2 %v8674_v44  ;;  %6410 = vmatpush.msrb.mxu3 %v8625_v60  ;;  %v5811_v44 = vadd.f32 %v5810_v38, %v5444_v45  ;;  %v8662_v60 = vld [vmem:[%s11350_s7 + $0x1780] sm:$0xff]  ;;  %s987_s7 = scalar_lea.vmem %s11357_s2, %s8782_s3  ;;  %s7771_s3 = sshll.u32 %s11365_s16, 3 }
0x19ca   : > { %6436 = vmatpush.msrb.mxu0 %v8638_v47  ;;  %6459 = vmatpush.msra.mxu1 %v8654_v49  ;;  %v5851_v47 = vmax.f32 %v5831_v39, 0.0  ;;  %v5764_v49 = vpop.f32.mrf.mxu3 }
0x19cb   : > { %6479 = vmatpush.msra.mxu2 %v8673_v51  ;;  %6333 = vmatmul.f32.gmra.mxu3 %v5860_v46  ;;  %v5848_v46 = vmax.f32 %v5762_v37, 0.0 }
0x19cc   : > { %6402 = vmatmul.f32.gmra.mxu2 %v5863_v50  ;;  %6411 = vmatpush.msrb.mxu3 %v8624_v53  ;;  %v5865_v50 = vmax.f32 %v5788_v41, 0.0  ;;  %v5833_v51 = vpop.f32.mrf.mxu2  ;;  %v5866_v53 = vmax.f32 %v5811_v44, 0.0 }
0x19cd   : > { %6437 = vmatpush.msrb.mxu0 %v8637_v54  ;;  %6460 = vmatpush.msra.mxu1 %v8653_v55  ;;  %v5765_v54 = vadd.f32 %v5764_v49, %v5442_v30  ;;  %v5834_v55 = vadd.f32 %v5833_v51, %v5445_v33 }
0x19ce   : > { %6480 = vmatpush.msra.mxu2 %v8672_v57  ;;  %6412 = vmatpush.msrb.mxu3 %v8623_v58 }
0x19cf   : > { %6438 = vmatpush.msrb.mxu0 %v8636_v59  ;;  %6461 = vmatpush.msra.mxu1 %v8652_v9  ;;  %v5864_v57 = vmax.f32 %v5765_v54, 0.0  ;;  %v5867_v58 = vmax.f32 %v5834_v55, 0.0 }
0x19d0   : > { %6481 = vmatpush.msra.mxu2 %v8671_v61  ;;  %6413 = vmatpush.msrb.mxu3 %v8622_v62 }
0x19d1   : > { %6439 = vmatpush.msrb.mxu0 %v8635_v63  ;;  %6462 = vmatpush.msra.mxu1 %v8651_v13 }
0x19d2   : > { %6482 = vmatpush.msra.mxu2 %v8670_v0  ;;  %6414 = vmatpush.msrb.mxu3 %v8621_v1  ;;  %v8863_v1 = vld [vmem:[%s11352_s11 + $0x2] ss:$0 sm:$0xff] }
0x19d3   : > { %6440 = vmatpush.msrb.mxu0 %v8634_v14  ;;  %6463 = vmatpush.msra.mxu1 %v8650_v2 }
0x19d4   : > { %6483 = vmatpush.msra.mxu2 %v8669_v18  ;;  %6415 = vmatpush.msrb.mxu3 %v8620_v5 }
0x19d5   : > { %6441 = vmatpush.msrb.mxu0 %v8633_v42  ;;  %6464 = vmatpush.msra.mxu1 %v8649_v15 }
0x19d6   : > { %6484 = vmatpush.msra.mxu2 %v8668_v52  ;;  %6416 = vmatpush.msrb.mxu3 %v8619_v19 }
0x19d7   : > { %6442 = vmatpush.msrb.mxu0 %v8632_v20  ;;  %6465 = vmatpush.msra.mxu1 %v8648_v48 }
0x19d8   : > { %6485 = vmatpush.msra.mxu2 %v8667_v56  ;;  %6417 = vmatpush.msrb.mxu3 %v8618_v21 }
0x19d9   : > { %6443 = vmatpush.msrb.mxu0 %v8631_v23  ;;  %6466 = vmatpush.msra.mxu1 %v8647_v8 }
0x19da   : > { %6486 = vmatpush.msra.mxu2 %v8666_v27  ;;  %6418 = vmatpush.msrb.mxu3 %v8617_v28 }
0x19db   : > { %6444 = vmatpush.msrb.mxu0 %v8630_v31  ;;  %6467 = vmatpush.msra.mxu1 %v8646_v36 }
0x19dc   : > { %6487 = vmatpush.msra.mxu2 %v8665_v16  ;;  %6445 = vmatmul.f32.vlgmr.msrb.gmra.mxu0 %v5849_v24 }
0x19dd   : > { %6468 = vmatmul.f32.vlgmr.msra.gmra.mxu1 %v5850_v34  ;;  %6419 = vmatpush.msrb.mxu3 %v8616_v12 }
0x19de   : > { %6488 = vmatpush.msra.mxu2 %v8664_v29 }
0x19df   : > { %6420 = vmatpush.msrb.mxu3 %v8615_v32 }
0x19e0   : > { %6489 = vmatpush.msra.mxu2 %v8663_v40 }
0x19e1   : > { %6421 = vmatpush.msrb.mxu3 %v8614_v43 }
0x19e2   : > { %6490 = vmatpush.msra.mxu2 %v8662_v60  ;;  %6422 = vmatmul.f32.vlgmr.msrb.gmra.mxu3 %v5848_v46 }
0x19e3   : > { %6491 = vmatmul.f32.vlgmr.msra.gmra.mxu2 %v5851_v47 }
0x19e4   : > { %6448 = vmatmul.f32.gmra.mxu0 %v5865_v50 }
0x19e5   : > { %6471 = vmatmul.f32.gmra.mxu1 %v5866_v53 }
0x19ea   : > { %6425 = vmatmul.f32.gmra.mxu3 %v5864_v57 }
0x19eb   : > { %6494 = vmatmul.f32.gmra.mxu2 %v5867_v58 }
0x1a0e   : > { %v6170_v59 = vpop.f32.mrf.mxu0 }
0x1a0f   : > { %v6193_v61 = vpop.f32.mrf.mxu1 }
0x1a17   : > { %v6173_v63 = vpop.f32.mrf.mxu0 }
0x1a18   : > { %v6196_v0 = vpop.f32.mrf.mxu1 }
0x1a1a   : > { %v6147_v9 = vpop.f32.mrf.mxu3 }
0x1a1b   : > { %v6216_v62 = vpop.f32.mrf.mxu2  ;;  %v6148_v2 = vadd.f32 %v8863_v1, %v6147_v9 }
0x1a1d   : > { %v6171_v5 = vadd.f32 %v6170_v59, %v6148_v2  ;;  %v6572_v2 = vld [vmem:[%s11355_s22 + $0x68] sm:$0xff] }
0x1a1f   : > { %v6194_v42 = vadd.f32 %v6193_v61, %v6171_v5  ;;  %v6569_v5 = vld [vmem:[%s11355_s22 + $0x50] sm:$0xff] }
0x1a21   : > { %v6262_v3 = vpop.f32.mrf.mxu0  ;;  %v6217_v45 = vadd.f32 %v6216_v62, %v6194_v42  ;;  %v6568_v42 = vld [vmem:[%s11355_s22 + $0x48] sm:$0xff] }
0x1a22   : > { %v6285_v7 = vpop.f32.mrf.mxu1 }
0x1a24   : > { %v6150_v13 = vpop.f32.mrf.mxu3 }
0x1a25   : > { %v6219_v14 = vpop.f32.mrf.mxu2  ;;  %v6151_v15 = vadd.f32 %v8863_v1, %v6150_v13  ;;  %v6574_v1 = vld [vmem:[%s11355_s22 + $0x78] sm:$0xff] }
0x1a26   : > { %6614 = vmatpush.msra.mxu3 %v6574_v1 }
0x1a27   : > { %v6174_v52 = vadd.f32 %v6173_v63, %v6151_v15  ;;  %v6587_v15 = vld [vmem:[%s11355_s22 + $0xe0] sm:$0xff] }
0x1a29   : > { %v6197_v21 = vadd.f32 %v6196_v0, %v6174_v52  ;;  %v6567_v52 = vld [vmem:[%s11355_s22 + $0x40] sm:$0xff] }
0x1a2b   : > { %v6265_v19 = vpop.f32.mrf.mxu0  ;;  %v6220_v8 = vadd.f32 %v6219_v14, %v6197_v21  ;;  %v6573_v14 = vld [vmem:[%s11355_s22 + $0x70] sm:$0xff] }
0x1a2c   : > { %v6288_v56 = vpop.f32.mrf.mxu1  ;;  %6615 = vmatpush.msra.mxu3 %v6573_v14  ;;  %v6565_v21 = vld [vmem:[%s11355_s22 + $0x30] sm:$0xff] }
0x1a2e   : > { %v6239_v18 = vpop.f32.mrf.mxu3  ;;  %6616 = vmatpush.msra.mxu3 %v6572_v2 }
0x1a2f   : > { %v6308_v10 = vpop.f32.mrf.mxu2  ;;  %v6240_v48 = vadd.f32 %v6239_v18, %v6217_v45  ;;  %v6590_v18 = vld [vmem:[%s11355_s22 + $0xf8] sm:$0xff]  ;;  %v8988_v45 = vmov 0  }
0x1a30   : > { %6634 = vmatpush.msra.mxu0 %v6590_v18  ;;  %8824 = vset.pattern.permute.xlu0 %v8988_v45 }
0x1a31   : > { %v6263_v23 = vadd.f32 %v6262_v3, %v6240_v48  ;;  %v6571_v3 = vld [vmem:[%s11355_s22 + $0x60] sm:$0xff]  ;;  %8825 = vset.pattern.permute.xlu1 %v8988_v45  ;;  %8823 = vset.pattern.permute.xlu2 %v8988_v45  ;;  %v6585_v48 = vld [vmem:[%s11355_s22 + $0xd0] sm:$0xff] }
0x1a32   : > { %6617 = vmatpush.msra.mxu3 %v6571_v3  ;;  %v6745_v45 = vld [vmem:[%s9132_s13 + $0xe0] sm:$0xff] }
0x1a33   : > { %v6286_v25 = vadd.f32 %v6285_v7, %v6263_v23  ;;  %v6589_v7 = vld [vmem:[%s11355_s22 + $0xf0] sm:$0xff]  ;;  %v6584_v23 = vld [vmem:[%s11355_s22 + $0xc8] sm:$0xff] }
0x1a34   : > { %6635 = vmatpush.msra.mxu0 %v6589_v7 }
0x1a35   : > { %v6309_v11 = vadd.f32 %v6308_v10, %v6286_v25  ;;  %v6588_v10 = vld [vmem:[%s11355_s22 + $0xe8] sm:$0xff]  ;;  %v6558_v25 = vld [vmem:[%s987_s7] sm:$0x3f] }
0x1a36   : > { %6636 = vmatpush.msra.mxu0 %v6588_v10  ;;  %6602 = vst [vmem:[#allocation1] ss:$4 sm:$0xff] %v6558_v25  ;;  %v6726_v25 = vld [vmem:[%s9132_s13 + $0x48] sm:$0xff] }
0x1a37   : > { %v6354_v27 = vpop.f32.mrf.mxu0  ;;  %v6377_v30 = vpop.f32.mrf.mxu1 }
0x1a38   : > { %v6242_v20 = vpop.f32.mrf.mxu3  ;;  %6637 = vmatpush.msra.mxu0 %v6587_v15  ;;  %v6741_v15 = vld [vmem:[%s9132_s13 + $0xc0] sm:$0xff] }
0x1a39   : > { %v6311_v22 = vpop.f32.mrf.mxu2  ;;  %v6243_v26 = vadd.f32 %v6242_v20, %v6220_v8  ;;  %v6566_v20 = vld [vmem:[%s11355_s22 + $0x38] sm:$0xff]  ;;  %v6596_v8 = vld [vmem:[%s11355_s22 + $0x128] sm:$0xf] }
0x1a3a   : > { %8681 = vmatpush.msk.msrb.mxu1 %vm1006_vm0, %v6596_v8 }
0x1a3b   : > { %v6266_v31 = vadd.f32 %v6265_v19, %v6243_v26  ;;  %v6586_v19 = vld [vmem:[%s11355_s22 + $0xd8] sm:$0xff] }
0x1a3c   : > { %6638 = vmatpush.msra.mxu0 %v6586_v19  ;;  %v6746_v19 = vld [vmem:[%s9132_s13 + $0xe8] sm:$0xff] }
0x1a3d   : > { %v6289_v16 = vadd.f32 %v6288_v56, %v6266_v31  ;;  %v6675_v56 = vld [vmem:[%s10965_s6] sm:$0xff] }
0x1a3e   : > { %6639 = vmatpush.msra.mxu0 %v6585_v48  ;;  %v6563_v31 = vld [vmem:[%s11355_s22 + $0x20] sm:$0xff]  ;;  %v6734_v48 = vld [vmem:[%s9132_s13 + $0x88] sm:$0xff] }
0x1a3f   : > { %v6312_v35 = vadd.f32 %v6311_v22, %v6289_v16  ;;  %v6690_v22 = vsel %vm6689_vm14, %v6675_v56, 0.0  ;;  %v6562_v16 = vld [vmem:[%s11355_s22 + $0x18] sm:$0xff] }
0x1a40   : > { %v6691_v26 = vrot.slane %v6690_v22, 4  ;;  %6640 = vmatpush.msra.mxu0 %v6584_v23 }
0x1a41   : > { %v6357_v12 = vpop.f32.mrf.mxu0 }
0x1a42   : > { %v6380_v29 = vpop.f32.mrf.mxu1 }
0x1a44   : > { %v6331_v28 = vpop.f32.mrf.mxu3 }
0x1a45   : > { %v6400_v36 = vpop.f32.mrf.mxu2  ;;  %v6332_v33 = vadd.f32 %v6331_v28, %v6309_v11  ;;  %v6564_v28 = vld [vmem:[%s11355_s22 + $0x28] sm:$0xff]  ;;  %v6594_v11 = vld [vmem:[%s11355_s22 + $0x118] sm:$0xff] }
0x1a47   : > { %v6355_v24 = vadd.f32 %v6354_v27, %v6332_v33  ;;  %v6595_v27 = vld [vmem:[%s11355_s22 + $0x120] sm:$0xff]  ;;  %v6692_v33 = vadd.f32 %v6691_v26, %v6690_v22  ;;  %v6738_v22 = vld [vmem:[%s9132_s13 + $0xa8] sm:$0xff] }
0x1a48   : > { %6665 = vmatpush.msrb.mxu1 %v6595_v27  ;;  %v6729_v26 = vld [vmem:[%s9132_s13 + $0x60] sm:$0xff] }
0x1a49   : > { %v6378_v37 = vadd.f32 %v6377_v30, %v6355_v24  ;;  %v6583_v30 = vld [vmem:[%s11355_s22 + $0xc0] sm:$0xff]  ;;  %v6581_v24 = vld [vmem:[%s11355_s22 + $0xb0] sm:$0xff] }
0x1a4a   : > { %6641 = vmatpush.msra.mxu0 %v6583_v30  ;;  %6666 = vmatpush.msrb.mxu1 %v6594_v11  ;;  %v6730_v30 = vld [vmem:[%s9132_s13 + $0x68] sm:$0xff] }
0x1a4b   : > { %v6401_v39 = vadd.f32 %v6400_v36, %v6378_v37  ;;  %v6582_v36 = vld [vmem:[%s11355_s22 + $0xb8] sm:$0xff]  ;;  %v6693_v37 = vrot.slane %v6692_v33, 2  ;;  %v6718_v11 = vld [vmem:[%s9132_s13 + $0x8] sm:$0xff] }
0x1a4c   : > { %6642 = vmatpush.msra.mxu0 %v6582_v36 }
0x1a4e   : > { %v6334_v34 = vpop.f32.mrf.mxu3  ;;  %6643 = vmatpush.msra.mxu0 %v6581_v24  ;;  %v6744_v24 = vld [vmem:[%s9132_s13 + $0xd8] sm:$0xff] }
0x1a4f   : > { %v6335_v38 = vadd.f32 %v6334_v34, %v6312_v35  ;;  %v6403_v32 = vpop.f32.mrf.mxu2  ;;  %v6561_v34 = vld [vmem:[%s11355_s22 + $0x10] sm:$0xff]  ;;  %v6580_v35 = vld [vmem:[%s11355_s22 + $0xa8] sm:$0xff] }
0x1a50   : > { %6644 = vmatpush.msra.mxu0 %v6580_v35  ;;  %v6966_v35 = vld [vmem:[%s9137_s27 + $0xc0] sm:$0xff] }
0x1a51   : > { %v6358_v40 = vadd.f32 %v6357_v12, %v6335_v38  ;;  %v6560_v38 = vld [vmem:[%s11355_s22 + $0x8] sm:$0xff] }
0x1a53   : > { %v6381_v46 = vadd.f32 %v6380_v29, %v6358_v40  ;;  %v6559_v40 = vld [vmem:[%s11355_s22] sm:$0xff] }
0x1a55   : > { %v6404_v51 = vadd.f32 %v6403_v32, %v6381_v46  ;;  %v6579_v32 = vld [vmem:[%s11355_s22 + $0xa0] sm:$0xff]  ;;  %v6577_v46 = vld [vmem:[%s11355_s22 + $0x90] sm:$0xff] }
0x1a56   : > { %6645 = vmatpush.msra.mxu0 %v6579_v32  ;;  %v6958_v32 = vld [vmem:[%s9137_s27 + $0x80] sm:$0xff] }
0x1a59   : > { %v6446_v41 = vpop.f32.mrf.mxu0 }
0x1a5a   : > { %v6469_v60 = vpop.f32.mrf.mxu1 }
0x1a61   : > { %v6449_v58 = vpop.f32.mrf.mxu0 }
0x1a62   : > { %v6472_v61 = vpop.f32.mrf.mxu1 }
0x1a65   : > { %v6423_v43 = vpop.f32.mrf.mxu3 }
0x1a66   : > { %v6424_v44 = vadd.f32 %v6423_v43, %v6401_v39  ;;  %v6492_v49 = vpop.f32.mrf.mxu2 }
0x1a68   : > { %v6447_v47 = vadd.f32 %v6446_v41, %v6424_v44  ;;  %v6578_v41 = vld [vmem:[%s11355_s22 + $0x98] sm:$0xff]  ;;  %v6694_v44 = vadd.f32 %v6693_v37, %v6692_v33  ;;  %v6721_v33 = vld [vmem:[%s9132_s13 + $0x20] sm:$0xff] }
0x1a69   : > { %6646 = vmatpush.msra.mxu0 %v6578_v41  ;;  %v6736_v37 = vld [vmem:[%s9132_s13 + $0x98] sm:$0xff]  ;;  %v6959_v41 = vld [vmem:[%s9137_s27 + $0x88] sm:$0xff] }
0x1a6a   : > { %v6470_v50 = vadd.f32 %v6469_v60, %v6447_v47  ;;  %v6603_v60 = vld.sshfl [vmem:[#allocation1] sm:$0xff pattern:$0x73625140] }
0x1a6b   : > { %6647 = vmatpush.msra.mxu0 %v6577_v46  ;;  %v6727_v46 = vld [vmem:[%s9132_s13 + $0x50] sm:$0xff] }
0x1a6c   : > { %v6493_v53 = vadd.f32 %v6492_v49, %v6470_v50 }
0x1a6d   : > { %v6426_v54 = vpop.f32.mrf.mxu3 }
0x1a6e   : > { %v6427_v55 = vadd.f32 %v6426_v54, %v6404_v51  ;;  %v10935_v57 = vadd.f32 %v6493_v53, %v10522_v17  ;;  %v6495_v63 = vpop.f32.mrf.mxu2  ;;  %v6576_v51 = vld [vmem:[%s11355_s22 + $0x88] sm:$0xff]  ;;  %v6593_v53 = vld [vmem:[%s11355_s22 + $0x110] sm:$0xff]  ;;  %v6695_v54 = vrot.slane %v6694_v44, 1 }
0x1a6f   : > { %6667 = vmatpush.msrb.mxu1 %v6593_v53  ;;  %6648 = vmatpush.msra.mxu0 %v6576_v51  ;;  %v6951_v51 = vld [vmem:[%s9137_s27 + $0x48] sm:$0xff]  ;;  %v6720_v53 = vld [vmem:[%s9132_s13 + $0x18] sm:$0xff] }
0x1a70   : > { %v6450_v59 = vadd.f32 %v6449_v58, %v6427_v55  ;;  %v6504_v9 = vsel %vm1125_vm6, %v10935_v57, 0.0  ;;  %v6575_v55 = vld [vmem:[%s11355_s22 + $0x80] sm:$0xff] }
0x1a71   : > { %6505 = vadd.xlane.f32.xlu2 %v6504_v9  ;;  %v6696_v9 = vadd.f32 %v6695_v54, %v6694_v44  ;;  %6649 = vmatpush.msra.mxu0 %v6575_v55  ;;  %v8864_v44 = vld [vmem:[%s11353_s23 + $0x2] ss:$0 sm:$0xff]  ;;  %v6719_v54 = vld [vmem:[%s9132_s13 + $0x10] sm:$0xff] }
0x1a72   : > { %v6473_v62 = vadd.f32 %v6472_v61, %v6450_v59  ;;  %v8699_v59 = vld [vmem:[%s10965_s6 + $0x8] sm:$0xff]  ;;  %s991_s6 = scalar_lea.vmem %s9147_s17, %s7771_s3 }
0x1a73   : > { %v6604_v61 = vld.sshfl [vmem:[#allocation1 + $0x8] sm:$0xff pattern:$0x73625140]  ;;  %6864 = vmatpush.msrb.mxu0 %v6746_v19 }
0x1a74   : > { %v6496_v13 = vadd.f32 %v6495_v63, %v6473_v62  ;;  %v6591_v62 = vld [vmem:[%s11355_s22 + $0x100] sm:$0xff]  ;;  %v6605_v63 = vld.sshfl [vmem:[#allocation1 + $0x10] sm:$0xff pattern:$0x73625140]  ;;  %6650 = vmatmul.f32.vlgmr.msra.gmra.mxu0 %v6604_v61 }
0x1a75   : > { %6865 = vmatpush.msrb.mxu0 %v6738_v22 }
0x1a76   : > { %v10940_v0 = vadd.f32 %v6496_v13, %v10545_v4  ;;  %v6570_v4 = vld [vmem:[%s11355_s22 + $0x58] sm:$0xff] }
0x1a77   : > { %6618 = vmatpush.msra.mxu3 %v6570_v4  ;;  %6866 = vmatpush.msrb.mxu0 %v6730_v30 }
0x1a78   : > { %v6507_v17 = vsel %vm1125_vm6, %v10940_v0, 0.0 }
0x1a79   : > { %6508 = vadd.xlane.f32.xlu0 %v6507_v17  ;;  %6619 = vmatpush.msra.mxu3 %v6569_v5  ;;  %v7176_v17 = vsel %vm6689_vm14, %v8699_v59, 0.0 }
0x1a7a   : > { %v7177_v1 = vrot.slane %v7176_v17, 4 }
0x1a7b   : > { %6620 = vmatpush.msra.mxu3 %v6568_v42  ;;  %v6742_v42 = vld [vmem:[%s9132_s13 + $0xc8] sm:$0xff] }
0x1a7c   : > { %v7178_v14 = vadd.f32 %v7177_v1, %v7176_v17  ;;  %6784 = vmatpush.msrb.mxu2 %v6742_v42 }
0x1a7d   : > { %6621 = vmatpush.msra.mxu3 %v6567_v52 }
0x1a7e   : > { %v7179_v2 = vrot.slane %v7178_v14, 2  ;;  %6785 = vmatpush.msrb.mxu2 %v6734_v48 }
0x1a7f   : > { %6622 = vmatpush.msra.mxu3 %v6566_v20 }
0x1a80   : > { %v7180_v3 = vadd.f32 %v7179_v2, %v7178_v14  ;;  %6786 = vmatpush.msrb.mxu2 %v6726_v25  ;;  %v8866_v25 = vld [vmem:[%s11359_s5] ss:$0 sm:$0xff] }
0x1a81   : > { %6623 = vmatpush.msra.mxu3 %v6565_v21  ;;  %v6737_v21 = vld [vmem:[%s9132_s13 + $0xa0] sm:$0xff] }
0x1a82   : > { %v7181_v18 = vrot.slane %v7180_v3, 1  ;;  %6787 = vmatpush.msrb.mxu2 %v6718_v11 }
0x1a83   : > { %6624 = vmatpush.msra.mxu3 %v6564_v28 }
0x1a84   : > { %v7182_v4 = vadd.f32 %v7181_v18, %v7180_v3  ;;  %6824 = vmatpush.msra.mxu2 %v6744_v24 }
0x1a85   : > { %6625 = vmatpush.msra.mxu3 %v6563_v31  ;;  %v6717_v31 = vld [vmem:[%s9132_s13] sm:$0xff] }
0x1a86   : > { %6825 = vmatpush.msra.mxu2 %v6736_v37 }
0x1a87   : > { %6626 = vmatpush.msra.mxu3 %v6562_v16  ;;  %v6722_v16 = vld [vmem:[%s9132_s13 + $0x28] sm:$0xff] }
0x1a88   : > { %6867 = vmatpush.msrb.mxu0 %v6722_v16 }
0x1a89   : > { %6627 = vmatpush.msra.mxu3 %v6561_v34  ;;  %6699 = vperm.xlu2 %8823, %v6696_v9  }
0x1a8b   : > { %6628 = vmatpush.msra.mxu3 %v6560_v38  ;;  %v6735_v38 = vld [vmem:[%s9132_s13 + $0x90] sm:$0xff] }
0x1a8d   : > { %6678 = vperm.xlu0 %8824, %v6675_v56   ;;  %6629 = vmatpush.msra.mxu3 %v6559_v40  ;;  %v6733_v56 = vld [vmem:[%s9132_s13 + $0x80] sm:$0xff] }
0x1a8e   : > { %6630 = vmatmul.f32.vlgmr.msra.gmra.mxu3 %v6603_v60  ;;  %v6728_v60 = vld [vmem:[%s9132_s13 + $0x58] sm:$0xff] }
0x1a8f   : > { %6844 = vmatpush.msrb.mxu3 %v6745_v45  ;;  %6826 = vmatpush.msra.mxu2 %v6728_v60 }
0x1a91   : > { %7165 = vperm.xlu2 %8823, %v8699_v59   ;;  %6845 = vmatpush.msrb.mxu3 %v6737_v21  ;;  %v6943_v59 = vld [vmem:[%s9137_s27 + $0x8] sm:$0xff] }
0x1a92   : > { %6827 = vmatpush.msra.mxu2 %v6720_v53 }
0x1a93   : > { %6846 = vmatpush.msrb.mxu3 %v6729_v26 }
0x1a95   : > { %6847 = vmatpush.msrb.mxu3 %v6721_v33 }
0x1a97   : > { %6989 = vmatpush.msra.mxu3 %v6966_v35  ;;  %v6970_v35 = vld [vmem:[%s9137_s27 + $0xe0] sm:$0xff] }
0x1a99   : > { %6990 = vmatpush.msra.mxu3 %v6958_v32  ;;  %v6740_v32 = vld [vmem:[%s9132_s13 + $0xb8] sm:$0xff] }
0x1ae4   : > { %v6506_v12 = vpop.xlane.xlu2 %6505 }
0x1ae5   : > { %v6510_v29 = vmul.f32 %v6506_v12, %v9301_v6  ;;  %v6743_v12 = vld [vmem:[%s9132_s13 + $0xd0] sm:$0xff] }
0x1ae7   : > { %v10990_v39 = vsub.f32 %v10935_v57, %v6510_v29  ;;  %v6592_v57 = vld [vmem:[%s11355_s22 + $0x108] sm:$0xff] }
0x1ae8   : > { %6668 = vmatpush.msrb.mxu1 %v6592_v57  ;;  %v6967_v29 = vld [vmem:[%s9137_s27 + $0xc8] sm:$0xff]  ;;  %v6942_v57 = vld [vmem:[%s9137_s27] sm:$0xff] }
0x1ae9   : > { %v6514_v43 = vmul.f32 %v10990_v39, %v10990_v39  ;;  %7009 = vmatpush.msra.mxu0 %v6967_v29  ;;  %v6971_v29 = vld [vmem:[%s9137_s27 + $0xe8] sm:$0xff] }
0x1aea   : > { %6669 = vmatpush.msrb.mxu1 %v6591_v62  ;;  %v8865_v62 = vld [vmem:[%s11354_s18 + $0x2] ss:$0 sm:$0xff] }
0x1aeb   : > { %v6516_v47 = vsel %vm1125_vm6, %v6514_v43, 0.0  ;;  %8682 = vmatmul.msk.f32.vlgmr.msrb.gmra.mxu1 %vm6608_vm15, %v6605_v63  ;;  %7010 = vmatpush.msra.mxu0 %v6959_v41 }
0x1aec   : > { %6517 = vadd.xlane.f32.xlu1 %v6516_v47  ;;  %v6509_v49 = vpop.xlane.xlu0 %6508  ;;  %6764 = vmatpush.msra.mxu1 %v6741_v15  ;;  %v11034_v28 = vpop.permute.xlu2 %6699  ;;  %v6950_v47 = vld [vmem:[%s9137_s27 + $0x40] sm:$0xff] }
0x1aed   : > { %v6511_v50 = vmul.f32 %v6509_v49, %v9301_v6  ;;  %6991 = vmatpush.msra.mxu3 %v6950_v47  ;;  %7011 = vmatpush.msra.mxu0 %v6951_v51  ;;  %vm6707_vm3 = vweird.f32 %v11034_v28  ;;  %v6731_v47 = vld [vmem:[%s9132_s13 + $0x70] sm:$0xff] }
0x1aee   : > { %6765 = vmatpush.msra.mxu1 %v6733_v56  ;;  %v6711_v56 = vand.u32 2147483647, %v11034_v28 }
0x1aef   : > { %v11004_v58 = vsub.f32 %v10940_v0, %v6511_v50  ;;  %6992 = vmatpush.msra.mxu3 %v6942_v57  ;;  %7012 = vmatpush.msra.mxu0 %v6943_v59  ;;  %v6723_v57 = vld [vmem:[%s9132_s13 + $0x30] sm:$0xff]  ;;  %v6946_v59 = vld [vmem:[%s9137_s27 + $0x20] sm:$0xff] }
0x1af0   : > { %vm6712_vm11 = vcmp.eq.f32.partialorder %v6711_v56, 8.507059e+37  ;;  %v8700_v56 = vld [vmem:[%s9132_s13 + $0x100] sm:$0xff] }
0x1af1   : > { %v6515_v13 = vmul.f32 %v11004_v58, %v11004_v58  ;;  %v6651_v16 = vpop.f32.mrf.mxu0 }
0x1af3   : > { %v6519_v0 = vsel %vm1125_vm6, %v6515_v13, 0.0 }
0x1af4   : > { %6520 = vadd.xlane.f32.xlu1 %v6519_v0 }
0x1aff   : > { %v6679_v14 = vpop.permute.xlu0 %6678 }
0x1b0d   : > { %7185 = vperm.xlu1 %8825, %v7182_v4  }
0x1b5f   : > { %v6518_v5 = vpop.xlane.xlu1 %6517 }
0x1b60   : > { %v6522_v7 = vmul.f32 %v6518_v5, %v9301_v6 }
0x1b62   : > { %v11013_v10 = vadd.f32 1e-05, %v6522_v7 }
0x1b64   : > { %8937 = vrsqrt.f32 %v11013_v10  ;;  %vm6532_vm2 = vweird.f32 %v11013_v10 }
0x1b67   : > { %v6521_v52 = vpop.xlane.xlu1 %6520 }
0x1b68   : > { %v6523_v20 = vmul.f32 %v6521_v52, %v9301_v6  ;;  %v6725_v6 = vld [vmem:[%s9132_s13 + $0x40] sm:$0xff]  ;;  %v6713_v52 = vand.u32 2147483648, %v11034_v28  ;;  %v6671_v41 = vpop.f32.mrf.mxu1 }
0x1b69   : > { %6766 = vmatpush.msra.mxu1 %v6725_v6 }
0x1b6a   : > { %v11025_v23 = vpop.eup %8937  ;;  %v11027_v8 = vadd.f32 1e-05, %v6523_v20 }
0x1b6b   : > { %v6527_v27 = vmul.f32 %v11025_v23, %v11013_v10  ;;  %6767 = vmatpush.msra.mxu1 %v6717_v31  ;;  %vm6533_vm1 = vweird.f32 %v11025_v23 }
0x1b6c   : > { %8939 = vrsqrt.f32 %v11027_v8  ;;  %vm6534_vm4 = vmor %vm6532_vm2, %vm6533_vm1  ;;  %vm6542_vm7 = vweird.f32 %v11027_v8  ;;  %vm6933_vm1 = vcmask 1044484   ;;  %vm6929_vm2 = vcmask 1042434  }
0x1b6d   : > { %v6528_v36 = vmul.f32 %v11025_v23, %v6527_v27  ;;  %8941 = vrcp.f32 %v11034_v28  ;;  %6804 = vmatpush.msrb.mxu1 %v6743_v12  ;;  %v6631_v27 = vpop.f32.mrf.mxu3  ;;  %v6748_v12 = vld [vmem:[%s9132_s13 + $0xf8] sm:$0xff] }
0x1b6e   : > { %v6632_v31 = vadd.f32 %v8866_v25, %v6631_v27  ;;  %v8728_v25 = vld [vmem:[%s9132_s13 + $0x1e0] sm:$0xff]  ;;  %v6965_v27 = vld [vmem:[%s9137_s27 + $0xb8] sm:$0xff] }
0x1b6f   : > { %v6529_v34 = vmul.f32 0.5, %v6528_v36  ;;  %6805 = vmatpush.msrb.mxu1 %v6735_v38 }
0x1b70   : > { %v6652_v38 = vadd.f32 %v6651_v16, %v6632_v31  ;;  %v6957_v31 = vld [vmem:[%s9137_s27 + $0x78] sm:$0xff]  ;;  %v8713_v16 = vld [vmem:[%s9132_s13 + $0x168] sm:$0xff] }
0x1b71   : > { %v6530_v40 = vsub.f32 1.5, %v6529_v34  ;;  %6806 = vmatpush.msrb.mxu1 %v6727_v46  ;;  %v6747_v34 = vld [vmem:[%s9132_s13 + $0xf0] sm:$0xff]  ;;  %v6732_v46 = vld [vmem:[%s9132_s13 + $0x78] sm:$0xff] }
0x1b72   : > { %v8940_v43 = vpop.eup %8939  ;;  %v11108_v53 = vadd.f32 %v6671_v41, %v6652_v38  ;;  %v8764_v38 = vld [vmem:[%s9137_s27 + $0x1c0] sm:$0xff]  ;;  %v8718_v41 = vld [vmem:[%s9132_s13 + $0x190] sm:$0xff] }
0x1b73   : > { %v6531_v49 = vmul.f32 %v11025_v23, %v6530_v40  ;;  %v6537_v50 = vmul.f32 %v8940_v43, %v11027_v8  ;;  %v8942_v55 = vpop.eup %8941  ;;  %6807 = vmatpush.msrb.mxu1 %v6719_v54  ;;  %vm6543_vm5 = vweird.f32 %v8940_v43  ;;  %v6714_v8 = vor.u32 1.1754944e-38, %v6713_v52  ;;  %v6739_v40 = vld [vmem:[%s9132_s13 + $0xb0] sm:$0xff]  ;;  %v8709_v52 = vld [vmem:[%s9132_s13 + $0x148] sm:$0xff] }
0x1b74   : > { %v6703_v17 = vmul.f32 %v8942_v55, %v11034_v28  ;;  %vm6544_vm9 = vmor %vm6542_vm7, %vm6543_vm5  ;;  %vm6708_vm8 = vweird.f32 %v8942_v55  ;;  %vm6935_vm5 = vcmask 1046534   ;;  %vm6937_vm7 = vcmask 1045508  }
0x1b75   : > { %v6538_v9 = vmul.f32 %v8940_v43, %v6537_v50  ;;  %v6535_v61 = vsel %vm6534_vm4, %v11025_v23, %v6531_v49  ;;  %vm6709_vm10 = vmor %vm6707_vm3, %vm6708_vm8  ;;  %v6954_v49 = vld [vmem:[%s9137_s27 + $0x60] sm:$0xff]  ;;  %v6955_v50 = vld [vmem:[%s9137_s27 + $0x68] sm:$0xff]  ;;  %vm6931_vm4 = vcmask 1041408  }
0x1b76   : > { %v6546_v63 = vmul.f32 %v6535_v61, %v10990_v39  ;;  %v6704_v18 = vsub.f32 1.0, %v6703_v17  ;;  %v8725_v17 = vld [vmem:[%s9132_s13 + $0x1c8] sm:$0xff] }
0x1b77   : > { %v6539_v13 = vmul.f32 0.5, %v6538_v9  ;;  %v6947_v9 = vld [vmem:[%s9137_s27 + $0x28] sm:$0xff] }
0x1b78   : > { %v6551_v0 = vmul.f32 %v8864_v44, %v6546_v63  ;;  %v6705_v10 = vmul.f32 %v8942_v55, %v6704_v18  ;;  %v6968_v63 = vld [vmem:[%s9137_s27 + $0xd0] sm:$0xff]  ;;  %v8717_v18 = vld [vmem:[%s9132_s13 + $0x188] sm:$0xff] }
0x1b79   : > { %v6540_v1 = vsub.f32 1.5, %v6539_v13  ;;  %v8724_v13 = vld [vmem:[%s9132_s13 + $0x1c0] sm:$0xff] }
0x1b7a   : > { %v6556_v2 = vadd.f32 %v8865_v62, %v6551_v0  ;;  %v6706_v48 = vadd.f32 %v8942_v55, %v6705_v10  ;;  %v6953_v10 = vld [vmem:[%s9137_s27 + $0x58] sm:$0xff] }
0x1b7b   : > { %v6541_v3 = vmul.f32 %v8940_v43, %v6540_v1  ;;  %v6961_v1 = vld [vmem:[%s9137_s27 + $0x98] sm:$0xff] }
0x1b7c   : > { %v6681_v4 = vmul.f32 %v6679_v14, %v6556_v2  ;;  %v6710_v6 = vsel %vm6709_vm10, %v8942_v55, %v6706_v48  ;;  %v6724_v55 = vld [vmem:[%s9132_s13 + $0x38] sm:$0xff]  ;;  %v6960_v14 = vld [vmem:[%s9137_s27 + $0x90] sm:$0xff] }
0x1b7d   : > { %v6545_v5 = vsel %vm6544_vm9, %v8940_v43, %v6541_v3  ;;  %v6715_v11 = vsel %vm6712_vm11, %v6714_v8, %v6710_v6  ;;  %v6962_v43 = vld [vmem:[%s9137_s27 + $0xa0] sm:$0xff]  ;;  %v6944_v48 = vld [vmem:[%s9137_s27 + $0x10] sm:$0xff]  ;;  %v8729_v6 = vld [vmem:[%s9132_s13 + $0x1e8] sm:$0xff] }
0x1b7e   : > { %v6547_v7 = vmul.f32 %v6545_v5, %v11004_v58  ;;  %v6682_v39 = vsel %vm1125_vm6, %v6681_v4, 0.0  ;;  %v7166_v58 = vpop.permute.xlu2 %7165  ;;  %v8716_v3 = vld [vmem:[%s9132_s13 + $0x180] sm:$0xff] }
0x1b7f   : > { %v6683_v42 = vrot.slane %v6682_v39, 4  ;;  %v11076_v20 = vpop.permute.xlu1 %7185 }
0x1b80   : > { %v6552_v15 = vmul.f32 %v8864_v44, %v6547_v7  ;;  %8943 = vrcp.f32 %v11076_v20  ;;  %v6963_v44 = vld [vmem:[%s9137_s27 + $0xa8] sm:$0xff]  ;;  %vm7193_vm12 = vweird.f32 %v11076_v20  ;;  %v7199_v2 = vand.u32 2147483648, %v11076_v20  ;;  %v8767_v7 = vld [vmem:[%s9137_s27 + $0x1d8] sm:$0xff] }
0x1b81   : > { %v6684_v45 = vadd.f32 %v6683_v42, %v6682_v39  ;;  %v7197_v5 = vand.u32 2147483647, %v11076_v20  ;;  %v6952_v42 = vld [vmem:[%s9137_s27 + $0x50] sm:$0xff] }
0x1b82   : > { %v6557_v19 = vadd.f32 %v8865_v62, %v6552_v15  ;;  %v6969_v62 = vld [vmem:[%s9137_s27 + $0xd8] sm:$0xff]  ;;  %v7200_v15 = vor.u32 1.1754944e-38, %v7199_v2  ;;  %v8753_v2 = vld [vmem:[%s9137_s27 + $0x168] sm:$0xff] }
0x1b83   : > { %v6685_v21 = vrot.slane %v6684_v45, 2  ;;  %vm7198_vm15 = vcmp.eq.f32.partialorder %v7197_v5, 8.507059e+37  ;;  %v8745_v5 = vld [vmem:[%s9137_s27 + $0x128] sm:$0xff] }
0x1b84   : > { %v7168_v22 = vmul.f32 %v7166_v58, %v6557_v19 }
0x1b85   : > { %v6686_v23 = vadd.f32 %v6685_v21, %v6684_v45  ;;  %v8708_v45 = vld [vmem:[%s9132_s13 + $0x140] sm:$0xff]  ;;  %v8701_v21 = vld [vmem:[%s9132_s13 + $0x108] sm:$0xff] }
0x1b86   : > { %v7169_v30 = vsel %vm1125_vm6, %v7168_v22, 0.0  ;;  %v11082_v36 = vpop.eup %8943  ;;  %v6973_v22 = vld [vmem:[%s9137_s27 + $0xf8] sm:$0xff] }
0x1b87   : > { %v6687_v26 = vrot.slane %v6686_v23, 1  ;;  %v7170_v24 = vrot.slane %v7169_v30, 4  ;;  %v7189_v37 = vmul.f32 %v11082_v36, %v11076_v20  ;;  %vm7194_vm13 = vweird.f32 %v11082_v36  ;;  %v6945_v20 = vld [vmem:[%s9137_s27 + $0x18] sm:$0xff] }
0x1b88   : > { %vm11138_vm14 = vmor %vm7193_vm12, %vm7194_vm13 }
0x1b89   : > { %v6688_v28 = vadd.f32 %v6687_v26, %v6686_v23  ;;  %v7171_v60 = vadd.f32 %v7170_v24, %v7169_v30  ;;  %v7190_v51 = vsub.f32 1.0, %v7189_v37  ;;  %v6972_v23 = vld [vmem:[%s9137_s27 + $0xf0] sm:$0xff]  ;;  %v6949_v24 = vld [vmem:[%s9137_s27 + $0x38] sm:$0xff] }
0x1b8a   : > { %v6964_v30 = vld [vmem:[%s9137_s27 + $0xb0] sm:$0xff] }
0x1b8b   : > { %v11084_v33 = vmul.f32 %v6715_v11, %v6688_v28  ;;  %v7172_v54 = vrot.slane %v7171_v60, 2  ;;  %v7191_v61 = vmul.f32 %v11082_v36, %v7190_v51  ;;  %v8720_v28 = vld [vmem:[%s9132_s13 + $0x1a0] sm:$0xff]  ;;  %v8721_v11 = vld [vmem:[%s9132_s13 + $0x1a8] sm:$0xff]  ;;  %v8726_v37 = vld [vmem:[%s9132_s13 + $0x1d0] sm:$0xff] }
0x1b8c   : > { %v8702_v51 = vld [vmem:[%s9132_s13 + $0x110] sm:$0xff] }
0x1b8d   : > { %8683 = vmatmul.msk.f32.vlgmr.msra.gmra.mxu1 %vm1125_vm6, %v11084_v33  ;;  %8684 = vmatmul.msk.f32.vlgmr.msrb.gmra.mxu2 %vm1125_vm6, %v11084_v33  ;;  %v7173_v0 = vadd.f32 %v7172_v54, %v7171_v60  ;;  %v7192_v4 = vadd.f32 %v11082_v36, %v7191_v61  ;;  %v8711_v60 = vld [vmem:[%s9132_s13 + $0x158] sm:$0xff]  ;;  %v8740_v54 = vld [vmem:[%s9137_s27 + $0x100] sm:$0xff] }
0x1b8e   : > { %8687 = vmatmul.msk.f32.vlgmr.msrb.gmra.mxu3 %vm1125_vm6, %v11084_v33  ;;  %8688 = vmatmul.msk.f32.vlgmr.msrb.gmra.mxu0 %vm1125_vm6, %v11084_v33  ;;  %v8768_v61 = vld [vmem:[%s9137_s27 + $0x1e0] sm:$0xff] }
0x1b8f   : > { %6904 = vmatpush.msrb.mxu2 %v6748_v12  ;;  %6884 = vmatpush.msra.mxu1 %v6747_v34  ;;  %v7174_v39 = vrot.slane %v7173_v0, 1  ;;  %v7196_v19 = vsel %vm11138_vm14, %v11082_v36, %v7192_v4  ;;  %v6956_v36 = vld [vmem:[%s9137_s27 + $0x70] sm:$0xff]  ;;  %v8704_v34 = vld [vmem:[%s9132_s13 + $0x120] sm:$0xff] }
0x1b90   : > { %7069 = vmatpush.msrb.mxu3 %v6970_v35  ;;  %7089 = vmatpush.msrb.mxu0 %v6971_v29  ;;  %v7201_v8 = vsel %vm7198_vm15, %v7200_v15, %v7196_v19  ;;  %v6948_v12 = vld [vmem:[%s9137_s27 + $0x30] sm:$0xff]  ;;  %v8705_v35 = vld [vmem:[%s9132_s13 + $0x128] sm:$0xff]  ;;  %v8727_v29 = vld [vmem:[%s9132_s13 + $0x1d8] sm:$0xff] }
0x1b91   : > { %6905 = vmatpush.msrb.mxu2 %v6740_v32  ;;  %6885 = vmatpush.msra.mxu1 %v6739_v40  ;;  %v7175_v58 = vadd.f32 %v7174_v39, %v7173_v0  ;;  %v8765_v32 = vld [vmem:[%s9137_s27 + $0x1c8] sm:$0xff]  ;;  %v8719_v40 = vld [vmem:[%s9132_s13 + $0x198] sm:$0xff]  ;;  %v8744_v4 = vld [vmem:[%s9137_s27 + $0x120] sm:$0xff] }
0x1b92   : > { %7070 = vmatpush.msrb.mxu3 %v6962_v43  ;;  %7090 = vmatpush.msrb.mxu0 %v6963_v44  ;;  %v8756_v43 = vld [vmem:[%s9137_s27 + $0x180] sm:$0xff]  ;;  %v8757_v44 = vld [vmem:[%s9137_s27 + $0x188] sm:$0xff]  ;;  %v8715_v0 = vld [vmem:[%s9132_s13 + $0x178] sm:$0xff] }
0x1b93   : > { %6906 = vmatpush.msrb.mxu2 %v6732_v46  ;;  %6886 = vmatpush.msra.mxu1 %v6731_v47  ;;  %v11165_v26 = vmul.f32 %v7201_v8, %v7175_v58  ;;  %v8710_v46 = vld [vmem:[%s9132_s13 + $0x150] sm:$0xff]  ;;  %v8748_v47 = vld [vmem:[%s9137_s27 + $0x140] sm:$0xff]  ;;  %v8751_v15 = vld [vmem:[%s9137_s27 + $0x158] sm:$0xff] }
0x1b94   : > { %7071 = vmatpush.msrb.mxu3 %v6954_v49  ;;  %7091 = vmatpush.msrb.mxu0 %v6955_v50  ;;  %v8749_v49 = vld [vmem:[%s9137_s27 + $0x148] sm:$0xff]  ;;  %v8703_v50 = vld [vmem:[%s9132_s13 + $0x118] sm:$0xff]  ;;  %v8766_v39 = vld [vmem:[%s9137_s27 + $0x1d0] sm:$0xff] }
0x1b95   : > { %8685 = vmatmul.msk.f32.vlgmr.msrb.gmra.mxu1 %vm1125_vm6, %v11084_v33  ;;  %8686 = vmatmul.msk.f32.vlgmr.msra.gmra.mxu2 %vm1125_vm6, %v11084_v33  ;;  %v8742_v19 = vld [vmem:[%s9137_s27 + $0x110] sm:$0xff]  ;;  %v8755_v58 = vld [vmem:[%s9137_s27 + $0x178] sm:$0xff] }
0x1b96   : > { %8691 = vmatmul.msk.f32.vlgmr.msra.gmra.mxu3 %vm1125_vm6, %v11108_v53  ;;  %8692 = vmatmul.msk.f32.vlgmr.msra.gmra.mxu0 %vm1125_vm6, %v11108_v53  ;;  %v8746_v8 = vld [vmem:[%s9137_s27 + $0x130] sm:$0xff] }
0x1b97   : > { %6907 = vmatpush.msrb.mxu2 %v6724_v55  ;;  %6887 = vmatpush.msra.mxu1 %v6723_v57  ;;  %v8741_v55 = vld [vmem:[%s9137_s27 + $0x108] sm:$0xff]  ;;  %v8731_v57 = vld [vmem:[%s9132_s13 + $0x1f8] sm:$0xff] }
0x1b98   : > { %7072 = vmatpush.msrb.mxu3 %v6946_v59  ;;  %7092 = vmatpush.msrb.mxu0 %v6947_v9  ;;  %v11213_v59 = vrot.slane %v11108_v53, 1  ;;  %v8730_v9 = vld [vmem:[%s9132_s13 + $0x1f0] sm:$0xff] }
0x1b99   : > { %7049 = vmatpush.msra.mxu2 %v6969_v62  ;;  %7029 = vmatpush.msrb.mxu1 %v6968_v63  ;;  %v8769_v62 = vld [vmem:[%s9137_s27 + $0x1e8] sm:$0xff]  ;;  %v8723_v63 = vld [vmem:[%s9132_s13 + $0x1b8] sm:$0xff] }
0x1b9a   : > { %7251 = vmatpush.msra.mxu3 %v8724_v13  ;;  %7271 = vmatpush.msra.mxu0 %v8725_v17  ;;  %v8760_v13 = vld [vmem:[%s9137_s27 + $0x1a0] sm:$0xff]  ;;  %v8761_v17 = vld [vmem:[%s9137_s27 + $0x1a8] sm:$0xff] }
0x1b9b   : > { %7050 = vmatpush.msra.mxu2 %v6961_v1  ;;  %7030 = vmatpush.msrb.mxu1 %v6960_v14  ;;  %v8714_v1 = vld [vmem:[%s9132_s13 + $0x170] sm:$0xff]  ;;  %v8752_v14 = vld [vmem:[%s9137_s27 + $0x160] sm:$0xff] }
0x1b9c   : > { %7252 = vmatpush.msra.mxu3 %v8716_v3  ;;  %7272 = vmatpush.msra.mxu0 %v8717_v18  ;;  %v8707_v3 = vld [vmem:[%s9132_s13 + $0x138] sm:$0xff]  ;;  %v8706_v18 = vld [vmem:[%s9132_s13 + $0x130] sm:$0xff] }
0x1b9d   : > { %8689 = vmatmul.msk.f32.vlgmr.msra.gmra.mxu1 %vm1125_vm6, %v11084_v33  ;;  %8690 = vmatmul.msk.f32.vlgmr.msrb.gmra.mxu2 %vm1125_vm6, %v11084_v33  ;;  %v8712_v33 = vld [vmem:[%s9132_s13 + $0x160] sm:$0xff] }
0x1b9e   : > { %8695 = vmatmul.msk.f32.vlgmr.msrb.gmra.mxu3 %vm1125_vm6, %v11108_v53  ;;  %8696 = vmatmul.msk.f32.vlgmr.msrb.gmra.mxu0 %vm1125_vm6, %v11108_v53 }
0x1b9f   : > { %7051 = vmatpush.msra.mxu2 %v6953_v10  ;;  %7031 = vmatpush.msrb.mxu1 %v6952_v42  ;;  %v8759_v10 = vld [vmem:[%s9137_s27 + $0x198] sm:$0xff]  ;;  %v8758_v42 = vld [vmem:[%s9137_s27 + $0x190] sm:$0xff] }
0x1ba0   : > { %7253 = vmatpush.msra.mxu3 %v8708_v45  ;;  %7273 = vmatpush.msra.mxu0 %v8709_v52  ;;  %v8750_v45 = vld [vmem:[%s9137_s27 + $0x150] sm:$0xff]  ;;  %v8743_v52 = vld [vmem:[%s9137_s27 + $0x118] sm:$0xff] }
0x1ba1   : > { %7052 = vmatpush.msra.mxu2 %v6945_v20  ;;  %7032 = vmatpush.msrb.mxu1 %v6944_v48  ;;  %v8771_v20 = vld [vmem:[%s9137_s27 + $0x1f8] sm:$0xff]  ;;  %v8770_v48 = vld [vmem:[%s9137_s27 + $0x1f0] sm:$0xff] }
0x1ba2   : > { %7254 = vmatpush.msra.mxu3 %v8700_v56  ;;  %7274 = vmatpush.msra.mxu0 %v8701_v21  ;;  %v8763_v56 = vld [vmem:[%s9137_s27 + $0x1b8] sm:$0xff]  ;;  %v8762_v21 = vld [vmem:[%s9137_s27 + $0x1b0] sm:$0xff] }
0x1ba3   : > { %7129 = vmatpush.msrb.mxu2 %v6973_v22  ;;  %7109 = vmatpush.msra.mxu1 %v6972_v23  ;;  %v8754_v22 = vld [vmem:[%s9137_s27 + $0x170] sm:$0xff]  ;;  %v8747_v23 = vld [vmem:[%s9137_s27 + $0x138] sm:$0xff] }
0x1ba4   : > { %7331 = vmatpush.msrb.mxu3 %v8728_v25  ;;  %7351 = vmatpush.msrb.mxu0 %v8729_v6 }
0x1ba5   : > { %8693 = vmatmul.msk.f32.vlgmr.msrb.gmra.mxu1 %vm1125_vm6, %v11108_v53  ;;  %8694 = vmatmul.msk.f32.vlgmr.msra.gmra.mxu2 %vm1125_vm6, %v11108_v53 }
0x1ba6   : > { %8732 = vmatmul.msk.f32.vlgmr.msra.gmra.mxu3 %vm1125_vm6, %v11165_v26  ;;  %8733 = vmatmul.msk.f32.vlgmr.msra.gmra.mxu0 %vm1125_vm6, %v11165_v26 }
0x1ba7   : > { %7130 = vmatpush.msrb.mxu2 %v6965_v27  ;;  %7110 = vmatpush.msra.mxu1 %v6964_v30 }
0x1ba8   : > { %7332 = vmatpush.msrb.mxu3 %v8720_v28  ;;  %7352 = vmatpush.msrb.mxu0 %v8721_v11 }
0x1ba9   : > { %7131 = vmatpush.msrb.mxu2 %v6957_v31  ;;  %7111 = vmatpush.msra.mxu1 %v6956_v36 }
0x1baa   : > { %7333 = vmatpush.msrb.mxu3 %v8712_v33  ;;  %7353 = vmatpush.msrb.mxu0 %v8713_v16 }
0x1bab   : > { %7132 = vmatpush.msrb.mxu2 %v6949_v24  ;;  %7112 = vmatpush.msra.mxu1 %v6948_v12 }
0x1bac   : > { %7334 = vmatpush.msrb.mxu3 %v8704_v34  ;;  %7354 = vmatpush.msrb.mxu0 %v8705_v35 }
0x1bad   : > { %8697 = vmatmul.msk.f32.vlgmr.msra.gmra.mxu1 %vm1125_vm6, %v11108_v53  ;;  %8698 = vmatmul.msk.f32.vlgmr.msrb.gmra.mxu2 %vm1125_vm6, %v11108_v53  ;;  %v8722_v53 = vld [vmem:[%s9132_s13 + $0x1b0] sm:$0xff] }
0x1bae   : > { %7311 = vmatpush.msra.mxu2 %v8727_v29  ;;  %8736 = vmatmul.msk.f32.vlgmr.msrb.gmra.mxu3 %vm1125_vm6, %v11165_v26 }
0x1baf   : > { %8737 = vmatmul.msk.f32.vlgmr.msrb.gmra.mxu0 %vm1125_vm6, %v11165_v26  ;;  %7291 = vmatpush.msrb.mxu1 %v8726_v37 }
0x1bb0   : > { %7471 = vmatpush.msra.mxu3 %v8764_v38  ;;  %7491 = vmatpush.msra.mxu0 %v8765_v32 }
0x1bb1   : > { %7312 = vmatpush.msra.mxu2 %v8719_v40  ;;  %7292 = vmatpush.msrb.mxu1 %v8718_v41 }
0x1bb2   : > { %7472 = vmatpush.msra.mxu3 %v8756_v43  ;;  %7492 = vmatpush.msra.mxu0 %v8757_v44 }
0x1bb3   : > { %7313 = vmatpush.msra.mxu2 %v8711_v60  ;;  %7293 = vmatpush.msrb.mxu1 %v8710_v46 }
0x1bb4   : > { %7473 = vmatpush.msra.mxu3 %v8748_v47  ;;  %7493 = vmatpush.msra.mxu0 %v8749_v49 }
0x1bb5   : > { %7314 = vmatpush.msra.mxu2 %v8703_v50  ;;  %7294 = vmatpush.msrb.mxu1 %v8702_v51 }
0x1bb6   : > { %7474 = vmatpush.msra.mxu3 %v8740_v54  ;;  %7494 = vmatpush.msra.mxu0 %v8741_v55 }
0x1bb7   : > { %8734 = vmatmul.msk.f32.vlgmr.msrb.gmra.mxu1 %vm1125_vm6, %v11165_v26  ;;  %8735 = vmatmul.msk.f32.vlgmr.msra.gmra.mxu2 %vm1125_vm6, %v11165_v26 }
0x1bb8   : > { %7391 = vmatpush.msrb.mxu2 %v8731_v57  ;;  %8772 = vmatmul.msk.f32.vlgmr.msra.gmra.mxu3 %vm1125_vm6, %v11213_v59 }
0x1bb9   : > { %8773 = vmatmul.msk.f32.vlgmr.msra.gmra.mxu0 %vm1125_vm6, %v11213_v59  ;;  %7371 = vmatpush.msra.mxu1 %v8730_v9 }
0x1bba   : > { %7551 = vmatpush.msrb.mxu3 %v8768_v61  ;;  %7571 = vmatpush.msrb.mxu0 %v8769_v62 }
0x1bbb   : > { %7392 = vmatpush.msrb.mxu2 %v8723_v63  ;;  %7372 = vmatpush.msra.mxu1 %v8722_v53 }
0x1bbc   : > { %7552 = vmatpush.msrb.mxu3 %v8760_v13  ;;  %7572 = vmatpush.msrb.mxu0 %v8761_v17 }
0x1bbd   : > { %7393 = vmatpush.msrb.mxu2 %v8715_v0  ;;  %7373 = vmatpush.msra.mxu1 %v8714_v1 }
0x1bbe   : > { %7553 = vmatpush.msrb.mxu3 %v8752_v14  ;;  %7573 = vmatpush.msrb.mxu0 %v8753_v2 }
0x1bbf   : > { %7394 = vmatpush.msrb.mxu2 %v8707_v3  ;;  %7374 = vmatpush.msra.mxu1 %v8706_v18 }
0x1bc0   : > { %7554 = vmatpush.msrb.mxu3 %v8744_v4  ;;  %7574 = vmatpush.msrb.mxu0 %v8745_v5 }
0x1bc1   : > { %8738 = vmatmul.msk.f32.vlgmr.msra.gmra.mxu1 %vm1125_vm6, %v11165_v26  ;;  %8739 = vmatmul.msk.f32.vlgmr.msrb.gmra.mxu2 %vm1125_vm6, %v11165_v26 }
0x1bc2   : > { %7531 = vmatpush.msra.mxu2 %v8767_v7  ;;  %8776 = vmatmul.msk.f32.vlgmr.msrb.gmra.mxu3 %vm1125_vm6, %v11213_v59 }
0x1bc3   : > { %8777 = vmatmul.msk.f32.vlgmr.msrb.gmra.mxu0 %vm1125_vm6, %v11213_v59  ;;  %7511 = vmatpush.msrb.mxu1 %v8766_v39 }
0x1bc4   : > { %7532 = vmatpush.msra.mxu2 %v8759_v10 }
0x1bc5   : > { %7512 = vmatpush.msrb.mxu1 %v8758_v42 }
0x1bc6   : > { %7533 = vmatpush.msra.mxu2 %v8751_v15 }
0x1bc7   : > { %7513 = vmatpush.msrb.mxu1 %v8750_v45 }
0x1bc8   : > { %7534 = vmatpush.msra.mxu2 %v8743_v52 }
0x1bc9   : > { %7514 = vmatpush.msrb.mxu1 %v8742_v19  ;;  %8775 = vmatmul.msk.f32.vlgmr.msra.gmra.mxu2 %vm1125_vm6, %v11213_v59 }
0x1bca   : > { %8774 = vmatmul.msk.f32.vlgmr.msrb.gmra.mxu1 %vm1125_vm6, %v11213_v59  ;;  %7611 = vmatpush.msrb.mxu2 %v8771_v20 }
0x1bcb   : > { %7591 = vmatpush.msra.mxu1 %v8770_v48 }
0x1bcc   : > { %7612 = vmatpush.msrb.mxu2 %v8763_v56 }
0x1bcd   : > { %7592 = vmatpush.msra.mxu1 %v8762_v21 }
0x1bce   : > { %7613 = vmatpush.msrb.mxu2 %v8755_v58 }
0x1bcf   : > { %7593 = vmatpush.msra.mxu1 %v8754_v22 }
0x1bd0   : > { %7614 = vmatpush.msrb.mxu2 %v8747_v23  ;;  %v6674_v23 = vld [vmem:[%s9142_s4] sm:$0xff] }
0x1bd1   : > { %7594 = vmatpush.msra.mxu1 %v8746_v8  ;;  %8779 = vmatmul.msk.f32.vlgmr.msrb.gmra.mxu2 %vm1125_vm6, %v11213_v59 }
0x1bd2   : > { %8778 = vmatmul.msk.f32.vlgmr.msra.gmra.mxu1 %vm1125_vm6, %v11213_v59  ;;  %vm6927_vm6 = vcmask 1040384  }
0x1c0a   : > { %v6769_v25 = vpop.f32.mrf.mxu1 }
0x1c0b   : > { %v6869_v30 = vpop.f32.mrf.mxu0 }
0x1c0c   : > { %v6924_v55 = vrot.slane %v6869_v30, 3 }
0x1c10   : > { %v6789_v6 = vpop.f32.mrf.mxu2 }
0x1c11   : > { %v6849_v27 = vpop.f32.mrf.mxu3  ;;  %v6920_v9 = vrot.slane %v6789_v6, 7 }
0x1c12   : > { %v6809_v26 = vpop.f32.mrf.mxu1  ;;  %v6923_v50 = vrot.slane %v6849_v27, 4 }
0x1c13   : > { %v7014_v36 = vpop.f32.mrf.mxu0  ;;  %v6921_v61 = vrot.slane %v6809_v26, 6  ;;  %v6928_v10 = vsel %vm6927_vm6, %v6769_v25, %v6920_v9 }
0x1c14   : > { %v6934_v1 = vsel %vm6933_vm1, %v6923_v50, %v6924_v55  ;;  %v7145_v14 = vrot.slane %v7014_v36, 7 }
0x1c18   : > { %v6829_v28 = vpop.f32.mrf.mxu2 }
0x1c19   : > { %v6994_v31 = vpop.f32.mrf.mxu3  ;;  %v6922_v51 = vrot.slane %v6829_v28, 5 }
0x1c1a   : > { %v6889_v11 = vpop.f32.mrf.mxu1  ;;  %v7152_v56 = vsel %vm6927_vm6, %v6994_v31, %v7145_v14 }
0x1c1b   : > { %v7094_v34 = vpop.f32.mrf.mxu0  ;;  %v6925_v57 = vrot.slane %v6889_v11, 2  ;;  %v6930_v2 = vsel %vm6929_vm2, %v6921_v61, %v6922_v51 }
0x1c1c   : > { %v7149_v62 = vrot.slane %v7094_v34, 3  ;;  %v6932_v48 = vsel %vm6931_vm4, %v6928_v10, %v6930_v2 }
0x1c20   : > { %v6909_v33 = vpop.f32.mrf.mxu2 }
0x1c21   : > { %v7074_v24 = vpop.f32.mrf.mxu3  ;;  %v6926_v47 = vrot.slane %v6909_v33, 1 }
0x1c22   : > { %v7034_v16 = vpop.f32.mrf.mxu1  ;;  %v7148_v63 = vrot.slane %v7074_v24, 4 }
0x1c23   : > { %v7276_v38 = vpop.f32.mrf.mxu0  ;;  %v6936_v53 = vsel %vm6935_vm5, %v6925_v57, %v6926_v47  ;;  %v7146_v3 = vrot.slane %v7034_v16, 6 }
0x1c24   : > { %v6938_v42 = vsel %vm6937_vm7, %v6934_v1, %v6936_v53  ;;  %v7155_v15 = vsel %vm6933_vm1, %v7148_v63, %v7149_v62  ;;  %v7407_v21 = vrot.slane %v7276_v38, 7 }
0x1c25   : > { %v6939_v8 = vsel %vm1006_vm0, %v6932_v48, %v6938_v42 }
0x1c26   : > { %v6941_v24 = vadd.f32 %v6939_v8, %v6674_v23 }
0x1c28   : > { %v7054_v12 = vpop.f32.mrf.mxu2 }
0x1c29   : > { %v7256_v37 = vpop.f32.mrf.mxu3  ;;  %v7147_v13 = vrot.slane %v7054_v12, 5 }
0x1c2a   : > { %v7114_v35 = vpop.f32.mrf.mxu1  ;;  %v7414_v31 = vsel %vm6927_vm6, %v7256_v37, %v7407_v21 }
0x1c2b   : > { %v7150_v17 = vrot.slane %v7114_v35, 2  ;;  %v7153_v45 = vsel %vm6929_vm2, %v7146_v3, %v7147_v13 }
0x1c2c   : > { %v7356_v43 = vpop.f32.mrf.mxu0  ;;  %v7154_v30 = vsel %vm6931_vm4, %v7152_v56, %v7153_v45 }
0x1c2d   : > { %v7411_v52 = vrot.slane %v7356_v43, 3 }
0x1c30   : > { %v7134_v29 = vpop.f32.mrf.mxu2 }
0x1c31   : > { %v7336_v41 = vpop.f32.mrf.mxu3  ;;  %v7151_v59 = vrot.slane %v7134_v29, 1 }
0x1c32   : > { %v7410_v5 = vrot.slane %v7336_v41, 4 }
0x1c33   : > { %v7156_v4 = vsel %vm6935_vm5, %v7150_v17, %v7151_v59 }
0x1c34   : > { %v7296_v32 = vpop.f32.mrf.mxu1  ;;  %v7157_v58 = vsel %vm6937_vm7, %v7155_v15, %v7156_v4  ;;  %v7417_v25 = vsel %vm6933_vm1, %v7410_v5, %v7411_v52 }
0x1c35   : > { %v7408_v19 = vrot.slane %v7296_v32, 6  ;;  %v7158_v36 = vsel %vm1006_vm0, %v7154_v30, %v7157_v58 }
0x1c36   : > { %v11272_v49 = vpop.f32.mrf.mxu0  ;;  %v7160_v43 = vadd.f32 %v7158_v36, %v6941_v24 }
0x1c37   : > { %v7627_v12 = vrot.slane %v11272_v49, 7 }
0x1c3a   : > { %v7316_v40 = vpop.f32.mrf.mxu2 }
0x1c3b   : > { %v11270_v46 = vpop.f32.mrf.mxu3  ;;  %v7409_v7 = vrot.slane %v7316_v40, 5 }
0x1c3c   : > { %v7634_v37 = vsel %vm6927_vm6, %v11270_v46, %v7627_v12 }
0x1c3d   : > { %v7415_v6 = vsel %vm6929_vm2, %v7408_v19, %v7409_v7 }
0x1c3e   : > { %v7376_v44 = vpop.f32.mrf.mxu1  ;;  %v7416_v34 = vsel %vm6931_vm4, %v7414_v31, %v7415_v6 }
0x1c3f   : > { %v7412_v39 = vrot.slane %v7376_v44, 2 }
0x1c40   : > { %v7576_v26 = vpop.f32.mrf.mxu0 }
0x1c41   : > { %v7631_v35 = vrot.slane %v7576_v26, 3 }
0x1c44   : > { %v7396_v60 = vpop.f32.mrf.mxu2 }
0x1c45   : > { %v7413_v0 = vrot.slane %v7396_v60, 1  ;;  %v7556_v22 = vpop.f32.mrf.mxu3 }
0x1c46   : > { %v7630_v33 = vrot.slane %v7556_v22, 4 }
0x1c47   : > { %v7516_v54 = vpop.f32.mrf.mxu1  ;;  %v7418_v20 = vsel %vm6935_vm5, %v7412_v39, %v7413_v0 }
0x1c48   : > { %v7419_v28 = vsel %vm6937_vm7, %v7417_v25, %v7418_v20  ;;  %v7628_v16 = vrot.slane %v7516_v54, 6  ;;  %v7637_v44 = vsel %vm6933_vm1, %v7630_v33, %v7631_v35 }
0x1c49   : > { %v7420_v38 = vsel %vm1006_vm0, %v7416_v34, %v7419_v28 }
0x1c4a   : > { %v7422_v47 = vadd.f32 %v7420_v38, %v7160_v43 }
0x1c4c   : > { %v7536_v18 = vpop.f32.mrf.mxu2 }
0x1c4d   : > { %v7629_v27 = vrot.slane %v7536_v18, 5 }
0x1c4f   : > { %v7596_v11 = vpop.f32.mrf.mxu1  ;;  %v7635_v32 = vsel %vm6929_vm2, %v7628_v16, %v7629_v27 }
0x1c50   : > { %v7632_v40 = vrot.slane %v7596_v11, 2  ;;  %v7636_v49 = vsel %vm6931_vm4, %v7634_v37, %v7635_v32 }
0x1c54   : > { %v7616_v29 = vpop.f32.mrf.mxu2 }
0x1c55   : > { %v7633_v41 = vrot.slane %v7616_v29, 1 }
0x1c57   : > { %v7638_v60 = vsel %vm6935_vm5, %v7632_v40, %v7633_v41 }
0x1c58   : > { %v7639_v50 = vsel %vm6937_vm7, %v7637_v44, %v7638_v60 }
0x1c59   : > { %v7640_v51 = vsel %vm1006_vm0, %v7636_v49, %v7639_v50 }
0x1c5a   : > { %v7642_v54 = vadd.f32 %v7640_v51, %v7422_v47 }
0x1c5c   : > { %7643 = vst [vmem:[%s991_s6] sm:$0xff] %v7642_v54 }
0x1c5d PF: > { %s71_s15 = sadd.s32 1, %s8955_s15  }
0x1c5e   : > { %p68_p5 = scmp.ge.s32.totalorder %s71_s15, 4  }
0x1c60   :  { %70 = sbr.rel (!%p68_p5) target bundleno = 51 (0x33), region = 244 }

</bundles_post_ra>
